<compile_context>
chip_gen: v7x
topology: tpu7x:2x2x1
jax: 0.10.0
libtpu: 0.0.40
codegen_flags: <defaults>
</compile_context>

<pallas_src>
import numpy as np
import jax
import jax.numpy as jnp
from jax.experimental import pallas as pl
from jax.experimental.pallas import tpu as pltpu


def _round_up(x, m):
    return ((x + m - 1) // m) * m


# ----------------------------------------------------------------------------
# Pallas kernels
# ----------------------------------------------------------------------------
def _matmul_bias_kernel(a_ref, b_ref, bias_ref, o_ref):
    acc = jnp.dot(a_ref[...], b_ref[...], preferred_element_type=jnp.float32)
    o_ref[...] = acc + bias_ref[...]


def pallas_matmul_bias(a, b, bias=None):
    """(M,K) @ (K,N) + bias -> (M,N) f32.

    bf16 MXU operands / f32 accumulation.  K is small for every matmul in this
    model (<= ~900), so the whole contraction lives in one block (no K grid
    axis, no accumulator revisit).  Bias add is fused into the epilogue."""
    M, K = a.shape
    K2, N = b.shape
    assert K == K2
    tm = 512 if M >= 512 else _round_up(M, 16)
    tn = 128 if N <= 128 else 256
    Mp = _round_up(M, tm)
    Np = _round_up(N, tn)
    Kp = _round_up(K, 128)
    a_p = jnp.pad(a.astype(jnp.bfloat16), ((0, Mp - M), (0, Kp - K)))
    b_p = jnp.pad(b.astype(jnp.bfloat16), ((0, Kp - K), (0, Np - N)))
    if bias is None:
        bias = jnp.zeros((N,), jnp.float32)
    bias_p = jnp.pad(bias.astype(jnp.float32), (0, Np - N)).reshape(1, Np)
    out = pl.pallas_call(
        _matmul_bias_kernel,
        out_shape=jax.ShapeDtypeStruct((Mp, Np), jnp.float32),
        grid=(Mp // tm, Np // tn),
        in_specs=[pl.BlockSpec((tm, Kp), lambda i, j: (i, 0)),
                  pl.BlockSpec((Kp, tn), lambda i, j: (0, j)),
                  pl.BlockSpec((1, tn), lambda i, j: (0, j))],
        out_specs=pl.BlockSpec((tm, tn), lambda i, j: (i, j)),
        compiler_params=pltpu.CompilerParams(
            dimension_semantics=("parallel", "parallel")),
    )(a_p, b_p, bias_p)
    return out[:M, :N]


_LANE = 128


def _lrelu_kernel(x_ref, o_ref):
    v = x_ref[...]
    o_ref[...] = jnp.where(v >= 0.0, v, 0.01 * v)


def _add_lrelu_kernel(x_ref, y_ref, o_ref):
    s = x_ref[...] + y_ref[...]
    o_ref[...] = jnp.where(s >= 0.0, s, 0.01 * s)


def _elementwise_call(kernel, *arrays):
    shape = arrays[0].shape
    n = int(np.prod(shape))
    rows = pl.cdiv(n, _LANE)
    trows = 1024 if rows >= 1024 else _round_up(rows, 8)
    rows_p = _round_up(rows, trows)
    padded = []
    for a in arrays:
        af = a.astype(jnp.float32).reshape(-1)
        padded.append(jnp.pad(af, (0, rows_p * _LANE - n)).reshape(rows_p, _LANE))
    out = pl.pallas_call(
        kernel,
        out_shape=jax.ShapeDtypeStruct((rows_p, _LANE), jnp.float32),
        grid=(rows_p // trows,),
        in_specs=[pl.BlockSpec((trows, _LANE), lambda i: (i, 0))
                  for _ in arrays],
        out_specs=pl.BlockSpec((trows, _LANE), lambda i: (i, 0)),
        compiler_params=pltpu.CompilerParams(
            dimension_semantics=("parallel",)),
    )(*padded)
    return out.reshape(-1)[:n].reshape(shape)


def pallas_lrelu(x):
    return _elementwise_call(_lrelu_kernel, x)


def pallas_add_lrelu(x, y):
    return _elementwise_call(_add_lrelu_kernel, x, y)


def _channel_attn_kernel(q_ref, k_ref, v_ref, t_ref, o_ref):
    q = q_ref[0]                                   # (c, Np)
    k = k_ref[0]
    v = v_ref[0]
    t = t_ref[0]                                   # (1, 1) per-head temperature
    qn = q / (jnp.sqrt(jnp.sum(q * q, axis=-1, keepdims=True)) + 1e-6)
    kn = k / (jnp.sqrt(jnp.sum(k * k, axis=-1, keepdims=True)) + 1e-6)
    scores = jax.lax.dot_general(qn, kn, (((1,), (1,)), ((), ())),
                                 preferred_element_type=jnp.float32) * t
    scores = scores - jnp.max(scores, axis=-1, keepdims=True)
    e = jnp.exp(scores)
    attn = e / jnp.sum(e, axis=-1, keepdims=True)
    o_ref[0] = jnp.dot(attn, v, preferred_element_type=jnp.float32)


def pallas_channel_attention(q, k, v, temperature):
    """Fused EPA channel attention.  q,k,v: (B*heads, c, N); temp: (B*heads,)."""
    BH, c, N = q.shape
    Np = _round_up(N, 128)
    pad = ((0, 0), (0, 0), (0, Np - N))
    qp, kp, vp = jnp.pad(q, pad), jnp.pad(k, pad), jnp.pad(v, pad)
    t = temperature.reshape(BH, 1, 1).astype(jnp.float32)
    blk = pl.BlockSpec((1, c, Np), lambda g: (g, 0, 0))
    out = pl.pallas_call(
        _channel_attn_kernel,
        out_shape=jax.ShapeDtypeStruct((BH, c, Np), jnp.float32),
        grid=(BH,),
        in_specs=[blk, blk, blk,
                  pl.BlockSpec((1, 1, 1), lambda g: (g, 0, 0))],
        out_specs=blk,
        compiler_params=pltpu.CompilerParams(
            dimension_semantics=("parallel",)),
    )(qp, kp, vp, t)
    return out[:, :, :N]


# ----------------------------------------------------------------------------
# conv / transposed conv on top of the Pallas matmul (channels-last, im2col)
# ----------------------------------------------------------------------------
def conv3d(x, w, b, stride):
    """x: (B,D,H,W,C) channels-last, w: (O,Cin,k,k,k); MONAI pad = (k-s+1)//2."""
    B, D, H, W, C = x.shape
    O, _, kd, kh, kw = w.shape
    s = stride
    p = (kd - s + 1) // 2
    Do = (D + 2 * p - kd) // s + 1
    Ho = (H + 2 * p - kh) // s + 1
    Wo = (W + 2 * p - kw) // s + 1
    if kd == 1 and kh == 1 and kw == 1 and p == 0:
        col = x[:, ::s, ::s, ::s, :].reshape(B * Do * Ho * Wo, C)
        wmat = w.reshape(O, C).T
    else:
        xp = jnp.pad(x, ((0, 0), (p, p), (p, p), (p, p), (0, 0)))
        cols = []
        for i in range(kd):
            for j in range(kh):
                for k in range(kw):
                    cols.append(xp[:,
                                   i:i + (Do - 1) * s + 1:s,
                                   j:j + (Ho - 1) * s + 1:s,
                                   k:k + (Wo - 1) * s + 1:s, :])
        col = jnp.stack(cols, axis=4)                    # (B,Do,Ho,Wo,K3,C)
        col = col.reshape(B * Do * Ho * Wo, kd * kh * kw * C)
        wmat = jnp.transpose(w, (2, 3, 4, 1, 0)).reshape(kd * kh * kw * C, O)
    y = pallas_matmul_bias(col, wmat, b)                 # bias fused
    return y.reshape(B, Do, Ho, Wo, O)


def transp_conv3d_k2s2(x, w, b):
    """ConvTranspose3d, kernel=2, stride=2, pad=0.  x channels-last, w:(Cin,Cout,2,2,2)."""
    B, D, H, W, C = x.shape
    Cout = w.shape[1]
    wmat = jnp.transpose(w, (0, 2, 3, 4, 1)).reshape(C, 8 * Cout)   # cols (kd,kh,kw,Cout)
    bias = jnp.tile(b, 8)
    y = pallas_matmul_bias(x.reshape(B * D * H * W, C), wmat, bias)
    y = y.reshape(B, D, H, W, 2, 2, 2, Cout)
    y = y.transpose(0, 1, 4, 2, 5, 3, 6, 7).reshape(B, 2 * D, 2 * H, 2 * W, Cout)
    return y


def instance_norm(x, eps=1e-5):
    m = x.mean(axis=(1, 2, 3), keepdims=True)
    v = x.var(axis=(1, 2, 3), keepdims=True)
    return (x - m) * jax.lax.rsqrt(v + eps)


def layer_norm(x, w, b, eps=1e-5):
    m = x.mean(-1, keepdims=True)
    v = x.var(-1, keepdims=True)
    return (x - m) * jax.lax.rsqrt(v + eps) * w + b


# ----------------------------------------------------------------------------
# parameter generation (deterministic)
# ----------------------------------------------------------------------------
class ParamGen:
    def __init__(self, seed):
        self._key = jax.random.PRNGKey(seed)

    def _take(self):
        self._key, k = jax.random.split(self._key)
        return k

    def conv(self, o, i, k):
        fan = i * k ** 3
        w = jax.random.normal(self._take(), (o, i, k, k, k), jnp.float32) / np.sqrt(fan)
        return w, jnp.zeros((o,), jnp.float32)

    def tconv(self, i, o, k=2):
        fan = i * k ** 3
        w = jax.random.normal(self._take(), (i, o, k, k, k), jnp.float32) / np.sqrt(fan)
        return w, jnp.zeros((o,), jnp.float32)

    def matrix(self, i, o):
        return jax.random.normal(self._take(), (i, o), jnp.float32) / np.sqrt(i)


# ----------------------------------------------------------------------------
# blocks
# ----------------------------------------------------------------------------
def make_resblock(pg, cin, cout, k, stride):
    p = {"conv1": pg.conv(cout, cin, k),
         "conv2": pg.conv(cout, cout, k),
         "stride": stride}
    if cin != cout or stride != 1:
        p["conv3"] = pg.conv(cout, cin, 1)
    return p


def resblock_fwd(p, x):
    res = x
    out = conv3d(x, *p["conv1"], p["stride"])
    out = pallas_lrelu(instance_norm(out))
    out = conv3d(out, *p["conv2"], 1)
    out = instance_norm(out)
    if "conv3" in p:
        res = instance_norm(conv3d(res, *p["conv3"], p["stride"]))
    return pallas_add_lrelu(out, res)


def make_transblock(pg, C, heads):
    return {"heads": heads,
            "gamma": jnp.full((C,), 1e-6, jnp.float32),
            "ln_w": jnp.ones((C,), jnp.float32),
            "ln_b": jnp.zeros((C,), jnp.float32),
            "qkv_w": pg.matrix(C, 3 * C),
            "temperature": jnp.ones((heads,), jnp.float32),
            "proj_w": pg.matrix(C, C),
            "proj_b": jnp.zeros((C,), jnp.float32),
            "lka": pg.conv(C, C, 3),
            "conv8": pg.conv(C, C, 1)}


def channel_attention(p, x):
    """EPA-style channel attention.  x: (B, N, C) tokens."""
    B, N, C = x.shape
    heads = p["heads"]
    c = C // heads
    qkv = pallas_matmul_bias(x.reshape(B * N, C), p["qkv_w"])
    qkv = qkv.reshape(B, N, 3, heads, c).transpose(2, 0, 3, 4, 1)   # (3,B,h,c,N)
    q = qkv[0].reshape(B * heads, c, N)
    k = qkv[1].reshape(B * heads, c, N)
    v = qkv[2].reshape(B * heads, c, N)
    temp = jnp.tile(p["temperature"], B)                            # (B*heads,)
    out = pallas_channel_attention(q, k, v, temp)                   # (BH, c, N)
    out = out.reshape(B, heads, c, N).transpose(0, 3, 1, 2).reshape(B * N, C)
    out = pallas_matmul_bias(out, p["proj_w"], p["proj_b"])
    return out.reshape(B, N, C)


def transblock_fwd(p, x):
    B, D, H, W, C = x.shape
    N = D * H * W
    tok = x.reshape(B, N, C)                                        # free in channels-last
    attn = channel_attention(p, layer_norm(tok, p["ln_w"], p["ln_b"]))
    tok = tok + p["gamma"] * attn
    attn_skip = tok.reshape(B, D, H, W, C)
    # TODO(synk): deformable 3-D LKA branch replaced by dense 3x3x3 + 1x1 convs.
    y = conv3d(attn_skip, *p["lka"], 1)
    y = conv3d(y, *p["conv8"], 1)
    return attn_skip + y


def make_enc_block(pg, cin, cout, k, stride, heads=None, repeats=0):
    p = {"cnn": make_resblock(pg, cin, cout, k, stride)}
    if repeats:
        p["trans"] = [make_transblock(pg, cout, heads) for _ in range(repeats)]
    return p


def enc_block_fwd(p, x):
    x = resblock_fwd(p["cnn"], x)
    for tp in p.get("trans", []):
        x = transblock_fwd(tp, x)
    return x


def make_dec_block(pg, cin, cout, skip_ch, k, heads=None, repeats=0):
    p = {"tcv": pg.tconv(cin + skip_ch, cout, 2),
         "cnn": make_resblock(pg, cout, cout, k, 1)}
    if repeats:
        p["trans"] = [make_transblock(pg, cout, heads) for _ in range(repeats)]
    return p


def dec_block_fwd(p, x, skip=None):
    if skip is not None:
        x = jnp.concatenate([x, skip], axis=-1)
    x = transp_conv3d_k2s2(x, *p["tcv"])
    x = resblock_fwd(p["cnn"], x)
    for tp in p.get("trans", []):
        x = transblock_fwd(tp, x)
    return x


# ----------------------------------------------------------------------------
# Model (same channel / skip bookkeeping as the PyTorch Model.__init__)
# ----------------------------------------------------------------------------
def build_model(pg, in_channels=4, out_channels=3,
                cnn_kernel_sizes=(3, 3), cnn_features=(8, 16), cnn_strides=(2, 2),
                hyb_kernel_sizes=(3, 3), hyb_features=(16, 32), hyb_strides=(2, 2),
                hyb_tf_repeats=(1, 1), hyb_tf_num_heads=(2, 2)):
    cnn_features, hyb_features = list(cnn_features), list(hyb_features)
    # CNN encoder (deform_cnn=True in torch; dense conv stand-in here)
    cnn_io = list(zip([in_channels] + cnn_features[:-1], cnn_features))
    enc_cnn = [make_enc_block(pg, i, o, k, s)
               for (i, o), k, s in zip(cnn_io, cnn_kernel_sizes, cnn_strides)]
    # Hybrid encoder (cnn block + channel-attention transformer blocks)
    hyb_io = list(zip([cnn_features[-1]] + hyb_features[:-1], hyb_features))
    enc_hyb = [make_enc_block(pg, i, o, k, s, heads=h, repeats=r)
               for (i, o), k, s, h, r in zip(hyb_io, hyb_kernel_sizes, hyb_strides,
                                             hyb_tf_num_heads, hyb_tf_repeats)]
    # Hybrid decoder
    dec_hyb_features = hyb_features[::-1][1:] + [cnn_features[-1]]
    dec_hyb_skips = [0] + hyb_features[::-1][1:]
    dh_io = list(zip([hyb_features[-1]] + dec_hyb_features[:-1], dec_hyb_features))
    dec_hyb = [make_dec_block(pg, i, o, sk, k, heads=h, repeats=r)
               for (i, o), sk, k, h, r in zip(dh_io, dec_hyb_skips,
                                              list(hyb_kernel_sizes)[::-1],
                                              hyb_tf_num_heads, hyb_tf_repeats)]
    # CNN decoder
    dec_cnn_features = cnn_features[::-1]
    dec_cnn_skips = cnn_features[::-1]
    dc_io = list(zip([dec_hyb_features[-1]] + dec_cnn_features[:-1], dec_cnn_features))
    dec_cnn = [make_dec_block(pg, i, o, sk, k)
               for (i, o), sk, k in zip(dc_io, dec_cnn_skips,
                                        list(cnn_kernel_sizes)[::-1])]
    out = pg.conv(out_channels, dec_cnn_features[-1], 1)
    return {"enc_cnn": enc_cnn, "enc_hyb": enc_hyb,
            "dec_hyb": dec_hyb, "dec_cnn": dec_cnn, "out": out}


def model_fwd(params, x):
    x = jnp.transpose(x, (0, 2, 3, 4, 1))          # NCDHW -> channels-last
    cnn_skips = []
    for p in params["enc_cnn"]:
        x = enc_block_fwd(p, x)
        cnn_skips.append(x)
    hyb_skips = []
    for p in params["enc_hyb"]:
        x = enc_block_fwd(p, x)
        hyb_skips.append(x)
    # hybrid decoder: first block has no skip
    skips = hyb_skips[:-1]
    first = True
    for p in params["dec_hyb"]:
        if first:
            x = dec_block_fwd(p, x)
            first = False
        else:
            x = dec_block_fwd(p, x, skips.pop())
    # cnn decoder
    skips = cnn_skips
    for p in params["dec_cnn"]:
        x = dec_block_fwd(p, x, skips.pop())
    # UnetOutBlock: 1x1x1 conv
    x = conv3d(x, *params["out"], 1)
    return jnp.transpose(x, (0, 4, 1, 2, 3))       # back to NCDHW


if __name__ == "__main__":
    key = jax.random.PRNGKey(0)
    x = jax.random.normal(key, (2, 4, 16, 16, 16), jnp.float32)   # (B,C,D,H,W)
    pg = ParamGen(42)
    params = build_model(pg)
    fwd = jax.jit(lambda inp: model_fwd(params, inp))
    y = jax.block_until_ready(fwd(x))
    assert y.shape == (2, 3, 16, 16, 16), y.shape
    assert bool(jnp.all(jnp.isfinite(y)))
    print("KERNEL_OK")
</pallas_src>

<mosaic_0001>
module attributes {stable_mosaic.version = 11 : i64} {
  func.func @_matmul_bias_kernel(%arg0: i32, %arg1: i32, %arg2: memref<512x128xbf16, #tpu.memory_space<vmem>>, %arg3: memref<128x128xbf16, #tpu.memory_space<vmem>>, %arg4: memref<1x128xf32, #tpu.memory_space<vmem>>, %arg5: memref<512x128xf32, #tpu.memory_space<vmem>>) attributes {dimension_semantics = [#tpu.dimension_semantics<parallel>, #tpu.dimension_semantics<parallel>], iteration_bounds = array<i64: 2, 1>, scalar_prefetch = 0 : i64, scratch_operands = 0 : i64, tpu.core_type = #tpu.core_type<tc>, window_params = [{transform_indices = @transform_0, window_bounds = array<i64: 512, 128>}, {transform_indices = @transform_1, window_bounds = array<i64: 128, 128>}, {transform_indices = @transform_2, window_bounds = array<i64: 1, 128>}, {transform_indices = @transform_3, window_bounds = array<i64: 512, 128>}]} {
    %c0 = arith.constant 0 : index
    %c0_0 = arith.constant 0 : index
    %0 = vector.load %arg2[%c0, %c0_0] : memref<512x128xbf16, #tpu.memory_space<vmem>>, vector<512x128xbf16>
    %c0_1 = arith.constant 0 : index
    %c0_2 = arith.constant 0 : index
    %1 = vector.load %arg3[%c0_1, %c0_2] : memref<128x128xbf16, #tpu.memory_space<vmem>>, vector<128x128xbf16>
    %cst = arith.constant dense<0.000000e+00> : vector<512x128xf32>
    %2 = tpu.matmul %0, %1, %cst {dimension_numbers = #tpu.dot_dimension_numbers<[1], [0], [0], [1], [0, 0, 1, 1], [], []>} : vector<512x128xbf16>, vector<128x128xbf16>, vector<512x128xf32> -> vector<512x128xf32>
    %c0_3 = arith.constant 0 : index
    %c0_4 = arith.constant 0 : index
    %3 = vector.load %arg4[%c0_3, %c0_4] : memref<1x128xf32, #tpu.memory_space<vmem>>, vector<1x128xf32>
    %4 = vector.broadcast %3 : vector<1x128xf32> to vector<512x128xf32>
    %5 = arith.addf %2, %4 : vector<512x128xf32>
    %c0_5 = arith.constant 0 : index
    %c0_6 = arith.constant 0 : index
    %6 = vector.load %arg5[%c0_5, %c0_6] : memref<512x128xf32, #tpu.memory_space<vmem>>, vector<512x128xf32>
    tpu.vector_store %arg5[%c0_5, %c0_6], %5 {strides = array<i32>} : memref<512x128xf32, #tpu.memory_space<vmem>>, vector<512x128xf32>,
    return
  }
  func.func @transform_0(%arg0: i32, %arg1: i32) -> (i32, i32) {
    %c0_i32 = arith.constant 0 : i32
    %c0_i32_0 = arith.constant 0 : i32
    return %arg0, %c0_i32 : i32, i32
  }
  func.func @transform_1(%arg0: i32, %arg1: i32) -> (i32, i32) {
    %c0_i32 = arith.constant 0 : i32
    %c0_i32_0 = arith.constant 0 : i32
    return %c0_i32, %arg1 : i32, i32
  }
  func.func @transform_2(%arg0: i32, %arg1: i32) -> (i32, i32) {
    %c0_i32 = arith.constant 0 : i32
    %c0_i32_0 = arith.constant 0 : i32
    return %c0_i32, %arg1 : i32, i32
  }
  func.func @transform_3(%arg0: i32, %arg1: i32) -> (i32, i32) {
    %c0_i32 = arith.constant 0 : i32
    return %arg0, %arg1 : i32, i32
  }
}

module attributes {stable_mosaic.version = 11 : i64} {
  func.func @_lrelu_kernel(%arg0: i32, %arg1: memref<64x128xf32, #tpu.memory_space<vmem>>, %arg2: memref<64x128xf32, #tpu.memory_space<vmem>>) attributes {dimension_semantics = [#tpu.dimension_semantics<parallel>], iteration_bounds = array<i64: 1>, scalar_prefetch = 0 : i64, scratch_operands = 0 : i64, tpu.core_type = #tpu.core_type<tc>, window_params = [{transform_indices = @transform_0, window_bounds = array<i64: 64, 128>}, {transform_indices = @transform_1, window_bounds = array<i64: 64, 128>}]} {
    %c0 = arith.constant 0 : index
    %c0_0 = arith.constant 0 : index
    %0 = vector.load %arg1[%c0, %c0_0] : memref<64x128xf32, #tpu.memory_space<vmem>>, vector<64x128xf32>
    %cst = arith.constant 0.000000e+00 : f32
    %1 = vector.broadcast %cst : f32 to vector<64x128xf32>
    %2 = arith.cmpf oge, %0, %1 : vector<64x128xf32>
    %cst_1 = arith.constant 0.00999999977 : f32
    %3 = vector.broadcast %cst_1 : f32 to vector<64x128xf32>
    %4 = arith.mulf %3, %0 : vector<64x128xf32>
    %5 = arith.select %2, %0, %4 : vector<64x128xi1>, vector<64x128xf32>
    %c0_2 = arith.constant 0 : index
    %c0_3 = arith.constant 0 : index
    %6 = vector.load %arg2[%c0_2, %c0_3] : memref<64x128xf32, #tpu.memory_space<vmem>>, vector<64x128xf32>
    tpu.vector_store %arg2[%c0_2, %c0_3], %5 {strides = array<i32>} : memref<64x128xf32, #tpu.memory_space<vmem>>, vector<64x128xf32>,
    return
  }
  func.func @transform_0(%arg0: i32) -> (i32, i32) {
    %c0_i32 = arith.constant 0 : i32
    %c0_i32_0 = arith.constant 0 : i32
    return %arg0, %c0_i32 : i32, i32
  }
  func.func @transform_1(%arg0: i32) -> (i32, i32) {
    %c0_i32 = arith.constant 0 : i32
    %c0_i32_0 = arith.constant 0 : i32
    return %arg0, %c0_i32 : i32, i32
  }
}

module attributes {stable_mosaic.version = 11 : i64} {
  func.func @_matmul_bias_kernel(%arg0: i32, %arg1: i32, %arg2: memref<512x128xbf16, #tpu.memory_space<vmem>>, %arg3: memref<128x128xbf16, #tpu.memory_space<vmem>>, %arg4: memref<1x128xf32, #tpu.memory_space<vmem>>, %arg5: memref<512x128xf32, #tpu.memory_space<vmem>>) attributes {dimension_semantics = [#tpu.dimension_semantics<parallel>, #tpu.dimension_semantics<parallel>], iteration_bounds = array<i64: 2, 1>, scalar_prefetch = 0 : i64, scratch_operands = 0 : i64, tpu.core_type = #tpu.core_type<tc>, window_params = [{transform_indices = @transform_0, window_bounds = array<i64: 512, 128>}, {transform_indices = @transform_1, window_bounds = array<i64: 128, 128>}, {transform_indices = @transform_2, window_bounds = array<i64: 1, 128>}, {transform_indices = @transform_3, window_bounds = array<i64: 512, 128>}]} {
    %c0 = arith.constant 0 : index
    %c0_0 = arith.constant 0 : index
    %0 = vector.load %arg2[%c0, %c0_0] : memref<512x128xbf16, #tpu.memory_space<vmem>>, vector<512x128xbf16>
    %c0_1 = arith.constant 0 : index
    %c0_2 = arith.constant 0 : index
    %1 = vector.load %arg3[%c0_1, %c0_2] : memref<128x128xbf16, #tpu.memory_space<vmem>>, vector<128x128xbf16>
    %cst = arith.constant dense<0.000000e+00> : vector<512x128xf32>
    %2 = tpu.matmul %0, %1, %cst {dimension_numbers = #tpu.dot_dimension_numbers<[1], [0], [0], [1], [0, 0, 1, 1], [], []>} : vector<512x128xbf16>, vector<128x128xbf16>, vector<512x128xf32> -> vector<512x128xf32>
    %c0_3 = arith.constant 0 : index
    %c0_4 = arith.constant 0 : index
    %3 = vector.load %arg4[%c0_3, %c0_4] : memref<1x128xf32, #tpu.memory_space<vmem>>, vector<1x128xf32>
    %4 = vector.broadcast %3 : vector<1x128xf32> to vector<512x128xf32>
    %5 = arith.addf %2, %4 : vector<512x128xf32>
    %c0_5 = arith.constant 0 : index
    %c0_6 = arith.constant 0 : index
    %6 = vector.load %arg5[%c0_5, %c0_6] : memref<512x128xf32, #tpu.memory_space<vmem>>, vector<512x128xf32>
    tpu.vector_store %arg5[%c0_5, %c0_6], %5 {strides = array<i32>} : memref<512x128xf32, #tpu.memory_space<vmem>>, vector<512x128xf32>,
    return
  }
  func.func @transform_0(%arg0: i32, %arg1: i32) -> (i32, i32) {
    %c0_i32 = arith.constant 0 : i32
    %c0_i32_0 = arith.constant 0 : i32
    return %arg0, %c0_i32 : i32, i32
  }
  func.func @transform_1(%arg0: i32, %arg1: i32) -> (i32, i32) {
    %c0_i32 = arith.constant 0 : i32
    %c0_i32_0 = arith.constant 0 : i32
    return %c0_i32, %arg1 : i32, i32
  }
  func.func @transform_2(%arg0: i32, %arg1: i32) -> (i32, i32) {
    %c0_i32 = arith.constant 0 : i32
    %c0_i32_0 = arith.constant 0 : i32
    return %c0_i32, %arg1 : i32, i32
  }
  func.func @transform_3(%arg0: i32, %arg1: i32) -> (i32, i32) {
    %c0_i32 = arith.constant 0 : i32
    return %arg0, %arg1 : i32, i32
  }
}

module attributes {stable_mosaic.version = 11 : i64} {
  func.func @_matmul_bias_kernel(%arg0: i32, %arg1: i32, %arg2: memref<512x256xbf16, #tpu.memory_space<vmem>>, %arg3: memref<256x128xbf16, #tpu.memory_space<vmem>>, %arg4: memref<1x128xf32, #tpu.memory_space<vmem>>, %arg5: memref<512x128xf32, #tpu.memory_space<vmem>>) attributes {dimension_semantics = [#tpu.dimension_semantics<parallel>, #tpu.dimension_semantics<parallel>], iteration_bounds = array<i64: 2, 1>, scalar_prefetch = 0 : i64, scratch_operands = 0 : i64, tpu.core_type = #tpu.core_type<tc>, window_params = [{transform_indices = @transform_0, window_bounds = array<i64: 512, 256>}, {transform_indices = @transform_1, window_bounds = array<i64: 256, 128>}, {transform_indices = @transform_2, window_bounds = array<i64: 1, 128>}, {transform_indices = @transform_3, window_bounds = array<i64: 512, 128>}]} {
    %c0 = arith.constant 0 : index
    %c0_0 = arith.constant 0 : index
    %0 = vector.load %arg2[%c0, %c0_0] : memref<512x256xbf16, #tpu.memory_space<vmem>>, vector<512x256xbf16>
    %c0_1 = arith.constant 0 : index
    %c0_2 = arith.constant 0 : index
    %1 = vector.load %arg3[%c0_1, %c0_2] : memref<256x128xbf16, #tpu.memory_space<vmem>>, vector<256x128xbf16>
    %cst = arith.constant dense<0.000000e+00> : vector<512x128xf32>
    %2 = tpu.matmul %0, %1, %cst {dimension_numbers = #tpu.dot_dimension_numbers<[1], [0], [0], [1], [0, 0, 1, 1], [], []>} : vector<512x256xbf16>, vector<256x128xbf16>, vector<512x128xf32> -> vector<512x128xf32>
    %c0_3 = arith.constant 0 : index
    %c0_4 = arith.constant 0 : index
    %3 = vector.load %arg4[%c0_3, %c0_4] : memref<1x128xf32, #tpu.memory_space<vmem>>, vector<1x128xf32>
    %4 = vector.broadcast %3 : vector<1x128xf32> to vector<512x128xf32>
    %5 = arith.addf %2, %4 : vector<512x128xf32>
    %c0_5 = arith.constant 0 : index
    %c0_6 = arith.constant 0 : index
    %6 = vector.load %arg5[%c0_5, %c0_6] : memref<512x128xf32, #tpu.memory_space<vmem>>, vector<512x128xf32>
    tpu.vector_store %arg5[%c0_5, %c0_6], %5 {strides = array<i32>} : memref<512x128xf32, #tpu.memory_space<vmem>>, vector<512x128xf32>,
    return
  }
  func.func @transform_0(%arg0: i32, %arg1: i32) -> (i32, i32) {
    %c0_i32 = arith.constant 0 : i32
    %c0_i32_0 = arith.constant 0 : i32
    return %arg0, %c0_i32 : i32, i32
  }
  func.func @transform_1(%arg0: i32, %arg1: i32) -> (i32, i32) {
    %c0_i32 = arith.constant 0 : i32
    %c0_i32_0 = arith.constant 0 : i32
    return %c0_i32, %arg1 : i32, i32
  }
  func.func @transform_2(%arg0: i32, %arg1: i32) -> (i32, i32) {
    %c0_i32 = arith.constant 0 : i32
    %c0_i32_0 = arith.constant 0 : i32
    return %c0_i32, %arg1 : i32, i32
  }
  func.func @transform_3(%arg0: i32, %arg1: i32) -> (i32, i32) {
    %c0_i32 = arith.constant 0 : i32
    return %arg0, %arg1 : i32, i32
  }
}

module attributes {stable_mosaic.version = 11 : i64} {
  func.func @_add_lrelu_kernel(%arg0: i32, %arg1: memref<64x128xf32, #tpu.memory_space<vmem>>, %arg2: memref<64x128xf32, #tpu.memory_space<vmem>>, %arg3: memref<64x128xf32, #tpu.memory_space<vmem>>) attributes {dimension_semantics = [#tpu.dimension_semantics<parallel>], iteration_bounds = array<i64: 1>, scalar_prefetch = 0 : i64, scratch_operands = 0 : i64, tpu.core_type = #tpu.core_type<tc>, window_params = [{transform_indices = @transform_0, window_bounds = array<i64: 64, 128>}, {transform_indices = @transform_1, window_bounds = array<i64: 64, 128>}, {transform_indices = @transform_2, window_bounds = array<i64: 64, 128>}]} {
    %c0 = arith.constant 0 : index
    %c0_0 = arith.constant 0 : index
    %0 = vector.load %arg1[%c0, %c0_0] : memref<64x128xf32, #tpu.memory_space<vmem>>, vector<64x128xf32>
    %c0_1 = arith.constant 0 : index
    %c0_2 = arith.constant 0 : index
    %1 = vector.load %arg2[%c0_1, %c0_2] : memref<64x128xf32, #tpu.memory_space<vmem>>, vector<64x128xf32>
    %2 = arith.addf %0, %1 : vector<64x128xf32>
    %cst = arith.constant 0.000000e+00 : f32
    %3 = vector.broadcast %cst : f32 to vector<64x128xf32>
    %4 = arith.cmpf oge, %2, %3 : vector<64x128xf32>
    %cst_3 = arith.constant 0.00999999977 : f32
    %5 = vector.broadcast %cst_3 : f32 to vector<64x128xf32>
    %6 = arith.mulf %5, %2 : vector<64x128xf32>
    %7 = arith.select %4, %2, %6 : vector<64x128xi1>, vector<64x128xf32>
    %c0_4 = arith.constant 0 : index
    %c0_5 = arith.constant 0 : index
    %8 = vector.load %arg3[%c0_4, %c0_5] : memref<64x128xf32, #tpu.memory_space<vmem>>, vector<64x128xf32>
    tpu.vector_store %arg3[%c0_4, %c0_5], %7 {strides = array<i32>} : memref<64x128xf32, #tpu.memory_space<vmem>>, vector<64x128xf32>,
    return
  }
  func.func @transform_0(%arg0: i32) -> (i32, i32) {
    %c0_i32 = arith.constant 0 : i32
    %c0_i32_0 = arith.constant 0 : i32
    return %arg0, %c0_i32 : i32, i32
  }
  func.func @transform_1(%arg0: i32) -> (i32, i32) {
    %c0_i32 = arith.constant 0 : i32
    %c0_i32_0 = arith.constant 0 : i32
    return %arg0, %c0_i32 : i32, i32
  }
  func.func @transform_2(%arg0: i32) -> (i32, i32) {
    %c0_i32 = arith.constant 0 : i32
    %c0_i32_0 = arith.constant 0 : i32
    return %arg0, %c0_i32 : i32, i32
  }
}

module attributes {stable_mosaic.version = 11 : i64} {
  func.func @_matmul_bias_kernel(%arg0: i32, %arg1: i32, %arg2: memref<128x128xbf16, #tpu.memory_space<vmem>>, %arg3: memref<128x128xbf16, #tpu.memory_space<vmem>>, %arg4: memref<1x128xf32, #tpu.memory_space<vmem>>, %arg5: memref<128x128xf32, #tpu.memory_space<vmem>>) attributes {dimension_semantics = [#tpu.dimension_semantics<parallel>, #tpu.dimension_semantics<parallel>], iteration_bounds = array<i64: 1, 1>, scalar_prefetch = 0 : i64, scratch_operands = 0 : i64, tpu.core_type = #tpu.core_type<tc>, window_params = [{transform_indices = @transform_0, window_bounds = array<i64: 128, 128>}, {transform_indices = @transform_1, window_bounds = array<i64: 128, 128>}, {transform_indices = @transform_2, window_bounds = array<i64: 1, 128>}, {transform_indices = @transform_3, window_bounds = array<i64: 128, 128>}]} {
    %c0 = arith.constant 0 : index
    %c0_0 = arith.constant 0 : index
    %0 = vector.load %arg2[%c0, %c0_0] : memref<128x128xbf16, #tpu.memory_space<vmem>>, vector<128x128xbf16>
    %c0_1 = arith.constant 0 : index
    %c0_2 = arith.constant 0 : index
    %1 = vector.load %arg3[%c0_1, %c0_2] : memref<128x128xbf16, #tpu.memory_space<vmem>>, vector<128x128xbf16>
    %cst = arith.constant dense<0.000000e+00> : vector<128x128xf32>
    %2 = tpu.matmul %0, %1, %cst {dimension_numbers = #tpu.dot_dimension_numbers<[1], [0], [0], [1], [0, 0, 1, 1], [], []>} : vector<128x128xbf16>, vector<128x128xbf16>, vector<128x128xf32> -> vector<128x128xf32>
    %c0_3 = arith.constant 0 : index
    %c0_4 = arith.constant 0 : index
    %3 = vector.load %arg4[%c0_3, %c0_4] : memref<1x128xf32, #tpu.memory_space<vmem>>, vector<1x128xf32>
    %4 = vector.broadcast %3 : vector<1x128xf32> to vector<128x128xf32>
    %5 = arith.addf %2, %4 : vector<128x128xf32>
    %c0_5 = arith.constant 0 : index
    %c0_6 = arith.constant 0 : index
    %6 = vector.load %arg5[%c0_5, %c0_6] : memref<128x128xf32, #tpu.memory_space<vmem>>, vector<128x128xf32>
    tpu.vector_store %arg5[%c0_5, %c0_6], %5 {strides = array<i32>} : memref<128x128xf32, #tpu.memory_space<vmem>>, vector<128x128xf32>,
    return
  }
  func.func @transform_0(%arg0: i32, %arg1: i32) -> (i32, i32) {
    %c0_i32 = arith.constant 0 : i32
    %c0_i32_0 = arith.constant 0 : i32
    return %arg0, %c0_i32 : i32, i32
  }
  func.func @transform_1(%arg0: i32, %arg1: i32) -> (i32, i32) {
    %c0_i32 = arith.constant 0 : i32
    %c0_i32_0 = arith.constant 0 : i32
    return %c0_i32, %arg1 : i32, i32
  }
  func.func @transform_2(%arg0: i32, %arg1: i32) -> (i32, i32) {
    %c0_i32 = arith.constant 0 : i32
    %c0_i32_0 = arith.constant 0 : i32
    return %c0_i32, %arg1 : i32, i32
  }
  func.func @transform_3(%arg0: i32, %arg1: i32) -> (i32, i32) {
    %c0_i32 = arith.constant 0 : i32
    return %arg0, %arg1 : i32, i32
  }
}

module attributes {stable_mosaic.version = 11 : i64} {
  func.func @_matmul_bias_kernel(%arg0: i32, %arg1: i32, %arg2: memref<128x256xbf16, #tpu.memory_space<vmem>>, %arg3: memref<256x128xbf16, #tpu.memory_space<vmem>>, %arg4: memref<1x128xf32, #tpu.memory_space<vmem>>, %arg5: memref<128x128xf32, #tpu.memory_space<vmem>>) attributes {dimension_semantics = [#tpu.dimension_semantics<parallel>, #tpu.dimension_semantics<parallel>], iteration_bounds = array<i64: 1, 1>, scalar_prefetch = 0 : i64, scratch_operands = 0 : i64, tpu.core_type = #tpu.core_type<tc>, window_params = [{transform_indices = @transform_0, window_bounds = array<i64: 128, 256>}, {transform_indices = @transform_1, window_bounds = array<i64: 256, 128>}, {transform_indices = @transform_2, window_bounds = array<i64: 1, 128>}, {transform_indices = @transform_3, window_bounds = array<i64: 128, 128>}]} {
    %c0 = arith.constant 0 : index
    %c0_0 = arith.constant 0 : index
    %0 = vector.load %arg2[%c0, %c0_0] : memref<128x256xbf16, #tpu.memory_space<vmem>>, vector<128x256xbf16>
    %c0_1 = arith.constant 0 : index
    %c0_2 = arith.constant 0 : index
    %1 = vector.load %arg3[%c0_1, %c0_2] : memref<256x128xbf16, #tpu.memory_space<vmem>>, vector<256x128xbf16>
    %cst = arith.constant dense<0.000000e+00> : vector<128x128xf32>
    %2 = tpu.matmul %0, %1, %cst {dimension_numbers = #tpu.dot_dimension_numbers<[1], [0], [0], [1], [0, 0, 1, 1], [], []>} : vector<128x256xbf16>, vector<256x128xbf16>, vector<128x128xf32> -> vector<128x128xf32>
    %c0_3 = arith.constant 0 : index
    %c0_4 = arith.constant 0 : index
    %3 = vector.load %arg4[%c0_3, %c0_4] : memref<1x128xf32, #tpu.memory_space<vmem>>, vector<1x128xf32>
    %4 = vector.broadcast %3 : vector<1x128xf32> to vector<128x128xf32>
    %5 = arith.addf %2, %4 : vector<128x128xf32>
    %c0_5 = arith.constant 0 : index
    %c0_6 = arith.constant 0 : index
    %6 = vector.load %arg5[%c0_5, %c0_6] : memref<128x128xf32, #tpu.memory_space<vmem>>, vector<128x128xf32>
    tpu.vector_store %arg5[%c0_5, %c0_6], %5 {strides = array<i32>} : memref<128x128xf32, #tpu.memory_space<vmem>>, vector<128x128xf32>,
    return
  }
  func.func @transform_0(%arg0: i32, %arg1: i32) -> (i32, i32) {
    %c0_i32 = arith.constant 0 : i32
    %c0_i32_0 = arith.constant 0 : i32
    return %arg0, %c0_i32 : i32, i32
  }
  func.func @transform_1(%arg0: i32, %arg1: i32) -> (i32, i32) {
    %c0_i32 = arith.constant 0 : i32
    %c0_i32_0 = arith.constant 0 : i32
    return %c0_i32, %arg1 : i32, i32
  }
  func.func @transform_2(%arg0: i32, %arg1: i32) -> (i32, i32) {
    %c0_i32 = arith.constant 0 : i32
    %c0_i32_0 = arith.constant 0 : i32
    return %c0_i32, %arg1 : i32, i32
  }
  func.func @transform_3(%arg0: i32, %arg1: i32) -> (i32, i32) {
    %c0_i32 = arith.constant 0 : i32
    return %arg0, %arg1 : i32, i32
  }
}

module attributes {stable_mosaic.version = 11 : i64} {
  func.func @_lrelu_kernel(%arg0: i32, %arg1: memref<16x128xf32, #tpu.memory_space<vmem>>, %arg2: memref<16x128xf32, #tpu.memory_space<vmem>>) attributes {dimension_semantics = [#tpu.dimension_semantics<parallel>], iteration_bounds = array<i64: 1>, scalar_prefetch = 0 : i64, scratch_operands = 0 : i64, tpu.core_type = #tpu.core_type<tc>, window_params = [{transform_indices = @transform_0, window_bounds = array<i64: 16, 128>}, {transform_indices = @transform_1, window_bounds = array<i64: 16, 128>}]} {
    %c0 = arith.constant 0 : index
    %c0_0 = arith.constant 0 : index
    %0 = vector.load %arg1[%c0, %c0_0] : memref<16x128xf32, #tpu.memory_space<vmem>>, vector<16x128xf32>
    %cst = arith.constant 0.000000e+00 : f32
    %1 = vector.broadcast %cst : f32 to vector<16x128xf32>
    %2 = arith.cmpf oge, %0, %1 : vector<16x128xf32>
    %cst_1 = arith.constant 0.00999999977 : f32
    %3 = vector.broadcast %cst_1 : f32 to vector<16x128xf32>
    %4 = arith.mulf %3, %0 : vector<16x128xf32>
    %5 = arith.select %2, %0, %4 : vector<16x128xi1>, vector<16x128xf32>
    %c0_2 = arith.constant 0 : index
    %c0_3 = arith.constant 0 : index
    %6 = vector.load %arg2[%c0_2, %c0_3] : memref<16x128xf32, #tpu.memory_space<vmem>>, vector<16x128xf32>
    tpu.vector_store %arg2[%c0_2, %c0_3], %5 {strides = array<i32>} : memref<16x128xf32, #tpu.memory_space<vmem>>, vector<16x128xf32>,
    return
  }
  func.func @transform_0(%arg0: i32) -> (i32, i32) {
    %c0_i32 = arith.constant 0 : i32
    %c0_i32_0 = arith.constant 0 : i32
    return %arg0, %c0_i32 : i32, i32
  }
  func.func @transform_1(%arg0: i32) -> (i32, i32) {
    %c0_i32 = arith.constant 0 : i32
    %c0_i32_0 = arith.constant 0 : i32
    return %arg0, %c0_i32 : i32, i32
  }
}

module attributes {stable_mosaic.version = 11 : i64} {
  func.func @_matmul_bias_kernel(%arg0: i32, %arg1: i32, %arg2: memref<128x512xbf16, #tpu.memory_space<vmem>>, %arg3: memref<512x128xbf16, #tpu.memory_space<vmem>>, %arg4: memref<1x128xf32, #tpu.memory_space<vmem>>, %arg5: memref<128x128xf32, #tpu.memory_space<vmem>>) attributes {dimension_semantics = [#tpu.dimension_semantics<parallel>, #tpu.dimension_semantics<parallel>], iteration_bounds = array<i64: 1, 1>, scalar_prefetch = 0 : i64, scratch_operands = 0 : i64, tpu.core_type = #tpu.core_type<tc>, window_params = [{transform_indices = @transform_0, window_bounds = array<i64: 128, 512>}, {transform_indices = @transform_1, window_bounds = array<i64: 512, 128>}, {transform_indices = @transform_2, window_bounds = array<i64: 1, 128>}, {transform_indices = @transform_3, window_bounds = array<i64: 128, 128>}]} {
    %c0 = arith.constant 0 : index
    %c0_0 = arith.constant 0 : index
    %0 = vector.load %arg2[%c0, %c0_0] : memref<128x512xbf16, #tpu.memory_space<vmem>>, vector<128x512xbf16>
    %c0_1 = arith.constant 0 : index
    %c0_2 = arith.constant 0 : index
    %1 = vector.load %arg3[%c0_1, %c0_2] : memref<512x128xbf16, #tpu.memory_space<vmem>>, vector<512x128xbf16>
    %cst = arith.constant dense<0.000000e+00> : vector<128x128xf32>
    %2 = tpu.matmul %0, %1, %cst {dimension_numbers = #tpu.dot_dimension_numbers<[1], [0], [0], [1], [0, 0, 1, 1], [], []>} : vector<128x512xbf16>, vector<512x128xbf16>, vector<128x128xf32> -> vector<128x128xf32>
    %c0_3 = arith.constant 0 : index
    %c0_4 = arith.constant 0 : index
    %3 = vector.load %arg4[%c0_3, %c0_4] : memref<1x128xf32, #tpu.memory_space<vmem>>, vector<1x128xf32>
    %4 = vector.broadcast %3 : vector<1x128xf32> to vector<128x128xf32>
    %5 = arith.addf %2, %4 : vector<128x128xf32>
    %c0_5 = arith.constant 0 : index
    %c0_6 = arith.constant 0 : index
    %6 = vector.load %arg5[%c0_5, %c0_6] : memref<128x128xf32, #tpu.memory_space<vmem>>, vector<128x128xf32>
    tpu.vector_store %arg5[%c0_5, %c0_6], %5 {strides = array<i32>} : memref<128x128xf32, #tpu.memory_space<vmem>>, vector<128x128xf32>,
    return
  }
  func.func @transform_0(%arg0: i32, %arg1: i32) -> (i32, i32) {
    %c0_i32 = arith.constant 0 : i32
    %c0_i32_0 = arith.constant 0 : i32
    return %arg0, %c0_i32 : i32, i32
  }
  func.func @transform_1(%arg0: i32, %arg1: i32) -> (i32, i32) {
    %c0_i32 = arith.constant 0 : i32
    %c0_i32_0 = arith.constant 0 : i32
    return %c0_i32, %arg1 : i32, i32
  }
  func.func @transform_2(%arg0: i32, %arg1: i32) -> (i32, i32) {
    %c0_i32 = arith.constant 0 : i32
    %c0_i32_0 = arith.constant 0 : i32
    return %c0_i32, %arg1 : i32, i32
  }
  func.func @transform_3(%arg0: i32, %arg1: i32) -> (i32, i32) {
    %c0_i32 = arith.constant 0 : i32
    return %arg0, %arg1 : i32, i32
  }
}

module attributes {stable_mosaic.version = 11 : i64} {
  func.func @_add_lrelu_kernel(%arg0: i32, %arg1: memref<16x128xf32, #tpu.memory_space<vmem>>, %arg2: memref<16x128xf32, #tpu.memory_space<vmem>>, %arg3: memref<16x128xf32, #tpu.memory_space<vmem>>) attributes {dimension_semantics = [#tpu.dimension_semantics<parallel>], iteration_bounds = array<i64: 1>, scalar_prefetch = 0 : i64, scratch_operands = 0 : i64, tpu.core_type = #tpu.core_type<tc>, window_params = [{transform_indices = @transform_0, window_bounds = array<i64: 16, 128>}, {transform_indices = @transform_1, window_bounds = array<i64: 16, 128>}, {transform_indices = @transform_2, window_bounds = array<i64: 16, 128>}]} {
    %c0 = arith.constant 0 : index
    %c0_0 = arith.constant 0 : index
    %0 = vector.load %arg1[%c0, %c0_0] : memref<16x128xf32, #tpu.memory_space<vmem>>, vector<16x128xf32>
    %c0_1 = arith.constant 0 : index
    %c0_2 = arith.constant 0 : index
    %1 = vector.load %arg2[%c0_1, %c0_2] : memref<16x128xf32, #tpu.memory_space<vmem>>, vector<16x128xf32>
    %2 = arith.addf %0, %1 : vector<16x128xf32>
    %cst = arith.constant 0.000000e+00 : f32
    %3 = vector.broadcast %cst : f32 to vector<16x128xf32>
    %4 = arith.cmpf oge, %2, %3 : vector<16x128xf32>
    %cst_3 = arith.constant 0.00999999977 : f32
    %5 = vector.broadcast %cst_3 : f32 to vector<16x128xf32>
    %6 = arith.mulf %5, %2 : vector<16x128xf32>
    %7 = arith.select %4, %2, %6 : vector<16x128xi1>, vector<16x128xf32>
    %c0_4 = arith.constant 0 : index
    %c0_5 = arith.constant 0 : index
    %8 = vector.load %arg3[%c0_4, %c0_5] : memref<16x128xf32, #tpu.memory_space<vmem>>, vector<16x128xf32>
    tpu.vector_store %arg3[%c0_4, %c0_5], %7 {strides = array<i32>} : memref<16x128xf32, #tpu.memory_space<vmem>>, vector<16x128xf32>,
    return
  }
  func.func @transform_0(%arg0: i32) -> (i32, i32) {
    %c0_i32 = arith.constant 0 : i32
    %c0_i32_0 = arith.constant 0 : i32
    return %arg0, %c0_i32 : i32, i32
  }
  func.func @transform_1(%arg0: i32) -> (i32, i32) {
    %c0_i32 = arith.constant 0 : i32
    %c0_i32_0 = arith.constant 0 : i32
    return %arg0, %c0_i32 : i32, i32
  }
  func.func @transform_2(%arg0: i32) -> (i32, i32) {
    %c0_i32 = arith.constant 0 : i32
    %c0_i32_0 = arith.constant 0 : i32
    return %arg0, %c0_i32 : i32, i32
  }
}

module attributes {stable_mosaic.version = 11 : i64} {
  func.func @_matmul_bias_kernel(%arg0: i32, %arg1: i32, %arg2: memref<16x128xbf16, #tpu.memory_space<vmem>>, %arg3: memref<128x128xbf16, #tpu.memory_space<vmem>>, %arg4: memref<1x128xf32, #tpu.memory_space<vmem>>, %arg5: memref<16x128xf32, #tpu.memory_space<vmem>>) attributes {dimension_semantics = [#tpu.dimension_semantics<parallel>, #tpu.dimension_semantics<parallel>], iteration_bounds = array<i64: 1, 1>, scalar_prefetch = 0 : i64, scratch_operands = 0 : i64, tpu.core_type = #tpu.core_type<tc>, window_params = [{transform_indices = @transform_0, window_bounds = array<i64: 16, 128>}, {transform_indices = @transform_1, window_bounds = array<i64: 128, 128>}, {transform_indices = @transform_2, window_bounds = array<i64: 1, 128>}, {transform_indices = @transform_3, window_bounds = array<i64: 16, 128>}]} {
    %c0 = arith.constant 0 : index
    %c0_0 = arith.constant 0 : index
    %0 = vector.load %arg2[%c0, %c0_0] : memref<16x128xbf16, #tpu.memory_space<vmem>>, vector<16x128xbf16>
    %c0_1 = arith.constant 0 : index
    %c0_2 = arith.constant 0 : index
    %1 = vector.load %arg3[%c0_1, %c0_2] : memref<128x128xbf16, #tpu.memory_space<vmem>>, vector<128x128xbf16>
    %cst = arith.constant dense<0.000000e+00> : vector<16x128xf32>
    %2 = tpu.matmul %0, %1, %cst {dimension_numbers = #tpu.dot_dimension_numbers<[1], [0], [0], [1], [0, 0, 1, 1], [], []>} : vector<16x128xbf16>, vector<128x128xbf16>, vector<16x128xf32> -> vector<16x128xf32>
    %c0_3 = arith.constant 0 : index
    %c0_4 = arith.constant 0 : index
    %3 = vector.load %arg4[%c0_3, %c0_4] : memref<1x128xf32, #tpu.memory_space<vmem>>, vector<1x128xf32>
    %4 = vector.broadcast %3 : vector<1x128xf32> to vector<16x128xf32>
    %5 = arith.addf %2, %4 : vector<16x128xf32>
    %c0_5 = arith.constant 0 : index
    %c0_6 = arith.constant 0 : index
    %6 = vector.load %arg5[%c0_5, %c0_6] : memref<16x128xf32, #tpu.memory_space<vmem>>, vector<16x128xf32>
    tpu.vector_store %arg5[%c0_5, %c0_6], %5 {strides = array<i32>} : memref<16x128xf32, #tpu.memory_space<vmem>>, vector<16x128xf32>,
    return
  }
  func.func @transform_0(%arg0: i32, %arg1: i32) -> (i32, i32) {
    %c0_i32 = arith.constant 0 : i32
    %c0_i32_0 = arith.constant 0 : i32
    return %arg0, %c0_i32 : i32, i32
  }
  func.func @transform_1(%arg0: i32, %arg1: i32) -> (i32, i32) {
    %c0_i32 = arith.constant 0 : i32
    %c0_i32_0 = arith.constant 0 : i32
    return %c0_i32, %arg1 : i32, i32
  }
  func.func @transform_2(%arg0: i32, %arg1: i32) -> (i32, i32) {
    %c0_i32 = arith.constant 0 : i32
    %c0_i32_0 = arith.constant 0 : i32
    return %c0_i32, %arg1 : i32, i32
  }
  func.func @transform_3(%arg0: i32, %arg1: i32) -> (i32, i32) {
    %c0_i32 = arith.constant 0 : i32
    return %arg0, %arg1 : i32, i32
  }
}

module attributes {stable_mosaic.version = 11 : i64} {
  func.func @_matmul_bias_kernel(%arg0: i32, %arg1: i32, %arg2: memref<16x512xbf16, #tpu.memory_space<vmem>>, %arg3: memref<512x128xbf16, #tpu.memory_space<vmem>>, %arg4: memref<1x128xf32, #tpu.memory_space<vmem>>, %arg5: memref<16x128xf32, #tpu.memory_space<vmem>>) attributes {dimension_semantics = [#tpu.dimension_semantics<parallel>, #tpu.dimension_semantics<parallel>], iteration_bounds = array<i64: 1, 1>, scalar_prefetch = 0 : i64, scratch_operands = 0 : i64, tpu.core_type = #tpu.core_type<tc>, window_params = [{transform_indices = @transform_0, window_bounds = array<i64: 16, 512>}, {transform_indices = @transform_1, window_bounds = array<i64: 512, 128>}, {transform_indices = @transform_2, window_bounds = array<i64: 1, 128>}, {transform_indices = @transform_3, window_bounds = array<i64: 16, 128>}]} {
    %c0 = arith.constant 0 : index
    %c0_0 = arith.constant 0 : index
    %0 = vector.load %arg2[%c0, %c0_0] : memref<16x512xbf16, #tpu.memory_space<vmem>>, vector<16x512xbf16>
    %c0_1 = arith.constant 0 : index
    %c0_2 = arith.constant 0 : index
    %1 = vector.load %arg3[%c0_1, %c0_2] : memref<512x128xbf16, #tpu.memory_space<vmem>>, vector<512x128xbf16>
    %cst = arith.constant dense<0.000000e+00> : vector<16x128xf32>
    %2 = tpu.matmul %0, %1, %cst {dimension_numbers = #tpu.dot_dimension_numbers<[1], [0], [0], [1], [0, 0, 1, 1], [], []>} : vector<16x512xbf16>, vector<512x128xbf16>, vector<16x128xf32> -> vector<16x128xf32>
    %c0_3 = arith.constant 0 : index
    %c0_4 = arith.constant 0 : index
    %3 = vector.load %arg4[%c0_3, %c0_4] : memref<1x128xf32, #tpu.memory_space<vmem>>, vector<1x128xf32>
    %4 = vector.broadcast %3 : vector<1x128xf32> to vector<16x128xf32>
    %5 = arith.addf %2, %4 : vector<16x128xf32>
    %c0_5 = arith.constant 0 : index
    %c0_6 = arith.constant 0 : index
    %6 = vector.load %arg5[%c0_5, %c0_6] : memref<16x128xf32, #tpu.memory_space<vmem>>, vector<16x128xf32>
    tpu.vector_store %arg5[%c0_5, %c0_6], %5 {strides = array<i32>} : memref<16x128xf32, #tpu.memory_space<vmem>>, vector<16x128xf32>,
    return
  }
  func.func @transform_0(%arg0: i32, %arg1: i32) -> (i32, i32) {
    %c0_i32 = arith.constant 0 : i32
    %c0_i32_0 = arith.constant 0 : i32
    return %arg0, %c0_i32 : i32, i32
  }
  func.func @transform_1(%arg0: i32, %arg1: i32) -> (i32, i32) {
    %c0_i32 = arith.constant 0 : i32
    %c0_i32_0 = arith.constant 0 : i32
    return %c0_i32, %arg1 : i32, i32
  }
  func.func @transform_2(%arg0: i32, %arg1: i32) -> (i32, i32) {
    %c0_i32 = arith.constant 0 : i32
    %c0_i32_0 = arith.constant 0 : i32
    return %c0_i32, %arg1 : i32, i32
  }
  func.func @transform_3(%arg0: i32, %arg1: i32) -> (i32, i32) {
    %c0_i32 = arith.constant 0 : i32
    return %arg0, %arg1 : i32, i32
  }
}

module attributes {stable_mosaic.version = 11 : i64} {
  func.func @_lrelu_kernel(%arg0: i32, %arg1: memref<8x128xf32, #tpu.memory_space<vmem>>, %arg2: memref<8x128xf32, #tpu.memory_space<vmem>>) attributes {dimension_semantics = [#tpu.dimension_semantics<parallel>], iteration_bounds = array<i64: 1>, scalar_prefetch = 0 : i64, scratch_operands = 0 : i64, tpu.core_type = #tpu.core_type<tc>, window_params = [{transform_indices = @transform_0, window_bounds = array<i64: 8, 128>}, {transform_indices = @transform_1, window_bounds = array<i64: 8, 128>}]} {
    %c0 = arith.constant 0 : index
    %c0_0 = arith.constant 0 : index
    %0 = vector.load %arg1[%c0, %c0_0] : memref<8x128xf32, #tpu.memory_space<vmem>>, vector<8x128xf32>
    %cst = arith.constant 0.000000e+00 : f32
    %1 = vector.broadcast %cst : f32 to vector<8x128xf32>
    %2 = arith.cmpf oge, %0, %1 : vector<8x128xf32>
    %cst_1 = arith.constant 0.00999999977 : f32
    %3 = vector.broadcast %cst_1 : f32 to vector<8x128xf32>
    %4 = arith.mulf %3, %0 : vector<8x128xf32>
    %5 = arith.select %2, %0, %4 : vector<8x128xi1>, vector<8x128xf32>
    %c0_2 = arith.constant 0 : index
    %c0_3 = arith.constant 0 : index
    %6 = vector.load %arg2[%c0_2, %c0_3] : memref<8x128xf32, #tpu.memory_space<vmem>>, vector<8x128xf32>
    tpu.vector_store %arg2[%c0_2, %c0_3], %5 {strides = array<i32>} : memref<8x128xf32, #tpu.memory_space<vmem>>, vector<8x128xf32>,
    return
  }
  func.func @transform_0(%arg0: i32) -> (i32, i32) {
    %c0_i32 = arith.constant 0 : i32
    %c0_i32_0 = arith.constant 0 : i32
    return %arg0, %c0_i32 : i32, i32
  }
  func.func @transform_1(%arg0: i32) -> (i32, i32) {
    %c0_i32 = arith.constant 0 : i32
    %c0_i32_0 = arith.constant 0 : i32
    return %arg0, %c0_i32 : i32, i32
  }
}

module attributes {stable_mosaic.version = 11 : i64} {
  func.func @_add_lrelu_kernel(%arg0: i32, %arg1: memref<8x128xf32, #tpu.memory_space<vmem>>, %arg2: memref<8x128xf32, #tpu.memory_space<vmem>>, %arg3: memref<8x128xf32, #tpu.memory_space<vmem>>) attributes {dimension_semantics = [#tpu.dimension_semantics<parallel>], iteration_bounds = array<i64: 1>, scalar_prefetch = 0 : i64, scratch_operands = 0 : i64, tpu.core_type = #tpu.core_type<tc>, window_params = [{transform_indices = @transform_0, window_bounds = array<i64: 8, 128>}, {transform_indices = @transform_1, window_bounds = array<i64: 8, 128>}, {transform_indices = @transform_2, window_bounds = array<i64: 8, 128>}]} {
    %c0 = arith.constant 0 : index
    %c0_0 = arith.constant 0 : index
    %0 = vector.load %arg1[%c0, %c0_0] : memref<8x128xf32, #tpu.memory_space<vmem>>, vector<8x128xf32>
    %c0_1 = arith.constant 0 : index
    %c0_2 = arith.constant 0 : index
    %1 = vector.load %arg2[%c0_1, %c0_2] : memref<8x128xf32, #tpu.memory_space<vmem>>, vector<8x128xf32>
    %2 = arith.addf %0, %1 : vector<8x128xf32>
    %cst = arith.constant 0.000000e+00 : f32
    %3 = vector.broadcast %cst : f32 to vector<8x128xf32>
    %4 = arith.cmpf oge, %2, %3 : vector<8x128xf32>
    %cst_3 = arith.constant 0.00999999977 : f32
    %5 = vector.broadcast %cst_3 : f32 to vector<8x128xf32>
    %6 = arith.mulf %5, %2 : vector<8x128xf32>
    %7 = arith.select %4, %2, %6 : vector<8x128xi1>, vector<8x128xf32>
    %c0_4 = arith.constant 0 : index
    %c0_5 = arith.constant 0 : index
    %8 = vector.load %arg3[%c0_4, %c0_5] : memref<8x128xf32, #tpu.memory_space<vmem>>, vector<8x128xf32>
    tpu.vector_store %arg3[%c0_4, %c0_5], %7 {strides = array<i32>} : memref<8x128xf32, #tpu.memory_space<vmem>>, vector<8x128xf32>,
    return
  }
  func.func @transform_0(%arg0: i32) -> (i32, i32) {
    %c0_i32 = arith.constant 0 : i32
    %c0_i32_0 = arith.constant 0 : i32
    return %arg0, %c0_i32 : i32, i32
  }
  func.func @transform_1(%arg0: i32) -> (i32, i32) {
    %c0_i32 = arith.constant 0 : i32
    %c0_i32_0 = arith.constant 0 : i32
    return %arg0, %c0_i32 : i32, i32
  }
  func.func @transform_2(%arg0: i32) -> (i32, i32) {
    %c0_i32 = arith.constant 0 : i32
    %c0_i32_0 = arith.constant 0 : i32
    return %arg0, %c0_i32 : i32, i32
  }
}

module attributes {stable_mosaic.version = 11 : i64} {
  func.func @_channel_attn_kernel(%arg0: i32, %arg1: memref<1x8x128xf32, #tpu.memory_space<vmem>>, %arg2: memref<1x8x128xf32, #tpu.memory_space<vmem>>, %arg3: memref<1x8x128xf32, #tpu.memory_space<vmem>>, %arg4: memref<1x1x1xf32, #tpu.memory_space<vmem>>, %arg5: memref<1x8x128xf32, #tpu.memory_space<vmem>>) attributes {dimension_semantics = [#tpu.dimension_semantics<parallel>], iteration_bounds = array<i64: 4>, scalar_prefetch = 0 : i64, scratch_operands = 0 : i64, tpu.core_type = #tpu.core_type<tc>, window_params = [{transform_indices = @transform_0, window_bounds = array<i64: 1, 8, 128>}, {transform_indices = @transform_1, window_bounds = array<i64: 1, 8, 128>}, {transform_indices = @transform_2, window_bounds = array<i64: 1, 8, 128>}, {transform_indices = @transform_3, window_bounds = array<i64: 1, 1, 1>}, {transform_indices = @transform_4, window_bounds = array<i64: 1, 8, 128>}]} {
    %c0 = arith.constant 0 : index
    %c0_0 = arith.constant 0 : index
    %c0_1 = arith.constant 0 : index
    %0 = vector.load %arg1[%c0, %c0_0, %c0_1] : memref<1x8x128xf32, #tpu.memory_space<vmem>>, vector<1x8x128xf32>
    %1 = vector.shape_cast %0 : vector<1x8x128xf32> to vector<8x128xf32>
    %c0_2 = arith.constant 0 : index
    %c0_3 = arith.constant 0 : index
    %c0_4 = arith.constant 0 : index
    %2 = vector.load %arg2[%c0_2, %c0_3, %c0_4] : memref<1x8x128xf32, #tpu.memory_space<vmem>>, vector<1x8x128xf32>
    %3 = vector.shape_cast %2 : vector<1x8x128xf32> to vector<8x128xf32>
    %c0_5 = arith.constant 0 : index
    %c0_6 = arith.constant 0 : index
    %c0_7 = arith.constant 0 : index
    %4 = vector.load %arg3[%c0_5, %c0_6, %c0_7] : memref<1x8x128xf32, #tpu.memory_space<vmem>>, vector<1x8x128xf32>
    %5 = vector.shape_cast %4 : vector<1x8x128xf32> to vector<8x128xf32>
    %c0_8 = arith.constant 0 : index
    %c0_9 = arith.constant 0 : index
    %c0_10 = arith.constant 0 : index
    %6 = vector.load %arg4[%c0_8, %c0_9, %c0_10] : memref<1x1x1xf32, #tpu.memory_space<vmem>>, vector<1x1x1xf32>
    %7 = vector.shape_cast %6 : vector<1x1x1xf32> to vector<1x1xf32>
    %8 = arith.mulf %1, %1 : vector<8x128xf32>
    %cst = arith.constant dense<0.000000e+00> : vector<8xf32>
    %9 = vector.multi_reduction <add>, %8, %cst [1] : vector<8x128xf32> to vector<8xf32>
    %10 = vector.shape_cast %9 : vector<8xf32> to vector<8x1xf32>
    %11 = math.sqrt %10 : vector<8x1xf32>
    %cst_11 = arith.constant 9.99999997E-7 : f32
    %12 = vector.broadcast %cst_11 : f32 to vector<8x1xf32>
    %13 = arith.addf %11, %12 : vector<8x1xf32>
    %14 = vector.broadcast %13 : vector<8x1xf32> to vector<8x128xf32>
    %15 = arith.divf %1, %14 : vector<8x128xf32>
    %16 = arith.mulf %3, %3 : vector<8x128xf32>
    %cst_12 = arith.constant dense<0.000000e+00> : vector<8xf32>
    %17 = vector.multi_reduction <add>, %16, %cst_12 [1] : vector<8x128xf32> to vector<8xf32>
    %18 = vector.shape_cast %17 : vector<8xf32> to vector<8x1xf32>
    %19 = math.sqrt %18 : vector<8x1xf32>
    %cst_13 = arith.constant 9.99999997E-7 : f32
    %20 = vector.broadcast %cst_13 : f32 to vector<8x1xf32>
    %21 = arith.addf %19, %20 : vector<8x1xf32>
    %22 = vector.broadcast %21 : vector<8x1xf32> to vector<8x128xf32>
    %23 = arith.divf %3, %22 : vector<8x128xf32>
    %cst_14 = arith.constant dense<0.000000e+00> : vector<8x8xf32>
    %24 = tpu.matmul %15, %23, %cst_14 {dimension_numbers = #tpu.dot_dimension_numbers<[1], [1], [0], [0], [0, 0, 1, 0], [], []>} : vector<8x128xf32>, vector<8x128xf32>, vector<8x8xf32> -> vector<8x8xf32>
    %25 = vector.broadcast %7 : vector<1x1xf32> to vector<8x8xf32>
    %26 = arith.mulf %24, %25 : vector<8x8xf32>
    %cst_15 = arith.constant dense<0xFF800000> : vector<8xf32>
    %27 = vector.multi_reduction <maximumf>, %26, %cst_15 [1] : vector<8x8xf32> to vector<8xf32>
    %28 = vector.shape_cast %27 : vector<8xf32> to vector<8x1xf32>
    %29 = vector.broadcast %28 : vector<8x1xf32> to vector<8x8xf32>
    %30 = arith.subf %26, %29 : vector<8x8xf32>
    %31 = math.exp %30 : vector<8x8xf32>
    %cst_16 = arith.constant dense<0.000000e+00> : vector<8xf32>
    %32 = vector.multi_reduction <add>, %31, %cst_16 [1] : vector<8x8xf32> to vector<8xf32>
    %33 = vector.shape_cast %32 : vector<8xf32> to vector<8x1xf32>
    %34 = vector.broadcast %33 : vector<8x1xf32> to vector<8x8xf32>
    %35 = arith.divf %31, %34 : vector<8x8xf32>
    %cst_17 = arith.constant dense<0.000000e+00> : vector<8x128xf32>
    %36 = tpu.matmul %35, %5, %cst_17 {dimension_numbers = #tpu.dot_dimension_numbers<[1], [0], [0], [1], [0, 0, 1, 1], [], []>} : vector<8x8xf32>, vector<8x128xf32>, vector<8x128xf32> -> vector<8x128xf32>
    %c0_18 = arith.constant 0 : index
    %c0_19 = arith.constant 0 : index
    %c0_20 = arith.constant 0 : index
    %37 = vector.load %arg5[%c0_18, %c0_19, %c0_20] : memref<1x8x128xf32, #tpu.memory_space<vmem>>, vector<1x8x128xf32>
    %38 = vector.shape_cast %37 : vector<1x8x128xf32> to vector<8x128xf32>
    %39 = vector.shape_cast %36 : vector<8x128xf32> to vector<1x8x128xf32>
    tpu.vector_store %arg5[%c0_18, %c0_19, %c0_20], %39 {strides = array<i32>} : memref<1x8x128xf32, #tpu.memory_space<vmem>>, vector<1x8x128xf32>,
    return
  }
  func.func @transform_0(%arg0: i32) -> (i32, i32, i32) {
    %c0_i32 = arith.constant 0 : i32
    %c0_i32_0 = arith.constant 0 : i32
    %c0_i32_1 = arith.constant 0 : i32
    return %arg0, %c0_i32, %c0_i32_0 : i32, i32, i32
  }
  func.func @transform_1(%arg0: i32) -> (i32, i32, i32) {
    %c0_i32 = arith.constant 0 : i32
    %c0_i32_0 = arith.constant 0 : i32
    %c0_i32_1 = arith.constant 0 : i32
    return %arg0, %c0_i32, %c0_i32_0 : i32, i32, i32
  }
  func.func @transform_2(%arg0: i32) -> (i32, i32, i32) {
    %c0_i32 = arith.constant 0 : i32
    %c0_i32_0 = arith.constant 0 : i32
    %c0_i32_1 = arith.constant 0 : i32
    return %arg0, %c0_i32, %c0_i32_0 : i32, i32, i32
  }
  func.func @transform_3(%arg0: i32) -> (i32, i32, i32) {
    %c0_i32 = arith.constant 0 : i32
    %c0_i32_0 = arith.constant 0 : i32
    %c0_i32_1 = arith.constant 0 : i32
    return %arg0, %c0_i32, %c0_i32_0 : i32, i32, i32
  }
  func.func @transform_4(%arg0: i32) -> (i32, i32, i32) {
    %c0_i32 = arith.constant 0 : i32
    %c0_i32_0 = arith.constant 0 : i32
    %c0_i32_1 = arith.constant 0 : i32
    return %arg0, %c0_i32, %c0_i32_0 : i32, i32, i32
  }
}

module attributes {stable_mosaic.version = 11 : i64} {
  func.func @_matmul_bias_kernel(%arg0: i32, %arg1: i32, %arg2: memref<16x896xbf16, #tpu.memory_space<vmem>>, %arg3: memref<896x128xbf16, #tpu.memory_space<vmem>>, %arg4: memref<1x128xf32, #tpu.memory_space<vmem>>, %arg5: memref<16x128xf32, #tpu.memory_space<vmem>>) attributes {dimension_semantics = [#tpu.dimension_semantics<parallel>, #tpu.dimension_semantics<parallel>], iteration_bounds = array<i64: 1, 1>, scalar_prefetch = 0 : i64, scratch_operands = 0 : i64, tpu.core_type = #tpu.core_type<tc>, window_params = [{transform_indices = @transform_0, window_bounds = array<i64: 16, 896>}, {transform_indices = @transform_1, window_bounds = array<i64: 896, 128>}, {transform_indices = @transform_2, window_bounds = array<i64: 1, 128>}, {transform_indices = @transform_3, window_bounds = array<i64: 16, 128>}]} {
    %c0 = arith.constant 0 : index
    %c0_0 = arith.constant 0 : index
    %0 = vector.load %arg2[%c0, %c0_0] : memref<16x896xbf16, #tpu.memory_space<vmem>>, vector<16x896xbf16>
    %c0_1 = arith.constant 0 : index
    %c0_2 = arith.constant 0 : index
    %1 = vector.load %arg3[%c0_1, %c0_2] : memref<896x128xbf16, #tpu.memory_space<vmem>>, vector<896x128xbf16>
    %cst = arith.constant dense<0.000000e+00> : vector<16x128xf32>
    %2 = tpu.matmul %0, %1, %cst {dimension_numbers = #tpu.dot_dimension_numbers<[1], [0], [0], [1], [0, 0, 1, 1], [], []>} : vector<16x896xbf16>, vector<896x128xbf16>, vector<16x128xf32> -> vector<16x128xf32>
    %c0_3 = arith.constant 0 : index
    %c0_4 = arith.constant 0 : index
    %3 = vector.load %arg4[%c0_3, %c0_4] : memref<1x128xf32, #tpu.memory_space<vmem>>, vector<1x128xf32>
    %4 = vector.broadcast %3 : vector<1x128xf32> to vector<16x128xf32>
    %5 = arith.addf %2, %4 : vector<16x128xf32>
    %c0_5 = arith.constant 0 : index
    %c0_6 = arith.constant 0 : index
    %6 = vector.load %arg5[%c0_5, %c0_6] : memref<16x128xf32, #tpu.memory_space<vmem>>, vector<16x128xf32>
    tpu.vector_store %arg5[%c0_5, %c0_6], %5 {strides = array<i32>} : memref<16x128xf32, #tpu.memory_space<vmem>>, vector<16x128xf32>,
    return
  }
  func.func @transform_0(%arg0: i32, %arg1: i32) -> (i32, i32) {
    %c0_i32 = arith.constant 0 : i32
    %c0_i32_0 = arith.constant 0 : i32
    return %arg0, %c0_i32 : i32, i32
  }
  func.func @transform_1(%arg0: i32, %arg1: i32) -> (i32, i32) {
    %c0_i32 = arith.constant 0 : i32
    %c0_i32_0 = arith.constant 0 : i32
    return %c0_i32, %arg1 : i32, i32
  }
  func.func @transform_2(%arg0: i32, %arg1: i32) -> (i32, i32) {
    %c0_i32 = arith.constant 0 : i32
    %c0_i32_0 = arith.constant 0 : i32
    return %c0_i32, %arg1 : i32, i32
  }
  func.func @transform_3(%arg0: i32, %arg1: i32) -> (i32, i32) {
    %c0_i32 = arith.constant 0 : i32
    return %arg0, %arg1 : i32, i32
  }
}

module attributes {stable_mosaic.version = 11 : i64} {
  func.func @_channel_attn_kernel(%arg0: i32, %arg1: memref<1x16x128xf32, #tpu.memory_space<vmem>>, %arg2: memref<1x16x128xf32, #tpu.memory_space<vmem>>, %arg3: memref<1x16x128xf32, #tpu.memory_space<vmem>>, %arg4: memref<1x1x1xf32, #tpu.memory_space<vmem>>, %arg5: memref<1x16x128xf32, #tpu.memory_space<vmem>>) attributes {dimension_semantics = [#tpu.dimension_semantics<parallel>], iteration_bounds = array<i64: 4>, scalar_prefetch = 0 : i64, scratch_operands = 0 : i64, tpu.core_type = #tpu.core_type<tc>, window_params = [{transform_indices = @transform_0, window_bounds = array<i64: 1, 16, 128>}, {transform_indices = @transform_1, window_bounds = array<i64: 1, 16, 128>}, {transform_indices = @transform_2, window_bounds = array<i64: 1, 16, 128>}, {transform_indices = @transform_3, window_bounds = array<i64: 1, 1, 1>}, {transform_indices = @transform_4, window_bounds = array<i64: 1, 16, 128>}]} {
    %c0 = arith.constant 0 : index
    %c0_0 = arith.constant 0 : index
    %c0_1 = arith.constant 0 : index
    %0 = vector.load %arg1[%c0, %c0_0, %c0_1] : memref<1x16x128xf32, #tpu.memory_space<vmem>>, vector<1x16x128xf32>
    %1 = vector.shape_cast %0 : vector<1x16x128xf32> to vector<16x128xf32>
    %c0_2 = arith.constant 0 : index
    %c0_3 = arith.constant 0 : index
    %c0_4 = arith.constant 0 : index
    %2 = vector.load %arg2[%c0_2, %c0_3, %c0_4] : memref<1x16x128xf32, #tpu.memory_space<vmem>>, vector<1x16x128xf32>
    %3 = vector.shape_cast %2 : vector<1x16x128xf32> to vector<16x128xf32>
    %c0_5 = arith.constant 0 : index
    %c0_6 = arith.constant 0 : index
    %c0_7 = arith.constant 0 : index
    %4 = vector.load %arg3[%c0_5, %c0_6, %c0_7] : memref<1x16x128xf32, #tpu.memory_space<vmem>>, vector<1x16x128xf32>
    %5 = vector.shape_cast %4 : vector<1x16x128xf32> to vector<16x128xf32>
    %c0_8 = arith.constant 0 : index
    %c0_9 = arith.constant 0 : index
    %c0_10 = arith.constant 0 : index
    %6 = vector.load %arg4[%c0_8, %c0_9, %c0_10] : memref<1x1x1xf32, #tpu.memory_space<vmem>>, vector<1x1x1xf32>
    %7 = vector.shape_cast %6 : vector<1x1x1xf32> to vector<1x1xf32>
    %8 = arith.mulf %1, %1 : vector<16x128xf32>
    %cst = arith.constant dense<0.000000e+00> : vector<16xf32>
    %9 = vector.multi_reduction <add>, %8, %cst [1] : vector<16x128xf32> to vector<16xf32>
    %10 = vector.shape_cast %9 : vector<16xf32> to vector<16x1xf32>
    %11 = math.sqrt %10 : vector<16x1xf32>
    %cst_11 = arith.constant 9.99999997E-7 : f32
    %12 = vector.broadcast %cst_11 : f32 to vector<16x1xf32>
    %13 = arith.addf %11, %12 : vector<16x1xf32>
    %14 = vector.broadcast %13 : vector<16x1xf32> to vector<16x128xf32>
    %15 = arith.divf %1, %14 : vector<16x128xf32>
    %16 = arith.mulf %3, %3 : vector<16x128xf32>
    %cst_12 = arith.constant dense<0.000000e+00> : vector<16xf32>
    %17 = vector.multi_reduction <add>, %16, %cst_12 [1] : vector<16x128xf32> to vector<16xf32>
    %18 = vector.shape_cast %17 : vector<16xf32> to vector<16x1xf32>
    %19 = math.sqrt %18 : vector<16x1xf32>
    %cst_13 = arith.constant 9.99999997E-7 : f32
    %20 = vector.broadcast %cst_13 : f32 to vector<16x1xf32>
    %21 = arith.addf %19, %20 : vector<16x1xf32>
    %22 = vector.broadcast %21 : vector<16x1xf32> to vector<16x128xf32>
    %23 = arith.divf %3, %22 : vector<16x128xf32>
    %cst_14 = arith.constant dense<0.000000e+00> : vector<16x16xf32>
    %24 = tpu.matmul %15, %23, %cst_14 {dimension_numbers = #tpu.dot_dimension_numbers<[1], [1], [0], [0], [0, 0, 1, 0], [], []>} : vector<16x128xf32>, vector<16x128xf32>, vector<16x16xf32> -> vector<16x16xf32>
    %25 = vector.broadcast %7 : vector<1x1xf32> to vector<16x16xf32>
    %26 = arith.mulf %24, %25 : vector<16x16xf32>
    %cst_15 = arith.constant dense<0xFF800000> : vector<16xf32>
    %27 = vector.multi_reduction <maximumf>, %26, %cst_15 [1] : vector<16x16xf32> to vector<16xf32>
    %28 = vector.shape_cast %27 : vector<16xf32> to vector<16x1xf32>
    %29 = vector.broadcast %28 : vector<16x1xf32> to vector<16x16xf32>
    %30 = arith.subf %26, %29 : vector<16x16xf32>
    %31 = math.exp %30 : vector<16x16xf32>
    %cst_16 = arith.constant dense<0.000000e+00> : vector<16xf32>
    %32 = vector.multi_reduction <add>, %31, %cst_16 [1] : vector<16x16xf32> to vector<16xf32>
    %33 = vector.shape_cast %32 : vector<16xf32> to vector<16x1xf32>
    %34 = vector.broadcast %33 : vector<16x1xf32> to vector<16x16xf32>
    %35 = arith.divf %31, %34 : vector<16x16xf32>
    %cst_17 = arith.constant dense<0.000000e+00> : vector<16x128xf32>
    %36 = tpu.matmul %35, %5, %cst_17 {dimension_numbers = #tpu.dot_dimension_numbers<[1], [0], [0], [1], [0, 0, 1, 1], [], []>} : vector<16x16xf32>, vector<16x128xf32>, vector<16x128xf32> -> vector<16x128xf32>
    %c0_18 = arith.constant 0 : index
    %c0_19 = arith.constant 0 : index
    %c0_20 = arith.constant 0 : index
    %37 = vector.load %arg5[%c0_18, %c0_19, %c0_20] : memref<1x16x128xf32, #tpu.memory_space<vmem>>, vector<1x16x128xf32>
    %38 = vector.shape_cast %37 : vector<1x16x128xf32> to vector<16x128xf32>
    %39 = vector.shape_cast %36 : vector<16x128xf32> to vector<1x16x128xf32>
    tpu.vector_store %arg5[%c0_18, %c0_19, %c0_20], %39 {strides = array<i32>} : memref<1x16x128xf32, #tpu.memory_space<vmem>>, vector<1x16x128xf32>,
    return
  }
  func.func @transform_0(%arg0: i32) -> (i32, i32, i32) {
    %c0_i32 = arith.constant 0 : i32
    %c0_i32_0 = arith.constant 0 : i32
    %c0_i32_1 = arith.constant 0 : i32
    return %arg0, %c0_i32, %c0_i32_0 : i32, i32, i32
  }
  func.func @transform_1(%arg0: i32) -> (i32, i32, i32) {
    %c0_i32 = arith.constant 0 : i32
    %c0_i32_0 = arith.constant 0 : i32
    %c0_i32_1 = arith.constant 0 : i32
    return %arg0, %c0_i32, %c0_i32_0 : i32, i32, i32
  }
  func.func @transform_2(%arg0: i32) -> (i32, i32, i32) {
    %c0_i32 = arith.constant 0 : i32
    %c0_i32_0 = arith.constant 0 : i32
    %c0_i32_1 = arith.constant 0 : i32
    return %arg0, %c0_i32, %c0_i32_0 : i32, i32, i32
  }
  func.func @transform_3(%arg0: i32) -> (i32, i32, i32) {
    %c0_i32 = arith.constant 0 : i32
    %c0_i32_0 = arith.constant 0 : i32
    %c0_i32_1 = arith.constant 0 : i32
    return %arg0, %c0_i32, %c0_i32_0 : i32, i32, i32
  }
  func.func @transform_4(%arg0: i32) -> (i32, i32, i32) {
    %c0_i32 = arith.constant 0 : i32
    %c0_i32_0 = arith.constant 0 : i32
    %c0_i32_1 = arith.constant 0 : i32
    return %arg0, %c0_i32, %c0_i32_0 : i32, i32, i32
  }
}

module attributes {stable_mosaic.version = 11 : i64} {
  func.func @_matmul_bias_kernel(%arg0: i32, %arg1: i32, %arg2: memref<512x512xbf16, #tpu.memory_space<vmem>>, %arg3: memref<512x128xbf16, #tpu.memory_space<vmem>>, %arg4: memref<1x128xf32, #tpu.memory_space<vmem>>, %arg5: memref<512x128xf32, #tpu.memory_space<vmem>>) attributes {dimension_semantics = [#tpu.dimension_semantics<parallel>, #tpu.dimension_semantics<parallel>], iteration_bounds = array<i64: 2, 1>, scalar_prefetch = 0 : i64, scratch_operands = 0 : i64, tpu.core_type = #tpu.core_type<tc>, window_params = [{transform_indices = @transform_0, window_bounds = array<i64: 512, 512>}, {transform_indices = @transform_1, window_bounds = array<i64: 512, 128>}, {transform_indices = @transform_2, window_bounds = array<i64: 1, 128>}, {transform_indices = @transform_3, window_bounds = array<i64: 512, 128>}]} {
    %c0 = arith.constant 0 : index
    %c0_0 = arith.constant 0 : index
    %0 = vector.load %arg2[%c0, %c0_0] : memref<512x512xbf16, #tpu.memory_space<vmem>>, vector<512x512xbf16>
    %c0_1 = arith.constant 0 : index
    %c0_2 = arith.constant 0 : index
    %1 = vector.load %arg3[%c0_1, %c0_2] : memref<512x128xbf16, #tpu.memory_space<vmem>>, vector<512x128xbf16>
    %cst = arith.constant dense<0.000000e+00> : vector<512x128xf32>
    %2 = tpu.matmul %0, %1, %cst {dimension_numbers = #tpu.dot_dimension_numbers<[1], [0], [0], [1], [0, 0, 1, 1], [], []>} : vector<512x512xbf16>, vector<512x128xbf16>, vector<512x128xf32> -> vector<512x128xf32>
    %c0_3 = arith.constant 0 : index
    %c0_4 = arith.constant 0 : index
    %3 = vector.load %arg4[%c0_3, %c0_4] : memref<1x128xf32, #tpu.memory_space<vmem>>, vector<1x128xf32>
    %4 = vector.broadcast %3 : vector<1x128xf32> to vector<512x128xf32>
    %5 = arith.addf %2, %4 : vector<512x128xf32>
    %c0_5 = arith.constant 0 : index
    %c0_6 = arith.constant 0 : index
    %6 = vector.load %arg5[%c0_5, %c0_6] : memref<512x128xf32, #tpu.memory_space<vmem>>, vector<512x128xf32>
    tpu.vector_store %arg5[%c0_5, %c0_6], %5 {strides = array<i32>} : memref<512x128xf32, #tpu.memory_space<vmem>>, vector<512x128xf32>,
    return
  }
  func.func @transform_0(%arg0: i32, %arg1: i32) -> (i32, i32) {
    %c0_i32 = arith.constant 0 : i32
    %c0_i32_0 = arith.constant 0 : i32
    return %arg0, %c0_i32 : i32, i32
  }
  func.func @transform_1(%arg0: i32, %arg1: i32) -> (i32, i32) {
    %c0_i32 = arith.constant 0 : i32
    %c0_i32_0 = arith.constant 0 : i32
    return %c0_i32, %arg1 : i32, i32
  }
  func.func @transform_2(%arg0: i32, %arg1: i32) -> (i32, i32) {
    %c0_i32 = arith.constant 0 : i32
    %c0_i32_0 = arith.constant 0 : i32
    return %c0_i32, %arg1 : i32, i32
  }
  func.func @transform_3(%arg0: i32, %arg1: i32) -> (i32, i32) {
    %c0_i32 = arith.constant 0 : i32
    return %arg0, %arg1 : i32, i32
  }
}

module attributes {stable_mosaic.version = 11 : i64} {
  func.func @_lrelu_kernel(%arg0: i32, %arg1: memref<128x128xf32, #tpu.memory_space<vmem>>, %arg2: memref<128x128xf32, #tpu.memory_space<vmem>>) attributes {dimension_semantics = [#tpu.dimension_semantics<parallel>], iteration_bounds = array<i64: 1>, scalar_prefetch = 0 : i64, scratch_operands = 0 : i64, tpu.core_type = #tpu.core_type<tc>, window_params = [{transform_indices = @transform_0, window_bounds = array<i64: 128, 128>}, {transform_indices = @transform_1, window_bounds = array<i64: 128, 128>}]} {
    %c0 = arith.constant 0 : index
    %c0_0 = arith.constant 0 : index
    %0 = vector.load %arg1[%c0, %c0_0] : memref<128x128xf32, #tpu.memory_space<vmem>>, vector<128x128xf32>
    %cst = arith.constant 0.000000e+00 : f32
    %1 = vector.broadcast %cst : f32 to vector<128x128xf32>
    %2 = arith.cmpf oge, %0, %1 : vector<128x128xf32>
    %cst_1 = arith.constant 0.00999999977 : f32
    %3 = vector.broadcast %cst_1 : f32 to vector<128x128xf32>
    %4 = arith.mulf %3, %0 : vector<128x128xf32>
    %5 = arith.select %2, %0, %4 : vector<128x128xi1>, vector<128x128xf32>
    %c0_2 = arith.constant 0 : index
    %c0_3 = arith.constant 0 : index
    %6 = vector.load %arg2[%c0_2, %c0_3] : memref<128x128xf32, #tpu.memory_space<vmem>>, vector<128x128xf32>
    tpu.vector_store %arg2[%c0_2, %c0_3], %5 {strides = array<i32>} : memref<128x128xf32, #tpu.memory_space<vmem>>, vector<128x128xf32>,
    return
  }
  func.func @transform_0(%arg0: i32) -> (i32, i32) {
    %c0_i32 = arith.constant 0 : i32
    %c0_i32_0 = arith.constant 0 : i32
    return %arg0, %c0_i32 : i32, i32
  }
  func.func @transform_1(%arg0: i32) -> (i32, i32) {
    %c0_i32 = arith.constant 0 : i32
    %c0_i32_0 = arith.constant 0 : i32
    return %arg0, %c0_i32 : i32, i32
  }
}

module attributes {stable_mosaic.version = 11 : i64} {
  func.func @_add_lrelu_kernel(%arg0: i32, %arg1: memref<128x128xf32, #tpu.memory_space<vmem>>, %arg2: memref<128x128xf32, #tpu.memory_space<vmem>>, %arg3: memref<128x128xf32, #tpu.memory_space<vmem>>) attributes {dimension_semantics = [#tpu.dimension_semantics<parallel>], iteration_bounds = array<i64: 1>, scalar_prefetch = 0 : i64, scratch_operands = 0 : i64, tpu.core_type = #tpu.core_type<tc>, window_params = [{transform_indices = @transform_0, window_bounds = array<i64: 128, 128>}, {transform_indices = @transform_1, window_bounds = array<i64: 128, 128>}, {transform_indices = @transform_2, window_bounds = array<i64: 128, 128>}]} {
    %c0 = arith.constant 0 : index
    %c0_0 = arith.constant 0 : index
    %0 = vector.load %arg1[%c0, %c0_0] : memref<128x128xf32, #tpu.memory_space<vmem>>, vector<128x128xf32>
    %c0_1 = arith.constant 0 : index
    %c0_2 = arith.constant 0 : index
    %1 = vector.load %arg2[%c0_1, %c0_2] : memref<128x128xf32, #tpu.memory_space<vmem>>, vector<128x128xf32>
    %2 = arith.addf %0, %1 : vector<128x128xf32>
    %cst = arith.constant 0.000000e+00 : f32
    %3 = vector.broadcast %cst : f32 to vector<128x128xf32>
    %4 = arith.cmpf oge, %2, %3 : vector<128x128xf32>
    %cst_3 = arith.constant 0.00999999977 : f32
    %5 = vector.broadcast %cst_3 : f32 to vector<128x128xf32>
    %6 = arith.mulf %5, %2 : vector<128x128xf32>
    %7 = arith.select %4, %2, %6 : vector<128x128xi1>, vector<128x128xf32>
    %c0_4 = arith.constant 0 : index
    %c0_5 = arith.constant 0 : index
    %8 = vector.load %arg3[%c0_4, %c0_5] : memref<128x128xf32, #tpu.memory_space<vmem>>, vector<128x128xf32>
    tpu.vector_store %arg3[%c0_4, %c0_5], %7 {strides = array<i32>} : memref<128x128xf32, #tpu.memory_space<vmem>>, vector<128x128xf32>,
    return
  }
  func.func @transform_0(%arg0: i32) -> (i32, i32) {
    %c0_i32 = arith.constant 0 : i32
    %c0_i32_0 = arith.constant 0 : i32
    return %arg0, %c0_i32 : i32, i32
  }
  func.func @transform_1(%arg0: i32) -> (i32, i32) {
    %c0_i32 = arith.constant 0 : i32
    %c0_i32_0 = arith.constant 0 : i32
    return %arg0, %c0_i32 : i32, i32
  }
  func.func @transform_2(%arg0: i32) -> (i32, i32) {
    %c0_i32 = arith.constant 0 : i32
    %c0_i32_0 = arith.constant 0 : i32
    return %arg0, %c0_i32 : i32, i32
  }
}

module attributes {stable_mosaic.version = 11 : i64} {
  func.func @_matmul_bias_kernel(%arg0: i32, %arg1: i32, %arg2: memref<512x256xbf16, #tpu.memory_space<vmem>>, %arg3: memref<256x128xbf16, #tpu.memory_space<vmem>>, %arg4: memref<1x128xf32, #tpu.memory_space<vmem>>, %arg5: memref<512x128xf32, #tpu.memory_space<vmem>>) attributes {dimension_semantics = [#tpu.dimension_semantics<parallel>, #tpu.dimension_semantics<parallel>], iteration_bounds = array<i64: 16, 1>, scalar_prefetch = 0 : i64, scratch_operands = 0 : i64, tpu.core_type = #tpu.core_type<tc>, window_params = [{transform_indices = @transform_0, window_bounds = array<i64: 512, 256>}, {transform_indices = @transform_1, window_bounds = array<i64: 256, 128>}, {transform_indices = @transform_2, window_bounds = array<i64: 1, 128>}, {transform_indices = @transform_3, window_bounds = array<i64: 512, 128>}]} {
    %c0 = arith.constant 0 : index
    %c0_0 = arith.constant 0 : index
    %0 = vector.load %arg2[%c0, %c0_0] : memref<512x256xbf16, #tpu.memory_space<vmem>>, vector<512x256xbf16>
    %c0_1 = arith.constant 0 : index
    %c0_2 = arith.constant 0 : index
    %1 = vector.load %arg3[%c0_1, %c0_2] : memref<256x128xbf16, #tpu.memory_space<vmem>>, vector<256x128xbf16>
    %cst = arith.constant dense<0.000000e+00> : vector<512x128xf32>
    %2 = tpu.matmul %0, %1, %cst {dimension_numbers = #tpu.dot_dimension_numbers<[1], [0], [0], [1], [0, 0, 1, 1], [], []>} : vector<512x256xbf16>, vector<256x128xbf16>, vector<512x128xf32> -> vector<512x128xf32>
    %c0_3 = arith.constant 0 : index
    %c0_4 = arith.constant 0 : index
    %3 = vector.load %arg4[%c0_3, %c0_4] : memref<1x128xf32, #tpu.memory_space<vmem>>, vector<1x128xf32>
    %4 = vector.broadcast %3 : vector<1x128xf32> to vector<512x128xf32>
    %5 = arith.addf %2, %4 : vector<512x128xf32>
    %c0_5 = arith.constant 0 : index
    %c0_6 = arith.constant 0 : index
    %6 = vector.load %arg5[%c0_5, %c0_6] : memref<512x128xf32, #tpu.memory_space<vmem>>, vector<512x128xf32>
    tpu.vector_store %arg5[%c0_5, %c0_6], %5 {strides = array<i32>} : memref<512x128xf32, #tpu.memory_space<vmem>>, vector<512x128xf32>,
    return
  }
  func.func @transform_0(%arg0: i32, %arg1: i32) -> (i32, i32) {
    %c0_i32 = arith.constant 0 : i32
    %c0_i32_0 = arith.constant 0 : i32
    return %arg0, %c0_i32 : i32, i32
  }
  func.func @transform_1(%arg0: i32, %arg1: i32) -> (i32, i32) {
    %c0_i32 = arith.constant 0 : i32
    %c0_i32_0 = arith.constant 0 : i32
    return %c0_i32, %arg1 : i32, i32
  }
  func.func @transform_2(%arg0: i32, %arg1: i32) -> (i32, i32) {
    %c0_i32 = arith.constant 0 : i32
    %c0_i32_0 = arith.constant 0 : i32
    return %c0_i32, %arg1 : i32, i32
  }
  func.func @transform_3(%arg0: i32, %arg1: i32) -> (i32, i32) {
    %c0_i32 = arith.constant 0 : i32
    return %arg0, %arg1 : i32, i32
  }
}

module attributes {stable_mosaic.version = 11 : i64} {
  func.func @_lrelu_kernel(%arg0: i32, %arg1: memref<512x128xf32, #tpu.memory_space<vmem>>, %arg2: memref<512x128xf32, #tpu.memory_space<vmem>>) attributes {dimension_semantics = [#tpu.dimension_semantics<parallel>], iteration_bounds = array<i64: 1>, scalar_prefetch = 0 : i64, scratch_operands = 0 : i64, tpu.core_type = #tpu.core_type<tc>, window_params = [{transform_indices = @transform_0, window_bounds = array<i64: 512, 128>}, {transform_indices = @transform_1, window_bounds = array<i64: 512, 128>}]} {
    %c0 = arith.constant 0 : index
    %c0_0 = arith.constant 0 : index
    %0 = vector.load %arg1[%c0, %c0_0] : memref<512x128xf32, #tpu.memory_space<vmem>>, vector<512x128xf32>
    %cst = arith.constant 0.000000e+00 : f32
    %1 = vector.broadcast %cst : f32 to vector<512x128xf32>
    %2 = arith.cmpf oge, %0, %1 : vector<512x128xf32>
    %cst_1 = arith.constant 0.00999999977 : f32
    %3 = vector.broadcast %cst_1 : f32 to vector<512x128xf32>
    %4 = arith.mulf %3, %0 : vector<512x128xf32>
    %5 = arith.select %2, %0, %4 : vector<512x128xi1>, vector<512x128xf32>
    %c0_2 = arith.constant 0 : index
    %c0_3 = arith.constant 0 : index
    %6 = vector.load %arg2[%c0_2, %c0_3] : memref<512x128xf32, #tpu.memory_space<vmem>>, vector<512x128xf32>
    tpu.vector_store %arg2[%c0_2, %c0_3], %5 {strides = array<i32>} : memref<512x128xf32, #tpu.memory_space<vmem>>, vector<512x128xf32>,
    return
  }
  func.func @transform_0(%arg0: i32) -> (i32, i32) {
    %c0_i32 = arith.constant 0 : i32
    %c0_i32_0 = arith.constant 0 : i32
    return %arg0, %c0_i32 : i32, i32
  }
  func.func @transform_1(%arg0: i32) -> (i32, i32) {
    %c0_i32 = arith.constant 0 : i32
    %c0_i32_0 = arith.constant 0 : i32
    return %arg0, %c0_i32 : i32, i32
  }
}

module attributes {stable_mosaic.version = 11 : i64} {
  func.func @_add_lrelu_kernel(%arg0: i32, %arg1: memref<512x128xf32, #tpu.memory_space<vmem>>, %arg2: memref<512x128xf32, #tpu.memory_space<vmem>>, %arg3: memref<512x128xf32, #tpu.memory_space<vmem>>) attributes {dimension_semantics = [#tpu.dimension_semantics<parallel>], iteration_bounds = array<i64: 1>, scalar_prefetch = 0 : i64, scratch_operands = 0 : i64, tpu.core_type = #tpu.core_type<tc>, window_params = [{transform_indices = @transform_0, window_bounds = array<i64: 512, 128>}, {transform_indices = @transform_1, window_bounds = array<i64: 512, 128>}, {transform_indices = @transform_2, window_bounds = array<i64: 512, 128>}]} {
    %c0 = arith.constant 0 : index
    %c0_0 = arith.constant 0 : index
    %0 = vector.load %arg1[%c0, %c0_0] : memref<512x128xf32, #tpu.memory_space<vmem>>, vector<512x128xf32>
    %c0_1 = arith.constant 0 : index
    %c0_2 = arith.constant 0 : index
    %1 = vector.load %arg2[%c0_1, %c0_2] : memref<512x128xf32, #tpu.memory_space<vmem>>, vector<512x128xf32>
    %2 = arith.addf %0, %1 : vector<512x128xf32>
    %cst = arith.constant 0.000000e+00 : f32
    %3 = vector.broadcast %cst : f32 to vector<512x128xf32>
    %4 = arith.cmpf oge, %2, %3 : vector<512x128xf32>
    %cst_3 = arith.constant 0.00999999977 : f32
    %5 = vector.broadcast %cst_3 : f32 to vector<512x128xf32>
    %6 = arith.mulf %5, %2 : vector<512x128xf32>
    %7 = arith.select %4, %2, %6 : vector<512x128xi1>, vector<512x128xf32>
    %c0_4 = arith.constant 0 : index
    %c0_5 = arith.constant 0 : index
    %8 = vector.load %arg3[%c0_4, %c0_5] : memref<512x128xf32, #tpu.memory_space<vmem>>, vector<512x128xf32>
    tpu.vector_store %arg3[%c0_4, %c0_5], %7 {strides = array<i32>} : memref<512x128xf32, #tpu.memory_space<vmem>>, vector<512x128xf32>,
    return
  }
  func.func @transform_0(%arg0: i32) -> (i32, i32) {
    %c0_i32 = arith.constant 0 : i32
    %c0_i32_0 = arith.constant 0 : i32
    return %arg0, %c0_i32 : i32, i32
  }
  func.func @transform_1(%arg0: i32) -> (i32, i32) {
    %c0_i32 = arith.constant 0 : i32
    %c0_i32_0 = arith.constant 0 : i32
    return %arg0, %c0_i32 : i32, i32
  }
  func.func @transform_2(%arg0: i32) -> (i32, i32) {
    %c0_i32 = arith.constant 0 : i32
    %c0_i32_0 = arith.constant 0 : i32
    return %arg0, %c0_i32 : i32, i32
  }
}

module attributes {stable_mosaic.version = 11 : i64} {
  func.func @_matmul_bias_kernel(%arg0: i32, %arg1: i32, %arg2: memref<512x128xbf16, #tpu.memory_space<vmem>>, %arg3: memref<128x128xbf16, #tpu.memory_space<vmem>>, %arg4: memref<1x128xf32, #tpu.memory_space<vmem>>, %arg5: memref<512x128xf32, #tpu.memory_space<vmem>>) attributes {dimension_semantics = [#tpu.dimension_semantics<parallel>, #tpu.dimension_semantics<parallel>], iteration_bounds = array<i64: 16, 1>, scalar_prefetch = 0 : i64, scratch_operands = 0 : i64, tpu.core_type = #tpu.core_type<tc>, window_params = [{transform_indices = @transform_0, window_bounds = array<i64: 512, 128>}, {transform_indices = @transform_1, window_bounds = array<i64: 128, 128>}, {transform_indices = @transform_2, window_bounds = array<i64: 1, 128>}, {transform_indices = @transform_3, window_bounds = array<i64: 512, 128>}]} {
    %c0 = arith.constant 0 : index
    %c0_0 = arith.constant 0 : index
    %0 = vector.load %arg2[%c0, %c0_0] : memref<512x128xbf16, #tpu.memory_space<vmem>>, vector<512x128xbf16>
    %c0_1 = arith.constant 0 : index
    %c0_2 = arith.constant 0 : index
    %1 = vector.load %arg3[%c0_1, %c0_2] : memref<128x128xbf16, #tpu.memory_space<vmem>>, vector<128x128xbf16>
    %cst = arith.constant dense<0.000000e+00> : vector<512x128xf32>
    %2 = tpu.matmul %0, %1, %cst {dimension_numbers = #tpu.dot_dimension_numbers<[1], [0], [0], [1], [0, 0, 1, 1], [], []>} : vector<512x128xbf16>, vector<128x128xbf16>, vector<512x128xf32> -> vector<512x128xf32>
    %c0_3 = arith.constant 0 : index
    %c0_4 = arith.constant 0 : index
    %3 = vector.load %arg4[%c0_3, %c0_4] : memref<1x128xf32, #tpu.memory_space<vmem>>, vector<1x128xf32>
    %4 = vector.broadcast %3 : vector<1x128xf32> to vector<512x128xf32>
    %5 = arith.addf %2, %4 : vector<512x128xf32>
    %c0_5 = arith.constant 0 : index
    %c0_6 = arith.constant 0 : index
    %6 = vector.load %arg5[%c0_5, %c0_6] : memref<512x128xf32, #tpu.memory_space<vmem>>, vector<512x128xf32>
    tpu.vector_store %arg5[%c0_5, %c0_6], %5 {strides = array<i32>} : memref<512x128xf32, #tpu.memory_space<vmem>>, vector<512x128xf32>,
    return
  }
  func.func @transform_0(%arg0: i32, %arg1: i32) -> (i32, i32) {
    %c0_i32 = arith.constant 0 : i32
    %c0_i32_0 = arith.constant 0 : i32
    return %arg0, %c0_i32 : i32, i32
  }
  func.func @transform_1(%arg0: i32, %arg1: i32) -> (i32, i32) {
    %c0_i32 = arith.constant 0 : i32
    %c0_i32_0 = arith.constant 0 : i32
    return %c0_i32, %arg1 : i32, i32
  }
  func.func @transform_2(%arg0: i32, %arg1: i32) -> (i32, i32) {
    %c0_i32 = arith.constant 0 : i32
    %c0_i32_0 = arith.constant 0 : i32
    return %c0_i32, %arg1 : i32, i32
  }
  func.func @transform_3(%arg0: i32, %arg1: i32) -> (i32, i32) {
    %c0_i32 = arith.constant 0 : i32
    return %arg0, %arg1 : i32, i32
  }
}

</mosaic_0001>

<bundles_post_ra>
// kernel: tile.1
= control target key start
LH: loop header
LB: loop body
LE: loop exit
PB: predicated region body
PF: predicated region fallthrough
CT: control target
= control target key end

     0   :  { %s20_s0 = inlined_call_operand.<no memory space> [shape: f32[], index: 0, kind: input, shape index: {}]   ;;  %s21_s1 = inlined_call_operand.vmem [shape: f32[64], index: 1, kind: output, shape index: {}]  }
   0x1   :  { %v2_v0 = vstv %s20_s0 }
   0x2   :  { %3 = vst [vmem:[%s21_s1] sm:$0x1] %v2_v0 }

// kernel: _lambda_.64
= control target key start
LH: loop header
LB: loop body
LE: loop exit
PB: predicated region body
PF: predicated region fallthrough
CT: control target
= control target key end

     0   :  { %8 = vsyncpa [#allocation3], 0  ;;  %s1359_s12 = smov 0   ;;  %s1361_s13 = smov 0   ;;  %s1607_s0 = inlined_call_operand.vmem [shape: bf16[1024,128], index: 0, kind: input, shape index: {}]   ;;  %s1608_s1 = inlined_call_operand.hbm [shape: bf16[128,128], index: 1, kind: input, shape index: {}]   ;;  %s1609_s2 = inlined_call_operand.vmem [shape: f32[1,128], index: 2, kind: input, shape index: {}]   ;;  %s1610_s3 = inlined_call_operand.vmem [shape: f32[1024,128], index: 3, kind: output, shape index: {}]  }
   0x1   :  { %s1363_s14 = smov 0  }
   0x2 LB: > { %s1012_s15 = sadd.s32 4294967295, %s1334_s14   ;;  %s26_s16 = sadd.s32 1, %s1330_s13  ;;  %s1334_s14 = sphi %s1363_s14, %s14_s14   ;;  %s1330_s13 = sphi %s1361_s13, %s1620_s13   ;;  %s1326_s12 = sphi %s1359_s12, %s1619_s12  }
   0x3   : > { %p28_p0 = scmp.ge.s32.totalorder %s26_s16, 2  ;;  %p1014_p1 = scmp.ge.s32.totalorder %s1334_s14, 1 }
   0x4   : > { %p137_p2 = scmp.lt.s32.totalorder %s1334_s14, 3  ;;  %p1384_p4 = scmp.eq.s32.totalorder %s1012_s15, 0 }
   0x5   : > { %s1622_s16 = smov (%p28_p0, %s26_s16), 0  ;;  %s1336_s19 = smov [#allocation2]  }
   0x6   : > { %p1380_p3 = pnand %p1014_p1, %p137_p2  ;;  %s151_s20 = sshll.u32 %s1336_s19, 4  ;;  %s152_s20 = int_to_ptr.vmem [resolvable:$true] %s151_s20 }
   0x7   : > { %s1615_s18 = scalar_select %p1384_p4, 1, 0 }
   0x8   : > { %s1614_s17 = scalar_select %p1380_p3, 1, 0 }
   0x9   : > { %p1207_p5 = pneg %p1380_p3  ;;  %s1280_s24 = scalar_lea.hbm %s1608_s1, 1024 }
   0xa   : > { %p1281_p7 = scmp.ne.s32.totalorder %s1608_s1, %s1280_s24  ;;  %p1287_p11 = scmp.lt.u32.totalorder %s1280_s24, %s1608_s1 }
   0xb   : > { %p1392_p6 = pnand %p1384_p4, %p1207_p5 }
   0xd   : > { %p1282_p8 = pneg %p1392_p6 }
   0xf   : > { %p1283_p9 = pnand %p1282_p8, %p1281_p7 }
  0x11   : > { %p1284_p10 = pneg %p1283_p9 }
  0x13   : > { %p1289_p12 = pnand %p1287_p11, %p1284_p10 }
  0x15   : > { %1292 = shalt.err (!%p1289_p12)
}
  0x16   : > { %s1293_s29 = scalar_lea.vmem %s152_s20, 1024  ;;  %p1301_p2 = scmp.lt.s32.totalorder %s152_s20, %s152_s20 }
  0x17   : > { %p1294_p13 = scmp.ne.s32.totalorder %s152_s20, %s1293_s29  ;;  %p1302_p5 = scmp.lt.s32.totalorder %s1293_s29, %s1293_s29 }
  0x19   : > { %p1296_p0 = pnand %p1294_p13, %p1282_p8  ;;  %p1303_p4 = por %p1302_p5, %p1301_p2 }
  0x1b   : > { %p1297_p1 = pneg %p1296_p0 }
  0x1d   : > { %p1304_p3 = pnand %p1303_p4, %p1297_p1 }
  0x1f   : > { %1307 = shalt.err (!%p1304_p3)
}
  0x20   : > { %s1337_s30 = smov 64   ;;  %s1338_s4 = smov 4  }
  0x21   : > { %1210 = dma.hbm_to_vmem [thread:$0]  (!%p1392_p6), %s1608_s1, 1024, %s152_s20, [#allocation3], %s1337_s30, %s1337_s30, %s1338_s4  }
  0x22   : > { %p1617_p7 = scmp.ne.s32.totalorder %s1614_s17, 0 }
  0x23   : > { %p1618_p9 = scmp.ne.s32.totalorder (!%p1617_p7), %s1615_s18, 0 }
  0x24   : > { %182 = sbr.rel (%p1617_p7) target bundleno = 351 (0x15f), region = 32 }
  0x2b   : > { %1321 = dma.done.wait (%p1618_p9), [#allocation3], 1024  }
  0x2c   : > { %1323 = vsyncadd (%p1618_p9), [#allocation3], 4294966272  ;;  %s1020_s7 = sshll.u32 %s1326_s12, 6  ;;  %v1240_v0 = vld [vmem:[#allocation2] sm:$0xff]   ;;  %v1241_v1 = vld [vmem:[#allocation2 + $0x8] sm:$0xff]  }
  0x2d   : > { %p213_p3 = scmp.lt.s32.totalorder %s1020_s7, 127  ;;  %1107 = vmatprep.subr.bf16.mxu0 %v1240_v0  ;;  %1187 = vmatprep.subr.bf16.mxu1 %v1240_v0  ;;  %v1242_v2 = vld [vmem:[#allocation2 + $0x10] sm:$0xff]   ;;  %v1243_v3 = vld [vmem:[#allocation2 + $0x18] sm:$0xff]   ;;  %v1244_v6 = vld [vmem:[#allocation2 + $0x20] sm:$0xff]  }
  0x2e   : > { %1108 = vmatpush3.bf16.msra.mxu0 %v1240_v0  ;;  %1195 = vmatpush3.bf16.msra.mxu1 %v1240_v0  ;;  %v1245_v7 = vld [vmem:[#allocation2 + $0x28] sm:$0xff]   ;;  %v1246_v8 = vld [vmem:[#allocation2 + $0x30] sm:$0xff]   ;;  %v1247_v9 = vld [vmem:[#allocation2 + $0x38] sm:$0xff]  }
  0x2f   : > { %s1624_s7 = smov (!%p213_p3, %s1020_s7), 127  ;;  %1109 = vmatprep.subr.bf16.mxu0 %v1241_v1  ;;  %1188 = vmatprep.subr.bf16.mxu1 %v1241_v1  ;;  %v1463_v40 = vld [vmem:[%s1609_s2] ss:$0 sm:$0xff] }
  0x30   : > { %s1021_s8 = sshll.u32 %s1624_s7, 2  ;;  %s1023_s12 = sshll.u32 %s1624_s7, 3 }
  0x31   : > { %s1425_s11 = scalar_lea.vmem %s1607_s0, %s1021_s8  ;;  %s1468_s20 = scalar_lea.vmem %s1610_s3, %s1023_s12 }
  0x32   : > { %1110 = vmatpush3.bf16.msra.mxu0 %v1241_v1  ;;  %1196 = vmatpush3.bf16.msra.mxu1 %v1241_v1  ;;  %v1248_v4 = vld [vmem:[%s1425_s11] sm:$0xff]   ;;  %v1250_v10 = vld [vmem:[%s1425_s11 + $0x8] sm:$0xff]   ;;  %v1252_v12 = vld [vmem:[%s1425_s11 + $0x10] sm:$0xff]  }
  0x33   : > { %1111 = vmatprep.subr.bf16.mxu0 %v1242_v2  ;;  %1189 = vmatprep.subr.bf16.mxu1 %v1242_v2  ;;  %v1249_v5 = vld [vmem:[%s1425_s11 + $0x80] sm:$0xff]   ;;  %v1251_v11 = vld [vmem:[%s1425_s11 + $0x88] sm:$0xff]   ;;  %v1253_v13 = vld [vmem:[%s1425_s11 + $0x90] sm:$0xff]  }
  0x34   : > { %1123 = vmatprep.mubr.bf16.mxu0 %v1248_v4  ;;  %1155 = vmatprep.mubr.bf16.mxu1 %v1249_v5  ;;  %v1254_v14 = vld [vmem:[%s1425_s11 + $0x18] sm:$0xff]   ;;  %v1256_v16 = vld [vmem:[%s1425_s11 + $0x20] sm:$0xff]   ;;  %v1258_v18 = vld [vmem:[%s1425_s11 + $0x28] sm:$0xff]  }
  0x35   : > { %v1255_v15 = vld [vmem:[%s1425_s11 + $0x98] sm:$0xff]   ;;  %v1257_v17 = vld [vmem:[%s1425_s11 + $0xa0] sm:$0xff]   ;;  %v1259_v19 = vld [vmem:[%s1425_s11 + $0xa8] sm:$0xff]  }
  0x36   : > { %1112 = vmatpush3.bf16.msra.mxu0 %v1242_v2  ;;  %1197 = vmatpush3.bf16.msra.mxu1 %v1242_v2  ;;  %v1260_v20 = vld [vmem:[%s1425_s11 + $0x30] sm:$0xff]   ;;  %v1262_v22 = vld [vmem:[%s1425_s11 + $0x38] sm:$0xff]   ;;  %v1264_v24 = vld [vmem:[%s1425_s11 + $0x40] sm:$0xff]  }
  0x37   : > { %1113 = vmatprep.subr.bf16.mxu0 %v1243_v3  ;;  %1190 = vmatprep.subr.bf16.mxu1 %v1243_v3  ;;  %v1261_v21 = vld [vmem:[%s1425_s11 + $0xb0] sm:$0xff]   ;;  %v1263_v23 = vld [vmem:[%s1425_s11 + $0xb8] sm:$0xff]   ;;  %v1265_v25 = vld [vmem:[%s1425_s11 + $0xc0] sm:$0xff]  }
  0x38   : > { %v1266_v26 = vld [vmem:[%s1425_s11 + $0x48] sm:$0xff]   ;;  %v1268_v28 = vld [vmem:[%s1425_s11 + $0x50] sm:$0xff]   ;;  %v1270_v30 = vld [vmem:[%s1425_s11 + $0x58] sm:$0xff]  }
  0x39   : > { %v1267_v27 = vld [vmem:[%s1425_s11 + $0xc8] sm:$0xff]   ;;  %v1269_v29 = vld [vmem:[%s1425_s11 + $0xd0] sm:$0xff]   ;;  %v1271_v31 = vld [vmem:[%s1425_s11 + $0xd8] sm:$0xff]  }
  0x3a   : > { %1114 = vmatpush3.bf16.msra.mxu0 %v1243_v3  ;;  %1198 = vmatpush3.bf16.msra.mxu1 %v1243_v3  ;;  %v1272_v32 = vld [vmem:[%s1425_s11 + $0x60] sm:$0xff]   ;;  %v1274_v34 = vld [vmem:[%s1425_s11 + $0x68] sm:$0xff]   ;;  %v1276_v36 = vld [vmem:[%s1425_s11 + $0x70] sm:$0xff]  }
  0x3b   : > { %1115 = vmatprep.subr.bf16.mxu0 %v1244_v6  ;;  %1191 = vmatprep.subr.bf16.mxu1 %v1244_v6  ;;  %v1273_v33 = vld [vmem:[%s1425_s11 + $0xe0] sm:$0xff]   ;;  %v1275_v35 = vld [vmem:[%s1425_s11 + $0xe8] sm:$0xff]   ;;  %v1277_v37 = vld [vmem:[%s1425_s11 + $0xf0] sm:$0xff]  }
  0x3c   : > { %v1278_v38 = vld [vmem:[%s1425_s11 + $0x78] sm:$0xff]  }
  0x3d   : > { %v1279_v39 = vld [vmem:[%s1425_s11 + $0xf8] sm:$0xff]  }
  0x3e   : > { %1116 = vmatpush3.bf16.msra.mxu0 %v1244_v6  ;;  %1199 = vmatpush3.bf16.msra.mxu1 %v1244_v6 }
  0x3f   : > { %1117 = vmatprep.subr.bf16.mxu0 %v1245_v7  ;;  %1192 = vmatprep.subr.bf16.mxu1 %v1245_v7 }
  0x42   : > { %1118 = vmatpush3.bf16.msra.mxu0 %v1245_v7  ;;  %1200 = vmatpush3.bf16.msra.mxu1 %v1245_v7 }
  0x43   : > { %1119 = vmatprep.subr.bf16.mxu0 %v1246_v8  ;;  %1193 = vmatprep.subr.bf16.mxu1 %v1246_v8 }
  0x46   : > { %1120 = vmatpush3.bf16.msra.mxu0 %v1246_v8  ;;  %1201 = vmatpush3.bf16.msra.mxu1 %v1246_v8 }
  0x47   : > { %1121 = vmatprep.subr.bf16.mxu0 %v1247_v9  ;;  %1194 = vmatprep.subr.bf16.mxu1 %v1247_v9 }
  0x4a   : > { %1122 = vmatpush3.bf16.msra.mxu0 %v1247_v9  ;;  %1202 = vmatpush3.bf16.msra.mxu1 %v1247_v9 }
  0x4d   : > { %1124 = vmatmul.mubr.bf16.vlgmr.msra.gmra.mrb[0].mxu0 %v1250_v10  ;;  %1156 = vmatmul.mubr.bf16.vlgmr.msra.gmra.mrb[0].mxu1 %v1251_v11 }
  0x4e   : > { %1127 = vmatprep.mubr.bf16.mxu0 %v1252_v12  ;;  %1159 = vmatprep.mubr.bf16.mxu1 %v1253_v13 }
  0x55   : > { %1128 = vmatmul.mubr.bf16.gmra.mrb[4].mxu0 %v1254_v14  ;;  %1160 = vmatmul.mubr.bf16.gmra.mrb[4].mxu1 %v1255_v15 }
  0x56   : > { %1131 = vmatprep.mubr.bf16.mxu0 %v1256_v16  ;;  %1163 = vmatprep.mubr.bf16.mxu1 %v1257_v17 }
  0x5d   : > { %1132 = vmatmul.mubr.bf16.gmra.mrb[8].mxu0 %v1258_v18  ;;  %1164 = vmatmul.mubr.bf16.gmra.mrb[8].mxu1 %v1259_v19 }
  0x5e   : > { %1135 = vmatprep.mubr.bf16.mxu0 %v1260_v20  ;;  %1167 = vmatprep.mubr.bf16.mxu1 %v1261_v21 }
  0x65   : > { %1136 = vmatmul.mubr.bf16.gmra.mrb[12].mxu0 %v1262_v22  ;;  %1168 = vmatmul.mubr.bf16.gmra.mrb[12].mxu1 %v1263_v23 }
  0x66   : > { %1139 = vmatprep.mubr.bf16.mxu0 %v1264_v24  ;;  %1171 = vmatprep.mubr.bf16.mxu1 %v1265_v25 }
  0x6d   : > { %1140 = vmatmul.mubr.bf16.gmra.mrb[16].mxu0 %v1266_v26  ;;  %1172 = vmatmul.mubr.bf16.gmra.mrb[16].mxu1 %v1267_v27 }
  0x6e   : > { %1143 = vmatprep.mubr.bf16.mxu0 %v1268_v28  ;;  %1175 = vmatprep.mubr.bf16.mxu1 %v1269_v29 }
  0x75   : > { %1144 = vmatmul.mubr.bf16.gmra.mrb[20].mxu0 %v1270_v30  ;;  %1176 = vmatmul.mubr.bf16.gmra.mrb[20].mxu1 %v1271_v31 }
  0x76   : > { %1147 = vmatprep.mubr.bf16.mxu0 %v1272_v32  ;;  %1179 = vmatprep.mubr.bf16.mxu1 %v1273_v33 }
  0x7d   : > { %1148 = vmatmul.mubr.bf16.gmra.mrb[24].mxu0 %v1274_v34  ;;  %1180 = vmatmul.mubr.bf16.gmra.mrb[24].mxu1 %v1275_v35 }
  0x7e   : > { %1151 = vmatprep.mubr.bf16.mxu0 %v1276_v36  ;;  %1183 = vmatprep.mubr.bf16.mxu1 %v1277_v37 }
  0x85   : > { %1152 = vmatmul.mubr.bf16.gmra.mrb[28].mxu0 %v1278_v38  ;;  %1184 = vmatmul.mubr.bf16.gmra.mrb[28].mxu1 %v1279_v39 }
 0x120   : > { %v1125_v41 = vpop.f32.mrb[0].mxu0  ;;  %v1157_v42 = vpop.f32.mrb[0].mxu1 }
 0x121   : > { %v601_v43 = vadd.f32 %v1125_v41, %v1463_v40  ;;  %v729_v44 = vadd.f32 %v1157_v42, %v1463_v40  ;;  %v592_v45 = vpop.f32.mrb[1].mxu0  ;;  %v720_v46 = vpop.f32.mrb[1].mxu1 }
 0x122   : > { %v593_v47 = vadd.f32 %v1463_v40, %v592_v45  ;;  %v721_v48 = vadd.f32 %v1463_v40, %v720_v46  ;;  %v1126_v49 = vpop.f32.mrb[2].mxu0  ;;  %v1158_v50 = vpop.f32.mrb[2].mxu1 }
 0x123   : > { %849 = vst [vmem:[%s1468_s20 + $0x10] sm:$0xff] %v601_v43  ;;  %881 = vst [vmem:[%s1468_s20 + $0x110] sm:$0xff] %v729_v44  ;;  %v604_v51 = vadd.f32 %v1126_v49, %v1463_v40  ;;  %v732_v52 = vadd.f32 %v1158_v50, %v1463_v40  ;;  %v595_v53 = vpop.f32.mrb[3].mxu0  ;;  %v723_v54 = vpop.f32.mrb[3].mxu1 }
 0x124   : > { %847 = vst [vmem:[%s1468_s20] sm:$0xff] %v593_v47  ;;  %879 = vst [vmem:[%s1468_s20 + $0x100] sm:$0xff] %v721_v48  ;;  %v596_v55 = vadd.f32 %v1463_v40, %v595_v53  ;;  %v724_v56 = vadd.f32 %v1463_v40, %v723_v54 }
 0x125   : > { %850 = vst [vmem:[%s1468_s20 + $0x18] sm:$0xff] %v604_v51  ;;  %882 = vst [vmem:[%s1468_s20 + $0x118] sm:$0xff] %v732_v52 }
 0x126   : > { %848 = vst [vmem:[%s1468_s20 + $0x8] sm:$0xff] %v596_v55  ;;  %880 = vst [vmem:[%s1468_s20 + $0x108] sm:$0xff] %v724_v56 }
 0x128   : > { %v1129_v57 = vpop.f32.mrb[4].mxu0  ;;  %v1161_v58 = vpop.f32.mrb[4].mxu1 }
 0x129   : > { %v617_v59 = vadd.f32 %v1129_v57, %v1463_v40  ;;  %v745_v60 = vadd.f32 %v1161_v58, %v1463_v40  ;;  %v608_v61 = vpop.f32.mrb[5].mxu0  ;;  %v736_v62 = vpop.f32.mrb[5].mxu1 }
 0x12a   : > { %v609_v63 = vadd.f32 %v1463_v40, %v608_v61  ;;  %v737_v0 = vadd.f32 %v1463_v40, %v736_v62  ;;  %v1130_v1 = vpop.f32.mrb[6].mxu0  ;;  %v1162_v2 = vpop.f32.mrb[6].mxu1 }
 0x12b   : > { %853 = vst [vmem:[%s1468_s20 + $0x30] sm:$0xff] %v617_v59  ;;  %885 = vst [vmem:[%s1468_s20 + $0x130] sm:$0xff] %v745_v60  ;;  %v620_v3 = vadd.f32 %v1130_v1, %v1463_v40  ;;  %v748_v4 = vadd.f32 %v1162_v2, %v1463_v40  ;;  %v611_v5 = vpop.f32.mrb[7].mxu0  ;;  %v739_v6 = vpop.f32.mrb[7].mxu1 }
 0x12c   : > { %851 = vst [vmem:[%s1468_s20 + $0x20] sm:$0xff] %v609_v63  ;;  %883 = vst [vmem:[%s1468_s20 + $0x120] sm:$0xff] %v737_v0  ;;  %v612_v7 = vadd.f32 %v1463_v40, %v611_v5  ;;  %v740_v8 = vadd.f32 %v1463_v40, %v739_v6 }
 0x12d   : > { %854 = vst [vmem:[%s1468_s20 + $0x38] sm:$0xff] %v620_v3  ;;  %886 = vst [vmem:[%s1468_s20 + $0x138] sm:$0xff] %v748_v4 }
 0x12e   : > { %852 = vst [vmem:[%s1468_s20 + $0x28] sm:$0xff] %v612_v7  ;;  %884 = vst [vmem:[%s1468_s20 + $0x128] sm:$0xff] %v740_v8 }
 0x130   : > { %v1133_v9 = vpop.f32.mrb[8].mxu0  ;;  %v1165_v10 = vpop.f32.mrb[8].mxu1 }
 0x131   : > { %v633_v11 = vadd.f32 %v1133_v9, %v1463_v40  ;;  %v761_v12 = vadd.f32 %v1165_v10, %v1463_v40  ;;  %v624_v13 = vpop.f32.mrb[9].mxu0  ;;  %v752_v14 = vpop.f32.mrb[9].mxu1 }
 0x132   : > { %v625_v15 = vadd.f32 %v1463_v40, %v624_v13  ;;  %v753_v16 = vadd.f32 %v1463_v40, %v752_v14  ;;  %v1134_v17 = vpop.f32.mrb[10].mxu0  ;;  %v1166_v18 = vpop.f32.mrb[10].mxu1 }
 0x133   : > { %857 = vst [vmem:[%s1468_s20 + $0x50] sm:$0xff] %v633_v11  ;;  %889 = vst [vmem:[%s1468_s20 + $0x150] sm:$0xff] %v761_v12  ;;  %v636_v19 = vadd.f32 %v1134_v17, %v1463_v40  ;;  %v764_v20 = vadd.f32 %v1166_v18, %v1463_v40  ;;  %v627_v21 = vpop.f32.mrb[11].mxu0  ;;  %v755_v22 = vpop.f32.mrb[11].mxu1 }
 0x134   : > { %855 = vst [vmem:[%s1468_s20 + $0x40] sm:$0xff] %v625_v15  ;;  %887 = vst [vmem:[%s1468_s20 + $0x140] sm:$0xff] %v753_v16  ;;  %v628_v23 = vadd.f32 %v1463_v40, %v627_v21  ;;  %v756_v24 = vadd.f32 %v1463_v40, %v755_v22 }
 0x135   : > { %858 = vst [vmem:[%s1468_s20 + $0x58] sm:$0xff] %v636_v19  ;;  %890 = vst [vmem:[%s1468_s20 + $0x158] sm:$0xff] %v764_v20 }
 0x136   : > { %856 = vst [vmem:[%s1468_s20 + $0x48] sm:$0xff] %v628_v23  ;;  %888 = vst [vmem:[%s1468_s20 + $0x148] sm:$0xff] %v756_v24 }
 0x138   : > { %v1137_v25 = vpop.f32.mrb[12].mxu0  ;;  %v1169_v26 = vpop.f32.mrb[12].mxu1 }
 0x139   : > { %v649_v27 = vadd.f32 %v1137_v25, %v1463_v40  ;;  %v777_v28 = vadd.f32 %v1169_v26, %v1463_v40  ;;  %v640_v29 = vpop.f32.mrb[13].mxu0  ;;  %v768_v30 = vpop.f32.mrb[13].mxu1 }
 0x13a   : > { %v641_v31 = vadd.f32 %v1463_v40, %v640_v29  ;;  %v769_v32 = vadd.f32 %v1463_v40, %v768_v30  ;;  %v1138_v33 = vpop.f32.mrb[14].mxu0  ;;  %v1170_v34 = vpop.f32.mrb[14].mxu1 }
 0x13b   : > { %861 = vst [vmem:[%s1468_s20 + $0x70] sm:$0xff] %v649_v27  ;;  %893 = vst [vmem:[%s1468_s20 + $0x170] sm:$0xff] %v777_v28  ;;  %v652_v35 = vadd.f32 %v1138_v33, %v1463_v40  ;;  %v780_v36 = vadd.f32 %v1170_v34, %v1463_v40  ;;  %v643_v37 = vpop.f32.mrb[15].mxu0  ;;  %v771_v38 = vpop.f32.mrb[15].mxu1 }
 0x13c   : > { %859 = vst [vmem:[%s1468_s20 + $0x60] sm:$0xff] %v641_v31  ;;  %891 = vst [vmem:[%s1468_s20 + $0x160] sm:$0xff] %v769_v32  ;;  %v644_v39 = vadd.f32 %v1463_v40, %v643_v37  ;;  %v772_v41 = vadd.f32 %v1463_v40, %v771_v38 }
 0x13d   : > { %862 = vst [vmem:[%s1468_s20 + $0x78] sm:$0xff] %v652_v35  ;;  %894 = vst [vmem:[%s1468_s20 + $0x178] sm:$0xff] %v780_v36 }
 0x13e   : > { %860 = vst [vmem:[%s1468_s20 + $0x68] sm:$0xff] %v644_v39  ;;  %892 = vst [vmem:[%s1468_s20 + $0x168] sm:$0xff] %v772_v41 }
 0x140   : > { %v1141_v42 = vpop.f32.mrb[16].mxu0  ;;  %v1173_v43 = vpop.f32.mrb[16].mxu1 }
 0x141   : > { %v665_v44 = vadd.f32 %v1141_v42, %v1463_v40  ;;  %v793_v45 = vadd.f32 %v1173_v43, %v1463_v40  ;;  %v656_v46 = vpop.f32.mrb[17].mxu0  ;;  %v784_v47 = vpop.f32.mrb[17].mxu1 }
 0x142   : > { %v657_v48 = vadd.f32 %v1463_v40, %v656_v46  ;;  %v785_v49 = vadd.f32 %v1463_v40, %v784_v47  ;;  %v1142_v50 = vpop.f32.mrb[18].mxu0  ;;  %v1174_v51 = vpop.f32.mrb[18].mxu1 }
 0x143   : > { %865 = vst [vmem:[%s1468_s20 + $0x90] sm:$0xff] %v665_v44  ;;  %897 = vst [vmem:[%s1468_s20 + $0x190] sm:$0xff] %v793_v45  ;;  %v668_v52 = vadd.f32 %v1142_v50, %v1463_v40  ;;  %v796_v53 = vadd.f32 %v1174_v51, %v1463_v40  ;;  %v659_v54 = vpop.f32.mrb[19].mxu0  ;;  %v787_v55 = vpop.f32.mrb[19].mxu1 }
 0x144   : > { %863 = vst [vmem:[%s1468_s20 + $0x80] sm:$0xff] %v657_v48  ;;  %895 = vst [vmem:[%s1468_s20 + $0x180] sm:$0xff] %v785_v49  ;;  %v660_v56 = vadd.f32 %v1463_v40, %v659_v54  ;;  %v788_v57 = vadd.f32 %v1463_v40, %v787_v55 }
 0x145   : > { %866 = vst [vmem:[%s1468_s20 + $0x98] sm:$0xff] %v668_v52  ;;  %898 = vst [vmem:[%s1468_s20 + $0x198] sm:$0xff] %v796_v53 }
 0x146   : > { %864 = vst [vmem:[%s1468_s20 + $0x88] sm:$0xff] %v660_v56  ;;  %896 = vst [vmem:[%s1468_s20 + $0x188] sm:$0xff] %v788_v57 }
 0x148   : > { %v1145_v58 = vpop.f32.mrb[20].mxu0  ;;  %v1177_v59 = vpop.f32.mrb[20].mxu1 }
 0x149   : > { %v681_v60 = vadd.f32 %v1145_v58, %v1463_v40  ;;  %v809_v61 = vadd.f32 %v1177_v59, %v1463_v40  ;;  %v672_v62 = vpop.f32.mrb[21].mxu0  ;;  %v800_v63 = vpop.f32.mrb[21].mxu1 }
 0x14a   : > { %v673_v0 = vadd.f32 %v1463_v40, %v672_v62  ;;  %v801_v1 = vadd.f32 %v1463_v40, %v800_v63  ;;  %v1146_v2 = vpop.f32.mrb[22].mxu0  ;;  %v1178_v3 = vpop.f32.mrb[22].mxu1 }
 0x14b   : > { %869 = vst [vmem:[%s1468_s20 + $0xb0] sm:$0xff] %v681_v60  ;;  %901 = vst [vmem:[%s1468_s20 + $0x1b0] sm:$0xff] %v809_v61  ;;  %v684_v4 = vadd.f32 %v1146_v2, %v1463_v40  ;;  %v812_v5 = vadd.f32 %v1178_v3, %v1463_v40  ;;  %v675_v6 = vpop.f32.mrb[23].mxu0  ;;  %v803_v7 = vpop.f32.mrb[23].mxu1 }
 0x14c   : > { %867 = vst [vmem:[%s1468_s20 + $0xa0] sm:$0xff] %v673_v0  ;;  %899 = vst [vmem:[%s1468_s20 + $0x1a0] sm:$0xff] %v801_v1  ;;  %v676_v8 = vadd.f32 %v1463_v40, %v675_v6  ;;  %v804_v9 = vadd.f32 %v1463_v40, %v803_v7 }
 0x14d   : > { %870 = vst [vmem:[%s1468_s20 + $0xb8] sm:$0xff] %v684_v4  ;;  %902 = vst [vmem:[%s1468_s20 + $0x1b8] sm:$0xff] %v812_v5 }
 0x14e   : > { %868 = vst [vmem:[%s1468_s20 + $0xa8] sm:$0xff] %v676_v8  ;;  %900 = vst [vmem:[%s1468_s20 + $0x1a8] sm:$0xff] %v804_v9 }
 0x150   : > { %v1149_v10 = vpop.f32.mrb[24].mxu0  ;;  %v1181_v11 = vpop.f32.mrb[24].mxu1 }
 0x151   : > { %v697_v12 = vadd.f32 %v1149_v10, %v1463_v40  ;;  %v825_v13 = vadd.f32 %v1181_v11, %v1463_v40  ;;  %v688_v14 = vpop.f32.mrb[25].mxu0  ;;  %v816_v15 = vpop.f32.mrb[25].mxu1 }
 0x152   : > { %v689_v16 = vadd.f32 %v1463_v40, %v688_v14  ;;  %v817_v17 = vadd.f32 %v1463_v40, %v816_v15  ;;  %v1150_v18 = vpop.f32.mrb[26].mxu0  ;;  %v1182_v19 = vpop.f32.mrb[26].mxu1 }
 0x153   : > { %873 = vst [vmem:[%s1468_s20 + $0xd0] sm:$0xff] %v697_v12  ;;  %905 = vst [vmem:[%s1468_s20 + $0x1d0] sm:$0xff] %v825_v13  ;;  %v700_v20 = vadd.f32 %v1150_v18, %v1463_v40  ;;  %v828_v21 = vadd.f32 %v1182_v19, %v1463_v40  ;;  %v691_v22 = vpop.f32.mrb[27].mxu0  ;;  %v819_v23 = vpop.f32.mrb[27].mxu1 }
 0x154   : > { %871 = vst [vmem:[%s1468_s20 + $0xc0] sm:$0xff] %v689_v16  ;;  %903 = vst [vmem:[%s1468_s20 + $0x1c0] sm:$0xff] %v817_v17  ;;  %v692_v24 = vadd.f32 %v1463_v40, %v691_v22  ;;  %v820_v25 = vadd.f32 %v1463_v40, %v819_v23 }
 0x155   : > { %874 = vst [vmem:[%s1468_s20 + $0xd8] sm:$0xff] %v700_v20  ;;  %906 = vst [vmem:[%s1468_s20 + $0x1d8] sm:$0xff] %v828_v21 }
 0x156   : > { %872 = vst [vmem:[%s1468_s20 + $0xc8] sm:$0xff] %v692_v24  ;;  %904 = vst [vmem:[%s1468_s20 + $0x1c8] sm:$0xff] %v820_v25 }
 0x158   : > { %v1153_v26 = vpop.f32.mrb[28].mxu0  ;;  %v1185_v27 = vpop.f32.mrb[28].mxu1 }
 0x159   : > { %v713_v28 = vadd.f32 %v1153_v26, %v1463_v40  ;;  %v841_v29 = vadd.f32 %v1185_v27, %v1463_v40  ;;  %v704_v30 = vpop.f32.mrb[29].mxu0  ;;  %v832_v31 = vpop.f32.mrb[29].mxu1 }
 0x15a   : > { %v705_v32 = vadd.f32 %v1463_v40, %v704_v30  ;;  %v833_v33 = vadd.f32 %v1463_v40, %v832_v31  ;;  %v1154_v34 = vpop.f32.mrb[30].mxu0  ;;  %v1186_v35 = vpop.f32.mrb[30].mxu1 }
 0x15b   : > { %877 = vst [vmem:[%s1468_s20 + $0xf0] sm:$0xff] %v713_v28  ;;  %909 = vst [vmem:[%s1468_s20 + $0x1f0] sm:$0xff] %v841_v29  ;;  %v716_v36 = vadd.f32 %v1154_v34, %v1463_v40  ;;  %v844_v37 = vadd.f32 %v1186_v35, %v1463_v40  ;;  %v707_v38 = vpop.f32.mrb[31].mxu0  ;;  %v835_v39 = vpop.f32.mrb[31].mxu1 }
 0x15c   : > { %875 = vst [vmem:[%s1468_s20 + $0xe0] sm:$0xff] %v705_v32  ;;  %907 = vst [vmem:[%s1468_s20 + $0x1e0] sm:$0xff] %v833_v33  ;;  %v708_v41 = vadd.f32 %v1463_v40, %v707_v38  ;;  %v836_v42 = vadd.f32 %v1463_v40, %v835_v39 }
 0x15d   : > { %878 = vst [vmem:[%s1468_s20 + $0xf8] sm:$0xff] %v716_v36  ;;  %910 = vst [vmem:[%s1468_s20 + $0x1f8] sm:$0xff] %v844_v37 }
 0x15e   : > { %876 = vst [vmem:[%s1468_s20 + $0xe8] sm:$0xff] %v708_v41  ;;  %908 = vst [vmem:[%s1468_s20 + $0x1e8] sm:$0xff] %v836_v42 }
 0x15f PF: > { %s14_s14 = sadd.s32 1, %s1334_s14   ;;  %s1619_s12 = smov %s1330_s13 }
 0x160   : > { %p11_p4 = scmp.ge.s32.totalorder %s14_s14, 4   ;;  %s1620_s13 = smov %s1622_s16 }
 0x162   :  { %13 = sbr.rel (!%p11_p4) target bundleno = 2 (0x2), region = 71 }
 0x169   :  { %939 = vsyncpa [#allocation3], 1 }
 0x16a   :  { %941 = vsyncpa [#allocation3 + $0x1], 1 }

// kernel: _lambda_.62
= control target key start
LH: loop header
LB: loop body
LE: loop exit
PB: predicated region body
PF: predicated region fallthrough
CT: control target
= control target key end

     0   :  { %s110_s0 = inlined_call_operand.vmem [shape: f32[64,128], index: 0, kind: input, shape index: {}]   ;;  %s111_s1 = inlined_call_operand.vmem [shape: f32[64,128], index: 1, kind: output, shape index: {}]  }
   0x1   :  { %v8_v0 = vld [vmem:[%s110_s0] sm:$0xff]  ;;  %v9_v1 = vld [vmem:[%s110_s0 + $0x8] sm:$0xff]  ;;  %v10_v2 = vld [vmem:[%s110_s0 + $0x10] sm:$0xff] }
   0x2   :  { %vm16_vm0 = vcmp.ge.f32.partialorder %v8_v0, 0.0  ;;  %v24_v3 = vmul.f32 0.01, %v8_v0  ;;  %vm17_vm1 = vcmp.ge.f32.partialorder %v9_v1, 0.0  ;;  %v25_v4 = vmul.f32 0.01, %v9_v1 }
   0x3   :  { %vm18_vm2 = vcmp.ge.f32.partialorder %v10_v2, 0.0  ;;  %v26_v5 = vmul.f32 0.01, %v10_v2  ;;  %v11_v6 = vld [vmem:[%s110_s0 + $0x18] sm:$0xff]  ;;  %v12_v7 = vld [vmem:[%s110_s0 + $0x20] sm:$0xff]  ;;  %v13_v8 = vld [vmem:[%s110_s0 + $0x28] sm:$0xff] }
   0x4   :  { %v32_v9 = vsel %vm16_vm0, %v8_v0, %v24_v3  ;;  %v33_v10 = vsel %vm17_vm1, %v9_v1, %v25_v4  ;;  %vm19_vm3 = vcmp.ge.f32.partialorder %v11_v6, 0.0  ;;  %v27_v11 = vmul.f32 0.01, %v11_v6  ;;  %v14_v12 = vld [vmem:[%s110_s0 + $0x30] sm:$0xff]  ;;  %v15_v13 = vld [vmem:[%s110_s0 + $0x38] sm:$0xff] }
   0x5   :  { %40 = vst [vmem:[%s111_s1] sm:$0xff] %v32_v9  ;;  %41 = vst [vmem:[%s111_s1 + $0x8] sm:$0xff] %v33_v10  ;;  %v34_v14 = vsel %vm18_vm2, %v10_v2, %v26_v5  ;;  %vm20_vm4 = vcmp.ge.f32.partialorder %v12_v7, 0.0  ;;  %v28_v15 = vmul.f32 0.01, %v12_v7  ;;  %vm21_vm5 = vcmp.ge.f32.partialorder %v13_v8, 0.0 }
   0x6   :  { %42 = vst [vmem:[%s111_s1 + $0x10] sm:$0xff] %v34_v14  ;;  %v35_v16 = vsel %vm19_vm3, %v11_v6, %v27_v11  ;;  %v29_v17 = vmul.f32 0.01, %v13_v8  ;;  %vm22_vm6 = vcmp.ge.f32.partialorder %v14_v12, 0.0  ;;  %v30_v18 = vmul.f32 0.01, %v14_v12 }
   0x7   :  { %43 = vst [vmem:[%s111_s1 + $0x18] sm:$0xff] %v35_v16  ;;  %v36_v19 = vsel %vm20_vm4, %v12_v7, %v28_v15  ;;  %vm23_vm7 = vcmp.ge.f32.partialorder %v15_v13, 0.0  ;;  %v31_v20 = vmul.f32 0.01, %v15_v13 }
   0x8   :  { %44 = vst [vmem:[%s111_s1 + $0x20] sm:$0xff] %v36_v19  ;;  %v37_v21 = vsel %vm21_vm5, %v13_v8, %v29_v17  ;;  %v38_v22 = vsel %vm22_vm6, %v14_v12, %v30_v18 }
   0x9   :  { %45 = vst [vmem:[%s111_s1 + $0x28] sm:$0xff] %v37_v21  ;;  %46 = vst [vmem:[%s111_s1 + $0x30] sm:$0xff] %v38_v22  ;;  %v39_v23 = vsel %vm23_vm7, %v15_v13, %v31_v20 }
   0xa   :  { %47 = vst [vmem:[%s111_s1 + $0x38] sm:$0xff] %v39_v23 }

// kernel: _lambda_.61
= control target key start
LH: loop header
LB: loop body
LE: loop exit
PB: predicated region body
PF: predicated region fallthrough
CT: control target
= control target key end

     0   :  { %s1306_s12 = smov 0   ;;  %s1308_s13 = smov 0   ;;  %s1536_s0 = inlined_call_operand.vmem [shape: bf16[1024,128], index: 0, kind: input, shape index: {}]   ;;  %s1537_s1 = inlined_call_operand.vmem [shape: bf16[128,128], index: 1, kind: input, shape index: {}]   ;;  %s1538_s2 = inlined_call_operand.vmem [shape: f32[1,128], index: 2, kind: input, shape index: {}]   ;;  %s1539_s3 = inlined_call_operand.vmem [shape: f32[1024,128], index: 3, kind: output, shape index: {}]  }
   0x1   :  { %s1310_s14 = smov 0  }
   0x2 LB: > { %s25_s15 = sadd.s32 1, %s1280_s13  ;;  %p1014_p0 = scmp.ge.s32.totalorder %s1284_s14, 1  ;;  %s1284_s14 = sphi %s1310_s14, %s13_s14   ;;  %s1280_s13 = sphi %s1308_s13, %s1541_s13   ;;  %s1276_s12 = sphi %s1306_s12, %s1540_s12  }
   0x3   : > { %p27_p1 = scmp.ge.s32.totalorder %s25_s15, 2  ;;  %p169_p2 = scmp.lt.s32.totalorder %s1284_s14, 3 }
   0x5   : > { %s1543_s15 = smov (%p27_p1, %s25_s15), 0  ;;  %p170_p3 = pnand %p1014_p0, %p169_p2 }
   0x6   : > { %v1222_v0 = vld [vmem:[%s1537_s1] sm:$0xff] (!%p170_p3)   ;;  %s1015_s18 = sshll.u32 (!%p170_p3), %s1276_s12, 6  ;;  %v1223_v1 = vld [vmem:[%s1537_s1 + $0x8] sm:$0xff] (!%p170_p3)   ;;  %v1224_v2 = vld [vmem:[%s1537_s1 + $0x10] sm:$0xff] (!%p170_p3)  }
   0x7   : > { %173 = sbr.rel (%p170_p3) target bundleno = 313 (0x139), region = 32  ;;  %p204_p4 = scmp.lt.s32.totalorder (!%p170_p3), %s1015_s18, 127  ;;  %1102 = vmatprep.subr.bf16.mxu0 (!%p170_p3), %v1222_v0  ;;  %1182 = vmatprep.subr.bf16.mxu1 (!%p170_p3), %v1222_v0  ;;  %v1225_v3 = vld [vmem:[%s1537_s1 + $0x18] sm:$0xff] (!%p170_p3)   ;;  %v1226_v6 = vld [vmem:[%s1537_s1 + $0x20] sm:$0xff] (!%p170_p3)   ;;  %v1227_v7 = vld [vmem:[%s1537_s1 + $0x28] sm:$0xff] (!%p170_p3)  }
   0x8   : > { %1103 = vmatpush3.bf16.msra.mxu0 (!%p170_p3), %v1222_v0  ;;  %1190 = vmatpush3.bf16.msra.mxu1 (!%p170_p3), %v1222_v0  ;;  %v1228_v8 = vld [vmem:[%s1537_s1 + $0x30] sm:$0xff] (!%p170_p3)   ;;  %v1229_v9 = vld [vmem:[%s1537_s1 + $0x38] sm:$0xff] (!%p170_p3)   ;;  %v1392_v40 = vld [vmem:[%s1538_s2] ss:$0 sm:$0xff] (!%p170_p3) }
   0x9   : > { %1104 = vmatprep.subr.bf16.mxu0 (!%p170_p3), %v1223_v1  ;;  %1183 = vmatprep.subr.bf16.mxu1 (!%p170_p3), %v1223_v1 }
   0xc   : > { %1105 = vmatpush3.bf16.msra.mxu0 (!%p170_p3), %v1223_v1  ;;  %1191 = vmatpush3.bf16.msra.mxu1 (!%p170_p3), %v1223_v1 }
   0xd   : > { %1106 = vmatprep.subr.bf16.mxu0 (!%p170_p3), %v1224_v2  ;;  %1184 = vmatprep.subr.bf16.mxu1 (!%p170_p3), %v1224_v2 }
   0xe   : > { %s1545_s18 = smov (!%p204_p4, %s1015_s18), 127 }
   0xf   : > { %s1016_s23 = sshll.u32 %s1545_s18, 2  ;;  %s1018_s10 = sshll.u32 %s1545_s18, 3 }
  0x10   : > { %s1339_s26 = scalar_lea.vmem %s1536_s0, %s1016_s23  ;;  %1107 = vmatpush3.bf16.msra.mxu0 %v1224_v2  ;;  %1192 = vmatpush3.bf16.msra.mxu1 %v1224_v2  ;;  %s1397_s19 = scalar_lea.vmem %s1539_s3, %s1018_s10 }
  0x11   : > { %v1230_v4 = vld [vmem:[%s1339_s26] sm:$0xff]   ;;  %1108 = vmatprep.subr.bf16.mxu0 %v1225_v3  ;;  %1185 = vmatprep.subr.bf16.mxu1 %v1225_v3  ;;  %v1232_v10 = vld [vmem:[%s1339_s26 + $0x8] sm:$0xff]   ;;  %v1234_v12 = vld [vmem:[%s1339_s26 + $0x10] sm:$0xff]  }
  0x12   : > { %v1231_v5 = vld [vmem:[%s1339_s26 + $0x80] sm:$0xff]   ;;  %1118 = vmatprep.mubr.bf16.mxu0 %v1230_v4  ;;  %v1233_v11 = vld [vmem:[%s1339_s26 + $0x88] sm:$0xff]   ;;  %v1235_v13 = vld [vmem:[%s1339_s26 + $0x90] sm:$0xff]  }
  0x13   : > { %1150 = vmatprep.mubr.bf16.mxu1 %v1231_v5  ;;  %v1236_v14 = vld [vmem:[%s1339_s26 + $0x18] sm:$0xff]   ;;  %v1238_v16 = vld [vmem:[%s1339_s26 + $0x20] sm:$0xff]   ;;  %v1240_v18 = vld [vmem:[%s1339_s26 + $0x28] sm:$0xff]  }
  0x14   : > { %1109 = vmatpush3.bf16.msra.mxu0 %v1225_v3  ;;  %1193 = vmatpush3.bf16.msra.mxu1 %v1225_v3  ;;  %v1237_v15 = vld [vmem:[%s1339_s26 + $0x98] sm:$0xff]   ;;  %v1239_v17 = vld [vmem:[%s1339_s26 + $0xa0] sm:$0xff]   ;;  %v1241_v19 = vld [vmem:[%s1339_s26 + $0xa8] sm:$0xff]  }
  0x15   : > { %1110 = vmatprep.subr.bf16.mxu0 %v1226_v6  ;;  %1186 = vmatprep.subr.bf16.mxu1 %v1226_v6  ;;  %v1242_v20 = vld [vmem:[%s1339_s26 + $0x30] sm:$0xff]   ;;  %v1244_v22 = vld [vmem:[%s1339_s26 + $0x38] sm:$0xff]   ;;  %v1246_v24 = vld [vmem:[%s1339_s26 + $0x40] sm:$0xff]  }
  0x16   : > { %v1243_v21 = vld [vmem:[%s1339_s26 + $0xb0] sm:$0xff]   ;;  %v1245_v23 = vld [vmem:[%s1339_s26 + $0xb8] sm:$0xff]   ;;  %v1247_v25 = vld [vmem:[%s1339_s26 + $0xc0] sm:$0xff]  }
  0x17   : > { %v1248_v26 = vld [vmem:[%s1339_s26 + $0x48] sm:$0xff]   ;;  %v1250_v28 = vld [vmem:[%s1339_s26 + $0x50] sm:$0xff]   ;;  %v1252_v30 = vld [vmem:[%s1339_s26 + $0x58] sm:$0xff]  }
  0x18   : > { %1111 = vmatpush3.bf16.msra.mxu0 %v1226_v6  ;;  %1194 = vmatpush3.bf16.msra.mxu1 %v1226_v6  ;;  %v1249_v27 = vld [vmem:[%s1339_s26 + $0xc8] sm:$0xff]   ;;  %v1251_v29 = vld [vmem:[%s1339_s26 + $0xd0] sm:$0xff]   ;;  %v1253_v31 = vld [vmem:[%s1339_s26 + $0xd8] sm:$0xff]  }
  0x19   : > { %1112 = vmatprep.subr.bf16.mxu0 %v1227_v7  ;;  %1187 = vmatprep.subr.bf16.mxu1 %v1227_v7  ;;  %v1254_v32 = vld [vmem:[%s1339_s26 + $0x60] sm:$0xff]   ;;  %v1256_v34 = vld [vmem:[%s1339_s26 + $0x68] sm:$0xff]   ;;  %v1258_v36 = vld [vmem:[%s1339_s26 + $0x70] sm:$0xff]  }
  0x1a   : > { %v1255_v33 = vld [vmem:[%s1339_s26 + $0xe0] sm:$0xff]   ;;  %v1257_v35 = vld [vmem:[%s1339_s26 + $0xe8] sm:$0xff]   ;;  %v1259_v37 = vld [vmem:[%s1339_s26 + $0xf0] sm:$0xff]  }
  0x1b   : > { %v1260_v38 = vld [vmem:[%s1339_s26 + $0x78] sm:$0xff]  }
  0x1c   : > { %1113 = vmatpush3.bf16.msra.mxu0 %v1227_v7  ;;  %1195 = vmatpush3.bf16.msra.mxu1 %v1227_v7  ;;  %v1261_v39 = vld [vmem:[%s1339_s26 + $0xf8] sm:$0xff]  }
  0x1d   : > { %1114 = vmatprep.subr.bf16.mxu0 %v1228_v8  ;;  %1188 = vmatprep.subr.bf16.mxu1 %v1228_v8 }
  0x20   : > { %1115 = vmatpush3.bf16.msra.mxu0 %v1228_v8  ;;  %1196 = vmatpush3.bf16.msra.mxu1 %v1228_v8 }
  0x21   : > { %1116 = vmatprep.subr.bf16.mxu0 %v1229_v9  ;;  %1189 = vmatprep.subr.bf16.mxu1 %v1229_v9 }
  0x24   : > { %1117 = vmatpush3.bf16.msra.mxu0 %v1229_v9  ;;  %1197 = vmatpush3.bf16.msra.mxu1 %v1229_v9 }
  0x27   : > { %1119 = vmatmul.mubr.bf16.vlgmr.msra.gmra.mrb[0].mxu0 %v1232_v10  ;;  %1151 = vmatmul.mubr.bf16.vlgmr.msra.gmra.mrb[0].mxu1 %v1233_v11 }
  0x28   : > { %1122 = vmatprep.mubr.bf16.mxu0 %v1234_v12  ;;  %1154 = vmatprep.mubr.bf16.mxu1 %v1235_v13 }
  0x2f   : > { %1123 = vmatmul.mubr.bf16.gmra.mrb[4].mxu0 %v1236_v14  ;;  %1155 = vmatmul.mubr.bf16.gmra.mrb[4].mxu1 %v1237_v15 }
  0x30   : > { %1126 = vmatprep.mubr.bf16.mxu0 %v1238_v16  ;;  %1158 = vmatprep.mubr.bf16.mxu1 %v1239_v17 }
  0x37   : > { %1127 = vmatmul.mubr.bf16.gmra.mrb[8].mxu0 %v1240_v18  ;;  %1159 = vmatmul.mubr.bf16.gmra.mrb[8].mxu1 %v1241_v19 }
  0x38   : > { %1130 = vmatprep.mubr.bf16.mxu0 %v1242_v20  ;;  %1162 = vmatprep.mubr.bf16.mxu1 %v1243_v21 }
  0x3f   : > { %1131 = vmatmul.mubr.bf16.gmra.mrb[12].mxu0 %v1244_v22  ;;  %1163 = vmatmul.mubr.bf16.gmra.mrb[12].mxu1 %v1245_v23 }
  0x40   : > { %1134 = vmatprep.mubr.bf16.mxu0 %v1246_v24  ;;  %1166 = vmatprep.mubr.bf16.mxu1 %v1247_v25 }
  0x47   : > { %1135 = vmatmul.mubr.bf16.gmra.mrb[16].mxu0 %v1248_v26  ;;  %1167 = vmatmul.mubr.bf16.gmra.mrb[16].mxu1 %v1249_v27 }
  0x48   : > { %1138 = vmatprep.mubr.bf16.mxu0 %v1250_v28  ;;  %1170 = vmatprep.mubr.bf16.mxu1 %v1251_v29 }
  0x4f   : > { %1139 = vmatmul.mubr.bf16.gmra.mrb[20].mxu0 %v1252_v30  ;;  %1171 = vmatmul.mubr.bf16.gmra.mrb[20].mxu1 %v1253_v31 }
  0x50   : > { %1142 = vmatprep.mubr.bf16.mxu0 %v1254_v32  ;;  %1174 = vmatprep.mubr.bf16.mxu1 %v1255_v33 }
  0x57   : > { %1143 = vmatmul.mubr.bf16.gmra.mrb[24].mxu0 %v1256_v34  ;;  %1175 = vmatmul.mubr.bf16.gmra.mrb[24].mxu1 %v1257_v35 }
  0x58   : > { %1146 = vmatprep.mubr.bf16.mxu0 %v1258_v36  ;;  %1178 = vmatprep.mubr.bf16.mxu1 %v1259_v37 }
  0x5f   : > { %1147 = vmatmul.mubr.bf16.gmra.mrb[28].mxu0 %v1260_v38  ;;  %1179 = vmatmul.mubr.bf16.gmra.mrb[28].mxu1 %v1261_v39 }
  0xfa   : > { %v1120_v41 = vpop.f32.mrb[0].mxu0  ;;  %v1152_v42 = vpop.f32.mrb[0].mxu1 }
  0xfb   : > { %v596_v43 = vadd.f32 %v1120_v41, %v1392_v40  ;;  %v724_v44 = vadd.f32 %v1152_v42, %v1392_v40  ;;  %v587_v45 = vpop.f32.mrb[1].mxu0  ;;  %v715_v46 = vpop.f32.mrb[1].mxu1 }
  0xfc   : > { %v588_v47 = vadd.f32 %v1392_v40, %v587_v45  ;;  %v716_v48 = vadd.f32 %v1392_v40, %v715_v46  ;;  %v1121_v49 = vpop.f32.mrb[2].mxu0  ;;  %v1153_v50 = vpop.f32.mrb[2].mxu1 }
  0xfd   : > { %844 = vst [vmem:[%s1397_s19 + $0x10] sm:$0xff] %v596_v43  ;;  %876 = vst [vmem:[%s1397_s19 + $0x110] sm:$0xff] %v724_v44  ;;  %v599_v51 = vadd.f32 %v1121_v49, %v1392_v40  ;;  %v727_v52 = vadd.f32 %v1153_v50, %v1392_v40  ;;  %v590_v53 = vpop.f32.mrb[3].mxu0  ;;  %v718_v54 = vpop.f32.mrb[3].mxu1 }
  0xfe   : > { %842 = vst [vmem:[%s1397_s19] sm:$0xff] %v588_v47  ;;  %874 = vst [vmem:[%s1397_s19 + $0x100] sm:$0xff] %v716_v48  ;;  %v591_v55 = vadd.f32 %v1392_v40, %v590_v53  ;;  %v719_v56 = vadd.f32 %v1392_v40, %v718_v54 }
  0xff   : > { %845 = vst [vmem:[%s1397_s19 + $0x18] sm:$0xff] %v599_v51  ;;  %877 = vst [vmem:[%s1397_s19 + $0x118] sm:$0xff] %v727_v52 }
 0x100   : > { %843 = vst [vmem:[%s1397_s19 + $0x8] sm:$0xff] %v591_v55  ;;  %875 = vst [vmem:[%s1397_s19 + $0x108] sm:$0xff] %v719_v56 }
 0x102   : > { %v1124_v57 = vpop.f32.mrb[4].mxu0  ;;  %v1156_v58 = vpop.f32.mrb[4].mxu1 }
 0x103   : > { %v612_v59 = vadd.f32 %v1124_v57, %v1392_v40  ;;  %v740_v60 = vadd.f32 %v1156_v58, %v1392_v40  ;;  %v603_v61 = vpop.f32.mrb[5].mxu0  ;;  %v731_v62 = vpop.f32.mrb[5].mxu1 }
 0x104   : > { %v604_v63 = vadd.f32 %v1392_v40, %v603_v61  ;;  %v732_v0 = vadd.f32 %v1392_v40, %v731_v62  ;;  %v1125_v1 = vpop.f32.mrb[6].mxu0  ;;  %v1157_v2 = vpop.f32.mrb[6].mxu1 }
 0x105   : > { %848 = vst [vmem:[%s1397_s19 + $0x30] sm:$0xff] %v612_v59  ;;  %880 = vst [vmem:[%s1397_s19 + $0x130] sm:$0xff] %v740_v60  ;;  %v615_v3 = vadd.f32 %v1125_v1, %v1392_v40  ;;  %v743_v4 = vadd.f32 %v1157_v2, %v1392_v40  ;;  %v606_v5 = vpop.f32.mrb[7].mxu0  ;;  %v734_v6 = vpop.f32.mrb[7].mxu1 }
 0x106   : > { %846 = vst [vmem:[%s1397_s19 + $0x20] sm:$0xff] %v604_v63  ;;  %878 = vst [vmem:[%s1397_s19 + $0x120] sm:$0xff] %v732_v0  ;;  %v607_v7 = vadd.f32 %v1392_v40, %v606_v5  ;;  %v735_v8 = vadd.f32 %v1392_v40, %v734_v6 }
 0x107   : > { %849 = vst [vmem:[%s1397_s19 + $0x38] sm:$0xff] %v615_v3  ;;  %881 = vst [vmem:[%s1397_s19 + $0x138] sm:$0xff] %v743_v4 }
 0x108   : > { %847 = vst [vmem:[%s1397_s19 + $0x28] sm:$0xff] %v607_v7  ;;  %879 = vst [vmem:[%s1397_s19 + $0x128] sm:$0xff] %v735_v8 }
 0x10a   : > { %v1128_v9 = vpop.f32.mrb[8].mxu0  ;;  %v1160_v10 = vpop.f32.mrb[8].mxu1 }
 0x10b   : > { %v628_v11 = vadd.f32 %v1128_v9, %v1392_v40  ;;  %v756_v12 = vadd.f32 %v1160_v10, %v1392_v40  ;;  %v619_v13 = vpop.f32.mrb[9].mxu0  ;;  %v747_v14 = vpop.f32.mrb[9].mxu1 }
 0x10c   : > { %v620_v15 = vadd.f32 %v1392_v40, %v619_v13  ;;  %v748_v16 = vadd.f32 %v1392_v40, %v747_v14  ;;  %v1129_v17 = vpop.f32.mrb[10].mxu0  ;;  %v1161_v18 = vpop.f32.mrb[10].mxu1 }
 0x10d   : > { %852 = vst [vmem:[%s1397_s19 + $0x50] sm:$0xff] %v628_v11  ;;  %884 = vst [vmem:[%s1397_s19 + $0x150] sm:$0xff] %v756_v12  ;;  %v631_v19 = vadd.f32 %v1129_v17, %v1392_v40  ;;  %v759_v20 = vadd.f32 %v1161_v18, %v1392_v40  ;;  %v622_v21 = vpop.f32.mrb[11].mxu0  ;;  %v750_v22 = vpop.f32.mrb[11].mxu1 }
 0x10e   : > { %850 = vst [vmem:[%s1397_s19 + $0x40] sm:$0xff] %v620_v15  ;;  %882 = vst [vmem:[%s1397_s19 + $0x140] sm:$0xff] %v748_v16  ;;  %v623_v23 = vadd.f32 %v1392_v40, %v622_v21  ;;  %v751_v24 = vadd.f32 %v1392_v40, %v750_v22 }
 0x10f   : > { %853 = vst [vmem:[%s1397_s19 + $0x58] sm:$0xff] %v631_v19  ;;  %885 = vst [vmem:[%s1397_s19 + $0x158] sm:$0xff] %v759_v20 }
 0x110   : > { %851 = vst [vmem:[%s1397_s19 + $0x48] sm:$0xff] %v623_v23  ;;  %883 = vst [vmem:[%s1397_s19 + $0x148] sm:$0xff] %v751_v24 }
 0x112   : > { %v1132_v25 = vpop.f32.mrb[12].mxu0  ;;  %v1164_v26 = vpop.f32.mrb[12].mxu1 }
 0x113   : > { %v644_v27 = vadd.f32 %v1132_v25, %v1392_v40  ;;  %v772_v28 = vadd.f32 %v1164_v26, %v1392_v40  ;;  %v635_v29 = vpop.f32.mrb[13].mxu0  ;;  %v763_v30 = vpop.f32.mrb[13].mxu1 }
 0x114   : > { %v636_v31 = vadd.f32 %v1392_v40, %v635_v29  ;;  %v764_v32 = vadd.f32 %v1392_v40, %v763_v30  ;;  %v1133_v33 = vpop.f32.mrb[14].mxu0  ;;  %v1165_v34 = vpop.f32.mrb[14].mxu1 }
 0x115   : > { %856 = vst [vmem:[%s1397_s19 + $0x70] sm:$0xff] %v644_v27  ;;  %888 = vst [vmem:[%s1397_s19 + $0x170] sm:$0xff] %v772_v28  ;;  %v647_v35 = vadd.f32 %v1133_v33, %v1392_v40  ;;  %v775_v36 = vadd.f32 %v1165_v34, %v1392_v40  ;;  %v638_v37 = vpop.f32.mrb[15].mxu0  ;;  %v766_v38 = vpop.f32.mrb[15].mxu1 }
 0x116   : > { %854 = vst [vmem:[%s1397_s19 + $0x60] sm:$0xff] %v636_v31  ;;  %886 = vst [vmem:[%s1397_s19 + $0x160] sm:$0xff] %v764_v32  ;;  %v639_v39 = vadd.f32 %v1392_v40, %v638_v37  ;;  %v767_v41 = vadd.f32 %v1392_v40, %v766_v38 }
 0x117   : > { %857 = vst [vmem:[%s1397_s19 + $0x78] sm:$0xff] %v647_v35  ;;  %889 = vst [vmem:[%s1397_s19 + $0x178] sm:$0xff] %v775_v36 }
 0x118   : > { %855 = vst [vmem:[%s1397_s19 + $0x68] sm:$0xff] %v639_v39  ;;  %887 = vst [vmem:[%s1397_s19 + $0x168] sm:$0xff] %v767_v41 }
 0x11a   : > { %v1136_v42 = vpop.f32.mrb[16].mxu0  ;;  %v1168_v43 = vpop.f32.mrb[16].mxu1 }
 0x11b   : > { %v660_v44 = vadd.f32 %v1136_v42, %v1392_v40  ;;  %v788_v45 = vadd.f32 %v1168_v43, %v1392_v40  ;;  %v651_v46 = vpop.f32.mrb[17].mxu0  ;;  %v779_v47 = vpop.f32.mrb[17].mxu1 }
 0x11c   : > { %v652_v48 = vadd.f32 %v1392_v40, %v651_v46  ;;  %v780_v49 = vadd.f32 %v1392_v40, %v779_v47  ;;  %v1137_v50 = vpop.f32.mrb[18].mxu0  ;;  %v1169_v51 = vpop.f32.mrb[18].mxu1 }
 0x11d   : > { %860 = vst [vmem:[%s1397_s19 + $0x90] sm:$0xff] %v660_v44  ;;  %892 = vst [vmem:[%s1397_s19 + $0x190] sm:$0xff] %v788_v45  ;;  %v663_v52 = vadd.f32 %v1137_v50, %v1392_v40  ;;  %v791_v53 = vadd.f32 %v1169_v51, %v1392_v40  ;;  %v654_v54 = vpop.f32.mrb[19].mxu0  ;;  %v782_v55 = vpop.f32.mrb[19].mxu1 }
 0x11e   : > { %858 = vst [vmem:[%s1397_s19 + $0x80] sm:$0xff] %v652_v48  ;;  %890 = vst [vmem:[%s1397_s19 + $0x180] sm:$0xff] %v780_v49  ;;  %v655_v56 = vadd.f32 %v1392_v40, %v654_v54  ;;  %v783_v57 = vadd.f32 %v1392_v40, %v782_v55 }
 0x11f   : > { %861 = vst [vmem:[%s1397_s19 + $0x98] sm:$0xff] %v663_v52  ;;  %893 = vst [vmem:[%s1397_s19 + $0x198] sm:$0xff] %v791_v53 }
 0x120   : > { %859 = vst [vmem:[%s1397_s19 + $0x88] sm:$0xff] %v655_v56  ;;  %891 = vst [vmem:[%s1397_s19 + $0x188] sm:$0xff] %v783_v57 }
 0x122   : > { %v1140_v58 = vpop.f32.mrb[20].mxu0  ;;  %v1172_v59 = vpop.f32.mrb[20].mxu1 }
 0x123   : > { %v676_v60 = vadd.f32 %v1140_v58, %v1392_v40  ;;  %v804_v61 = vadd.f32 %v1172_v59, %v1392_v40  ;;  %v667_v62 = vpop.f32.mrb[21].mxu0  ;;  %v795_v63 = vpop.f32.mrb[21].mxu1 }
 0x124   : > { %v668_v0 = vadd.f32 %v1392_v40, %v667_v62  ;;  %v796_v1 = vadd.f32 %v1392_v40, %v795_v63  ;;  %v1141_v2 = vpop.f32.mrb[22].mxu0  ;;  %v1173_v3 = vpop.f32.mrb[22].mxu1 }
 0x125   : > { %864 = vst [vmem:[%s1397_s19 + $0xb0] sm:$0xff] %v676_v60  ;;  %896 = vst [vmem:[%s1397_s19 + $0x1b0] sm:$0xff] %v804_v61  ;;  %v679_v4 = vadd.f32 %v1141_v2, %v1392_v40  ;;  %v807_v5 = vadd.f32 %v1173_v3, %v1392_v40  ;;  %v670_v6 = vpop.f32.mrb[23].mxu0  ;;  %v798_v7 = vpop.f32.mrb[23].mxu1 }
 0x126   : > { %862 = vst [vmem:[%s1397_s19 + $0xa0] sm:$0xff] %v668_v0  ;;  %894 = vst [vmem:[%s1397_s19 + $0x1a0] sm:$0xff] %v796_v1  ;;  %v671_v8 = vadd.f32 %v1392_v40, %v670_v6  ;;  %v799_v9 = vadd.f32 %v1392_v40, %v798_v7 }
 0x127   : > { %865 = vst [vmem:[%s1397_s19 + $0xb8] sm:$0xff] %v679_v4  ;;  %897 = vst [vmem:[%s1397_s19 + $0x1b8] sm:$0xff] %v807_v5 }
 0x128   : > { %863 = vst [vmem:[%s1397_s19 + $0xa8] sm:$0xff] %v671_v8  ;;  %895 = vst [vmem:[%s1397_s19 + $0x1a8] sm:$0xff] %v799_v9 }
 0x12a   : > { %v1144_v10 = vpop.f32.mrb[24].mxu0  ;;  %v1176_v11 = vpop.f32.mrb[24].mxu1 }
 0x12b   : > { %v692_v12 = vadd.f32 %v1144_v10, %v1392_v40  ;;  %v820_v13 = vadd.f32 %v1176_v11, %v1392_v40  ;;  %v683_v14 = vpop.f32.mrb[25].mxu0  ;;  %v811_v15 = vpop.f32.mrb[25].mxu1 }
 0x12c   : > { %v684_v16 = vadd.f32 %v1392_v40, %v683_v14  ;;  %v812_v17 = vadd.f32 %v1392_v40, %v811_v15  ;;  %v1145_v18 = vpop.f32.mrb[26].mxu0  ;;  %v1177_v19 = vpop.f32.mrb[26].mxu1 }
 0x12d   : > { %868 = vst [vmem:[%s1397_s19 + $0xd0] sm:$0xff] %v692_v12  ;;  %900 = vst [vmem:[%s1397_s19 + $0x1d0] sm:$0xff] %v820_v13  ;;  %v695_v20 = vadd.f32 %v1145_v18, %v1392_v40  ;;  %v823_v21 = vadd.f32 %v1177_v19, %v1392_v40  ;;  %v686_v22 = vpop.f32.mrb[27].mxu0  ;;  %v814_v23 = vpop.f32.mrb[27].mxu1 }
 0x12e   : > { %866 = vst [vmem:[%s1397_s19 + $0xc0] sm:$0xff] %v684_v16  ;;  %898 = vst [vmem:[%s1397_s19 + $0x1c0] sm:$0xff] %v812_v17  ;;  %v687_v24 = vadd.f32 %v1392_v40, %v686_v22  ;;  %v815_v25 = vadd.f32 %v1392_v40, %v814_v23 }
 0x12f   : > { %869 = vst [vmem:[%s1397_s19 + $0xd8] sm:$0xff] %v695_v20  ;;  %901 = vst [vmem:[%s1397_s19 + $0x1d8] sm:$0xff] %v823_v21 }
 0x130   : > { %867 = vst [vmem:[%s1397_s19 + $0xc8] sm:$0xff] %v687_v24  ;;  %899 = vst [vmem:[%s1397_s19 + $0x1c8] sm:$0xff] %v815_v25 }
 0x132   : > { %v1148_v26 = vpop.f32.mrb[28].mxu0  ;;  %v1180_v27 = vpop.f32.mrb[28].mxu1 }
 0x133   : > { %v708_v28 = vadd.f32 %v1148_v26, %v1392_v40  ;;  %v836_v29 = vadd.f32 %v1180_v27, %v1392_v40  ;;  %v699_v30 = vpop.f32.mrb[29].mxu0  ;;  %v827_v31 = vpop.f32.mrb[29].mxu1 }
 0x134   : > { %v700_v32 = vadd.f32 %v1392_v40, %v699_v30  ;;  %v828_v33 = vadd.f32 %v1392_v40, %v827_v31  ;;  %v1149_v34 = vpop.f32.mrb[30].mxu0  ;;  %v1181_v35 = vpop.f32.mrb[30].mxu1 }
 0x135   : > { %872 = vst [vmem:[%s1397_s19 + $0xf0] sm:$0xff] %v708_v28  ;;  %904 = vst [vmem:[%s1397_s19 + $0x1f0] sm:$0xff] %v836_v29  ;;  %v711_v36 = vadd.f32 %v1149_v34, %v1392_v40  ;;  %v839_v37 = vadd.f32 %v1181_v35, %v1392_v40  ;;  %v702_v38 = vpop.f32.mrb[31].mxu0  ;;  %v830_v39 = vpop.f32.mrb[31].mxu1 }
 0x136   : > { %870 = vst [vmem:[%s1397_s19 + $0xe0] sm:$0xff] %v700_v32  ;;  %902 = vst [vmem:[%s1397_s19 + $0x1e0] sm:$0xff] %v828_v33  ;;  %v703_v41 = vadd.f32 %v1392_v40, %v702_v38  ;;  %v831_v42 = vadd.f32 %v1392_v40, %v830_v39 }
 0x137   : > { %873 = vst [vmem:[%s1397_s19 + $0xf8] sm:$0xff] %v711_v36  ;;  %905 = vst [vmem:[%s1397_s19 + $0x1f8] sm:$0xff] %v839_v37 }
 0x138   : > { %871 = vst [vmem:[%s1397_s19 + $0xe8] sm:$0xff] %v703_v41  ;;  %903 = vst [vmem:[%s1397_s19 + $0x1e8] sm:$0xff] %v831_v42 }
 0x139 PF: > { %s13_s14 = sadd.s32 1, %s1284_s14   ;;  %s1540_s12 = smov %s1280_s13 }
 0x13a   : > { %p10_p5 = scmp.ge.s32.totalorder %s13_s14, 4   ;;  %s1541_s13 = smov %s1543_s15 }
 0x13c   :  { %12 = sbr.rel (!%p10_p5) target bundleno = 2 (0x2), region = 68 }

// kernel: _lambda_.63
= control target key start
LH: loop header
LB: loop body
LE: loop exit
PB: predicated region body
PF: predicated region fallthrough
CT: control target
= control target key end

     0   :  { %s1513_s12 = smov 0   ;;  %s1515_s13 = smov 0   ;;  %s1834_s0 = inlined_call_operand.vmem [shape: bf16[1024,256], index: 0, kind: input, shape index: {}]   ;;  %s1835_s1 = inlined_call_operand.vmem [shape: bf16[256,128], index: 1, kind: input, shape index: {}]   ;;  %s1836_s2 = inlined_call_operand.vmem [shape: f32[1,128], index: 2, kind: input, shape index: {}]   ;;  %s1837_s3 = inlined_call_operand.vmem [shape: f32[1024,128], index: 3, kind: output, shape index: {}]  }
   0x1   :  { %s1517_s14 = smov 0  }
   0x2 LB: > { %s25_s15 = sadd.s32 1, %s1486_s13  ;;  %p1209_p0 = scmp.ge.s32.totalorder %s1490_s14, 1  ;;  %s1490_s14 = sphi %s1517_s14, %s13_s14   ;;  %s1486_s13 = sphi %s1515_s13, %s1839_s13   ;;  %s1482_s12 = sphi %s1513_s12, %s1838_s12  }
   0x3   : > { %p27_p1 = scmp.ge.s32.totalorder %s25_s15, 2  ;;  %p170_p2 = scmp.lt.s32.totalorder %s1490_s14, 3 }
   0x5   : > { %s1841_s15 = smov (%p27_p1, %s25_s15), 0  ;;  %p171_p3 = pnand %p1209_p0, %p170_p2 }
   0x6   : > { %v1356_v0 = vld [vmem:[%s1835_s1] sm:$0xff] (!%p171_p3)   ;;  %v1492_v1 = vmov (!%p171_p3), 0   ;;  %s1210_s18 = sshll.u32 (!%p171_p3), %s1482_s12, 6  ;;  %v1357_v2 = vld [vmem:[%s1835_s1 + $0x8] sm:$0xff] (!%p171_p3)   ;;  %v1358_v3 = vld [vmem:[%s1835_s1 + $0x10] sm:$0xff] (!%p171_p3)  }
   0x7   : > { %174 = sbr.rel (%p171_p3) target bundleno = 408 (0x198), region = 32  ;;  %748 = vmatprep.subr.bf16.mxu0 (!%p171_p3), %v1492_v1  ;;  %1299 = vmatprep.subr.bf16.mxu1 (!%p171_p3), %v1492_v1  ;;  %p206_p4 = scmp.lt.s32.totalorder (!%p171_p3), %s1210_s18, 127  ;;  %v1359_v4 = vld [vmem:[%s1835_s1 + $0x18] sm:$0xff] (!%p171_p3)   ;;  %v1360_v5 = vld [vmem:[%s1835_s1 + $0x20] sm:$0xff] (!%p171_p3)   ;;  %v1361_v7 = vld [vmem:[%s1835_s1 + $0x28] sm:$0xff] (!%p171_p3)  }
   0x8   : > { %749 = vmatpush1.bf16.msra.mxu0 (!%p171_p3), %v1356_v0  ;;  %1315 = vmatpush1.bf16.msra.mxu1 (!%p171_p3), %v1356_v0  ;;  %v1362_v9 = vld [vmem:[%s1835_s1 + $0x30] sm:$0xff] (!%p171_p3)   ;;  %v1363_v10 = vld [vmem:[%s1835_s1 + $0x38] sm:$0xff] (!%p171_p3)   ;;  %v1364_v11 = vld [vmem:[%s1835_s1 + $0x40] sm:$0xff] (!%p171_p3)  }
   0x9   : > { %750 = vmatprep.subr.bf16.mxu0 (!%p171_p3), %v1492_v1  ;;  %1300 = vmatprep.subr.bf16.mxu1 (!%p171_p3), %v1492_v1  ;;  %v1365_v12 = vld [vmem:[%s1835_s1 + $0x48] sm:$0xff] (!%p171_p3)   ;;  %v1366_v13 = vld [vmem:[%s1835_s1 + $0x50] sm:$0xff] (!%p171_p3)   ;;  %v1367_v14 = vld [vmem:[%s1835_s1 + $0x58] sm:$0xff] (!%p171_p3)  }
   0xa   : > { %v1368_v15 = vld [vmem:[%s1835_s1 + $0x60] sm:$0xff] (!%p171_p3)   ;;  %v1369_v16 = vld [vmem:[%s1835_s1 + $0x68] sm:$0xff] (!%p171_p3)   ;;  %v1370_v17 = vld [vmem:[%s1835_s1 + $0x70] sm:$0xff] (!%p171_p3)  }
   0xb   : > { %v1371_v18 = vld [vmem:[%s1835_s1 + $0x78] sm:$0xff] (!%p171_p3)  }
   0xc   : > { %751 = vmatpush1.bf16.msra.mxu0 (!%p171_p3), %v1357_v2  ;;  %1316 = vmatpush1.bf16.msra.mxu1 (!%p171_p3), %v1357_v2 }
   0xd   : > { %752 = vmatprep.subr.bf16.mxu0 (!%p171_p3), %v1492_v1  ;;  %1301 = vmatprep.subr.bf16.mxu1 (!%p171_p3), %v1492_v1 }
   0xe   : > { %s1843_s18 = smov (!%p206_p4, %s1210_s18), 127 }
   0xf   : > { %s1298_s25 = sshll.u32 %s1843_s18, 3 }
  0x10   : > { %753 = vmatpush1.bf16.msra.mxu0 %v1358_v3  ;;  %1317 = vmatpush1.bf16.msra.mxu1 %v1358_v3  ;;  %s1562_s30 = scalar_lea.vmem %s1834_s0, %s1298_s25  ;;  %s1695_s9 = scalar_lea.vmem %s1837_s3, %s1298_s25 }
  0x11   : > { %754 = vmatprep.subr.bf16.mxu0 %v1492_v1  ;;  %1302 = vmatprep.subr.bf16.mxu1 %v1492_v1  ;;  %v1374_v6 = vld [vmem:[%s1562_s30 + $0x4] ss:$8 sps:$4 sm:$0xff]   ;;  %v1372_v19 = vld [vmem:[%s1562_s30] ss:$8 sps:$4 sm:$0xff]   ;;  %v1378_v21 = vld [vmem:[%s1562_s30 + $0x14] ss:$8 sps:$4 sm:$0xff]  }
  0x12   : > { %v1377_v8 = vld [vmem:[%s1562_s30 + $0x104] ss:$8 sps:$4 sm:$0xff]   ;;  %780 = vmatprep.mubr.bf16.mxu0 %v1374_v6  ;;  %v1375_v20 = vld [vmem:[%s1562_s30 + $0x100] ss:$8 sps:$4 sm:$0xff]   ;;  %v1380_v22 = vld [vmem:[%s1562_s30 + $0x114] ss:$8 sps:$4 sm:$0xff]  }
  0x13   : > { %908 = vmatprep.mubr.bf16.mxu1 %v1377_v8  ;;  %v1382_v23 = vld [vmem:[%s1562_s30 + $0x10] ss:$8 sps:$4 sm:$0xff]   ;;  %v1384_v25 = vld [vmem:[%s1562_s30 + $0x24] ss:$8 sps:$4 sm:$0xff]   ;;  %v1388_v27 = vld [vmem:[%s1562_s30 + $0x20] ss:$8 sps:$4 sm:$0xff]  }
  0x14   : > { %755 = vmatpush1.bf16.msra.mxu0 %v1359_v4  ;;  %1318 = vmatpush1.bf16.msra.mxu1 %v1359_v4  ;;  %v1383_v24 = vld [vmem:[%s1562_s30 + $0x110] ss:$8 sps:$4 sm:$0xff]   ;;  %v1386_v26 = vld [vmem:[%s1562_s30 + $0x124] ss:$8 sps:$4 sm:$0xff]   ;;  %v1389_v28 = vld [vmem:[%s1562_s30 + $0x120] ss:$8 sps:$4 sm:$0xff]  }
  0x15   : > { %756 = vmatprep.subr.bf16.mxu0 %v1492_v1  ;;  %1303 = vmatprep.subr.bf16.mxu1 %v1492_v1  ;;  %v1390_v29 = vld [vmem:[%s1562_s30 + $0x34] ss:$8 sps:$4 sm:$0xff]   ;;  %v1394_v31 = vld [vmem:[%s1562_s30 + $0x30] ss:$8 sps:$4 sm:$0xff]   ;;  %v1396_v33 = vld [vmem:[%s1562_s30 + $0x44] ss:$8 sps:$4 sm:$0xff]  }
  0x16   : > { %v1392_v30 = vld [vmem:[%s1562_s30 + $0x134] ss:$8 sps:$4 sm:$0xff]   ;;  %v1395_v32 = vld [vmem:[%s1562_s30 + $0x130] ss:$8 sps:$4 sm:$0xff]   ;;  %v1398_v34 = vld [vmem:[%s1562_s30 + $0x144] ss:$8 sps:$4 sm:$0xff]  }
  0x17   : > { %v1400_v35 = vld [vmem:[%s1562_s30 + $0x40] ss:$8 sps:$4 sm:$0xff]   ;;  %v1402_v37 = vld [vmem:[%s1562_s30 + $0x54] ss:$8 sps:$4 sm:$0xff]   ;;  %v1406_v39 = vld [vmem:[%s1562_s30 + $0x50] ss:$8 sps:$4 sm:$0xff]  }
  0x18   : > { %757 = vmatpush1.bf16.msra.mxu0 %v1360_v5  ;;  %1319 = vmatpush1.bf16.msra.mxu1 %v1360_v5  ;;  %v1401_v36 = vld [vmem:[%s1562_s30 + $0x140] ss:$8 sps:$4 sm:$0xff]   ;;  %v1404_v38 = vld [vmem:[%s1562_s30 + $0x154] ss:$8 sps:$4 sm:$0xff]   ;;  %v1407_v40 = vld [vmem:[%s1562_s30 + $0x150] ss:$8 sps:$4 sm:$0xff]  }
  0x19   : > { %758 = vmatprep.subr.bf16.mxu0 %v1492_v1  ;;  %1304 = vmatprep.subr.bf16.mxu1 %v1492_v1  ;;  %v1408_v41 = vld [vmem:[%s1562_s30 + $0x64] ss:$8 sps:$4 sm:$0xff]   ;;  %v1412_v43 = vld [vmem:[%s1562_s30 + $0x60] ss:$8 sps:$4 sm:$0xff]   ;;  %v1414_v45 = vld [vmem:[%s1562_s30 + $0x74] ss:$8 sps:$4 sm:$0xff]  }
  0x1a   : > { %v1410_v42 = vld [vmem:[%s1562_s30 + $0x164] ss:$8 sps:$4 sm:$0xff]   ;;  %v1413_v44 = vld [vmem:[%s1562_s30 + $0x160] ss:$8 sps:$4 sm:$0xff]   ;;  %v1416_v46 = vld [vmem:[%s1562_s30 + $0x174] ss:$8 sps:$4 sm:$0xff]  }
  0x1b   : > { %v1418_v47 = vld [vmem:[%s1562_s30 + $0x70] ss:$8 sps:$4 sm:$0xff]   ;;  %v1420_v49 = vld [vmem:[%s1562_s30 + $0x84] ss:$8 sps:$4 sm:$0xff]   ;;  %v1424_v51 = vld [vmem:[%s1562_s30 + $0x80] ss:$8 sps:$4 sm:$0xff]  }
  0x1c   : > { %759 = vmatpush1.bf16.msra.mxu0 %v1361_v7  ;;  %1320 = vmatpush1.bf16.msra.mxu1 %v1361_v7  ;;  %v1419_v48 = vld [vmem:[%s1562_s30 + $0x170] ss:$8 sps:$4 sm:$0xff]   ;;  %v1422_v50 = vld [vmem:[%s1562_s30 + $0x184] ss:$8 sps:$4 sm:$0xff]   ;;  %v1425_v52 = vld [vmem:[%s1562_s30 + $0x180] ss:$8 sps:$4 sm:$0xff]  }
  0x1d   : > { %760 = vmatprep.subr.bf16.mxu0 %v1492_v1  ;;  %1305 = vmatprep.subr.bf16.mxu1 %v1492_v1  ;;  %v1426_v53 = vld [vmem:[%s1562_s30 + $0x94] ss:$8 sps:$4 sm:$0xff]   ;;  %v1430_v55 = vld [vmem:[%s1562_s30 + $0x90] ss:$8 sps:$4 sm:$0xff]   ;;  %v1432_v57 = vld [vmem:[%s1562_s30 + $0xa4] ss:$8 sps:$4 sm:$0xff]  }
  0x1e   : > { %v1428_v54 = vld [vmem:[%s1562_s30 + $0x194] ss:$8 sps:$4 sm:$0xff]   ;;  %v1431_v56 = vld [vmem:[%s1562_s30 + $0x190] ss:$8 sps:$4 sm:$0xff]   ;;  %v1434_v58 = vld [vmem:[%s1562_s30 + $0x1a4] ss:$8 sps:$4 sm:$0xff]  }
  0x1f   : > { %v1436_v59 = vld [vmem:[%s1562_s30 + $0xa0] ss:$8 sps:$4 sm:$0xff]   ;;  %v1438_v61 = vld [vmem:[%s1562_s30 + $0xb4] ss:$8 sps:$4 sm:$0xff]   ;;  %v1442_v63 = vld [vmem:[%s1562_s30 + $0xb0] ss:$8 sps:$4 sm:$0xff]  }
  0x20   : > { %761 = vmatpush1.bf16.msra.mxu0 %v1362_v9  ;;  %1321 = vmatpush1.bf16.msra.mxu1 %v1362_v9  ;;  %v1437_v60 = vld [vmem:[%s1562_s30 + $0x1a0] ss:$8 sps:$4 sm:$0xff]   ;;  %v1440_v62 = vld [vmem:[%s1562_s30 + $0x1b4] ss:$8 sps:$4 sm:$0xff]   ;;  %v1443_v0 = vld [vmem:[%s1562_s30 + $0x1b0] ss:$8 sps:$4 sm:$0xff]  }
  0x21   : > { %762 = vmatprep.subr.bf16.mxu0 %v1492_v1  ;;  %1306 = vmatprep.subr.bf16.mxu1 %v1492_v1  ;;  %v1446_v2 = vld [vmem:[%s1562_s30 + $0x1c4] ss:$8 sps:$4 sm:$0xff]   ;;  %v1448_v3 = vld [vmem:[%s1562_s30 + $0xc0] ss:$8 sps:$4 sm:$0xff]   ;;  %v1450_v5 = vld [vmem:[%s1562_s30 + $0xd4] ss:$8 sps:$4 sm:$0xff]  }
  0x22   : > { %v1449_v4 = vld [vmem:[%s1562_s30 + $0x1c0] ss:$8 sps:$4 sm:$0xff]   ;;  %v1452_v6 = vld [vmem:[%s1562_s30 + $0x1d4] ss:$8 sps:$4 sm:$0xff]   ;;  %v1454_v7 = vld [vmem:[%s1562_s30 + $0xd0] ss:$8 sps:$4 sm:$0xff]  }
  0x23   : > { %v1455_v8 = vld [vmem:[%s1562_s30 + $0x1d0] ss:$8 sps:$4 sm:$0xff]   ;;  %v1456_v9 = vld [vmem:[%s1562_s30 + $0xe4] ss:$8 sps:$4 sm:$0xff]  }
  0x24   : > { %763 = vmatpush1.bf16.msra.mxu0 %v1363_v10  ;;  %1322 = vmatpush1.bf16.msra.mxu1 %v1363_v10  ;;  %v1458_v10 = vld [vmem:[%s1562_s30 + $0x1e4] ss:$8 sps:$4 sm:$0xff]  }
  0x25   : > { %764 = vmatprep.subr.bf16.mxu0 %v1492_v1  ;;  %1307 = vmatprep.subr.bf16.mxu1 %v1492_v1 }
  0x28   : > { %765 = vmatpush1.bf16.msra.mxu0 %v1364_v11  ;;  %1323 = vmatpush1.bf16.msra.mxu1 %v1364_v11  ;;  %v1460_v11 = vld [vmem:[%s1562_s30 + $0xe0] ss:$8 sps:$4 sm:$0xff]  }
  0x29   : > { %766 = vmatprep.subr.bf16.mxu0 %v1492_v1  ;;  %1308 = vmatprep.subr.bf16.mxu1 %v1492_v1 }
  0x2c   : > { %767 = vmatpush1.bf16.msra.mxu0 %v1365_v12  ;;  %1324 = vmatpush1.bf16.msra.mxu1 %v1365_v12  ;;  %v1461_v12 = vld [vmem:[%s1562_s30 + $0x1e0] ss:$8 sps:$4 sm:$0xff]  }
  0x2d   : > { %768 = vmatprep.subr.bf16.mxu0 %v1492_v1  ;;  %1309 = vmatprep.subr.bf16.mxu1 %v1492_v1 }
  0x30   : > { %769 = vmatpush1.bf16.msra.mxu0 %v1366_v13  ;;  %1325 = vmatpush1.bf16.msra.mxu1 %v1366_v13  ;;  %v1462_v13 = vld [vmem:[%s1562_s30 + $0xf4] ss:$8 sps:$4 sm:$0xff]  }
  0x31   : > { %770 = vmatprep.subr.bf16.mxu0 %v1492_v1  ;;  %1310 = vmatprep.subr.bf16.mxu1 %v1492_v1 }
  0x34   : > { %771 = vmatpush1.bf16.msra.mxu0 %v1367_v14  ;;  %1326 = vmatpush1.bf16.msra.mxu1 %v1367_v14  ;;  %v1464_v14 = vld [vmem:[%s1562_s30 + $0x1f4] ss:$8 sps:$4 sm:$0xff]  }
  0x35   : > { %772 = vmatprep.subr.bf16.mxu0 %v1492_v1  ;;  %1311 = vmatprep.subr.bf16.mxu1 %v1492_v1 }
  0x38   : > { %773 = vmatpush1.bf16.msra.mxu0 %v1368_v15  ;;  %1327 = vmatpush1.bf16.msra.mxu1 %v1368_v15  ;;  %v1466_v15 = vld [vmem:[%s1562_s30 + $0xf0] ss:$8 sps:$4 sm:$0xff]  }
  0x39   : > { %774 = vmatprep.subr.bf16.mxu0 %v1492_v1  ;;  %1312 = vmatprep.subr.bf16.mxu1 %v1492_v1 }
  0x3c   : > { %775 = vmatpush1.bf16.msra.mxu0 %v1369_v16  ;;  %1328 = vmatpush1.bf16.msra.mxu1 %v1369_v16  ;;  %v1467_v16 = vld [vmem:[%s1562_s30 + $0x1f0] ss:$8 sps:$4 sm:$0xff]  }
  0x3d   : > { %776 = vmatprep.subr.bf16.mxu0 %v1492_v1  ;;  %1313 = vmatprep.subr.bf16.mxu1 %v1492_v1 }
  0x40   : > { %777 = vmatpush1.bf16.msra.mxu0 %v1370_v17  ;;  %1329 = vmatpush1.bf16.msra.mxu1 %v1370_v17  ;;  %v1688_v17 = vld [vmem:[%s1836_s2] ss:$0 sm:$0xff] }
  0x41   : > { %778 = vmatprep.subr.bf16.mxu0 %v1492_v1  ;;  %1314 = vmatprep.subr.bf16.mxu1 %v1492_v1  ;;  %v1444_v1 = vld [vmem:[%s1562_s30 + $0xc4] ss:$8 sps:$4 sm:$0xff]  }
  0x44   : > { %779 = vmatpush1.bf16.msra.mxu0 %v1371_v18  ;;  %1330 = vmatpush1.bf16.msra.mxu1 %v1371_v18 }
  0x47   : > { %781 = vmatmul.mubr.bf16.vlgmr.msra.gmra.mrb[0].mxu0 %v1372_v19  ;;  %909 = vmatmul.mubr.bf16.vlgmr.msra.gmra.mrb[0].mxu1 %v1375_v20 }
  0x48   : > { %788 = vmatprep.mubr.bf16.mxu0 %v1378_v21  ;;  %916 = vmatprep.mubr.bf16.mxu1 %v1380_v22 }
  0x4f   : > { %789 = vmatmul.mubr.bf16.gmra.mrb[4].mxu0 %v1382_v23  ;;  %917 = vmatmul.mubr.bf16.gmra.mrb[4].mxu1 %v1383_v24 }
  0x50   : > { %796 = vmatprep.mubr.bf16.mxu0 %v1384_v25  ;;  %924 = vmatprep.mubr.bf16.mxu1 %v1386_v26 }
  0x57   : > { %797 = vmatmul.mubr.bf16.gmra.mrb[8].mxu0 %v1388_v27  ;;  %925 = vmatmul.mubr.bf16.gmra.mrb[8].mxu1 %v1389_v28 }
  0x58   : > { %804 = vmatprep.mubr.bf16.mxu0 %v1390_v29  ;;  %932 = vmatprep.mubr.bf16.mxu1 %v1392_v30 }
  0x5f   : > { %805 = vmatmul.mubr.bf16.gmra.mrb[12].mxu0 %v1394_v31  ;;  %933 = vmatmul.mubr.bf16.gmra.mrb[12].mxu1 %v1395_v32 }
  0x60   : > { %812 = vmatprep.mubr.bf16.mxu0 %v1396_v33  ;;  %940 = vmatprep.mubr.bf16.mxu1 %v1398_v34 }
  0x67   : > { %813 = vmatmul.mubr.bf16.gmra.mrb[16].mxu0 %v1400_v35  ;;  %941 = vmatmul.mubr.bf16.gmra.mrb[16].mxu1 %v1401_v36 }
  0x68   : > { %820 = vmatprep.mubr.bf16.mxu0 %v1402_v37  ;;  %948 = vmatprep.mubr.bf16.mxu1 %v1404_v38 }
  0x6f   : > { %821 = vmatmul.mubr.bf16.gmra.mrb[20].mxu0 %v1406_v39  ;;  %949 = vmatmul.mubr.bf16.gmra.mrb[20].mxu1 %v1407_v40 }
  0x70   : > { %828 = vmatprep.mubr.bf16.mxu0 %v1408_v41  ;;  %956 = vmatprep.mubr.bf16.mxu1 %v1410_v42 }
  0x77   : > { %829 = vmatmul.mubr.bf16.gmra.mrb[24].mxu0 %v1412_v43  ;;  %957 = vmatmul.mubr.bf16.gmra.mrb[24].mxu1 %v1413_v44 }
  0x78   : > { %836 = vmatprep.mubr.bf16.mxu0 %v1414_v45  ;;  %964 = vmatprep.mubr.bf16.mxu1 %v1416_v46 }
  0x7f   : > { %837 = vmatmul.mubr.bf16.gmra.mrb[28].mxu0 %v1418_v47  ;;  %965 = vmatmul.mubr.bf16.gmra.mrb[28].mxu1 %v1419_v48 }
  0x80   : > { %844 = vmatprep.mubr.bf16.mxu0 %v1420_v49  ;;  %972 = vmatprep.mubr.bf16.mxu1 %v1422_v50 }
  0x87   : > { %845 = vmatmul.mubr.bf16.gmra.mrb[32].mxu0 %v1424_v51  ;;  %973 = vmatmul.mubr.bf16.gmra.mrb[32].mxu1 %v1425_v52 }
  0x88   : > { %852 = vmatprep.mubr.bf16.mxu0 %v1426_v53  ;;  %980 = vmatprep.mubr.bf16.mxu1 %v1428_v54 }
  0x8f   : > { %853 = vmatmul.mubr.bf16.gmra.mrb[36].mxu0 %v1430_v55  ;;  %981 = vmatmul.mubr.bf16.gmra.mrb[36].mxu1 %v1431_v56 }
  0x90   : > { %860 = vmatprep.mubr.bf16.mxu0 %v1432_v57  ;;  %988 = vmatprep.mubr.bf16.mxu1 %v1434_v58 }
  0x97   : > { %861 = vmatmul.mubr.bf16.gmra.mrb[40].mxu0 %v1436_v59  ;;  %989 = vmatmul.mubr.bf16.gmra.mrb[40].mxu1 %v1437_v60 }
  0x98   : > { %868 = vmatprep.mubr.bf16.mxu0 %v1438_v61  ;;  %996 = vmatprep.mubr.bf16.mxu1 %v1440_v62 }
  0x9f   : > { %869 = vmatmul.mubr.bf16.gmra.mrb[44].mxu0 %v1442_v63  ;;  %997 = vmatmul.mubr.bf16.gmra.mrb[44].mxu1 %v1443_v0 }
  0xa0   : > { %876 = vmatprep.mubr.bf16.mxu0 %v1444_v1  ;;  %1004 = vmatprep.mubr.bf16.mxu1 %v1446_v2 }
  0xa7   : > { %877 = vmatmul.mubr.bf16.gmra.mrb[48].mxu0 %v1448_v3  ;;  %1005 = vmatmul.mubr.bf16.gmra.mrb[48].mxu1 %v1449_v4 }
  0xa8   : > { %884 = vmatprep.mubr.bf16.mxu0 %v1450_v5  ;;  %1012 = vmatprep.mubr.bf16.mxu1 %v1452_v6 }
  0xaf   : > { %885 = vmatmul.mubr.bf16.gmra.mrb[52].mxu0 %v1454_v7  ;;  %1013 = vmatmul.mubr.bf16.gmra.mrb[52].mxu1 %v1455_v8 }
  0xb0   : > { %892 = vmatprep.mubr.bf16.mxu0 %v1456_v9  ;;  %1020 = vmatprep.mubr.bf16.mxu1 %v1458_v10 }
  0xb7   : > { %893 = vmatmul.mubr.bf16.gmra.mrb[56].mxu0 %v1460_v11  ;;  %1021 = vmatmul.mubr.bf16.gmra.mrb[56].mxu1 %v1461_v12 }
  0xb8   : > { %900 = vmatprep.mubr.bf16.mxu0 %v1462_v13  ;;  %1028 = vmatprep.mubr.bf16.mxu1 %v1464_v14 }
  0xbf   : > { %901 = vmatmul.mubr.bf16.gmra.mrb[60].mxu0 %v1466_v15  ;;  %1029 = vmatmul.mubr.bf16.gmra.mrb[60].mxu1 %v1467_v16 }
 0x11a   : > { %v782_v18 = vpop.f32.mrb[0].mxu0  ;;  %v910_v19 = vpop.f32.mrb[0].mxu1 }
 0x11b   : > { %v783_v20 = vadd.f32 %v1688_v17, %v782_v18  ;;  %v911_v21 = vadd.f32 %v1688_v17, %v910_v19  ;;  %v784_v22 = vpop.f32.mrb[1].mxu0  ;;  %v912_v23 = vpop.f32.mrb[1].mxu1 }
 0x11c   : > { %v785_v24 = vpop.f32.mrb[2].mxu0  ;;  %v913_v25 = vpop.f32.mrb[2].mxu1 }
 0x11d   : > { %1037 = vst [vmem:[%s1695_s9] sm:$0xff] %v783_v20  ;;  %1069 = vst [vmem:[%s1695_s9 + $0x100] sm:$0xff] %v911_v21  ;;  %v786_v26 = vadd.f32 %v1688_v17, %v785_v24  ;;  %v914_v27 = vadd.f32 %v1688_v17, %v913_v25  ;;  %v787_v28 = vpop.f32.mrb[3].mxu0  ;;  %v915_v29 = vpop.f32.mrb[3].mxu1 }
 0x11f   : > { %1038 = vst [vmem:[%s1695_s9 + $0x8] sm:$0xff] %v786_v26  ;;  %1070 = vst [vmem:[%s1695_s9 + $0x108] sm:$0xff] %v914_v27 }
 0x122   : > { %v790_v30 = vpop.f32.mrb[4].mxu0  ;;  %v918_v31 = vpop.f32.mrb[4].mxu1 }
 0x123   : > { %v791_v32 = vadd.f32 %v1688_v17, %v790_v30  ;;  %v919_v33 = vadd.f32 %v1688_v17, %v918_v31  ;;  %v792_v34 = vpop.f32.mrb[5].mxu0  ;;  %v920_v35 = vpop.f32.mrb[5].mxu1 }
 0x124   : > { %v793_v36 = vpop.f32.mrb[6].mxu0  ;;  %v921_v37 = vpop.f32.mrb[6].mxu1 }
 0x125   : > { %1039 = vst [vmem:[%s1695_s9 + $0x10] sm:$0xff] %v791_v32  ;;  %1071 = vst [vmem:[%s1695_s9 + $0x110] sm:$0xff] %v919_v33  ;;  %v794_v38 = vadd.f32 %v1688_v17, %v793_v36  ;;  %v922_v39 = vadd.f32 %v1688_v17, %v921_v37  ;;  %v795_v40 = vpop.f32.mrb[7].mxu0  ;;  %v923_v41 = vpop.f32.mrb[7].mxu1 }
 0x127   : > { %1040 = vst [vmem:[%s1695_s9 + $0x18] sm:$0xff] %v794_v38  ;;  %1072 = vst [vmem:[%s1695_s9 + $0x118] sm:$0xff] %v922_v39 }
 0x12a   : > { %v798_v42 = vpop.f32.mrb[8].mxu0  ;;  %v926_v43 = vpop.f32.mrb[8].mxu1 }
 0x12b   : > { %v799_v44 = vadd.f32 %v1688_v17, %v798_v42  ;;  %v927_v45 = vadd.f32 %v1688_v17, %v926_v43  ;;  %v800_v46 = vpop.f32.mrb[9].mxu0  ;;  %v928_v47 = vpop.f32.mrb[9].mxu1 }
 0x12c   : > { %v801_v48 = vpop.f32.mrb[10].mxu0  ;;  %v929_v49 = vpop.f32.mrb[10].mxu1 }
 0x12d   : > { %1041 = vst [vmem:[%s1695_s9 + $0x20] sm:$0xff] %v799_v44  ;;  %1073 = vst [vmem:[%s1695_s9 + $0x120] sm:$0xff] %v927_v45  ;;  %v802_v50 = vadd.f32 %v1688_v17, %v801_v48  ;;  %v930_v51 = vadd.f32 %v1688_v17, %v929_v49  ;;  %v803_v52 = vpop.f32.mrb[11].mxu0  ;;  %v931_v53 = vpop.f32.mrb[11].mxu1 }
 0x12f   : > { %1042 = vst [vmem:[%s1695_s9 + $0x28] sm:$0xff] %v802_v50  ;;  %1074 = vst [vmem:[%s1695_s9 + $0x128] sm:$0xff] %v930_v51 }
 0x132   : > { %v806_v54 = vpop.f32.mrb[12].mxu0  ;;  %v934_v55 = vpop.f32.mrb[12].mxu1 }
 0x133   : > { %v807_v56 = vadd.f32 %v1688_v17, %v806_v54  ;;  %v935_v57 = vadd.f32 %v1688_v17, %v934_v55  ;;  %v808_v58 = vpop.f32.mrb[13].mxu0  ;;  %v936_v59 = vpop.f32.mrb[13].mxu1 }
 0x134   : > { %v809_v60 = vpop.f32.mrb[14].mxu0  ;;  %v937_v61 = vpop.f32.mrb[14].mxu1 }
 0x135   : > { %1043 = vst [vmem:[%s1695_s9 + $0x30] sm:$0xff] %v807_v56  ;;  %1075 = vst [vmem:[%s1695_s9 + $0x130] sm:$0xff] %v935_v57  ;;  %v810_v62 = vadd.f32 %v1688_v17, %v809_v60  ;;  %v938_v63 = vadd.f32 %v1688_v17, %v937_v61  ;;  %v811_v0 = vpop.f32.mrb[15].mxu0  ;;  %v939_v1 = vpop.f32.mrb[15].mxu1 }
 0x137   : > { %1044 = vst [vmem:[%s1695_s9 + $0x38] sm:$0xff] %v810_v62  ;;  %1076 = vst [vmem:[%s1695_s9 + $0x138] sm:$0xff] %v938_v63 }
 0x13a   : > { %v814_v2 = vpop.f32.mrb[16].mxu0  ;;  %v942_v3 = vpop.f32.mrb[16].mxu1 }
 0x13b   : > { %v815_v4 = vadd.f32 %v1688_v17, %v814_v2  ;;  %v943_v5 = vadd.f32 %v1688_v17, %v942_v3  ;;  %v816_v6 = vpop.f32.mrb[17].mxu0  ;;  %v944_v7 = vpop.f32.mrb[17].mxu1 }
 0x13c   : > { %v817_v8 = vpop.f32.mrb[18].mxu0  ;;  %v945_v9 = vpop.f32.mrb[18].mxu1 }
 0x13d   : > { %1045 = vst [vmem:[%s1695_s9 + $0x40] sm:$0xff] %v815_v4  ;;  %1077 = vst [vmem:[%s1695_s9 + $0x140] sm:$0xff] %v943_v5  ;;  %v818_v10 = vadd.f32 %v1688_v17, %v817_v8  ;;  %v946_v11 = vadd.f32 %v1688_v17, %v945_v9  ;;  %v819_v12 = vpop.f32.mrb[19].mxu0  ;;  %v947_v13 = vpop.f32.mrb[19].mxu1 }
 0x13f   : > { %1046 = vst [vmem:[%s1695_s9 + $0x48] sm:$0xff] %v818_v10  ;;  %1078 = vst [vmem:[%s1695_s9 + $0x148] sm:$0xff] %v946_v11 }
 0x142   : > { %v822_v14 = vpop.f32.mrb[20].mxu0  ;;  %v950_v15 = vpop.f32.mrb[20].mxu1 }
 0x143   : > { %v823_v16 = vadd.f32 %v1688_v17, %v822_v14  ;;  %v951_v18 = vadd.f32 %v1688_v17, %v950_v15  ;;  %v824_v19 = vpop.f32.mrb[21].mxu0  ;;  %v952_v20 = vpop.f32.mrb[21].mxu1 }
 0x144   : > { %v825_v21 = vpop.f32.mrb[22].mxu0  ;;  %v953_v22 = vpop.f32.mrb[22].mxu1 }
 0x145   : > { %1047 = vst [vmem:[%s1695_s9 + $0x50] sm:$0xff] %v823_v16  ;;  %1079 = vst [vmem:[%s1695_s9 + $0x150] sm:$0xff] %v951_v18  ;;  %v826_v23 = vadd.f32 %v1688_v17, %v825_v21  ;;  %v954_v24 = vadd.f32 %v1688_v17, %v953_v22  ;;  %v827_v25 = vpop.f32.mrb[23].mxu0  ;;  %v955_v26 = vpop.f32.mrb[23].mxu1 }
 0x147   : > { %1048 = vst [vmem:[%s1695_s9 + $0x58] sm:$0xff] %v826_v23  ;;  %1080 = vst [vmem:[%s1695_s9 + $0x158] sm:$0xff] %v954_v24 }
 0x14a   : > { %v830_v27 = vpop.f32.mrb[24].mxu0  ;;  %v958_v28 = vpop.f32.mrb[24].mxu1 }
 0x14b   : > { %v831_v29 = vadd.f32 %v1688_v17, %v830_v27  ;;  %v959_v30 = vadd.f32 %v1688_v17, %v958_v28  ;;  %v832_v31 = vpop.f32.mrb[25].mxu0  ;;  %v960_v32 = vpop.f32.mrb[25].mxu1 }
 0x14c   : > { %v833_v33 = vpop.f32.mrb[26].mxu0  ;;  %v961_v34 = vpop.f32.mrb[26].mxu1 }
 0x14d   : > { %1049 = vst [vmem:[%s1695_s9 + $0x60] sm:$0xff] %v831_v29  ;;  %1081 = vst [vmem:[%s1695_s9 + $0x160] sm:$0xff] %v959_v30  ;;  %v834_v35 = vadd.f32 %v1688_v17, %v833_v33  ;;  %v962_v36 = vadd.f32 %v1688_v17, %v961_v34  ;;  %v835_v37 = vpop.f32.mrb[27].mxu0  ;;  %v963_v38 = vpop.f32.mrb[27].mxu1 }
 0x14f   : > { %1050 = vst [vmem:[%s1695_s9 + $0x68] sm:$0xff] %v834_v35  ;;  %1082 = vst [vmem:[%s1695_s9 + $0x168] sm:$0xff] %v962_v36 }
 0x152   : > { %v838_v39 = vpop.f32.mrb[28].mxu0  ;;  %v966_v40 = vpop.f32.mrb[28].mxu1 }
 0x153   : > { %v839_v41 = vadd.f32 %v1688_v17, %v838_v39  ;;  %v967_v42 = vadd.f32 %v1688_v17, %v966_v40  ;;  %v840_v43 = vpop.f32.mrb[29].mxu0  ;;  %v968_v44 = vpop.f32.mrb[29].mxu1 }
 0x154   : > { %v841_v45 = vpop.f32.mrb[30].mxu0  ;;  %v969_v46 = vpop.f32.mrb[30].mxu1 }
 0x155   : > { %1051 = vst [vmem:[%s1695_s9 + $0x70] sm:$0xff] %v839_v41  ;;  %1083 = vst [vmem:[%s1695_s9 + $0x170] sm:$0xff] %v967_v42  ;;  %v842_v47 = vadd.f32 %v1688_v17, %v841_v45  ;;  %v970_v48 = vadd.f32 %v1688_v17, %v969_v46  ;;  %v843_v49 = vpop.f32.mrb[31].mxu0  ;;  %v971_v50 = vpop.f32.mrb[31].mxu1 }
 0x157   : > { %1052 = vst [vmem:[%s1695_s9 + $0x78] sm:$0xff] %v842_v47  ;;  %1084 = vst [vmem:[%s1695_s9 + $0x178] sm:$0xff] %v970_v48 }
 0x15a   : > { %v846_v51 = vpop.f32.mrb[32].mxu0  ;;  %v974_v52 = vpop.f32.mrb[32].mxu1 }
 0x15b   : > { %v847_v53 = vadd.f32 %v1688_v17, %v846_v51  ;;  %v975_v54 = vadd.f32 %v1688_v17, %v974_v52  ;;  %v848_v55 = vpop.f32.mrb[33].mxu0  ;;  %v976_v56 = vpop.f32.mrb[33].mxu1 }
 0x15c   : > { %v849_v57 = vpop.f32.mrb[34].mxu0  ;;  %v977_v58 = vpop.f32.mrb[34].mxu1 }
 0x15d   : > { %1053 = vst [vmem:[%s1695_s9 + $0x80] sm:$0xff] %v847_v53  ;;  %1085 = vst [vmem:[%s1695_s9 + $0x180] sm:$0xff] %v975_v54  ;;  %v850_v59 = vadd.f32 %v1688_v17, %v849_v57  ;;  %v978_v60 = vadd.f32 %v1688_v17, %v977_v58  ;;  %v851_v61 = vpop.f32.mrb[35].mxu0  ;;  %v979_v62 = vpop.f32.mrb[35].mxu1 }
 0x15f   : > { %1054 = vst [vmem:[%s1695_s9 + $0x88] sm:$0xff] %v850_v59  ;;  %1086 = vst [vmem:[%s1695_s9 + $0x188] sm:$0xff] %v978_v60 }
 0x162   : > { %v854_v63 = vpop.f32.mrb[36].mxu0  ;;  %v982_v0 = vpop.f32.mrb[36].mxu1 }
 0x163   : > { %v855_v1 = vadd.f32 %v1688_v17, %v854_v63  ;;  %v983_v2 = vadd.f32 %v1688_v17, %v982_v0  ;;  %v856_v3 = vpop.f32.mrb[37].mxu0  ;;  %v984_v4 = vpop.f32.mrb[37].mxu1 }
 0x164   : > { %v857_v5 = vpop.f32.mrb[38].mxu0  ;;  %v985_v6 = vpop.f32.mrb[38].mxu1 }
 0x165   : > { %1055 = vst [vmem:[%s1695_s9 + $0x90] sm:$0xff] %v855_v1  ;;  %1087 = vst [vmem:[%s1695_s9 + $0x190] sm:$0xff] %v983_v2  ;;  %v858_v7 = vadd.f32 %v1688_v17, %v857_v5  ;;  %v986_v8 = vadd.f32 %v1688_v17, %v985_v6  ;;  %v859_v9 = vpop.f32.mrb[39].mxu0  ;;  %v987_v10 = vpop.f32.mrb[39].mxu1 }
 0x167   : > { %1056 = vst [vmem:[%s1695_s9 + $0x98] sm:$0xff] %v858_v7  ;;  %1088 = vst [vmem:[%s1695_s9 + $0x198] sm:$0xff] %v986_v8 }
 0x16a   : > { %v862_v11 = vpop.f32.mrb[40].mxu0  ;;  %v990_v12 = vpop.f32.mrb[40].mxu1 }
 0x16b   : > { %v863_v13 = vadd.f32 %v1688_v17, %v862_v11  ;;  %v991_v14 = vadd.f32 %v1688_v17, %v990_v12  ;;  %v864_v15 = vpop.f32.mrb[41].mxu0  ;;  %v992_v16 = vpop.f32.mrb[41].mxu1 }
 0x16c   : > { %v865_v18 = vpop.f32.mrb[42].mxu0  ;;  %v993_v19 = vpop.f32.mrb[42].mxu1 }
 0x16d   : > { %1057 = vst [vmem:[%s1695_s9 + $0xa0] sm:$0xff] %v863_v13  ;;  %1089 = vst [vmem:[%s1695_s9 + $0x1a0] sm:$0xff] %v991_v14  ;;  %v866_v20 = vadd.f32 %v1688_v17, %v865_v18  ;;  %v994_v21 = vadd.f32 %v1688_v17, %v993_v19  ;;  %v867_v22 = vpop.f32.mrb[43].mxu0  ;;  %v995_v23 = vpop.f32.mrb[43].mxu1 }
 0x16f   : > { %1058 = vst [vmem:[%s1695_s9 + $0xa8] sm:$0xff] %v866_v20  ;;  %1090 = vst [vmem:[%s1695_s9 + $0x1a8] sm:$0xff] %v994_v21 }
 0x172   : > { %v870_v24 = vpop.f32.mrb[44].mxu0  ;;  %v998_v25 = vpop.f32.mrb[44].mxu1 }
 0x173   : > { %v871_v26 = vadd.f32 %v1688_v17, %v870_v24  ;;  %v999_v27 = vadd.f32 %v1688_v17, %v998_v25  ;;  %v872_v28 = vpop.f32.mrb[45].mxu0  ;;  %v1000_v29 = vpop.f32.mrb[45].mxu1 }
 0x174   : > { %v873_v30 = vpop.f32.mrb[46].mxu0  ;;  %v1001_v31 = vpop.f32.mrb[46].mxu1 }
 0x175   : > { %1059 = vst [vmem:[%s1695_s9 + $0xb0] sm:$0xff] %v871_v26  ;;  %1091 = vst [vmem:[%s1695_s9 + $0x1b0] sm:$0xff] %v999_v27  ;;  %v874_v32 = vadd.f32 %v1688_v17, %v873_v30  ;;  %v1002_v33 = vadd.f32 %v1688_v17, %v1001_v31  ;;  %v875_v34 = vpop.f32.mrb[47].mxu0  ;;  %v1003_v35 = vpop.f32.mrb[47].mxu1 }
 0x177   : > { %1060 = vst [vmem:[%s1695_s9 + $0xb8] sm:$0xff] %v874_v32  ;;  %1092 = vst [vmem:[%s1695_s9 + $0x1b8] sm:$0xff] %v1002_v33 }
 0x17a   : > { %v878_v36 = vpop.f32.mrb[48].mxu0  ;;  %v1006_v37 = vpop.f32.mrb[48].mxu1 }
 0x17b   : > { %v879_v38 = vadd.f32 %v1688_v17, %v878_v36  ;;  %v1007_v39 = vadd.f32 %v1688_v17, %v1006_v37  ;;  %v880_v40 = vpop.f32.mrb[49].mxu0  ;;  %v1008_v41 = vpop.f32.mrb[49].mxu1 }
 0x17c   : > { %v881_v42 = vpop.f32.mrb[50].mxu0  ;;  %v1009_v43 = vpop.f32.mrb[50].mxu1 }
 0x17d   : > { %1061 = vst [vmem:[%s1695_s9 + $0xc0] sm:$0xff] %v879_v38  ;;  %1093 = vst [vmem:[%s1695_s9 + $0x1c0] sm:$0xff] %v1007_v39  ;;  %v882_v44 = vadd.f32 %v1688_v17, %v881_v42  ;;  %v1010_v45 = vadd.f32 %v1688_v17, %v1009_v43  ;;  %v883_v46 = vpop.f32.mrb[51].mxu0  ;;  %v1011_v47 = vpop.f32.mrb[51].mxu1 }
 0x17f   : > { %1062 = vst [vmem:[%s1695_s9 + $0xc8] sm:$0xff] %v882_v44  ;;  %1094 = vst [vmem:[%s1695_s9 + $0x1c8] sm:$0xff] %v1010_v45 }
 0x182   : > { %v886_v48 = vpop.f32.mrb[52].mxu0  ;;  %v1014_v49 = vpop.f32.mrb[52].mxu1 }
 0x183   : > { %v887_v50 = vadd.f32 %v1688_v17, %v886_v48  ;;  %v1015_v51 = vadd.f32 %v1688_v17, %v1014_v49  ;;  %v888_v52 = vpop.f32.mrb[53].mxu0  ;;  %v1016_v53 = vpop.f32.mrb[53].mxu1 }
 0x184   : > { %v889_v54 = vpop.f32.mrb[54].mxu0  ;;  %v1017_v55 = vpop.f32.mrb[54].mxu1 }
 0x185   : > { %1063 = vst [vmem:[%s1695_s9 + $0xd0] sm:$0xff] %v887_v50  ;;  %1095 = vst [vmem:[%s1695_s9 + $0x1d0] sm:$0xff] %v1015_v51  ;;  %v890_v56 = vadd.f32 %v1688_v17, %v889_v54  ;;  %v1018_v57 = vadd.f32 %v1688_v17, %v1017_v55  ;;  %v891_v58 = vpop.f32.mrb[55].mxu0  ;;  %v1019_v59 = vpop.f32.mrb[55].mxu1 }
 0x187   : > { %1064 = vst [vmem:[%s1695_s9 + $0xd8] sm:$0xff] %v890_v56  ;;  %1096 = vst [vmem:[%s1695_s9 + $0x1d8] sm:$0xff] %v1018_v57 }
 0x18a   : > { %v894_v60 = vpop.f32.mrb[56].mxu0  ;;  %v1022_v61 = vpop.f32.mrb[56].mxu1 }
 0x18b   : > { %v895_v62 = vadd.f32 %v1688_v17, %v894_v60  ;;  %v1023_v63 = vadd.f32 %v1688_v17, %v1022_v61  ;;  %v896_v0 = vpop.f32.mrb[57].mxu0  ;;  %v1024_v1 = vpop.f32.mrb[57].mxu1 }
 0x18c   : > { %v897_v2 = vpop.f32.mrb[58].mxu0  ;;  %v1025_v3 = vpop.f32.mrb[58].mxu1 }
 0x18d   : > { %1065 = vst [vmem:[%s1695_s9 + $0xe0] sm:$0xff] %v895_v62  ;;  %1097 = vst [vmem:[%s1695_s9 + $0x1e0] sm:$0xff] %v1023_v63  ;;  %v898_v4 = vadd.f32 %v1688_v17, %v897_v2  ;;  %v1026_v5 = vadd.f32 %v1688_v17, %v1025_v3  ;;  %v899_v6 = vpop.f32.mrb[59].mxu0  ;;  %v1027_v7 = vpop.f32.mrb[59].mxu1 }
 0x18f   : > { %1066 = vst [vmem:[%s1695_s9 + $0xe8] sm:$0xff] %v898_v4  ;;  %1098 = vst [vmem:[%s1695_s9 + $0x1e8] sm:$0xff] %v1026_v5 }
 0x192   : > { %v902_v8 = vpop.f32.mrb[60].mxu0  ;;  %v1030_v9 = vpop.f32.mrb[60].mxu1 }
 0x193   : > { %v903_v10 = vadd.f32 %v1688_v17, %v902_v8  ;;  %v1031_v11 = vadd.f32 %v1688_v17, %v1030_v9  ;;  %v904_v12 = vpop.f32.mrb[61].mxu0  ;;  %v1032_v13 = vpop.f32.mrb[61].mxu1 }
 0x194   : > { %v905_v14 = vpop.f32.mrb[62].mxu0  ;;  %v1033_v15 = vpop.f32.mrb[62].mxu1 }
 0x195   : > { %1067 = vst [vmem:[%s1695_s9 + $0xf0] sm:$0xff] %v903_v10  ;;  %1099 = vst [vmem:[%s1695_s9 + $0x1f0] sm:$0xff] %v1031_v11  ;;  %v906_v16 = vadd.f32 %v1688_v17, %v905_v14  ;;  %v1034_v18 = vadd.f32 %v1688_v17, %v1033_v15  ;;  %v907_v19 = vpop.f32.mrb[63].mxu0  ;;  %v1035_v20 = vpop.f32.mrb[63].mxu1 }
 0x197   : > { %1068 = vst [vmem:[%s1695_s9 + $0xf8] sm:$0xff] %v906_v16  ;;  %1100 = vst [vmem:[%s1695_s9 + $0x1f8] sm:$0xff] %v1034_v18 }
 0x198 PF: > { %s13_s14 = sadd.s32 1, %s1490_s14   ;;  %s1838_s12 = smov %s1486_s13 }
 0x199   : > { %p10_p5 = scmp.ge.s32.totalorder %s13_s14, 4   ;;  %s1839_s13 = smov %s1841_s15 }
 0x19b   :  { %12 = sbr.rel (!%p10_p5) target bundleno = 2 (0x2), region = 68 }

// kernel: _lambda_.65
= control target key start
LH: loop header
LB: loop body
LE: loop exit
PB: predicated region body
PF: predicated region fallthrough
CT: control target
= control target key end

     0   :  { %s158_s0 = inlined_call_operand.vmem [shape: f32[64,128], index: 0, kind: input, shape index: {}]   ;;  %s159_s1 = inlined_call_operand.vmem [shape: f32[64,128], index: 1, kind: input, shape index: {}]   ;;  %s160_s2 = inlined_call_operand.vmem [shape: f32[64,128], index: 2, kind: output, shape index: {}]  }
   0x1   :  { %v11_v0 = vld [vmem:[%s158_s0] sm:$0xff]  ;;  %v12_v2 = vld [vmem:[%s158_s0 + $0x8] sm:$0xff]  ;;  %v13_v5 = vld [vmem:[%s158_s0 + $0x10] sm:$0xff] }
   0x2   :  { %v19_v1 = vld [vmem:[%s159_s1] sm:$0xff]  ;;  %v20_v4 = vld [vmem:[%s159_s1 + $0x8] sm:$0xff]  ;;  %v21_v6 = vld [vmem:[%s159_s1 + $0x10] sm:$0xff] }
   0x3   :  { %v27_v3 = vadd.f32 %v19_v1, %v11_v0  ;;  %v28_v7 = vadd.f32 %v20_v4, %v12_v2  ;;  %v29_v8 = vadd.f32 %v21_v6, %v13_v5  ;;  %v14_v9 = vld [vmem:[%s158_s0 + $0x18] sm:$0xff]  ;;  %v15_v11 = vld [vmem:[%s158_s0 + $0x20] sm:$0xff]  ;;  %v16_v15 = vld [vmem:[%s158_s0 + $0x28] sm:$0xff] }
   0x4   :  { %v22_v10 = vld [vmem:[%s159_s1 + $0x18] sm:$0xff]  ;;  %v23_v14 = vld [vmem:[%s159_s1 + $0x20] sm:$0xff]  ;;  %v24_v16 = vld [vmem:[%s159_s1 + $0x28] sm:$0xff] }
   0x5   :  { %vm35_vm0 = vcmp.ge.f32.partialorder %v27_v3, 0.0  ;;  %v43_v12 = vmul.f32 0.01, %v27_v3  ;;  %v30_v13 = vadd.f32 %v22_v10, %v14_v9  ;;  %vm36_vm1 = vcmp.ge.f32.partialorder %v28_v7, 0.0  ;;  %v17_v22 = vld [vmem:[%s158_s0 + $0x30] sm:$0xff]  ;;  %v18_v24 = vld [vmem:[%s158_s0 + $0x38] sm:$0xff] }
   0x6   :  { %v44_v17 = vmul.f32 0.01, %v28_v7  ;;  %vm37_vm2 = vcmp.ge.f32.partialorder %v29_v8, 0.0  ;;  %v45_v18 = vmul.f32 0.01, %v29_v8  ;;  %v31_v21 = vadd.f32 %v23_v14, %v15_v11  ;;  %v25_v23 = vld [vmem:[%s159_s1 + $0x30] sm:$0xff] }
   0x7   :  { %v51_v19 = vsel %vm35_vm0, %v27_v3, %v43_v12  ;;  %vm38_vm3 = vcmp.ge.f32.partialorder %v30_v13, 0.0  ;;  %v46_v20 = vmul.f32 0.01, %v30_v13  ;;  %v32_v27 = vadd.f32 %v24_v16, %v16_v15  ;;  %v26_v29 = vld [vmem:[%s159_s1 + $0x38] sm:$0xff] }
   0x8   :  { %59 = vst [vmem:[%s160_s2] sm:$0xff] %v51_v19  ;;  %v52_v25 = vsel %vm36_vm1, %v28_v7, %v44_v17  ;;  %v53_v26 = vsel %vm37_vm2, %v29_v8, %v45_v18  ;;  %v33_v28 = vadd.f32 %v25_v23, %v17_v22  ;;  %vm39_vm4 = vcmp.ge.f32.partialorder %v31_v21, 0.0 }
   0x9   :  { %60 = vst [vmem:[%s160_s2 + $0x8] sm:$0xff] %v52_v25  ;;  %61 = vst [vmem:[%s160_s2 + $0x10] sm:$0xff] %v53_v26  ;;  %v54_v30 = vsel %vm38_vm3, %v30_v13, %v46_v20  ;;  %v47_v31 = vmul.f32 0.01, %v31_v21  ;;  %v34_v32 = vadd.f32 %v26_v29, %v18_v24  ;;  %vm40_vm5 = vcmp.ge.f32.partialorder %v32_v27, 0.0 }
   0xa   :  { %62 = vst [vmem:[%s160_s2 + $0x18] sm:$0xff] %v54_v30  ;;  %v48_v33 = vmul.f32 0.01, %v32_v27  ;;  %vm41_vm6 = vcmp.ge.f32.partialorder %v33_v28, 0.0  ;;  %v49_v34 = vmul.f32 0.01, %v33_v28 }
   0xb   :  { %v55_v35 = vsel %vm39_vm4, %v31_v21, %v47_v31  ;;  %vm42_vm7 = vcmp.ge.f32.partialorder %v34_v32, 0.0  ;;  %v50_v36 = vmul.f32 0.01, %v34_v32 }
   0xc   :  { %63 = vst [vmem:[%s160_s2 + $0x20] sm:$0xff] %v55_v35  ;;  %v56_v37 = vsel %vm40_vm5, %v32_v27, %v48_v33  ;;  %v57_v38 = vsel %vm41_vm6, %v33_v28, %v49_v34 }
   0xd   :  { %64 = vst [vmem:[%s160_s2 + $0x28] sm:$0xff] %v56_v37  ;;  %65 = vst [vmem:[%s160_s2 + $0x30] sm:$0xff] %v57_v38  ;;  %v58_v39 = vsel %vm42_vm7, %v34_v32, %v50_v36 }
   0xe   :  { %66 = vst [vmem:[%s160_s2 + $0x38] sm:$0xff] %v58_v39 }

// kernel: _lambda_.69
= control target key start
LH: loop header
LB: loop body
LE: loop exit
PB: predicated region body
PF: predicated region fallthrough
CT: control target
= control target key end

     0   :  { %s483_s1 = inlined_call_operand.vmem [shape: bf16[128,128], index: 1, kind: input, shape index: {}]   ;;  %s484_s0 = inlined_call_operand.vmem [shape: bf16[128,128], index: 0, kind: input, shape index: {}]   ;;  %s485_s2 = inlined_call_operand.vmem [shape: f32[1,128], index: 2, kind: input, shape index: {}]   ;;  %s486_s3 = inlined_call_operand.vmem [shape: f32[128,128], index: 3, kind: output, shape index: {}]  }
   0x1   :  { %v348_v0 = vld [vmem:[%s483_s1] sm:$0xff]   ;;  %v349_v1 = vld [vmem:[%s483_s1 + $0x8] sm:$0xff]   ;;  %v350_v2 = vld [vmem:[%s483_s1 + $0x10] sm:$0xff]  }
   0x2   :  { %300 = vmatprep.subr.bf16.mxu0 %v348_v0  ;;  %332 = vmatprep.subr.bf16.mxu1 %v348_v0  ;;  %v351_v3 = vld [vmem:[%s483_s1 + $0x18] sm:$0xff]   ;;  %v356_v4 = vld [vmem:[%s484_s0] sm:$0xff]   ;;  %v353_v7 = vld [vmem:[%s483_s1 + $0x28] sm:$0xff]  }
   0x3   :  { %301 = vmatpush3.bf16.msra.mxu0 %v348_v0  ;;  %340 = vmatpush3.bf16.msra.mxu1 %v348_v0  ;;  %v357_v5 = vld [vmem:[%s484_s0 + $0x20] sm:$0xff]   ;;  %v354_v8 = vld [vmem:[%s483_s1 + $0x30] sm:$0xff]   ;;  %v355_v9 = vld [vmem:[%s483_s1 + $0x38] sm:$0xff]  }
   0x4   :  { %302 = vmatprep.subr.bf16.mxu0 %v349_v1  ;;  %333 = vmatprep.subr.bf16.mxu1 %v349_v1  ;;  %v352_v6 = vld [vmem:[%s483_s1 + $0x20] sm:$0xff]   ;;  %v358_v10 = vld [vmem:[%s484_s0 + $0x8] sm:$0xff]   ;;  %v360_v12 = vld [vmem:[%s484_s0 + $0x10] sm:$0xff]  }
   0x5   :  { %316 = vmatprep.mubr.bf16.mxu0 %v356_v4  ;;  %324 = vmatprep.mubr.bf16.mxu1 %v357_v5  ;;  %v359_v11 = vld [vmem:[%s484_s0 + $0x28] sm:$0xff]   ;;  %v361_v13 = vld [vmem:[%s484_s0 + $0x30] sm:$0xff]   ;;  %v362_v14 = vld [vmem:[%s484_s0 + $0x18] sm:$0xff]  }
   0x6   :  { %v363_v15 = vld [vmem:[%s484_s0 + $0x38] sm:$0xff]   ;;  %v267_v16 = vld [vmem:[%s485_s2] ss:$0 sm:$0xff] }
   0x7   :  { %303 = vmatpush3.bf16.msra.mxu0 %v349_v1  ;;  %341 = vmatpush3.bf16.msra.mxu1 %v349_v1 }
   0x8   :  { %304 = vmatprep.subr.bf16.mxu0 %v350_v2  ;;  %334 = vmatprep.subr.bf16.mxu1 %v350_v2 }
   0xb   :  { %305 = vmatpush3.bf16.msra.mxu0 %v350_v2  ;;  %342 = vmatpush3.bf16.msra.mxu1 %v350_v2 }
   0xc   :  { %306 = vmatprep.subr.bf16.mxu0 %v351_v3  ;;  %335 = vmatprep.subr.bf16.mxu1 %v351_v3 }
   0xf   :  { %307 = vmatpush3.bf16.msra.mxu0 %v351_v3  ;;  %343 = vmatpush3.bf16.msra.mxu1 %v351_v3 }
  0x10   :  { %308 = vmatprep.subr.bf16.mxu0 %v352_v6  ;;  %336 = vmatprep.subr.bf16.mxu1 %v352_v6 }
  0x13   :  { %309 = vmatpush3.bf16.msra.mxu0 %v352_v6  ;;  %344 = vmatpush3.bf16.msra.mxu1 %v352_v6 }
  0x14   :  { %310 = vmatprep.subr.bf16.mxu0 %v353_v7  ;;  %337 = vmatprep.subr.bf16.mxu1 %v353_v7 }
  0x17   :  { %311 = vmatpush3.bf16.msra.mxu0 %v353_v7  ;;  %345 = vmatpush3.bf16.msra.mxu1 %v353_v7 }
  0x18   :  { %312 = vmatprep.subr.bf16.mxu0 %v354_v8  ;;  %338 = vmatprep.subr.bf16.mxu1 %v354_v8 }
  0x1b   :  { %313 = vmatpush3.bf16.msra.mxu0 %v354_v8  ;;  %346 = vmatpush3.bf16.msra.mxu1 %v354_v8 }
  0x1c   :  { %314 = vmatprep.subr.bf16.mxu0 %v355_v9  ;;  %339 = vmatprep.subr.bf16.mxu1 %v355_v9 }
  0x1f   :  { %315 = vmatpush3.bf16.msra.mxu0 %v355_v9  ;;  %347 = vmatpush3.bf16.msra.mxu1 %v355_v9 }
  0x22   :  { %317 = vmatmul.mubr.bf16.vlgmr.msra.gmra.mrb[0].mxu0 %v358_v10  ;;  %325 = vmatmul.mubr.bf16.vlgmr.msra.gmra.mrb[0].mxu1 %v359_v11 }
  0x23   :  { %320 = vmatprep.mubr.bf16.mxu0 %v360_v12  ;;  %328 = vmatprep.mubr.bf16.mxu1 %v361_v13 }
  0x2a   :  { %321 = vmatmul.mubr.bf16.gmra.mrb[4].mxu0 %v362_v14  ;;  %329 = vmatmul.mubr.bf16.gmra.mrb[4].mxu1 %v363_v15 }
  0xf5   :  { %v318_v17 = vpop.f32.mrb[0].mxu0  ;;  %v326_v18 = vpop.f32.mrb[0].mxu1 }
  0xf6   :  { %v193_v19 = vadd.f32 %v318_v17, %v267_v16  ;;  %v225_v20 = vadd.f32 %v326_v18, %v267_v16  ;;  %v184_v21 = vpop.f32.mrb[1].mxu0  ;;  %v216_v22 = vpop.f32.mrb[1].mxu1 }
  0xf7   :  { %v185_v23 = vadd.f32 %v267_v16, %v184_v21  ;;  %v217_v24 = vadd.f32 %v267_v16, %v216_v22  ;;  %v319_v25 = vpop.f32.mrb[2].mxu0  ;;  %v327_v26 = vpop.f32.mrb[2].mxu1 }
  0xf8   :  { %249 = vst [vmem:[%s486_s3 + $0x10] sm:$0xff] %v193_v19  ;;  %257 = vst [vmem:[%s486_s3 + $0x50] sm:$0xff] %v225_v20  ;;  %v196_v27 = vadd.f32 %v319_v25, %v267_v16  ;;  %v228_v28 = vadd.f32 %v327_v26, %v267_v16  ;;  %v187_v29 = vpop.f32.mrb[3].mxu0  ;;  %v219_v30 = vpop.f32.mrb[3].mxu1 }
  0xf9   :  { %247 = vst [vmem:[%s486_s3] sm:$0xff] %v185_v23  ;;  %255 = vst [vmem:[%s486_s3 + $0x40] sm:$0xff] %v217_v24  ;;  %v188_v31 = vadd.f32 %v267_v16, %v187_v29  ;;  %v220_v32 = vadd.f32 %v267_v16, %v219_v30 }
  0xfa   :  { %250 = vst [vmem:[%s486_s3 + $0x18] sm:$0xff] %v196_v27  ;;  %258 = vst [vmem:[%s486_s3 + $0x58] sm:$0xff] %v228_v28 }
  0xfb   :  { %248 = vst [vmem:[%s486_s3 + $0x8] sm:$0xff] %v188_v31  ;;  %256 = vst [vmem:[%s486_s3 + $0x48] sm:$0xff] %v220_v32 }
  0xfd   :  { %v322_v33 = vpop.f32.mrb[4].mxu0  ;;  %v330_v34 = vpop.f32.mrb[4].mxu1 }
  0xfe   :  { %v209_v35 = vadd.f32 %v322_v33, %v267_v16  ;;  %v241_v36 = vadd.f32 %v330_v34, %v267_v16  ;;  %v200_v37 = vpop.f32.mrb[5].mxu0  ;;  %v232_v38 = vpop.f32.mrb[5].mxu1 }
  0xff   :  { %v201_v39 = vadd.f32 %v267_v16, %v200_v37  ;;  %v233_v40 = vadd.f32 %v267_v16, %v232_v38  ;;  %v323_v41 = vpop.f32.mrb[6].mxu0  ;;  %v331_v42 = vpop.f32.mrb[6].mxu1 }
 0x100   :  { %253 = vst [vmem:[%s486_s3 + $0x30] sm:$0xff] %v209_v35  ;;  %261 = vst [vmem:[%s486_s3 + $0x70] sm:$0xff] %v241_v36  ;;  %v212_v43 = vadd.f32 %v323_v41, %v267_v16  ;;  %v244_v44 = vadd.f32 %v331_v42, %v267_v16  ;;  %v203_v45 = vpop.f32.mrb[7].mxu0  ;;  %v235_v46 = vpop.f32.mrb[7].mxu1 }
 0x101   :  { %251 = vst [vmem:[%s486_s3 + $0x20] sm:$0xff] %v201_v39  ;;  %259 = vst [vmem:[%s486_s3 + $0x60] sm:$0xff] %v233_v40  ;;  %v204_v47 = vadd.f32 %v267_v16, %v203_v45  ;;  %v236_v48 = vadd.f32 %v267_v16, %v235_v46 }
 0x102   :  { %254 = vst [vmem:[%s486_s3 + $0x38] sm:$0xff] %v212_v43  ;;  %262 = vst [vmem:[%s486_s3 + $0x78] sm:$0xff] %v244_v44 }
 0x103   :  { %252 = vst [vmem:[%s486_s3 + $0x28] sm:$0xff] %v204_v47  ;;  %260 = vst [vmem:[%s486_s3 + $0x68] sm:$0xff] %v236_v48 }

// kernel: _lambda_.66
= control target key start
LH: loop header
LB: loop body
LE: loop exit
PB: predicated region body
PF: predicated region fallthrough
CT: control target
= control target key end

     0   :  { %s701_s1 = inlined_call_operand.vmem [shape: bf16[256,128], index: 1, kind: input, shape index: {}]   ;;  %s702_s0 = inlined_call_operand.vmem [shape: bf16[128,256], index: 0, kind: input, shape index: {}]   ;;  %s703_s2 = inlined_call_operand.vmem [shape: f32[1,128], index: 2, kind: input, shape index: {}]   ;;  %s704_s3 = inlined_call_operand.vmem [shape: f32[128,128], index: 3, kind: output, shape index: {}]  }
   0x1   :  { %v476_v0 = vld [vmem:[%s701_s1 + $0x40] sm:$0xff]   ;;  %v478_v2 = vld [vmem:[%s701_s1 + $0x48] sm:$0xff]   ;;  %v480_v4 = vld [vmem:[%s701_s1 + $0x50] sm:$0xff]  }
   0x2   :  { %v477_v1 = vld [vmem:[%s701_s1] sm:$0xff]   ;;  %396 = vmatprep.subr.bf16.mxu0 %v476_v0  ;;  %460 = vmatprep.subr.bf16.mxu1 %v476_v0  ;;  %v479_v3 = vld [vmem:[%s701_s1 + $0x8] sm:$0xff]   ;;  %v481_v5 = vld [vmem:[%s701_s1 + $0x10] sm:$0xff]  }
   0x3   :  { %397 = vmatpush3.bf16.msra.mxu0 %v477_v1  ;;  %468 = vmatpush3.bf16.msra.mxu1 %v477_v1  ;;  %v482_v6 = vld [vmem:[%s701_s1 + $0x58] sm:$0xff]   ;;  %v484_v8 = vld [vmem:[%s701_s1 + $0x60] sm:$0xff]   ;;  %v486_v10 = vld [vmem:[%s701_s1 + $0x68] sm:$0xff]  }
   0x4   :  { %398 = vmatprep.subr.bf16.mxu0 %v478_v2  ;;  %461 = vmatprep.subr.bf16.mxu1 %v478_v2  ;;  %v483_v7 = vld [vmem:[%s701_s1 + $0x18] sm:$0xff]   ;;  %v485_v9 = vld [vmem:[%s701_s1 + $0x20] sm:$0xff]   ;;  %v487_v13 = vld [vmem:[%s701_s1 + $0x28] sm:$0xff]  }
   0x5   :  { %v494_v11 = vld [vmem:[%s702_s0 + $0x4] ss:$8 sps:$4 sm:$0xff]   ;;  %v488_v14 = vld [vmem:[%s701_s1 + $0x70] sm:$0xff]   ;;  %v490_v16 = vld [vmem:[%s701_s1 + $0x78] sm:$0xff]  }
   0x6   :  { %v497_v12 = vld [vmem:[%s702_s0 + $0x44] ss:$8 sps:$4 sm:$0xff]   ;;  %278 = vmatprep.mubr.bf16.mxu0 %v494_v11  ;;  %v489_v15 = vld [vmem:[%s701_s1 + $0x30] sm:$0xff]   ;;  %v491_v17 = vld [vmem:[%s701_s1 + $0x38] sm:$0xff]  }
   0x7   :  { %399 = vmatpush3.bf16.msra.mxu0 %v479_v3  ;;  %469 = vmatpush3.bf16.msra.mxu1 %v479_v3  ;;  %v492_v18 = vld [vmem:[%s702_s0] ss:$8 sps:$4 sm:$0xff]   ;;  %v498_v20 = vld [vmem:[%s702_s0 + $0x14] ss:$8 sps:$4 sm:$0xff]   ;;  %v502_v22 = vld [vmem:[%s702_s0 + $0x10] ss:$8 sps:$4 sm:$0xff]  }
   0x8   :  { %400 = vmatprep.subr.bf16.mxu0 %v480_v4  ;;  %462 = vmatprep.subr.bf16.mxu1 %v480_v4  ;;  %v495_v19 = vld [vmem:[%s702_s0 + $0x40] ss:$8 sps:$4 sm:$0xff]   ;;  %v500_v21 = vld [vmem:[%s702_s0 + $0x54] ss:$8 sps:$4 sm:$0xff]   ;;  %v503_v23 = vld [vmem:[%s702_s0 + $0x50] ss:$8 sps:$4 sm:$0xff]  }
   0x9   :  { %310 = vmatprep.mubr.bf16.mxu1 %v497_v12  ;;  %v504_v24 = vld [vmem:[%s702_s0 + $0x24] ss:$8 sps:$4 sm:$0xff]   ;;  %v508_v26 = vld [vmem:[%s702_s0 + $0x20] ss:$8 sps:$4 sm:$0xff]   ;;  %v510_v28 = vld [vmem:[%s702_s0 + $0x34] ss:$8 sps:$4 sm:$0xff]  }
   0xa   :  { %v506_v25 = vld [vmem:[%s702_s0 + $0x64] ss:$8 sps:$4 sm:$0xff]   ;;  %v509_v27 = vld [vmem:[%s702_s0 + $0x60] ss:$8 sps:$4 sm:$0xff]   ;;  %v512_v29 = vld [vmem:[%s702_s0 + $0x74] ss:$8 sps:$4 sm:$0xff]  }
   0xb   :  { %401 = vmatpush3.bf16.msra.mxu0 %v481_v5  ;;  %470 = vmatpush3.bf16.msra.mxu1 %v481_v5  ;;  %v514_v30 = vld [vmem:[%s702_s0 + $0x30] ss:$8 sps:$4 sm:$0xff]   ;;  %v635_v34 = vld [vmem:[%s703_s2] ss:$0 sm:$0xff] }
   0xc   :  { %402 = vmatprep.subr.bf16.mxu0 %v482_v6  ;;  %463 = vmatprep.subr.bf16.mxu1 %v482_v6  ;;  %v515_v31 = vld [vmem:[%s702_s0 + $0x70] ss:$8 sps:$4 sm:$0xff]  }
   0xf   :  { %403 = vmatpush3.bf16.msra.mxu0 %v483_v7  ;;  %471 = vmatpush3.bf16.msra.mxu1 %v483_v7 }
  0x10   :  { %404 = vmatprep.subr.bf16.mxu0 %v484_v8  ;;  %464 = vmatprep.subr.bf16.mxu1 %v484_v8 }
  0x13   :  { %405 = vmatpush3.bf16.msra.mxu0 %v485_v9  ;;  %472 = vmatpush3.bf16.msra.mxu1 %v485_v9 }
  0x14   :  { %406 = vmatprep.subr.bf16.mxu0 %v486_v10  ;;  %465 = vmatprep.subr.bf16.mxu1 %v486_v10 }
  0x17   :  { %407 = vmatpush3.bf16.msra.mxu0 %v487_v13  ;;  %473 = vmatpush3.bf16.msra.mxu1 %v487_v13 }
  0x18   :  { %408 = vmatprep.subr.bf16.mxu0 %v488_v14  ;;  %466 = vmatprep.subr.bf16.mxu1 %v488_v14 }
  0x1b   :  { %409 = vmatpush3.bf16.msra.mxu0 %v489_v15  ;;  %474 = vmatpush3.bf16.msra.mxu1 %v489_v15 }
  0x1c   :  { %410 = vmatprep.subr.bf16.mxu0 %v490_v16  ;;  %467 = vmatprep.subr.bf16.mxu1 %v490_v16 }
  0x1f   :  { %411 = vmatpush3.bf16.msra.mxu0 %v491_v17  ;;  %475 = vmatpush3.bf16.msra.mxu1 %v491_v17 }
  0x22   :  { %279 = vmatmul.mubr.bf16.vlgmr.msra.gmra.mrb[0].mxu0 %v492_v18  ;;  %311 = vmatmul.mubr.bf16.vlgmr.msra.gmra.mrb[0].mxu1 %v495_v19 }
  0x23   :  { %286 = vmatprep.mubr.bf16.mxu0 %v498_v20  ;;  %318 = vmatprep.mubr.bf16.mxu1 %v500_v21 }
  0x2a   :  { %287 = vmatmul.mubr.bf16.gmra.mrb[4].mxu0 %v502_v22  ;;  %319 = vmatmul.mubr.bf16.gmra.mrb[4].mxu1 %v503_v23 }
  0x2b   :  { %294 = vmatprep.mubr.bf16.mxu0 %v504_v24  ;;  %326 = vmatprep.mubr.bf16.mxu1 %v506_v25 }
  0x32   :  { %295 = vmatmul.mubr.bf16.gmra.mrb[8].mxu0 %v508_v26  ;;  %327 = vmatmul.mubr.bf16.gmra.mrb[8].mxu1 %v509_v27 }
  0x33   :  { %302 = vmatprep.mubr.bf16.mxu0 %v510_v28  ;;  %334 = vmatprep.mubr.bf16.mxu1 %v512_v29 }
  0x3a   :  { %303 = vmatmul.mubr.bf16.gmra.mrb[12].mxu0 %v514_v30  ;;  %335 = vmatmul.mubr.bf16.gmra.mrb[12].mxu1 %v515_v31 }
  0xf5   :  { %v412_v32 = vpop.f32.mrb[0].mxu0  ;;  %v436_v33 = vpop.f32.mrb[0].mxu1 }
  0xf6   :  { %v413_v35 = vpop.f32.mrb[1].mxu0  ;;  %v437_v36 = vpop.f32.mrb[1].mxu1 }
  0xf7   :  { %v414_v37 = vadd.f32 %v413_v35, %v412_v32  ;;  %v438_v38 = vadd.f32 %v437_v36, %v436_v33  ;;  %v415_v39 = vpop.f32.mrb[2].mxu0  ;;  %v439_v40 = vpop.f32.mrb[2].mxu1 }
  0xf8   :  { %v416_v41 = vpop.f32.mrb[3].mxu0  ;;  %v440_v42 = vpop.f32.mrb[3].mxu1 }
  0xf9   :  { %v281_v43 = vadd.f32 %v414_v37, %v635_v34  ;;  %v313_v44 = vadd.f32 %v438_v38, %v635_v34  ;;  %v417_v45 = vadd.f32 %v416_v41, %v415_v39  ;;  %v441_v46 = vadd.f32 %v440_v42, %v439_v40 }
  0xfb   :  { %343 = vst [vmem:[%s704_s3] sm:$0xff] %v281_v43  ;;  %351 = vst [vmem:[%s704_s3 + $0x40] sm:$0xff] %v313_v44  ;;  %v284_v47 = vadd.f32 %v417_v45, %v635_v34  ;;  %v316_v48 = vadd.f32 %v441_v46, %v635_v34 }
  0xfd   :  { %344 = vst [vmem:[%s704_s3 + $0x8] sm:$0xff] %v284_v47  ;;  %352 = vst [vmem:[%s704_s3 + $0x48] sm:$0xff] %v316_v48  ;;  %v418_v49 = vpop.f32.mrb[4].mxu0  ;;  %v442_v50 = vpop.f32.mrb[4].mxu1 }
  0xfe   :  { %v419_v51 = vpop.f32.mrb[5].mxu0  ;;  %v443_v52 = vpop.f32.mrb[5].mxu1 }
  0xff   :  { %v420_v53 = vadd.f32 %v419_v51, %v418_v49  ;;  %v444_v54 = vadd.f32 %v443_v52, %v442_v50  ;;  %v421_v55 = vpop.f32.mrb[6].mxu0  ;;  %v445_v56 = vpop.f32.mrb[6].mxu1 }
 0x100   :  { %v422_v57 = vpop.f32.mrb[7].mxu0  ;;  %v446_v58 = vpop.f32.mrb[7].mxu1 }
 0x101   :  { %v289_v59 = vadd.f32 %v420_v53, %v635_v34  ;;  %v321_v60 = vadd.f32 %v444_v54, %v635_v34  ;;  %v423_v61 = vadd.f32 %v422_v57, %v421_v55  ;;  %v447_v62 = vadd.f32 %v446_v58, %v445_v56 }
 0x103   :  { %345 = vst [vmem:[%s704_s3 + $0x10] sm:$0xff] %v289_v59  ;;  %353 = vst [vmem:[%s704_s3 + $0x50] sm:$0xff] %v321_v60  ;;  %v292_v63 = vadd.f32 %v423_v61, %v635_v34  ;;  %v324_v0 = vadd.f32 %v447_v62, %v635_v34 }
 0x105   :  { %346 = vst [vmem:[%s704_s3 + $0x18] sm:$0xff] %v292_v63  ;;  %354 = vst [vmem:[%s704_s3 + $0x58] sm:$0xff] %v324_v0  ;;  %v424_v1 = vpop.f32.mrb[8].mxu0  ;;  %v448_v2 = vpop.f32.mrb[8].mxu1 }
 0x106   :  { %v425_v3 = vpop.f32.mrb[9].mxu0  ;;  %v449_v4 = vpop.f32.mrb[9].mxu1 }
 0x107   :  { %v426_v5 = vadd.f32 %v425_v3, %v424_v1  ;;  %v450_v6 = vadd.f32 %v449_v4, %v448_v2  ;;  %v427_v7 = vpop.f32.mrb[10].mxu0  ;;  %v451_v8 = vpop.f32.mrb[10].mxu1 }
 0x108   :  { %v428_v9 = vpop.f32.mrb[11].mxu0  ;;  %v452_v10 = vpop.f32.mrb[11].mxu1 }
 0x109   :  { %v297_v11 = vadd.f32 %v426_v5, %v635_v34  ;;  %v329_v12 = vadd.f32 %v450_v6, %v635_v34  ;;  %v429_v13 = vadd.f32 %v428_v9, %v427_v7  ;;  %v453_v14 = vadd.f32 %v452_v10, %v451_v8 }
 0x10b   :  { %347 = vst [vmem:[%s704_s3 + $0x20] sm:$0xff] %v297_v11  ;;  %355 = vst [vmem:[%s704_s3 + $0x60] sm:$0xff] %v329_v12  ;;  %v300_v15 = vadd.f32 %v429_v13, %v635_v34  ;;  %v332_v16 = vadd.f32 %v453_v14, %v635_v34 }
 0x10d   :  { %348 = vst [vmem:[%s704_s3 + $0x28] sm:$0xff] %v300_v15  ;;  %356 = vst [vmem:[%s704_s3 + $0x68] sm:$0xff] %v332_v16  ;;  %v430_v17 = vpop.f32.mrb[12].mxu0  ;;  %v454_v18 = vpop.f32.mrb[12].mxu1 }
 0x10e   :  { %v431_v19 = vpop.f32.mrb[13].mxu0  ;;  %v455_v20 = vpop.f32.mrb[13].mxu1 }
 0x10f   :  { %v432_v21 = vadd.f32 %v431_v19, %v430_v17  ;;  %v456_v22 = vadd.f32 %v455_v20, %v454_v18  ;;  %v433_v23 = vpop.f32.mrb[14].mxu0  ;;  %v457_v24 = vpop.f32.mrb[14].mxu1 }
 0x110   :  { %v434_v25 = vpop.f32.mrb[15].mxu0  ;;  %v458_v26 = vpop.f32.mrb[15].mxu1 }
 0x111   :  { %v305_v27 = vadd.f32 %v432_v21, %v635_v34  ;;  %v337_v28 = vadd.f32 %v456_v22, %v635_v34  ;;  %v435_v29 = vadd.f32 %v434_v25, %v433_v23  ;;  %v459_v30 = vadd.f32 %v458_v26, %v457_v24 }
 0x113   :  { %349 = vst [vmem:[%s704_s3 + $0x30] sm:$0xff] %v305_v27  ;;  %357 = vst [vmem:[%s704_s3 + $0x70] sm:$0xff] %v337_v28  ;;  %v308_v31 = vadd.f32 %v435_v29, %v635_v34  ;;  %v340_v32 = vadd.f32 %v459_v30, %v635_v34 }
 0x115   :  { %350 = vst [vmem:[%s704_s3 + $0x38] sm:$0xff] %v308_v31  ;;  %358 = vst [vmem:[%s704_s3 + $0x78] sm:$0xff] %v340_v32 }

// kernel: _lambda_.67
= control target key start
LH: loop header
LB: loop body
LE: loop exit
PB: predicated region body
PF: predicated region fallthrough
CT: control target
= control target key end

     0   :  { %s44_s0 = inlined_call_operand.vmem [shape: f32[16,128], index: 0, kind: input, shape index: {}]   ;;  %s45_s1 = inlined_call_operand.vmem [shape: f32[16,128], index: 1, kind: output, shape index: {}]  }
   0x1   :  { %v8_v0 = vld [vmem:[%s44_s0] sm:$0xff]  ;;  %v9_v1 = vld [vmem:[%s44_s0 + $0x8] sm:$0xff] }
   0x2   :  { %vm10_vm0 = vcmp.ge.f32.partialorder %v8_v0, 0.0  ;;  %v12_v2 = vmul.f32 0.01, %v8_v0  ;;  %vm11_vm1 = vcmp.ge.f32.partialorder %v9_v1, 0.0  ;;  %v13_v3 = vmul.f32 0.01, %v9_v1 }
   0x4   :  { %v14_v4 = vsel %vm10_vm0, %v8_v0, %v12_v2  ;;  %v15_v5 = vsel %vm11_vm1, %v9_v1, %v13_v3 }
   0x5   :  { %16 = vst [vmem:[%s45_s1] sm:$0xff] %v14_v4  ;;  %17 = vst [vmem:[%s45_s1 + $0x8] sm:$0xff] %v15_v5 }

// kernel: _lambda_.68
= control target key start
LH: loop header
LB: loop body
LE: loop exit
PB: predicated region body
PF: predicated region fallthrough
CT: control target
= control target key end

     0   :  { %s1238_s1 = inlined_call_operand.vmem [shape: bf16[512,128], index: 1, kind: input, shape index: {}]   ;;  %s1239_s0 = inlined_call_operand.vmem [shape: bf16[128,512], index: 0, kind: input, shape index: {}]   ;;  %s1240_s2 = inlined_call_operand.vmem [shape: f32[1,128], index: 2, kind: input, shape index: {}]   ;;  %s1241_s3 = inlined_call_operand.vmem [shape: f32[128,128], index: 3, kind: output, shape index: {}]  }
   0x1   :  { %v877_v0 = vld [vmem:[%s1238_s1 + $0x40] sm:$0xff]   ;;  %v881_v4 = vld [vmem:[%s1238_s1 + $0x48] sm:$0xff]   ;;  %v885_v8 = vld [vmem:[%s1238_s1 + $0x50] sm:$0xff]  }
   0x2   :  { %v878_v1 = vld [vmem:[%s1238_s1 + $0xc0] sm:$0xff]   ;;  %749 = vmatprep.subr.bf16.mxu0 %v877_v0  ;;  %v882_v5 = vld [vmem:[%s1238_s1 + $0xc8] sm:$0xff]   ;;  %v886_v9 = vld [vmem:[%s1238_s1 + $0xd0] sm:$0xff]  }
   0x3   :  { %v879_v2 = vld [vmem:[%s1238_s1] sm:$0xff]   ;;  %813 = vmatprep.subr.bf16.mxu1 %v878_v1  ;;  %v883_v6 = vld [vmem:[%s1238_s1 + $0x8] sm:$0xff]   ;;  %v887_v10 = vld [vmem:[%s1238_s1 + $0x10] sm:$0xff]  }
   0x4   :  { %v880_v3 = vld [vmem:[%s1238_s1 + $0x80] sm:$0xff]   ;;  %750 = vmatpush3.bf16.msra.mxu0 %v879_v2  ;;  %v884_v7 = vld [vmem:[%s1238_s1 + $0x88] sm:$0xff]   ;;  %v888_v11 = vld [vmem:[%s1238_s1 + $0x90] sm:$0xff]  }
   0x5   :  { %814 = vmatpush3.bf16.msra.mxu1 %v880_v3  ;;  %751 = vmatprep.subr.bf16.mxu0 %v881_v4  ;;  %v889_v12 = vld [vmem:[%s1238_s1 + $0x58] sm:$0xff]   ;;  %v893_v16 = vld [vmem:[%s1238_s1 + $0x60] sm:$0xff]   ;;  %v897_v20 = vld [vmem:[%s1238_s1 + $0x68] sm:$0xff]  }
   0x6   :  { %815 = vmatprep.subr.bf16.mxu1 %v882_v5  ;;  %v890_v13 = vld [vmem:[%s1238_s1 + $0xd8] sm:$0xff]   ;;  %v894_v17 = vld [vmem:[%s1238_s1 + $0xe0] sm:$0xff]   ;;  %v898_v21 = vld [vmem:[%s1238_s1 + $0xe8] sm:$0xff]  }
   0x7   :  { %v891_v14 = vld [vmem:[%s1238_s1 + $0x18] sm:$0xff]   ;;  %v895_v18 = vld [vmem:[%s1238_s1 + $0x20] sm:$0xff]   ;;  %v899_v22 = vld [vmem:[%s1238_s1 + $0x28] sm:$0xff]  }
   0x8   :  { %752 = vmatpush3.bf16.msra.mxu0 %v883_v6  ;;  %v892_v15 = vld [vmem:[%s1238_s1 + $0x98] sm:$0xff]   ;;  %v896_v19 = vld [vmem:[%s1238_s1 + $0xa0] sm:$0xff]   ;;  %v900_v23 = vld [vmem:[%s1238_s1 + $0xa8] sm:$0xff]  }
   0x9   :  { %816 = vmatpush3.bf16.msra.mxu1 %v884_v7  ;;  %753 = vmatprep.subr.bf16.mxu0 %v885_v8  ;;  %v901_v24 = vld [vmem:[%s1238_s1 + $0x70] sm:$0xff]   ;;  %v905_v28 = vld [vmem:[%s1238_s1 + $0x78] sm:$0xff]   ;;  %v1172_v2 = vld [vmem:[%s1240_s2] ss:$0 sm:$0xff] }
   0xa   :  { %817 = vmatprep.subr.bf16.mxu1 %v886_v9  ;;  %v902_v25 = vld [vmem:[%s1238_s1 + $0xf0] sm:$0xff]   ;;  %v906_v29 = vld [vmem:[%s1238_s1 + $0xf8] sm:$0xff]  }
   0xb   :  { %v903_v26 = vld [vmem:[%s1238_s1 + $0x30] sm:$0xff]   ;;  %v907_v30 = vld [vmem:[%s1238_s1 + $0x38] sm:$0xff]  }
   0xc   :  { %754 = vmatpush3.bf16.msra.mxu0 %v887_v10  ;;  %v904_v27 = vld [vmem:[%s1238_s1 + $0xb0] sm:$0xff]   ;;  %v908_v31 = vld [vmem:[%s1238_s1 + $0xb8] sm:$0xff]  }
   0xd   :  { %818 = vmatpush3.bf16.msra.mxu1 %v888_v11  ;;  %755 = vmatprep.subr.bf16.mxu0 %v889_v12  ;;  %v909_v32 = vld [vmem:[%s1239_s0] ss:$16 sps:$4 sm:$0xff]   ;;  %v911_v33 = vld [vmem:[%s1239_s0 + $0x4] ss:$16 sps:$4 sm:$0xff]   ;;  %v912_v34 = vld [vmem:[%s1239_s0 + $0x8] ss:$16 sps:$4 sm:$0xff]  }
   0xe   :  { %819 = vmatprep.subr.bf16.mxu1 %v890_v13  ;;  %v914_v35 = vld [vmem:[%s1239_s0 + $0xc] ss:$16 sps:$4 sm:$0xff]   ;;  %502 = vmatprep.mubr.bf16.mxu0 %v911_v33  ;;  %v915_v36 = vld [vmem:[%s1239_s0 + $0x24] ss:$16 sps:$4 sm:$0xff]   ;;  %v919_v38 = vld [vmem:[%s1239_s0 + $0x20] ss:$16 sps:$4 sm:$0xff]  }
   0xf   :  { %599 = vmatprep.mubr.bf16.mxu1 %v914_v35  ;;  %v917_v37 = vld [vmem:[%s1239_s0 + $0x2c] ss:$16 sps:$4 sm:$0xff]   ;;  %v920_v39 = vld [vmem:[%s1239_s0 + $0x28] ss:$16 sps:$4 sm:$0xff]   ;;  %v921_v40 = vld [vmem:[%s1239_s0 + $0x44] ss:$16 sps:$4 sm:$0xff]  }
  0x10   :  { %756 = vmatpush3.bf16.msra.mxu0 %v891_v14  ;;  %v923_v41 = vld [vmem:[%s1239_s0 + $0x4c] ss:$16 sps:$4 sm:$0xff]   ;;  %v925_v42 = vld [vmem:[%s1239_s0 + $0x40] ss:$16 sps:$4 sm:$0xff]   ;;  %v926_v43 = vld [vmem:[%s1239_s0 + $0x48] ss:$16 sps:$4 sm:$0xff]  }
  0x11   :  { %820 = vmatpush3.bf16.msra.mxu1 %v892_v15  ;;  %757 = vmatprep.subr.bf16.mxu0 %v893_v16  ;;  %v927_v44 = vld [vmem:[%s1239_s0 + $0x64] ss:$16 sps:$4 sm:$0xff]   ;;  %v929_v45 = vld [vmem:[%s1239_s0 + $0x6c] ss:$16 sps:$4 sm:$0xff]   ;;  %v931_v46 = vld [vmem:[%s1239_s0 + $0x60] ss:$16 sps:$4 sm:$0xff]  }
  0x12   :  { %821 = vmatprep.subr.bf16.mxu1 %v894_v17  ;;  %v932_v47 = vld [vmem:[%s1239_s0 + $0x68] ss:$16 sps:$4 sm:$0xff]   ;;  %v933_v48 = vld [vmem:[%s1239_s0 + $0x84] ss:$16 sps:$4 sm:$0xff]   ;;  %v935_v49 = vld [vmem:[%s1239_s0 + $0x8c] ss:$16 sps:$4 sm:$0xff]  }
  0x13   :  { %v937_v50 = vld [vmem:[%s1239_s0 + $0x80] ss:$16 sps:$4 sm:$0xff]   ;;  %v938_v51 = vld [vmem:[%s1239_s0 + $0x88] ss:$16 sps:$4 sm:$0xff]   ;;  %v939_v52 = vld [vmem:[%s1239_s0 + $0xa4] ss:$16 sps:$4 sm:$0xff]  }
  0x14   :  { %758 = vmatpush3.bf16.msra.mxu0 %v895_v18  ;;  %v941_v53 = vld [vmem:[%s1239_s0 + $0xac] ss:$16 sps:$4 sm:$0xff]   ;;  %v943_v54 = vld [vmem:[%s1239_s0 + $0xa0] ss:$16 sps:$4 sm:$0xff]   ;;  %v944_v55 = vld [vmem:[%s1239_s0 + $0xa8] ss:$16 sps:$4 sm:$0xff]  }
  0x15   :  { %822 = vmatpush3.bf16.msra.mxu1 %v896_v19  ;;  %759 = vmatprep.subr.bf16.mxu0 %v897_v20  ;;  %v945_v56 = vld [vmem:[%s1239_s0 + $0xc4] ss:$16 sps:$4 sm:$0xff]   ;;  %v947_v57 = vld [vmem:[%s1239_s0 + $0xcc] ss:$16 sps:$4 sm:$0xff]   ;;  %v949_v58 = vld [vmem:[%s1239_s0 + $0xc0] ss:$16 sps:$4 sm:$0xff]  }
  0x16   :  { %823 = vmatprep.subr.bf16.mxu1 %v898_v21  ;;  %v950_v59 = vld [vmem:[%s1239_s0 + $0xc8] ss:$16 sps:$4 sm:$0xff]   ;;  %v951_v60 = vld [vmem:[%s1239_s0 + $0xe4] ss:$16 sps:$4 sm:$0xff]   ;;  %v953_v61 = vld [vmem:[%s1239_s0 + $0xec] ss:$16 sps:$4 sm:$0xff]  }
  0x17   :  { %v955_v62 = vld [vmem:[%s1239_s0 + $0xe0] ss:$16 sps:$4 sm:$0xff]   ;;  %v956_v63 = vld [vmem:[%s1239_s0 + $0xe8] ss:$16 sps:$4 sm:$0xff]  }
  0x18   :  { %760 = vmatpush3.bf16.msra.mxu0 %v899_v22 }
  0x19   :  { %824 = vmatpush3.bf16.msra.mxu1 %v900_v23  ;;  %761 = vmatprep.subr.bf16.mxu0 %v901_v24 }
  0x1a   :  { %825 = vmatprep.subr.bf16.mxu1 %v902_v25 }
  0x1c   :  { %762 = vmatpush3.bf16.msra.mxu0 %v903_v26 }
  0x1d   :  { %826 = vmatpush3.bf16.msra.mxu1 %v904_v27  ;;  %763 = vmatprep.subr.bf16.mxu0 %v905_v28 }
  0x1e   :  { %827 = vmatprep.subr.bf16.mxu1 %v906_v29 }
  0x20   :  { %764 = vmatpush3.bf16.msra.mxu0 %v907_v30 }
  0x21   :  { %828 = vmatpush3.bf16.msra.mxu1 %v908_v31 }
  0x23   :  { %503 = vmatmul.mubr.bf16.vlgmr.msra.gmra.mrb[0].mxu0 %v909_v32 }
  0x24   :  { %600 = vmatmul.mubr.bf16.vlgmr.msra.gmra.mrb[0].mxu1 %v912_v34  ;;  %510 = vmatprep.mubr.bf16.mxu0 %v915_v36 }
  0x25   :  { %607 = vmatprep.mubr.bf16.mxu1 %v917_v37 }
  0x2b   :  { %511 = vmatmul.mubr.bf16.gmra.mrb[4].mxu0 %v919_v38 }
  0x2c   :  { %608 = vmatmul.mubr.bf16.gmra.mrb[4].mxu1 %v920_v39  ;;  %518 = vmatprep.mubr.bf16.mxu0 %v921_v40 }
  0x2d   :  { %615 = vmatprep.mubr.bf16.mxu1 %v923_v41 }
  0x33   :  { %519 = vmatmul.mubr.bf16.gmra.mrb[8].mxu0 %v925_v42 }
  0x34   :  { %616 = vmatmul.mubr.bf16.gmra.mrb[8].mxu1 %v926_v43  ;;  %526 = vmatprep.mubr.bf16.mxu0 %v927_v44 }
  0x35   :  { %623 = vmatprep.mubr.bf16.mxu1 %v929_v45 }
  0x3b   :  { %527 = vmatmul.mubr.bf16.gmra.mrb[12].mxu0 %v931_v46 }
  0x3c   :  { %624 = vmatmul.mubr.bf16.gmra.mrb[12].mxu1 %v932_v47  ;;  %534 = vmatprep.mubr.bf16.mxu0 %v933_v48 }
  0x3d   :  { %631 = vmatprep.mubr.bf16.mxu1 %v935_v49 }
  0x43   :  { %535 = vmatmul.mubr.bf16.gmra.mrb[16].mxu0 %v937_v50 }
  0x44   :  { %632 = vmatmul.mubr.bf16.gmra.mrb[16].mxu1 %v938_v51  ;;  %542 = vmatprep.mubr.bf16.mxu0 %v939_v52 }
  0x45   :  { %639 = vmatprep.mubr.bf16.mxu1 %v941_v53 }
  0x4b   :  { %543 = vmatmul.mubr.bf16.gmra.mrb[20].mxu0 %v943_v54 }
  0x4c   :  { %640 = vmatmul.mubr.bf16.gmra.mrb[20].mxu1 %v944_v55  ;;  %550 = vmatprep.mubr.bf16.mxu0 %v945_v56 }
  0x4d   :  { %647 = vmatprep.mubr.bf16.mxu1 %v947_v57 }
  0x53   :  { %551 = vmatmul.mubr.bf16.gmra.mrb[24].mxu0 %v949_v58 }
  0x54   :  { %648 = vmatmul.mubr.bf16.gmra.mrb[24].mxu1 %v950_v59  ;;  %558 = vmatprep.mubr.bf16.mxu0 %v951_v60 }
  0x55   :  { %655 = vmatprep.mubr.bf16.mxu1 %v953_v61 }
  0x5b   :  { %559 = vmatmul.mubr.bf16.gmra.mrb[28].mxu0 %v955_v62 }
  0x5c   :  { %656 = vmatmul.mubr.bf16.gmra.mrb[28].mxu1 %v956_v63 }
  0xf6   :  { %v765_v0 = vpop.f32.mrb[0].mxu0 }
  0xf7   :  { %v829_v1 = vpop.f32.mrb[0].mxu1  ;;  %v766_v3 = vpop.f32.mrb[1].mxu0 }
  0xf8   :  { %v767_v4 = vadd.f32 %v766_v3, %v765_v0  ;;  %v830_v5 = vpop.f32.mrb[1].mxu1  ;;  %v768_v6 = vpop.f32.mrb[2].mxu0 }
  0xf9   :  { %v831_v7 = vadd.f32 %v830_v5, %v829_v1  ;;  %v832_v8 = vpop.f32.mrb[2].mxu1  ;;  %v769_v9 = vpop.f32.mrb[3].mxu0 }
  0xfa   :  { %v505_v10 = vadd.f32 %v767_v4, %v1172_v2  ;;  %v770_v11 = vadd.f32 %v769_v9, %v768_v6  ;;  %v833_v12 = vpop.f32.mrb[3].mxu1 }
  0xfb   :  { %v834_v13 = vadd.f32 %v833_v12, %v832_v8 }
  0xfc   :  { %v602_v14 = vadd.f32 %v831_v7, %v505_v10  ;;  %v508_v15 = vadd.f32 %v770_v11, %v1172_v2 }
  0xfe   :  { %664 = vst [vmem:[%s1241_s3] sm:$0xff] %v602_v14  ;;  %v605_v16 = vadd.f32 %v834_v13, %v508_v15  ;;  %v771_v17 = vpop.f32.mrb[4].mxu0 }
  0xff   :  { %v835_v18 = vpop.f32.mrb[4].mxu1  ;;  %v772_v19 = vpop.f32.mrb[5].mxu0 }
 0x100   :  { %665 = vst [vmem:[%s1241_s3 + $0x8] sm:$0xff] %v605_v16  ;;  %v773_v20 = vadd.f32 %v772_v19, %v771_v17  ;;  %v836_v21 = vpop.f32.mrb[5].mxu1  ;;  %v774_v22 = vpop.f32.mrb[6].mxu0 }
 0x101   :  { %v837_v23 = vadd.f32 %v836_v21, %v835_v18  ;;  %v838_v24 = vpop.f32.mrb[6].mxu1  ;;  %v775_v25 = vpop.f32.mrb[7].mxu0 }
 0x102   :  { %v513_v26 = vadd.f32 %v773_v20, %v1172_v2  ;;  %v776_v27 = vadd.f32 %v775_v25, %v774_v22  ;;  %v839_v28 = vpop.f32.mrb[7].mxu1 }
 0x103   :  { %v840_v29 = vadd.f32 %v839_v28, %v838_v24 }
 0x104   :  { %v610_v30 = vadd.f32 %v837_v23, %v513_v26  ;;  %v516_v31 = vadd.f32 %v776_v27, %v1172_v2 }
 0x106   :  { %666 = vst [vmem:[%s1241_s3 + $0x10] sm:$0xff] %v610_v30  ;;  %v613_v32 = vadd.f32 %v840_v29, %v516_v31  ;;  %v777_v33 = vpop.f32.mrb[8].mxu0 }
 0x107   :  { %v841_v34 = vpop.f32.mrb[8].mxu1  ;;  %v778_v35 = vpop.f32.mrb[9].mxu0 }
 0x108   :  { %667 = vst [vmem:[%s1241_s3 + $0x18] sm:$0xff] %v613_v32  ;;  %v779_v36 = vadd.f32 %v778_v35, %v777_v33  ;;  %v842_v37 = vpop.f32.mrb[9].mxu1  ;;  %v780_v38 = vpop.f32.mrb[10].mxu0 }
 0x109   :  { %v843_v39 = vadd.f32 %v842_v37, %v841_v34  ;;  %v844_v40 = vpop.f32.mrb[10].mxu1  ;;  %v781_v41 = vpop.f32.mrb[11].mxu0 }
 0x10a   :  { %v521_v42 = vadd.f32 %v779_v36, %v1172_v2  ;;  %v782_v43 = vadd.f32 %v781_v41, %v780_v38  ;;  %v845_v44 = vpop.f32.mrb[11].mxu1 }
 0x10b   :  { %v846_v45 = vadd.f32 %v845_v44, %v844_v40 }
 0x10c   :  { %v618_v46 = vadd.f32 %v843_v39, %v521_v42  ;;  %v524_v47 = vadd.f32 %v782_v43, %v1172_v2 }
 0x10e   :  { %668 = vst [vmem:[%s1241_s3 + $0x20] sm:$0xff] %v618_v46  ;;  %v621_v48 = vadd.f32 %v846_v45, %v524_v47  ;;  %v783_v49 = vpop.f32.mrb[12].mxu0 }
 0x10f   :  { %v847_v50 = vpop.f32.mrb[12].mxu1  ;;  %v784_v51 = vpop.f32.mrb[13].mxu0 }
 0x110   :  { %669 = vst [vmem:[%s1241_s3 + $0x28] sm:$0xff] %v621_v48  ;;  %v785_v52 = vadd.f32 %v784_v51, %v783_v49  ;;  %v848_v53 = vpop.f32.mrb[13].mxu1  ;;  %v786_v54 = vpop.f32.mrb[14].mxu0 }
 0x111   :  { %v849_v55 = vadd.f32 %v848_v53, %v847_v50  ;;  %v850_v56 = vpop.f32.mrb[14].mxu1  ;;  %v787_v57 = vpop.f32.mrb[15].mxu0 }
 0x112   :  { %v529_v58 = vadd.f32 %v785_v52, %v1172_v2  ;;  %v788_v59 = vadd.f32 %v787_v57, %v786_v54  ;;  %v851_v60 = vpop.f32.mrb[15].mxu1 }
 0x113   :  { %v852_v61 = vadd.f32 %v851_v60, %v850_v56 }
 0x114   :  { %v626_v62 = vadd.f32 %v849_v55, %v529_v58  ;;  %v532_v63 = vadd.f32 %v788_v59, %v1172_v2 }
 0x116   :  { %670 = vst [vmem:[%s1241_s3 + $0x30] sm:$0xff] %v626_v62  ;;  %v629_v0 = vadd.f32 %v852_v61, %v532_v63  ;;  %v789_v1 = vpop.f32.mrb[16].mxu0 }
 0x117   :  { %v853_v3 = vpop.f32.mrb[16].mxu1  ;;  %v790_v4 = vpop.f32.mrb[17].mxu0 }
 0x118   :  { %671 = vst [vmem:[%s1241_s3 + $0x38] sm:$0xff] %v629_v0  ;;  %v791_v5 = vadd.f32 %v790_v4, %v789_v1  ;;  %v854_v6 = vpop.f32.mrb[17].mxu1  ;;  %v792_v7 = vpop.f32.mrb[18].mxu0 }
 0x119   :  { %v855_v8 = vadd.f32 %v854_v6, %v853_v3  ;;  %v856_v9 = vpop.f32.mrb[18].mxu1  ;;  %v793_v10 = vpop.f32.mrb[19].mxu0 }
 0x11a   :  { %v537_v11 = vadd.f32 %v791_v5, %v1172_v2  ;;  %v794_v12 = vadd.f32 %v793_v10, %v792_v7  ;;  %v857_v13 = vpop.f32.mrb[19].mxu1 }
 0x11b   :  { %v858_v14 = vadd.f32 %v857_v13, %v856_v9 }
 0x11c   :  { %v634_v15 = vadd.f32 %v855_v8, %v537_v11  ;;  %v540_v16 = vadd.f32 %v794_v12, %v1172_v2 }
 0x11e   :  { %672 = vst [vmem:[%s1241_s3 + $0x40] sm:$0xff] %v634_v15  ;;  %v637_v17 = vadd.f32 %v858_v14, %v540_v16  ;;  %v795_v18 = vpop.f32.mrb[20].mxu0 }
 0x11f   :  { %v859_v19 = vpop.f32.mrb[20].mxu1  ;;  %v796_v20 = vpop.f32.mrb[21].mxu0 }
 0x120   :  { %673 = vst [vmem:[%s1241_s3 + $0x48] sm:$0xff] %v637_v17  ;;  %v797_v21 = vadd.f32 %v796_v20, %v795_v18  ;;  %v860_v22 = vpop.f32.mrb[21].mxu1  ;;  %v798_v23 = vpop.f32.mrb[22].mxu0 }
 0x121   :  { %v861_v24 = vadd.f32 %v860_v22, %v859_v19  ;;  %v862_v25 = vpop.f32.mrb[22].mxu1  ;;  %v799_v26 = vpop.f32.mrb[23].mxu0 }
 0x122   :  { %v545_v27 = vadd.f32 %v797_v21, %v1172_v2  ;;  %v800_v28 = vadd.f32 %v799_v26, %v798_v23  ;;  %v863_v29 = vpop.f32.mrb[23].mxu1 }
 0x123   :  { %v864_v30 = vadd.f32 %v863_v29, %v862_v25 }
 0x124   :  { %v642_v31 = vadd.f32 %v861_v24, %v545_v27  ;;  %v548_v32 = vadd.f32 %v800_v28, %v1172_v2 }
 0x126   :  { %674 = vst [vmem:[%s1241_s3 + $0x50] sm:$0xff] %v642_v31  ;;  %v645_v33 = vadd.f32 %v864_v30, %v548_v32  ;;  %v801_v34 = vpop.f32.mrb[24].mxu0 }
 0x127   :  { %v865_v35 = vpop.f32.mrb[24].mxu1  ;;  %v802_v36 = vpop.f32.mrb[25].mxu0 }
 0x128   :  { %675 = vst [vmem:[%s1241_s3 + $0x58] sm:$0xff] %v645_v33  ;;  %v803_v37 = vadd.f32 %v802_v36, %v801_v34  ;;  %v866_v38 = vpop.f32.mrb[25].mxu1  ;;  %v804_v39 = vpop.f32.mrb[26].mxu0 }
 0x129   :  { %v867_v40 = vadd.f32 %v866_v38, %v865_v35  ;;  %v868_v41 = vpop.f32.mrb[26].mxu1  ;;  %v805_v42 = vpop.f32.mrb[27].mxu0 }
 0x12a   :  { %v553_v43 = vadd.f32 %v803_v37, %v1172_v2  ;;  %v806_v44 = vadd.f32 %v805_v42, %v804_v39  ;;  %v869_v45 = vpop.f32.mrb[27].mxu1 }
 0x12b   :  { %v870_v46 = vadd.f32 %v869_v45, %v868_v41 }
 0x12c   :  { %v650_v47 = vadd.f32 %v867_v40, %v553_v43  ;;  %v556_v48 = vadd.f32 %v806_v44, %v1172_v2 }
 0x12e   :  { %676 = vst [vmem:[%s1241_s3 + $0x60] sm:$0xff] %v650_v47  ;;  %v653_v49 = vadd.f32 %v870_v46, %v556_v48  ;;  %v807_v50 = vpop.f32.mrb[28].mxu0 }
 0x12f   :  { %v871_v51 = vpop.f32.mrb[28].mxu1  ;;  %v808_v52 = vpop.f32.mrb[29].mxu0 }
 0x130   :  { %677 = vst [vmem:[%s1241_s3 + $0x68] sm:$0xff] %v653_v49  ;;  %v809_v53 = vadd.f32 %v808_v52, %v807_v50  ;;  %v872_v54 = vpop.f32.mrb[29].mxu1  ;;  %v810_v55 = vpop.f32.mrb[30].mxu0 }
 0x131   :  { %v873_v56 = vadd.f32 %v872_v54, %v871_v51  ;;  %v874_v57 = vpop.f32.mrb[30].mxu1  ;;  %v811_v58 = vpop.f32.mrb[31].mxu0 }
 0x132   :  { %v561_v59 = vadd.f32 %v809_v53, %v1172_v2  ;;  %v812_v60 = vadd.f32 %v811_v58, %v810_v55  ;;  %v875_v61 = vpop.f32.mrb[31].mxu1 }
 0x133   :  { %v876_v62 = vadd.f32 %v875_v61, %v874_v57 }
 0x134   :  { %v658_v63 = vadd.f32 %v873_v56, %v561_v59  ;;  %v564_v0 = vadd.f32 %v812_v60, %v1172_v2 }
 0x136   :  { %678 = vst [vmem:[%s1241_s3 + $0x70] sm:$0xff] %v658_v63  ;;  %v661_v1 = vadd.f32 %v876_v62, %v564_v0 }
 0x138   :  { %679 = vst [vmem:[%s1241_s3 + $0x78] sm:$0xff] %v661_v1 }

// kernel: _lambda_.70
= control target key start
LH: loop header
LB: loop body
LE: loop exit
PB: predicated region body
PF: predicated region fallthrough
CT: control target
= control target key end

     0   :  { %s62_s0 = inlined_call_operand.vmem [shape: f32[16,128], index: 0, kind: input, shape index: {}]   ;;  %s63_s1 = inlined_call_operand.vmem [shape: f32[16,128], index: 1, kind: input, shape index: {}]   ;;  %s64_s2 = inlined_call_operand.vmem [shape: f32[16,128], index: 2, kind: output, shape index: {}]  }
   0x1   :  { %v11_v0 = vld [vmem:[%s62_s0] sm:$0xff]  ;;  %v12_v2 = vld [vmem:[%s62_s0 + $0x8] sm:$0xff] }
   0x2   :  { %v13_v1 = vld [vmem:[%s63_s1] sm:$0xff]  ;;  %v14_v4 = vld [vmem:[%s63_s1 + $0x8] sm:$0xff] }
   0x3   :  { %v15_v3 = vadd.f32 %v13_v1, %v11_v0  ;;  %v16_v5 = vadd.f32 %v14_v4, %v12_v2 }
   0x5   :  { %vm17_vm0 = vcmp.ge.f32.partialorder %v15_v3, 0.0  ;;  %v19_v6 = vmul.f32 0.01, %v15_v3  ;;  %vm18_vm1 = vcmp.ge.f32.partialorder %v16_v5, 0.0  ;;  %v20_v7 = vmul.f32 0.01, %v16_v5 }
   0x7   :  { %v21_v8 = vsel %vm17_vm0, %v15_v3, %v19_v6  ;;  %v22_v9 = vsel %vm18_vm1, %v16_v5, %v20_v7 }
   0x8   :  { %23 = vst [vmem:[%s64_s2] sm:$0xff] %v21_v8  ;;  %24 = vst [vmem:[%s64_s2 + $0x8] sm:$0xff] %v22_v9 }

// kernel: _lambda_.74
= control target key start
LH: loop header
LB: loop body
LE: loop exit
PB: predicated region body
PF: predicated region fallthrough
CT: control target
= control target key end

     0   :  { %v191_v0 = vmov 0.0   ;;  %vm192_vm0 = vmmov 0   ;;  %s249_s1 = inlined_call_operand.vmem [shape: bf16[128,128], index: 1, kind: input, shape index: {}]   ;;  %s250_s0 = inlined_call_operand.vmem [shape: bf16[16,128], index: 0, kind: input, shape index: {}]   ;;  %s251_s2 = inlined_call_operand.vmem [shape: f32[1,128], index: 2, kind: input, shape index: {}]   ;;  %s252_s3 = inlined_call_operand.vmem [shape: f32[16,128], index: 3, kind: output, shape index: {}]  }
   0x1   :  { %160 = vmatprep.subr.bf16.mxu0 %v191_v0  ;;  %v182_v1 = vld [vmem:[%s249_s1] sm:$0xff]   ;;  %176 = vmatprep.mubr.msk.bf16.mxu0 %vm192_vm0, %v191_v0  ;;  %v183_v2 = vld [vmem:[%s249_s1 + $0x8] sm:$0xff]   ;;  %v184_v3 = vld [vmem:[%s249_s1 + $0x10] sm:$0xff]  }
   0x2   :  { %161 = vmatpush3.bf16.msra.mxu0 %v182_v1  ;;  %v185_v4 = vld [vmem:[%s249_s1 + $0x18] sm:$0xff]   ;;  %v186_v5 = vld [vmem:[%s249_s1 + $0x20] sm:$0xff]   ;;  %v187_v6 = vld [vmem:[%s249_s1 + $0x28] sm:$0xff]  }
   0x3   :  { %162 = vmatprep.subr.bf16.mxu0 %v191_v0  ;;  %v188_v7 = vld [vmem:[%s249_s1 + $0x30] sm:$0xff]   ;;  %v189_v8 = vld [vmem:[%s249_s1 + $0x38] sm:$0xff]   ;;  %v190_v9 = vld [vmem:[%s250_s0] sm:$0xff]  }
   0x4   :  { %v141_v10 = vld [vmem:[%s251_s2] ss:$0 sm:$0xff] }
   0x6   :  { %163 = vmatpush3.bf16.msra.mxu0 %v183_v2 }
   0x7   :  { %164 = vmatprep.subr.bf16.mxu0 %v191_v0 }
   0xa   :  { %165 = vmatpush3.bf16.msra.mxu0 %v184_v3 }
   0xb   :  { %166 = vmatprep.subr.bf16.mxu0 %v191_v0 }
   0xe   :  { %167 = vmatpush3.bf16.msra.mxu0 %v185_v4 }
   0xf   :  { %168 = vmatprep.subr.bf16.mxu0 %v191_v0 }
  0x12   :  { %169 = vmatpush3.bf16.msra.mxu0 %v186_v5 }
  0x13   :  { %170 = vmatprep.subr.bf16.mxu0 %v191_v0 }
  0x16   :  { %171 = vmatpush3.bf16.msra.mxu0 %v187_v6 }
  0x17   :  { %172 = vmatprep.subr.bf16.mxu0 %v191_v0 }
  0x1a   :  { %173 = vmatpush3.bf16.msra.mxu0 %v188_v7 }
  0x1b   :  { %174 = vmatprep.subr.bf16.mxu0 %v191_v0 }
  0x1e   :  { %175 = vmatpush3.bf16.msra.mxu0 %v189_v8 }
  0x21   :  { %177 = vmatmul.mubr.bf16.vlgmr.msra.gmra.mrb[0].mxu0 %v190_v9 }
  0xf4   :  { %v128_v11 = vpop.f32.mrb[0].mxu0 }
  0xf5   :  { %v129_v12 = vadd.f32 %v141_v10, %v128_v11  ;;  %v178_v13 = vpop.f32.mrb[1].mxu0 }
  0xf6   :  { %v131_v14 = vpop.f32.mrb[2].mxu0 }
  0xf7   :  { %135 = vst [vmem:[%s252_s3] sm:$0xff] %v129_v12  ;;  %v132_v15 = vadd.f32 %v141_v10, %v131_v14  ;;  %v179_v16 = vpop.f32.mrb[3].mxu0 }
  0xf9   :  { %136 = vst [vmem:[%s252_s3 + $0x8] sm:$0xff] %v132_v15 }

// kernel: _lambda_.71
= control target key start
LH: loop header
LB: loop body
LE: loop exit
PB: predicated region body
PF: predicated region fallthrough
CT: control target
= control target key end

     0   :  { %s646_s1 = inlined_call_operand.vmem [shape: bf16[512,128], index: 1, kind: input, shape index: {}]   ;;  %s647_s0 = inlined_call_operand.vmem [shape: bf16[16,512], index: 0, kind: input, shape index: {}]   ;;  %s648_s2 = inlined_call_operand.vmem [shape: f32[1,128], index: 2, kind: input, shape index: {}]   ;;  %s649_s3 = inlined_call_operand.vmem [shape: f32[16,128], index: 3, kind: output, shape index: {}]  }
   0x1   :  { %v471_v0 = vld [vmem:[%s646_s1 + $0x40] sm:$0xff]   ;;  %v475_v4 = vld [vmem:[%s646_s1 + $0x48] sm:$0xff]   ;;  %v479_v8 = vld [vmem:[%s646_s1 + $0x50] sm:$0xff]  }
   0x2   :  { %v472_v1 = vld [vmem:[%s646_s1 + $0xc0] sm:$0xff]   ;;  %427 = vmatprep.subr.bf16.mxu0 %v471_v0  ;;  %v476_v5 = vld [vmem:[%s646_s1 + $0xc8] sm:$0xff]   ;;  %v480_v9 = vld [vmem:[%s646_s1 + $0xd0] sm:$0xff]  }
   0x3   :  { %v473_v2 = vld [vmem:[%s646_s1] sm:$0xff]   ;;  %449 = vmatprep.subr.bf16.mxu1 %v472_v1  ;;  %v477_v6 = vld [vmem:[%s646_s1 + $0x8] sm:$0xff]   ;;  %v481_v10 = vld [vmem:[%s646_s1 + $0x10] sm:$0xff]  }
   0x4   :  { %v474_v3 = vld [vmem:[%s646_s1 + $0x80] sm:$0xff]   ;;  %428 = vmatpush3.bf16.msra.mxu0 %v473_v2  ;;  %v478_v7 = vld [vmem:[%s646_s1 + $0x88] sm:$0xff]   ;;  %v482_v11 = vld [vmem:[%s646_s1 + $0x90] sm:$0xff]  }
   0x5   :  { %450 = vmatpush3.bf16.msra.mxu1 %v474_v3  ;;  %429 = vmatprep.subr.bf16.mxu0 %v475_v4  ;;  %v483_v12 = vld [vmem:[%s646_s1 + $0x58] sm:$0xff]   ;;  %v487_v16 = vld [vmem:[%s646_s1 + $0x60] sm:$0xff]   ;;  %v491_v20 = vld [vmem:[%s646_s1 + $0x68] sm:$0xff]  }
   0x6   :  { %451 = vmatprep.subr.bf16.mxu1 %v476_v5  ;;  %v484_v13 = vld [vmem:[%s646_s1 + $0xd8] sm:$0xff]   ;;  %v488_v17 = vld [vmem:[%s646_s1 + $0xe0] sm:$0xff]   ;;  %v492_v21 = vld [vmem:[%s646_s1 + $0xe8] sm:$0xff]  }
   0x7   :  { %v485_v14 = vld [vmem:[%s646_s1 + $0x18] sm:$0xff]   ;;  %v489_v18 = vld [vmem:[%s646_s1 + $0x20] sm:$0xff]   ;;  %v493_v22 = vld [vmem:[%s646_s1 + $0x28] sm:$0xff]  }
   0x8   :  { %430 = vmatpush3.bf16.msra.mxu0 %v477_v6  ;;  %v486_v15 = vld [vmem:[%s646_s1 + $0x98] sm:$0xff]   ;;  %v490_v19 = vld [vmem:[%s646_s1 + $0xa0] sm:$0xff]   ;;  %v494_v23 = vld [vmem:[%s646_s1 + $0xa8] sm:$0xff]  }
   0x9   :  { %452 = vmatpush3.bf16.msra.mxu1 %v478_v7  ;;  %431 = vmatprep.subr.bf16.mxu0 %v479_v8  ;;  %v495_v24 = vld [vmem:[%s646_s1 + $0x70] sm:$0xff]   ;;  %v499_v28 = vld [vmem:[%s646_s1 + $0x78] sm:$0xff]   ;;  %v390_v38 = vld [vmem:[%s648_s2] ss:$0 sm:$0xff] }
   0xa   :  { %453 = vmatprep.subr.bf16.mxu1 %v480_v9  ;;  %v496_v25 = vld [vmem:[%s646_s1 + $0xf0] sm:$0xff]   ;;  %v500_v29 = vld [vmem:[%s646_s1 + $0xf8] sm:$0xff]  }
   0xb   :  { %v497_v26 = vld [vmem:[%s646_s1 + $0x30] sm:$0xff]   ;;  %v501_v30 = vld [vmem:[%s646_s1 + $0x38] sm:$0xff]  }
   0xc   :  { %432 = vmatpush3.bf16.msra.mxu0 %v481_v10  ;;  %v498_v27 = vld [vmem:[%s646_s1 + $0xb0] sm:$0xff]   ;;  %v502_v31 = vld [vmem:[%s646_s1 + $0xb8] sm:$0xff]  }
   0xd   :  { %454 = vmatpush3.bf16.msra.mxu1 %v482_v11  ;;  %433 = vmatprep.subr.bf16.mxu0 %v483_v12  ;;  %v503_v32 = vld [vmem:[%s647_s0] ss:$16 sps:$4 sm:$0xff]   ;;  %v505_v33 = vld [vmem:[%s647_s0 + $0x4] ss:$16 sps:$4 sm:$0xff]   ;;  %v506_v34 = vld [vmem:[%s647_s0 + $0x8] ss:$16 sps:$4 sm:$0xff]  }
   0xe   :  { %455 = vmatprep.subr.bf16.mxu1 %v484_v13  ;;  %v508_v35 = vld [vmem:[%s647_s0 + $0xc] ss:$16 sps:$4 sm:$0xff]   ;;  %334 = vmatprep.mubr.bf16.mxu0 %v505_v33 }
   0xf   :  { %375 = vmatprep.mubr.bf16.mxu1 %v508_v35 }
  0x10   :  { %434 = vmatpush3.bf16.msra.mxu0 %v485_v14 }
  0x11   :  { %456 = vmatpush3.bf16.msra.mxu1 %v486_v15  ;;  %435 = vmatprep.subr.bf16.mxu0 %v487_v16 }
  0x12   :  { %457 = vmatprep.subr.bf16.mxu1 %v488_v17 }
  0x14   :  { %436 = vmatpush3.bf16.msra.mxu0 %v489_v18 }
  0x15   :  { %458 = vmatpush3.bf16.msra.mxu1 %v490_v19  ;;  %437 = vmatprep.subr.bf16.mxu0 %v491_v20 }
  0x16   :  { %459 = vmatprep.subr.bf16.mxu1 %v492_v21 }
  0x18   :  { %438 = vmatpush3.bf16.msra.mxu0 %v493_v22 }
  0x19   :  { %460 = vmatpush3.bf16.msra.mxu1 %v494_v23  ;;  %439 = vmatprep.subr.bf16.mxu0 %v495_v24 }
  0x1a   :  { %461 = vmatprep.subr.bf16.mxu1 %v496_v25 }
  0x1c   :  { %440 = vmatpush3.bf16.msra.mxu0 %v497_v26 }
  0x1d   :  { %462 = vmatpush3.bf16.msra.mxu1 %v498_v27  ;;  %441 = vmatprep.subr.bf16.mxu0 %v499_v28 }
  0x1e   :  { %463 = vmatprep.subr.bf16.mxu1 %v500_v29 }
  0x20   :  { %442 = vmatpush3.bf16.msra.mxu0 %v501_v30 }
  0x21   :  { %464 = vmatpush3.bf16.msra.mxu1 %v502_v31 }
  0x23   :  { %335 = vmatmul.mubr.bf16.vlgmr.msra.gmra.mrb[0].mxu0 %v503_v32 }
  0x24   :  { %376 = vmatmul.mubr.bf16.vlgmr.msra.gmra.mrb[0].mxu1 %v506_v34 }
  0xf6   :  { %v443_v36 = vpop.f32.mrb[0].mxu0 }
  0xf7   :  { %v465_v37 = vpop.f32.mrb[0].mxu1  ;;  %v444_v39 = vpop.f32.mrb[1].mxu0 }
  0xf8   :  { %v445_v40 = vadd.f32 %v444_v39, %v443_v36  ;;  %v466_v41 = vpop.f32.mrb[1].mxu1  ;;  %v446_v42 = vpop.f32.mrb[2].mxu0 }
  0xf9   :  { %v467_v43 = vadd.f32 %v466_v41, %v465_v37  ;;  %v468_v44 = vpop.f32.mrb[2].mxu1  ;;  %v447_v45 = vpop.f32.mrb[3].mxu0 }
  0xfa   :  { %v337_v46 = vadd.f32 %v445_v40, %v390_v38  ;;  %v448_v47 = vadd.f32 %v447_v45, %v446_v42  ;;  %v469_v48 = vpop.f32.mrb[3].mxu1 }
  0xfb   :  { %v470_v49 = vadd.f32 %v469_v48, %v468_v44 }
  0xfc   :  { %v378_v50 = vadd.f32 %v467_v43, %v337_v46  ;;  %v340_v51 = vadd.f32 %v448_v47, %v390_v38 }
  0xfe   :  { %384 = vst [vmem:[%s649_s3] sm:$0xff] %v378_v50  ;;  %v381_v52 = vadd.f32 %v470_v49, %v340_v51 }
 0x100   :  { %385 = vst [vmem:[%s649_s3 + $0x8] sm:$0xff] %v381_v52 }

// kernel: _lambda_.72
= control target key start
LH: loop header
LB: loop body
LE: loop exit
PB: predicated region body
PF: predicated region fallthrough
CT: control target
= control target key end

     0   :  { %s33_s0 = inlined_call_operand.vmem [shape: f32[8,128], index: 0, kind: input, shape index: {}]   ;;  %s34_s1 = inlined_call_operand.vmem [shape: f32[8,128], index: 1, kind: output, shape index: {}]  }
   0x1   :  { %v8_v0 = vld [vmem:[%s33_s0] sm:$0xff] }
   0x2   :  { %vm9_vm0 = vcmp.ge.f32.partialorder %v8_v0, 0.0  ;;  %v10_v1 = vmul.f32 0.01, %v8_v0 }
   0x4   :  { %v11_v2 = vsel %vm9_vm0, %v8_v0, %v10_v1 }
   0x5   :  { %12 = vst [vmem:[%s34_s1] sm:$0xff] %v11_v2 }

// kernel: _lambda_.75
= control target key start
LH: loop header
LB: loop body
LE: loop exit
PB: predicated region body
PF: predicated region fallthrough
CT: control target
= control target key end

     0   :  { %s46_s0 = inlined_call_operand.vmem [shape: f32[8,128], index: 0, kind: input, shape index: {}]   ;;  %s47_s1 = inlined_call_operand.vmem [shape: f32[8,128], index: 1, kind: input, shape index: {}]   ;;  %s48_s2 = inlined_call_operand.vmem [shape: f32[8,128], index: 2, kind: output, shape index: {}]  }
   0x1   :  { %v11_v0 = vld [vmem:[%s46_s0] sm:$0xff] }
   0x2   :  { %v12_v1 = vld [vmem:[%s47_s1] sm:$0xff] }
   0x3   :  { %v13_v2 = vadd.f32 %v12_v1, %v11_v0 }
   0x5   :  { %vm14_vm0 = vcmp.ge.f32.partialorder %v13_v2, 0.0  ;;  %v15_v3 = vmul.f32 0.01, %v13_v2 }
   0x7   :  { %v16_v4 = vsel %vm14_vm0, %v13_v2, %v15_v3 }
   0x8   :  { %17 = vst [vmem:[%s48_s2] sm:$0xff] %v16_v4 }

// kernel: _lambda_.77
= control target key start
LH: loop header
LB: loop body
LE: loop exit
PB: predicated region body
PF: predicated region fallthrough
CT: control target
= control target key end

     0   :  { %s611_s15 = smov 0   ;;  %s646_s0 = inlined_call_operand.vmem [shape: f32[4,8,128], index: 0, kind: input, shape index: {}]   ;;  %s647_s1 = inlined_call_operand.vmem [shape: f32[4,8,128], index: 1, kind: input, shape index: {}]   ;;  %s648_s2 = inlined_call_operand.vmem [shape: f32[4,8,128], index: 2, kind: input, shape index: {}]   ;;  %s649_s3 = inlined_call_operand.vmem [shape: f32[4,1,1], index: 3, kind: input, shape index: {}]   ;;  %s650_s4 = inlined_call_operand.vmem [shape: f32[4,8,128], index: 4, kind: output, shape index: {}]  }
   0x1 LB: > { %s523_s16 = sadd.s32 4294967295, %s581_s15   ;;  %p527_p0 = scmp.ge.s32.totalorder %s581_s15, 1  ;;  %s581_s15 = sphi %s611_s15, %s14_s15  }
   0x2   : > { %p187_p1 = scmp.lt.s32.totalorder %s581_s15, 5 }
   0x4   : > { %p188_p2 = pnand %p527_p0, %p187_p1 }
   0x5   : > { %p222_p3 = scmp.lt.s32.totalorder (!%p188_p2), %s523_s16, 3  ;;  %v583_v4 = vmov (!%p188_p2), 0.0   ;;  %vm584_vm0 = vmmov (!%p188_p2), 0   ;;  %v585_v5 = vmov (!%p188_p2), 0   ;;  %vm351_vm5 = vcmask (!%p188_p2), 64512  }
   0x6   : > { %191 = sbr.rel (%p188_p2) target bundleno = 936 (0x3a8), region = 36  ;;  %540 = vmatprep.subr.mxu0 (!%p188_p2), %v583_v4  ;;  %545 = vmatprep.subr.mxu1 (!%p188_p2), %v583_v4 }
   0x7   : > { %542 = vmatprep.mubr.msk.f32.mxu0 (!%p188_p2), %vm584_vm0, %v583_v4  ;;  %547 = vmatprep.mubr.msk.f32.mxu1 (!%p188_p2), %vm584_vm0, %v583_v4 }
   0x8   : > { %561 = vset.pattern.permute.xlu1 (!%p188_p2), %v585_v5  ;;  %562 = vset.pattern.permute.xlu0 (!%p188_p2), %v585_v5 }
   0xd   : > { %s652_s16 = smov (!%p222_p3, %s523_s16), 3 }
   0xe   : > { %s619_s17 = sshll.u32 %s652_s16, 3  ;;  %s236_s26 = scalar_lea.vmem %s649_s3, %s652_s16 }
   0xf   : > { %s229_s20 = scalar_lea.vmem %s647_s1, %s619_s17  ;;  %s225_s23 = scalar_lea.vmem %s646_s0, %s619_s17  ;;  %v532_v6 = vld [vmem:[%s236_s26] ss:$0 sm:$0xff] }
  0x10   : > { %v242_v0 = vld [vmem:[%s229_s20] sm:$0xff]  ;;  %347 = vperm.xlu1 %561, %v532_v6   ;;  %s233_s29 = scalar_lea.vmem %s648_s2, %s619_s17  ;;  %s240_s6 = scalar_lea.vmem %s650_s4, %s619_s17 }
  0x11   : > { %v241_v1 = vld [vmem:[%s225_s23] sm:$0xff]  ;;  %v258_v2 = vmul.f32 %v242_v0, %v242_v0 }
  0x12   : > { %v245_v3 = vmul.f32 %v241_v1, %v241_v1  ;;  %v243_v35 = vld [vmem:[%s233_s29] sm:$0xff] }
  0x13   : > { %259 = vadd.xlane.f32.xlu0 %v258_v2  ;;  %546 = vmatpush3.msra.mxu1 %v243_v35 }
  0x17   : > { %246 = vadd.xlane.f32.xlu0 %v245_v3 }
  0x8f   : > { %v348_v25 = vpop.permute.xlu1 %347 }
  0xa0   : > { %v260_v7 = vpop.xlane.xlu0 %259 }
  0xa1   : > { %563 = vrsqrt.f32 %v260_v7  ;;  %vm263_vm1 = vcmp.eq.f32.partialorder %v260_v7, inf  ;;  %v266_v11 = vand.u32 2147483648, %v260_v7  ;;  %vm265_vm2 = vcmp.eq.f32.partialorder %v260_v7, 0.0 }
  0xa4   : > { %v247_v8 = vpop.xlane.xlu0 %246 }
  0xa5   : > { %565 = vrsqrt.f32 %v247_v8  ;;  %vm250_vm3 = vcmp.eq.f32.partialorder %v247_v8, inf  ;;  %v253_v17 = vand.u32 2147483648, %v247_v8  ;;  %vm252_vm4 = vcmp.eq.f32.partialorder %v247_v8, 0.0 }
  0xab   : > { %v564_v9 = vpop.eup %563 }
  0xac   : > { %v262_v10 = vmul.f32 %v564_v9, %v260_v7 }
  0xae   : > { %v264_v12 = vsel %vm263_vm1, %v260_v7, %v262_v10 }
  0xaf   : > { %v566_v13 = vpop.eup %565  ;;  %v267_v14 = vsel %vm265_vm2, %v266_v11, %v264_v12 }
  0xb0   : > { %v249_v15 = vmul.f32 %v566_v13, %v247_v8  ;;  %v268_v16 = vadd.f32 1e-06, %v267_v14 }
  0xb2   : > { %v251_v18 = vsel %vm250_vm3, %v247_v8, %v249_v15  ;;  %567 = vrcp.f32 %v268_v16 }
  0xb3   : > { %v254_v19 = vsel %vm252_vm4, %v253_v17, %v251_v18 }
  0xb4   : > { %v255_v20 = vadd.f32 1e-06, %v254_v19 }
  0xb6   : > { %569 = vrcp.f32 %v255_v20 }
  0xbc   : > { %v568_v21 = vpop.eup %567 }
  0xbd   : > { %v270_v22 = vmul.f32 %v568_v21, %v242_v0 }
  0xbf   : > { %541 = vmatpush3.xpose.msra.mxu0 %v270_v22 }
  0xc0   : > { %v570_v23 = vpop.eup %569 }
  0xc1   : > { %v257_v24 = vmul.f32 %v570_v23, %v241_v1 }
  0xc3   : > { %543 = vmatmul.mubr.f32.vlgmr.msra.gmra.mrb[0].mxu0 %v257_v24 }
 0x196   : > { %v337_v26 = vpop.f32.mrb[0].mxu0 }
 0x197   : > { %v350_v27 = vmul.f32 %v348_v25, %v337_v26  ;;  %v544_v28 = vpop.f32.mrb[1].mxu0 }
 0x199   : > { %v352_v29 = vsel %vm351_vm5, %v350_v27, -inf }
 0x19a   : > { %353 = vmax.xlane.f32.xlu1 %v352_v29 }
 0x227   : > { %v354_v30 = vpop.xlane.xlu1 %353 }
 0x228   : > { %v355_v31 = vsub.f32 %v350_v27, %v354_v30 }
 0x22a   : > { %v356_v32 = vmul.f32 1.442695, %v355_v31 }
 0x22c   : > { %571 = vpow2.f32 %v356_v32 }
 0x236   : > { %v572_v33 = vpop.eup %571 }
 0x237   : > { %v358_v34 = vsel %vm351_vm5, %v572_v33, 0.0 }
 0x238   : > { %359 = vadd.xlane.f32.xlu0 %v358_v34 }
 0x2c5   : > { %v360_v36 = vpop.xlane.xlu0 %359 }
 0x2c6   : > { %573 = vrcp.f32 %v360_v36 }
 0x2d0   : > { %v574_v37 = vpop.eup %573 }
 0x2d1   : > { %v362_v38 = vmul.f32 %v574_v37, %v572_v33 }
 0x2d3   : > { %548 = vmatmul.mubr.msk.f32.vlgmr.msra.gmra.mrb[0].mxu1 %vm351_vm5, %v362_v38 }
 0x3a6   : > { %v432_v39 = vpop.f32.mrb[0].mxu1 }
 0x3a7   : > { %436 = vst [vmem:[%s240_s6] sm:$0xff] %v432_v39  ;;  %v549_v40 = vpop.f32.mrb[1].mxu1 }
 0x3a8 PF: > { %s14_s15 = sadd.s32 1, %s581_s15  }
 0x3a9   : > { %p11_p4 = scmp.ge.s32.totalorder %s14_s15, 6  }
 0x3ab   :  { %13 = sbr.rel (!%p11_p4) target bundleno = 1 (0x1), region = 75 }

// kernel: _lambda_.83
= control target key start
LH: loop header
LB: loop body
LE: loop exit
PB: predicated region body
PF: predicated region fallthrough
CT: control target
= control target key end

     0   :  { %v911_v38 = vmov 0.0   ;;  %vm912_vm0 = vmmov 0   ;;  %s1131_s1 = inlined_call_operand.vmem [shape: bf16[896,128], index: 1, kind: input, shape index: {}]   ;;  %s1132_s0 = inlined_call_operand.vmem [shape: bf16[16,896], index: 0, kind: input, shape index: {}]   ;;  %s1133_s2 = inlined_call_operand.vmem [shape: f32[1,128], index: 2, kind: input, shape index: {}]   ;;  %s1134_s3 = inlined_call_operand.vmem [shape: f32[16,128], index: 3, kind: output, shape index: {}]  }
   0x1   :  { %v845_v0 = vld [vmem:[%s1131_s1 + $0x40] sm:$0xff]   ;;  %v849_v4 = vld [vmem:[%s1131_s1 + $0x48] sm:$0xff]   ;;  %v853_v8 = vld [vmem:[%s1131_s1 + $0x50] sm:$0xff]  }
   0x2   :  { %v846_v1 = vld [vmem:[%s1131_s1] sm:$0xff]   ;;  %748 = vmatprep.subr.bf16.mxu0 %v845_v0  ;;  %v850_v5 = vld [vmem:[%s1131_s1 + $0x8] sm:$0xff]   ;;  %v854_v9 = vld [vmem:[%s1131_s1 + $0x10] sm:$0xff]  }
   0x3   :  { %v847_v2 = vld [vmem:[%s1131_s1 + $0xc0] sm:$0xff]   ;;  %749 = vmatpush3.bf16.msra.mxu0 %v846_v1  ;;  %v851_v6 = vld [vmem:[%s1131_s1 + $0xc8] sm:$0xff]   ;;  %v855_v10 = vld [vmem:[%s1131_s1 + $0xd0] sm:$0xff]  }
   0x4   :  { %v848_v3 = vld [vmem:[%s1131_s1 + $0x80] sm:$0xff]   ;;  %770 = vmatprep.subr.bf16.mxu1 %v847_v2  ;;  %750 = vmatprep.subr.bf16.mxu0 %v849_v4  ;;  %v852_v7 = vld [vmem:[%s1131_s1 + $0x88] sm:$0xff]   ;;  %v856_v11 = vld [vmem:[%s1131_s1 + $0x90] sm:$0xff]  }
   0x5   :  { %771 = vmatpush3.bf16.msra.mxu1 %v848_v3  ;;  %v857_v12 = vld [vmem:[%s1131_s1 + $0x58] sm:$0xff]   ;;  %v861_v16 = vld [vmem:[%s1131_s1 + $0x60] sm:$0xff]   ;;  %v865_v20 = vld [vmem:[%s1131_s1 + $0x68] sm:$0xff]  }
   0x6   :  { %772 = vmatprep.subr.bf16.mxu1 %v851_v6  ;;  %v858_v13 = vld [vmem:[%s1131_s1 + $0x18] sm:$0xff]   ;;  %v862_v17 = vld [vmem:[%s1131_s1 + $0x20] sm:$0xff]   ;;  %v866_v21 = vld [vmem:[%s1131_s1 + $0x28] sm:$0xff]  }
   0x7   :  { %751 = vmatpush3.bf16.msra.mxu0 %v850_v5  ;;  %v859_v14 = vld [vmem:[%s1131_s1 + $0xd8] sm:$0xff]   ;;  %v863_v18 = vld [vmem:[%s1131_s1 + $0xe0] sm:$0xff]   ;;  %v867_v22 = vld [vmem:[%s1131_s1 + $0xe8] sm:$0xff]  }
   0x8   :  { %752 = vmatprep.subr.bf16.mxu0 %v853_v8  ;;  %v860_v15 = vld [vmem:[%s1131_s1 + $0x98] sm:$0xff]   ;;  %v864_v19 = vld [vmem:[%s1131_s1 + $0xa0] sm:$0xff]   ;;  %v868_v23 = vld [vmem:[%s1131_s1 + $0xa8] sm:$0xff]  }
   0x9   :  { %773 = vmatpush3.bf16.msra.mxu1 %v852_v7  ;;  %v869_v24 = vld [vmem:[%s1131_s1 + $0x70] sm:$0xff]   ;;  %v873_v28 = vld [vmem:[%s1131_s1 + $0x78] sm:$0xff]   ;;  %v878_v32 = vld [vmem:[%s1132_s0 + $0x4] ss:$28 sps:$4 sm:$0xff]  }
   0xa   :  { %774 = vmatprep.subr.bf16.mxu1 %v855_v10  ;;  %v870_v25 = vld [vmem:[%s1131_s1 + $0x30] sm:$0xff]   ;;  %v874_v29 = vld [vmem:[%s1131_s1 + $0x38] sm:$0xff]   ;;  %546 = vmatprep.mubr.bf16.mxu0 %v878_v32  ;;  %v880_v34 = vld [vmem:[%s1131_s1 + $0x140] sm:$0xff]  }
   0xb   :  { %753 = vmatpush3.bf16.msra.mxu0 %v854_v9  ;;  %v871_v26 = vld [vmem:[%s1131_s1 + $0xf0] sm:$0xff]   ;;  %v875_v30 = vld [vmem:[%s1131_s1 + $0xf8] sm:$0xff]   ;;  %v881_v35 = vld [vmem:[%s1132_s0 + $0x8] ss:$28 sps:$4 sm:$0xff]  }
   0xc   :  { %754 = vmatprep.subr.bf16.mxu0 %v857_v12  ;;  %v872_v27 = vld [vmem:[%s1131_s1 + $0xb0] sm:$0xff]   ;;  %v876_v31 = vld [vmem:[%s1132_s0] ss:$28 sps:$4 sm:$0xff]   ;;  %v883_v36 = vld [vmem:[%s1132_s0 + $0xc] ss:$28 sps:$4 sm:$0xff]  }
   0xd   :  { %775 = vmatpush3.bf16.msra.mxu1 %v856_v11  ;;  %v879_v33 = vld [vmem:[%s1131_s1 + $0xb8] sm:$0xff]   ;;  %v884_v37 = vld [vmem:[%s1131_s1 + $0x100] sm:$0xff]   ;;  %587 = vmatprep.mubr.bf16.mxu1 %v883_v36  ;;  %v886_v40 = vld [vmem:[%s1131_s1 + $0x148] sm:$0xff]  }
   0xe   :  { %776 = vmatprep.subr.bf16.mxu1 %v859_v14  ;;  %v885_v39 = vld [vmem:[%s1131_s1 + $0x180] sm:$0xff]   ;;  %v887_v41 = vld [vmem:[%s1131_s1 + $0x108] sm:$0xff]   ;;  %v889_v43 = vld [vmem:[%s1131_s1 + $0x150] sm:$0xff]  }
   0xf   :  { %755 = vmatpush3.bf16.msra.mxu0 %v858_v13  ;;  %v888_v42 = vld [vmem:[%s1131_s1 + $0x188] sm:$0xff]   ;;  %v890_v44 = vld [vmem:[%s1131_s1 + $0x110] sm:$0xff]   ;;  %v892_v46 = vld [vmem:[%s1131_s1 + $0x158] sm:$0xff]  }
  0x10   :  { %756 = vmatprep.subr.bf16.mxu0 %v861_v16  ;;  %v891_v45 = vld [vmem:[%s1131_s1 + $0x190] sm:$0xff]   ;;  %v893_v47 = vld [vmem:[%s1131_s1 + $0x118] sm:$0xff]   ;;  %v895_v49 = vld [vmem:[%s1131_s1 + $0x160] sm:$0xff]  }
  0x11   :  { %777 = vmatpush3.bf16.msra.mxu1 %v860_v15  ;;  %v894_v48 = vld [vmem:[%s1131_s1 + $0x198] sm:$0xff]   ;;  %v896_v50 = vld [vmem:[%s1131_s1 + $0x120] sm:$0xff]   ;;  %v898_v52 = vld [vmem:[%s1131_s1 + $0x168] sm:$0xff]  }
  0x12   :  { %778 = vmatprep.subr.bf16.mxu1 %v863_v18  ;;  %v897_v51 = vld [vmem:[%s1131_s1 + $0x1a0] sm:$0xff]   ;;  %v899_v53 = vld [vmem:[%s1131_s1 + $0x128] sm:$0xff]   ;;  %v901_v55 = vld [vmem:[%s1131_s1 + $0x170] sm:$0xff]  }
  0x13   :  { %757 = vmatpush3.bf16.msra.mxu0 %v862_v17  ;;  %v900_v54 = vld [vmem:[%s1131_s1 + $0x1a8] sm:$0xff]   ;;  %v902_v56 = vld [vmem:[%s1131_s1 + $0x130] sm:$0xff]   ;;  %v904_v59 = vld [vmem:[%s1131_s1 + $0x178] sm:$0xff]  }
  0x14   :  { %758 = vmatprep.subr.bf16.mxu0 %v865_v20  ;;  %v903_v57 = vld [vmem:[%s1131_s1 + $0x1b0] sm:$0xff]   ;;  %v905_v60 = vld [vmem:[%s1131_s1 + $0x138] sm:$0xff]   ;;  %v684_v1 = vld [vmem:[%s1133_s2] ss:$0 sm:$0xff] }
  0x15   :  { %779 = vmatpush3.bf16.msra.mxu1 %v864_v19  ;;  %v908_v58 = vld [vmem:[%s1132_s0 + $0x14] ss:$28 sps:$4 sm:$0xff]   ;;  %v909_v61 = vld [vmem:[%s1131_s1 + $0x1b8] sm:$0xff]  }
  0x16   :  { %780 = vmatprep.subr.bf16.mxu1 %v867_v22  ;;  %v906_v62 = vld [vmem:[%s1132_s0 + $0x10] ss:$28 sps:$4 sm:$0xff]   ;;  %v910_v63 = vld [vmem:[%s1132_s0 + $0x18] ss:$28 sps:$4 sm:$0xff]  }
  0x17   :  { %759 = vmatpush3.bf16.msra.mxu0 %v866_v21 }
  0x18   :  { %760 = vmatprep.subr.bf16.mxu0 %v869_v24 }
  0x19   :  { %781 = vmatpush3.bf16.msra.mxu1 %v868_v23 }
  0x1a   :  { %782 = vmatprep.subr.bf16.mxu1 %v871_v26 }
  0x1b   :  { %761 = vmatpush3.bf16.msra.mxu0 %v870_v25 }
  0x1c   :  { %762 = vmatprep.subr.bf16.mxu0 %v873_v28 }
  0x1d   :  { %783 = vmatpush3.bf16.msra.mxu1 %v872_v27 }
  0x1e   :  { %784 = vmatprep.subr.bf16.mxu1 %v875_v30 }
  0x1f   :  { %763 = vmatpush3.bf16.msra.mxu0 %v874_v29 }
  0x20   :  { %792 = vmatprep.subr.bf16.mxu0 %v880_v34 }
  0x21   :  { %785 = vmatpush3.bf16.msra.mxu1 %v879_v33 }
  0x22   :  { %547 = vmatmul.mubr.bf16.vlgmr.msra.gmra.mrb[0].mxu0 %v876_v31  ;;  %823 = vmatprep.subr.bf16.mxu1 %v911_v38 }
  0x23   :  { %793 = vmatpush3.bf16.msra.mxu0 %v884_v37  ;;  %628 = vmatprep.mubr.bf16.mxu0 %v908_v58 }
  0x24   :  { %588 = vmatmul.mubr.bf16.vlgmr.msra.gmra.mrb[0].mxu1 %v881_v35  ;;  %794 = vmatprep.subr.bf16.mxu0 %v886_v40 }
  0x25   :  { %824 = vmatpush3.bf16.msra.mxu1 %v885_v39  ;;  %839 = vmatprep.mubr.msk.bf16.mxu1 %vm912_vm0, %v911_v38 }
  0x26   :  { %825 = vmatprep.subr.bf16.mxu1 %v911_v38 }
  0x27   :  { %795 = vmatpush3.bf16.msra.mxu0 %v887_v41 }
  0x28   :  { %796 = vmatprep.subr.bf16.mxu0 %v889_v43 }
  0x29   :  { %826 = vmatpush3.bf16.msra.mxu1 %v888_v42 }
  0x2a   :  { %827 = vmatprep.subr.bf16.mxu1 %v911_v38 }
  0x2b   :  { %797 = vmatpush3.bf16.msra.mxu0 %v890_v44 }
  0x2c   :  { %798 = vmatprep.subr.bf16.mxu0 %v892_v46 }
  0x2d   :  { %828 = vmatpush3.bf16.msra.mxu1 %v891_v45 }
  0x2e   :  { %829 = vmatprep.subr.bf16.mxu1 %v911_v38 }
  0x2f   :  { %799 = vmatpush3.bf16.msra.mxu0 %v893_v47 }
  0x30   :  { %800 = vmatprep.subr.bf16.mxu0 %v895_v49 }
  0x31   :  { %830 = vmatpush3.bf16.msra.mxu1 %v894_v48 }
  0x32   :  { %831 = vmatprep.subr.bf16.mxu1 %v911_v38 }
  0x33   :  { %801 = vmatpush3.bf16.msra.mxu0 %v896_v50 }
  0x34   :  { %802 = vmatprep.subr.bf16.mxu0 %v898_v52 }
  0x35   :  { %832 = vmatpush3.bf16.msra.mxu1 %v897_v51 }
  0x36   :  { %833 = vmatprep.subr.bf16.mxu1 %v911_v38 }
  0x37   :  { %803 = vmatpush3.bf16.msra.mxu0 %v899_v53 }
  0x38   :  { %804 = vmatprep.subr.bf16.mxu0 %v901_v55 }
  0x39   :  { %834 = vmatpush3.bf16.msra.mxu1 %v900_v54 }
  0x3a   :  { %835 = vmatprep.subr.bf16.mxu1 %v911_v38 }
  0x3b   :  { %805 = vmatpush3.bf16.msra.mxu0 %v902_v56 }
  0x3c   :  { %806 = vmatprep.subr.bf16.mxu0 %v904_v59 }
  0x3d   :  { %836 = vmatpush3.bf16.msra.mxu1 %v903_v57 }
  0x3e   :  { %837 = vmatprep.subr.bf16.mxu1 %v911_v38 }
  0x3f   :  { %807 = vmatpush3.bf16.msra.mxu0 %v905_v60 }
  0x41   :  { %838 = vmatpush3.bf16.msra.mxu1 %v909_v61 }
  0x42   :  { %629 = vmatmul.mubr.bf16.vlgmr.msra.gmra.mrb[4].mxu0 %v906_v62 }
  0x44   :  { %840 = vmatmul.mubr.bf16.vlgmr.msra.gmra.mrb[4].mxu1 %v910_v63 }
  0xf5   :  { %v764_v0 = vpop.f32.mrb[0].mxu0 }
  0xf6   :  { %v765_v2 = vpop.f32.mrb[1].mxu0 }
  0xf7   :  { %v766_v3 = vadd.f32 %v765_v2, %v764_v0  ;;  %v767_v4 = vpop.f32.mrb[2].mxu0  ;;  %v786_v5 = vpop.f32.mrb[0].mxu1 }
  0xf8   :  { %v768_v6 = vpop.f32.mrb[3].mxu0  ;;  %v787_v9 = vpop.f32.mrb[1].mxu1 }
  0xf9   :  { %v549_v7 = vadd.f32 %v766_v3, %v684_v1  ;;  %v769_v8 = vadd.f32 %v768_v6, %v767_v4  ;;  %v788_v10 = vadd.f32 %v787_v9, %v786_v5  ;;  %v789_v11 = vpop.f32.mrb[2].mxu1 }
  0xfa   :  { %v790_v13 = vpop.f32.mrb[3].mxu1 }
  0xfb   :  { %v552_v12 = vadd.f32 %v769_v8, %v684_v1  ;;  %v590_v14 = vadd.f32 %v788_v10, %v549_v7  ;;  %v791_v15 = vadd.f32 %v790_v13, %v789_v11 }
  0xfd   :  { %v593_v16 = vadd.f32 %v791_v15, %v552_v12 }
 0x115   :  { %v808_v17 = vpop.f32.mrb[4].mxu0 }
 0x116   :  { %v809_v18 = vpop.f32.mrb[5].mxu0 }
 0x117   :  { %v671_v19 = vpop.f32.mrb[4].mxu1  ;;  %v810_v20 = vadd.f32 %v809_v18, %v808_v17  ;;  %v811_v21 = vpop.f32.mrb[6].mxu0 }
 0x118   :  { %v841_v22 = vpop.f32.mrb[5].mxu1  ;;  %v812_v23 = vpop.f32.mrb[7].mxu0 }
 0x119   :  { %v674_v24 = vpop.f32.mrb[6].mxu1  ;;  %v631_v25 = vadd.f32 %v810_v20, %v590_v14  ;;  %v813_v26 = vadd.f32 %v812_v23, %v811_v21 }
 0x11a   :  { %v842_v27 = vpop.f32.mrb[7].mxu1 }
 0x11b   :  { %v672_v28 = vadd.f32 %v671_v19, %v631_v25  ;;  %v634_v29 = vadd.f32 %v813_v26, %v593_v16 }
 0x11d   :  { %678 = vst [vmem:[%s1134_s3] sm:$0xff] %v672_v28  ;;  %v675_v30 = vadd.f32 %v674_v24, %v634_v29 }
 0x11f   :  { %679 = vst [vmem:[%s1134_s3 + $0x8] sm:$0xff] %v675_v30 }

// kernel: _lambda_.87
= control target key start
LH: loop header
LB: loop body
LE: loop exit
PB: predicated region body
PF: predicated region fallthrough
CT: control target
= control target key end

     0   :  { %s711_s15 = smov 0   ;;  %s764_s0 = inlined_call_operand.vmem [shape: f32[4,16,128], index: 0, kind: input, shape index: {}]   ;;  %s765_s1 = inlined_call_operand.vmem [shape: f32[4,16,128], index: 1, kind: input, shape index: {}]   ;;  %s766_s2 = inlined_call_operand.vmem [shape: f32[4,16,128], index: 2, kind: input, shape index: {}]   ;;  %s767_s3 = inlined_call_operand.vmem [shape: f32[4,1,1], index: 3, kind: input, shape index: {}]   ;;  %s768_s4 = inlined_call_operand.vmem [shape: f32[4,16,128], index: 4, kind: output, shape index: {}]  }
   0x1 LB: > { %s591_s16 = sadd.s32 4294967295, %s683_s15   ;;  %p595_p0 = scmp.ge.s32.totalorder %s683_s15, 1  ;;  %s683_s15 = sphi %s711_s15, %s14_s15  }
   0x2   : > { %p190_p1 = scmp.lt.s32.totalorder %s683_s15, 5 }
   0x4   : > { %p191_p2 = pnand %p595_p0, %p190_p1 }
   0x5   : > { %p229_p3 = scmp.lt.s32.totalorder (!%p191_p2), %s591_s16, 3  ;;  %v685_v8 = vmov (!%p191_p2), 0   ;;  %vm397_vm8 = vcmask (!%p191_p2), 130048  }
   0x6   : > { %194 = sbr.rel (%p191_p2) target bundleno = 952 (0x3b8), region = 36  ;;  %652 = vset.pattern.permute.xlu0 (!%p191_p2), %v685_v8 }
   0xd   : > { %s770_s16 = smov (!%p229_p3, %s591_s16), 3 }
   0xe   : > { %s719_s17 = sshll.u32 %s770_s16, 4  ;;  %s246_s26 = scalar_lea.vmem %s767_s3, %s770_s16 }
   0xf   : > { %s238_s20 = scalar_lea.vmem %s765_s1, %s719_s17  ;;  %s233_s23 = scalar_lea.vmem %s764_s0, %s719_s17  ;;  %v604_v9 = vld [vmem:[%s246_s26] ss:$0 sm:$0xff] }
  0x10   : > { %v729_v0 = vld [vmem:[%s238_s20] sm:$0xff]  ;;  %v731_v2 = vld [vmem:[%s238_s20 + $0x8] sm:$0xff]  ;;  %s243_s29 = scalar_lea.vmem %s766_s2, %s719_s17  ;;  %s251_s6 = scalar_lea.vmem %s768_s4, %s719_s17 }
  0x11   : > { %v252_v1 = vld [vmem:[%s233_s23] sm:$0xff]  ;;  %v285_v3 = vmul.f32 %v729_v0, %v729_v0  ;;  %v735_v5 = vld [vmem:[%s233_s23 + $0x8] sm:$0xff]  ;;  %v286_v6 = vmul.f32 %v731_v2, %v731_v2 }
  0x12   : > { %v259_v4 = vmul.f32 %v252_v1, %v252_v1  ;;  %v260_v7 = vmul.f32 %v735_v5, %v735_v5 }
  0x13   : > { %287 = vadd.xlane.f32.xlu0 %v285_v3 }
  0x14   : > { %261 = vadd.xlane.f32.xlu1 %v259_v4 }
  0x17   : > { %289 = vadd.xlane.f32.xlu0 %v286_v6 }
  0x18   : > { %263 = vadd.xlane.f32.xlu1 %v260_v7 }
  0x2d   : > { %392 = vperm.xlu0 %652, %v604_v9  }
  0xa0   : > { %v288_v10 = vpop.xlane.xlu0 %287 }
  0xa1   : > { %v262_v11 = vpop.xlane.xlu1 %261  ;;  %653 = vrsqrt.f32 %v288_v10  ;;  %vm293_vm0 = vcmp.eq.f32.partialorder %v288_v10, inf  ;;  %v296_v17 = vand.u32 2147483648, %v288_v10  ;;  %vm295_vm1 = vcmp.eq.f32.partialorder %v288_v10, 0.0 }
  0xa2   : > { %655 = vrsqrt.f32 %v262_v11  ;;  %vm267_vm2 = vcmp.eq.f32.partialorder %v262_v11, inf  ;;  %v270_v20 = vand.u32 2147483648, %v262_v11  ;;  %vm269_vm3 = vcmp.eq.f32.partialorder %v262_v11, 0.0 }
  0xa4   : > { %v290_v12 = vpop.xlane.xlu0 %289 }
  0xa5   : > { %v264_v13 = vpop.xlane.xlu1 %263  ;;  %657 = vrsqrt.f32 %v290_v12  ;;  %vm300_vm4 = vcmp.eq.f32.partialorder %v290_v12, inf  ;;  %v303_v28 = vand.u32 2147483648, %v290_v12  ;;  %vm302_vm5 = vcmp.eq.f32.partialorder %v290_v12, 0.0 }
  0xa6   : > { %659 = vrsqrt.f32 %v264_v13  ;;  %vm274_vm6 = vcmp.eq.f32.partialorder %v264_v13, inf  ;;  %v277_v35 = vand.u32 2147483648, %v264_v13  ;;  %vm276_vm7 = vcmp.eq.f32.partialorder %v264_v13, 0.0 }
  0xab   : > { %v654_v14 = vpop.eup %653 }
  0xac   : > { %v656_v15 = vpop.eup %655  ;;  %v292_v16 = vmul.f32 %v654_v14, %v288_v10  ;;  %v393_v47 = vpop.permute.xlu0 %392 }
  0xad   : > { %v266_v18 = vmul.f32 %v656_v15, %v262_v11 }
  0xae   : > { %v294_v19 = vsel %vm293_vm0, %v288_v10, %v292_v16 }
  0xaf   : > { %v658_v21 = vpop.eup %657  ;;  %v297_v22 = vsel %vm295_vm1, %v296_v17, %v294_v19  ;;  %v268_v23 = vsel %vm267_vm2, %v262_v11, %v266_v18 }
  0xb0   : > { %v660_v24 = vpop.eup %659  ;;  %v305_v25 = vadd.f32 1e-06, %v297_v22  ;;  %v299_v26 = vmul.f32 %v658_v21, %v290_v12  ;;  %v271_v27 = vsel %vm269_vm3, %v270_v20, %v268_v23 }
  0xb1   : > { %v273_v29 = vmul.f32 %v660_v24, %v264_v13  ;;  %v279_v30 = vadd.f32 1e-06, %v271_v27 }
  0xb2   : > { %v301_v31 = vsel %vm300_vm4, %v290_v12, %v299_v26 }
  0xb3   : > { %v304_v32 = vsel %vm302_vm5, %v303_v28, %v301_v31  ;;  %661 = vrcp.f32 %v279_v30  ;;  %v275_v34 = vsel %vm274_vm6, %v264_v13, %v273_v29 }
  0xb4   : > { %v306_v33 = vadd.f32 1e-06, %v304_v32  ;;  %663 = vrcp.f32 %v305_v25  ;;  %v278_v36 = vsel %vm276_vm7, %v277_v35, %v275_v34 }
  0xb5   : > { %v280_v37 = vadd.f32 1e-06, %v278_v36 }
  0xb6   : > { %665 = vrcp.f32 %v306_v33 }
  0xb7   : > { %667 = vrcp.f32 %v280_v37 }
  0xbd   : > { %v662_v38 = vpop.eup %661 }
  0xbe   : > { %v664_v39 = vpop.eup %663  ;;  %v282_v40 = vmul.f32 %v662_v38, %v252_v1  ;;  %v257_v1 = vld [vmem:[%s243_s29 + $0x8] sm:$0xff] }
  0xbf   : > { %v308_v42 = vmul.f32 %v664_v39, %v729_v0  ;;  %v256_v0 = vld [vmem:[%s243_s29] sm:$0xff] }
  0xc0   : > { %v666_v41 = vpop.eup %665  ;;  %625 = vmatprep.mubr.f32.mxu0 %v282_v40 }
  0xc1   : > { %v310_v43 = vmul.f32 %v666_v41, %v731_v2  ;;  %v668_v45 = vpop.eup %667  ;;  %v639_v2 = vpack.c.bf16 %v257_v1, %v256_v0 }
  0xc2   : > { %v284_v46 = vmul.f32 %v668_v45, %v735_v5 }
  0xc3   : > { %v635_v44 = vpack.c.bf16 %v310_v43, %v308_v42  ;;  %640 = vmatprep.subr.bf16.mxu1 %v639_v2 }
  0xc4   : > { %642 = vmatpush3.bf16.msra.mxu1 %v639_v2 }
  0xc5   : > { %636 = vmatprep.subr.bf16.mxu0 %v635_v44 }
  0xc6   : > { %638 = vmatpush3.bf16.xpose.msra.mxu0 %v635_v44 }
  0xcd   : > { %626 = vmatmul.mubr.f32.vlgmr.msra.gmra.mrb[0].mxu0 %v284_v46 }
 0x1a0   : > { %v627_v48 = vpop.f32.mrb[0].mxu0 }
 0x1a1   : > { %v377_v49 = vpop.f32.mrb[1].mxu0  ;;  %v396_v51 = vmul.f32 %v627_v48, %v393_v47 }
 0x1a2   : > { %v395_v50 = vmul.f32 %v393_v47, %v377_v49 }
 0x1a3   : > { %v401_v53 = vsel %vm397_vm8, %v396_v51, -inf }
 0x1a4   : > { %v398_v52 = vsel %vm397_vm8, %v395_v50, -inf }
 0x1a5   : > { %399 = vmax.xlane.f32.xlu1 %v398_v52 }
 0x1a9   : > { %402 = vmax.xlane.f32.xlu1 %v401_v53 }
 0x232   : > { %v400_v54 = vpop.xlane.xlu1 %399 }
 0x233   : > { %v404_v55 = vsub.f32 %v395_v50, %v400_v54 }
 0x235   : > { %v406_v56 = vmul.f32 1.442695, %v404_v55 }
 0x236   : > { %v403_v57 = vpop.xlane.xlu1 %402 }
 0x237   : > { %669 = vpow2.f32 %v406_v56  ;;  %v405_v58 = vsub.f32 %v396_v51, %v403_v57 }
 0x239   : > { %v408_v59 = vmul.f32 1.442695, %v405_v58 }
 0x23b   : > { %671 = vpow2.f32 %v408_v59 }
 0x241   : > { %v670_v60 = vpop.eup %669 }
 0x242   : > { %v410_v61 = vsel %vm397_vm8, %v670_v60, 0.0 }
 0x243   : > { %411 = vadd.xlane.f32.xlu1 %v410_v61 }
 0x245   : > { %v672_v62 = vpop.eup %671 }
 0x246   : > { %v413_v63 = vsel %vm397_vm8, %v672_v62, 0.0 }
 0x247   : > { %414 = vadd.xlane.f32.xlu1 %v413_v63 }
 0x2d0   : > { %v412_v3 = vpop.xlane.xlu1 %411 }
 0x2d1   : > { %673 = vrcp.f32 %v412_v3 }
 0x2d4   : > { %v415_v4 = vpop.xlane.xlu1 %414 }
 0x2d5   : > { %675 = vrcp.f32 %v415_v4 }
 0x2db   : > { %v674_v5 = vpop.eup %673 }
 0x2dc   : > { %v417_v6 = vmul.f32 %v674_v5, %v670_v60 }
 0x2de   : > { %632 = vmatprep.mubr.msk.f32.mxu1 %vm397_vm8, %v417_v6 }
 0x2df   : > { %v676_v7 = vpop.eup %675 }
 0x2e0   : > { %v419_v8 = vmul.f32 %v676_v7, %v672_v62 }
 0x2e2   : > { %633 = vmatmul.mubr.msk.f32.vlgmr.msra.gmra.mrb[0].mxu1 %vm397_vm8, %v419_v8 }
 0x3b5   : > { %v634_v9 = vpop.f32.mrb[0].mxu1 }
 0x3b6   : > { %502 = vst [vmem:[%s251_s6 + $0x8] sm:$0xff] %v634_v9  ;;  %v492_v10 = vpop.f32.mrb[1].mxu1 }
 0x3b7   : > { %501 = vst [vmem:[%s251_s6] sm:$0xff] %v492_v10 }
 0x3b8 PF: > { %s14_s15 = sadd.s32 1, %s683_s15  }
 0x3b9   : > { %p11_p4 = scmp.ge.s32.totalorder %s14_s15, 6  }
 0x3bb   :  { %13 = sbr.rel (!%p11_p4) target bundleno = 1 (0x1), region = 75 }

// kernel: _lambda_.112
= control target key start
LH: loop header
LB: loop body
LE: loop exit
PB: predicated region body
PF: predicated region fallthrough
CT: control target
= control target key end

     0   :  { %s2602_s12 = smov 0   ;;  %s2604_s13 = smov 0   ;;  %s3035_s0 = inlined_call_operand.vmem [shape: bf16[1024,512], index: 0, kind: input, shape index: {}]   ;;  %s3036_s1 = inlined_call_operand.vmem [shape: bf16[512,128], index: 1, kind: input, shape index: {}]   ;;  %s3037_s2 = inlined_call_operand.vmem [shape: f32[1,128], index: 2, kind: input, shape index: {}]   ;;  %s3038_s3 = inlined_call_operand.vmem [shape: f32[1024,128], index: 3, kind: output, shape index: {}]  }
   0x1   :  { %s2606_s14 = smov 0  }
   0x2 LB: > { %s25_s15 = sadd.s32 1, %s2575_s13  ;;  %p2010_p0 = scmp.ge.s32.totalorder %s2579_s14, 1  ;;  %s2579_s14 = sphi %s2606_s14, %s13_s14   ;;  %s2575_s13 = sphi %s2604_s13, %s3040_s13   ;;  %s2571_s12 = sphi %s2602_s12, %s3039_s12  }
   0x3   : > { %p27_p1 = scmp.ge.s32.totalorder %s25_s15, 2  ;;  %p170_p2 = scmp.lt.s32.totalorder %s2579_s14, 3 }
   0x5   : > { %s3042_s15 = smov (%p27_p1, %s25_s15), 0  ;;  %p171_p3 = pnand %p2010_p0, %p170_p2 }
   0x6   : > { %v2333_v0 = vld [vmem:[%s3036_s1] sm:$0xff] (!%p171_p3)   ;;  %v2581_v1 = vmov (!%p171_p3), 0   ;;  %v2335_v3 = vld [vmem:[%s3036_s1 + $0x8] sm:$0xff] (!%p171_p3)   ;;  %v2337_v5 = vld [vmem:[%s3036_s1 + $0x10] sm:$0xff] (!%p171_p3)   ;;  %s2011_s9 = sshll.u32 (!%p171_p3), %s2571_s12, 6 }
   0x7   : > { %174 = sbr.rel (%p171_p3) target bundleno = 538 (0x21a), region = 32  ;;  %1260 = vmatprep.subr.bf16.mxu1 (!%p171_p3), %v2581_v1  ;;  %1549 = vmatprep.subr.bf16.mxu0 (!%p171_p3), %v2581_v1  ;;  %v2334_v2 = vld [vmem:[%s3036_s1 + $0x80] sm:$0xff] (!%p171_p3)   ;;  %v2336_v4 = vld [vmem:[%s3036_s1 + $0x88] sm:$0xff] (!%p171_p3)   ;;  %v2338_v6 = vld [vmem:[%s3036_s1 + $0x90] sm:$0xff] (!%p171_p3)   ;;  %p206_p4 = scmp.lt.s32.totalorder (!%p171_p3), %s2011_s9, 127 }
   0x8   : > { %1261 = vmatpush1.bf16.msra.mxu1 (!%p171_p3), %v2333_v0  ;;  %1550 = vmatpush1.bf16.msra.mxu0 (!%p171_p3), %v2334_v2  ;;  %v2339_v7 = vld [vmem:[%s3036_s1 + $0x18] sm:$0xff] (!%p171_p3)   ;;  %v2341_v9 = vld [vmem:[%s3036_s1 + $0x20] sm:$0xff] (!%p171_p3)   ;;  %v2343_v11 = vld [vmem:[%s3036_s1 + $0x28] sm:$0xff] (!%p171_p3)  }
   0x9   : > { %1262 = vmatprep.subr.bf16.mxu1 (!%p171_p3), %v2581_v1  ;;  %1551 = vmatprep.subr.bf16.mxu0 (!%p171_p3), %v2581_v1  ;;  %v2340_v8 = vld [vmem:[%s3036_s1 + $0x98] sm:$0xff] (!%p171_p3)   ;;  %v2342_v10 = vld [vmem:[%s3036_s1 + $0xa0] sm:$0xff] (!%p171_p3)   ;;  %v2344_v12 = vld [vmem:[%s3036_s1 + $0xa8] sm:$0xff] (!%p171_p3)  }
   0xa   : > { %v2345_v13 = vld [vmem:[%s3036_s1 + $0x30] sm:$0xff] (!%p171_p3)   ;;  %v2347_v15 = vld [vmem:[%s3036_s1 + $0x38] sm:$0xff] (!%p171_p3)   ;;  %v2349_v17 = vld [vmem:[%s3036_s1 + $0x40] sm:$0xff] (!%p171_p3)  }
   0xb   : > { %v2346_v14 = vld [vmem:[%s3036_s1 + $0xb0] sm:$0xff] (!%p171_p3)   ;;  %v2348_v16 = vld [vmem:[%s3036_s1 + $0xb8] sm:$0xff] (!%p171_p3)   ;;  %v2350_v18 = vld [vmem:[%s3036_s1 + $0xc0] sm:$0xff] (!%p171_p3)  }
   0xc   : > { %1263 = vmatpush1.bf16.msra.mxu1 (!%p171_p3), %v2335_v3  ;;  %1552 = vmatpush1.bf16.msra.mxu0 (!%p171_p3), %v2336_v4  ;;  %v2351_v20 = vld [vmem:[%s3036_s1 + $0x48] sm:$0xff] (!%p171_p3)   ;;  %v2353_v23 = vld [vmem:[%s3036_s1 + $0x50] sm:$0xff] (!%p171_p3)   ;;  %v2355_v25 = vld [vmem:[%s3036_s1 + $0x58] sm:$0xff] (!%p171_p3)  }
   0xd   : > { %1264 = vmatprep.subr.bf16.mxu1 (!%p171_p3), %v2581_v1  ;;  %1553 = vmatprep.subr.bf16.mxu0 (!%p171_p3), %v2581_v1  ;;  %v2352_v22 = vld [vmem:[%s3036_s1 + $0xc8] sm:$0xff] (!%p171_p3)   ;;  %v2354_v24 = vld [vmem:[%s3036_s1 + $0xd0] sm:$0xff] (!%p171_p3)   ;;  %v2356_v26 = vld [vmem:[%s3036_s1 + $0xd8] sm:$0xff] (!%p171_p3)  }
   0xe   : > { %s3044_s9 = smov (!%p206_p4, %s2011_s9), 127  ;;  %v2357_v27 = vld [vmem:[%s3036_s1 + $0x60] sm:$0xff]   ;;  %v2359_v29 = vld [vmem:[%s3036_s1 + $0x68] sm:$0xff]   ;;  %v2361_v31 = vld [vmem:[%s3036_s1 + $0x70] sm:$0xff]  }
   0xf   : > { %s2179_s25 = sshll.u32 %s3044_s9, 4  ;;  %v2358_v28 = vld [vmem:[%s3036_s1 + $0xe0] sm:$0xff]   ;;  %v2360_v30 = vld [vmem:[%s3036_s1 + $0xe8] sm:$0xff]   ;;  %v2362_v32 = vld [vmem:[%s3036_s1 + $0xf0] sm:$0xff]   ;;  %s2015_s19 = sshll.u32 %s3044_s9, 3 }
  0x10   : > { %1265 = vmatpush1.bf16.msra.mxu1 %v2337_v5  ;;  %1554 = vmatpush1.bf16.msra.mxu0 %v2338_v6  ;;  %s2696_s30 = scalar_lea.vmem %s3035_s0, %s2179_s25  ;;  %v2363_v33 = vld [vmem:[%s3036_s1 + $0x78] sm:$0xff]   ;;  %s2880_s21 = scalar_lea.vmem %s3038_s3, %s2015_s19 }
  0x11   : > { %1266 = vmatprep.subr.bf16.mxu1 %v2581_v1  ;;  %1555 = vmatprep.subr.bf16.mxu0 %v2581_v1  ;;  %v2367_v19 = vld [vmem:[%s2696_s30 + $0x4] ss:$16 sps:$4 sm:$0xff]   ;;  %v2370_v21 = vld [vmem:[%s2696_s30 + $0xc] ss:$16 sps:$4 sm:$0xff]   ;;  %v2365_v35 = vld [vmem:[%s2696_s30] ss:$16 sps:$4 sm:$0xff]  }
  0x12   : > { %1292 = vmatprep.mubr.bf16.mxu1 %v2367_v19  ;;  %1581 = vmatprep.mubr.bf16.mxu0 %v2370_v21  ;;  %v2364_v34 = vld [vmem:[%s3036_s1 + $0xf8] sm:$0xff]   ;;  %v2371_v37 = vld [vmem:[%s2696_s30 + $0x24] ss:$16 sps:$4 sm:$0xff]   ;;  %v2375_v39 = vld [vmem:[%s2696_s30 + $0x20] ss:$16 sps:$4 sm:$0xff]  }
  0x13   : > { %v2368_v36 = vld [vmem:[%s2696_s30 + $0x8] ss:$16 sps:$4 sm:$0xff]   ;;  %v2373_v38 = vld [vmem:[%s2696_s30 + $0x2c] ss:$16 sps:$4 sm:$0xff]   ;;  %v2377_v41 = vld [vmem:[%s2696_s30 + $0x44] ss:$16 sps:$4 sm:$0xff]  }
  0x14   : > { %1267 = vmatpush1.bf16.msra.mxu1 %v2339_v7  ;;  %1556 = vmatpush1.bf16.msra.mxu0 %v2340_v8  ;;  %v2376_v40 = vld [vmem:[%s2696_s30 + $0x28] ss:$16 sps:$4 sm:$0xff]   ;;  %v2379_v42 = vld [vmem:[%s2696_s30 + $0x4c] ss:$16 sps:$4 sm:$0xff]   ;;  %v2381_v43 = vld [vmem:[%s2696_s30 + $0x40] ss:$16 sps:$4 sm:$0xff]  }
  0x15   : > { %1268 = vmatprep.subr.bf16.mxu1 %v2581_v1  ;;  %1557 = vmatprep.subr.bf16.mxu0 %v2581_v1  ;;  %v2382_v44 = vld [vmem:[%s2696_s30 + $0x48] ss:$16 sps:$4 sm:$0xff]   ;;  %v2383_v45 = vld [vmem:[%s2696_s30 + $0x64] ss:$16 sps:$4 sm:$0xff]   ;;  %v2385_v46 = vld [vmem:[%s2696_s30 + $0x6c] ss:$16 sps:$4 sm:$0xff]  }
  0x16   : > { %v2387_v47 = vld [vmem:[%s2696_s30 + $0x60] ss:$16 sps:$4 sm:$0xff]   ;;  %v2388_v48 = vld [vmem:[%s2696_s30 + $0x68] ss:$16 sps:$4 sm:$0xff]   ;;  %v2389_v49 = vld [vmem:[%s2696_s30 + $0x84] ss:$16 sps:$4 sm:$0xff]  }
  0x17   : > { %v2391_v50 = vld [vmem:[%s2696_s30 + $0x8c] ss:$16 sps:$4 sm:$0xff]   ;;  %v2393_v51 = vld [vmem:[%s2696_s30 + $0x80] ss:$16 sps:$4 sm:$0xff]   ;;  %v2394_v52 = vld [vmem:[%s2696_s30 + $0x88] ss:$16 sps:$4 sm:$0xff]  }
  0x18   : > { %1269 = vmatpush1.bf16.msra.mxu1 %v2341_v9  ;;  %1558 = vmatpush1.bf16.msra.mxu0 %v2342_v10  ;;  %v2395_v53 = vld [vmem:[%s2696_s30 + $0xa4] ss:$16 sps:$4 sm:$0xff]   ;;  %v2397_v54 = vld [vmem:[%s2696_s30 + $0xac] ss:$16 sps:$4 sm:$0xff]   ;;  %v2399_v55 = vld [vmem:[%s2696_s30 + $0xa0] ss:$16 sps:$4 sm:$0xff]  }
  0x19   : > { %1270 = vmatprep.subr.bf16.mxu1 %v2581_v1  ;;  %1559 = vmatprep.subr.bf16.mxu0 %v2581_v1  ;;  %v2400_v56 = vld [vmem:[%s2696_s30 + $0xa8] ss:$16 sps:$4 sm:$0xff]   ;;  %v2401_v57 = vld [vmem:[%s2696_s30 + $0xc4] ss:$16 sps:$4 sm:$0xff]   ;;  %v2403_v58 = vld [vmem:[%s2696_s30 + $0xcc] ss:$16 sps:$4 sm:$0xff]  }
  0x1a   : > { %v2405_v59 = vld [vmem:[%s2696_s30 + $0xc0] ss:$16 sps:$4 sm:$0xff]   ;;  %v2406_v60 = vld [vmem:[%s2696_s30 + $0xc8] ss:$16 sps:$4 sm:$0xff]   ;;  %v2407_v61 = vld [vmem:[%s2696_s30 + $0xe4] ss:$16 sps:$4 sm:$0xff]  }
  0x1b   : > { %v2409_v62 = vld [vmem:[%s2696_s30 + $0xec] ss:$16 sps:$4 sm:$0xff]   ;;  %v2411_v63 = vld [vmem:[%s2696_s30 + $0xe0] ss:$16 sps:$4 sm:$0xff]   ;;  %v2412_v0 = vld [vmem:[%s2696_s30 + $0xe8] ss:$16 sps:$4 sm:$0xff]  }
  0x1c   : > { %1271 = vmatpush1.bf16.msra.mxu1 %v2343_v11  ;;  %1560 = vmatpush1.bf16.msra.mxu0 %v2344_v12  ;;  %v2415_v2 = vld [vmem:[%s2696_s30 + $0x10c] ss:$16 sps:$4 sm:$0xff]   ;;  %v2417_v3 = vld [vmem:[%s2696_s30 + $0x100] ss:$16 sps:$4 sm:$0xff]   ;;  %v2418_v4 = vld [vmem:[%s2696_s30 + $0x108] ss:$16 sps:$4 sm:$0xff]  }
  0x1d   : > { %1272 = vmatprep.subr.bf16.mxu1 %v2581_v1  ;;  %1561 = vmatprep.subr.bf16.mxu0 %v2581_v1  ;;  %v2419_v5 = vld [vmem:[%s2696_s30 + $0x124] ss:$16 sps:$4 sm:$0xff]   ;;  %v2421_v6 = vld [vmem:[%s2696_s30 + $0x12c] ss:$16 sps:$4 sm:$0xff]   ;;  %v2423_v7 = vld [vmem:[%s2696_s30 + $0x120] ss:$16 sps:$4 sm:$0xff]  }
  0x1e   : > { %v2424_v8 = vld [vmem:[%s2696_s30 + $0x128] ss:$16 sps:$4 sm:$0xff]   ;;  %v2425_v9 = vld [vmem:[%s2696_s30 + $0x144] ss:$16 sps:$4 sm:$0xff]   ;;  %v2427_v10 = vld [vmem:[%s2696_s30 + $0x14c] ss:$16 sps:$4 sm:$0xff]  }
  0x1f   : > { %v2429_v11 = vld [vmem:[%s2696_s30 + $0x140] ss:$16 sps:$4 sm:$0xff]   ;;  %v2430_v12 = vld [vmem:[%s2696_s30 + $0x148] ss:$16 sps:$4 sm:$0xff]   ;;  %v2443_v21 = vld [vmem:[%s2696_s30 + $0x1a4] ss:$16 sps:$4 sm:$0xff]  }
  0x20   : > { %1273 = vmatpush1.bf16.msra.mxu1 %v2345_v13  ;;  %1562 = vmatpush1.bf16.msra.mxu0 %v2346_v14  ;;  %v2431_v13 = vld [vmem:[%s2696_s30 + $0x164] ss:$16 sps:$4 sm:$0xff]   ;;  %v2433_v14 = vld [vmem:[%s2696_s30 + $0x16c] ss:$16 sps:$4 sm:$0xff]   ;;  %v2441_v19 = vld [vmem:[%s2696_s30 + $0x180] ss:$16 sps:$4 sm:$0xff]  }
  0x21   : > { %1274 = vmatprep.subr.bf16.mxu1 %v2581_v1  ;;  %1563 = vmatprep.subr.bf16.mxu0 %v2581_v1 }
  0x24   : > { %1275 = vmatpush1.bf16.msra.mxu1 %v2347_v15  ;;  %1564 = vmatpush1.bf16.msra.mxu0 %v2348_v16  ;;  %v2435_v15 = vld [vmem:[%s2696_s30 + $0x160] ss:$16 sps:$4 sm:$0xff]   ;;  %v2436_v16 = vld [vmem:[%s2696_s30 + $0x168] ss:$16 sps:$4 sm:$0xff]  }
  0x25   : > { %1276 = vmatprep.subr.bf16.mxu1 %v2581_v1  ;;  %1565 = vmatprep.subr.bf16.mxu0 %v2581_v1 }
  0x28   : > { %1277 = vmatpush1.bf16.msra.mxu1 %v2349_v17  ;;  %1566 = vmatpush1.bf16.msra.mxu0 %v2350_v18  ;;  %v2437_v17 = vld [vmem:[%s2696_s30 + $0x184] ss:$16 sps:$4 sm:$0xff]   ;;  %v2439_v18 = vld [vmem:[%s2696_s30 + $0x18c] ss:$16 sps:$4 sm:$0xff]  }
  0x29   : > { %1278 = vmatprep.subr.bf16.mxu1 %v2581_v1  ;;  %1567 = vmatprep.subr.bf16.mxu0 %v2581_v1 }
  0x2c   : > { %1279 = vmatpush1.bf16.msra.mxu1 %v2351_v20  ;;  %1568 = vmatpush1.bf16.msra.mxu0 %v2352_v22  ;;  %v2442_v20 = vld [vmem:[%s2696_s30 + $0x188] ss:$16 sps:$4 sm:$0xff]   ;;  %v2445_v22 = vld [vmem:[%s2696_s30 + $0x1ac] ss:$16 sps:$4 sm:$0xff]  }
  0x2d   : > { %1280 = vmatprep.subr.bf16.mxu1 %v2581_v1  ;;  %1569 = vmatprep.subr.bf16.mxu0 %v2581_v1 }
  0x30   : > { %1281 = vmatpush1.bf16.msra.mxu1 %v2353_v23  ;;  %1570 = vmatpush1.bf16.msra.mxu0 %v2354_v24  ;;  %v2447_v23 = vld [vmem:[%s2696_s30 + $0x1a0] ss:$16 sps:$4 sm:$0xff]   ;;  %v2448_v24 = vld [vmem:[%s2696_s30 + $0x1a8] ss:$16 sps:$4 sm:$0xff]  }
  0x31   : > { %1282 = vmatprep.subr.bf16.mxu1 %v2581_v1  ;;  %1571 = vmatprep.subr.bf16.mxu0 %v2581_v1 }
  0x34   : > { %1283 = vmatpush1.bf16.msra.mxu1 %v2355_v25  ;;  %1572 = vmatpush1.bf16.msra.mxu0 %v2356_v26  ;;  %v2449_v25 = vld [vmem:[%s2696_s30 + $0x1c4] ss:$16 sps:$4 sm:$0xff]   ;;  %v2451_v26 = vld [vmem:[%s2696_s30 + $0x1cc] ss:$16 sps:$4 sm:$0xff]  }
  0x35   : > { %1284 = vmatprep.subr.bf16.mxu1 %v2581_v1  ;;  %1573 = vmatprep.subr.bf16.mxu0 %v2581_v1 }
  0x38   : > { %1285 = vmatpush1.bf16.msra.mxu1 %v2357_v27  ;;  %1574 = vmatpush1.bf16.msra.mxu0 %v2358_v28  ;;  %v2453_v27 = vld [vmem:[%s2696_s30 + $0x1c0] ss:$16 sps:$4 sm:$0xff]   ;;  %v2454_v28 = vld [vmem:[%s2696_s30 + $0x1c8] ss:$16 sps:$4 sm:$0xff]  }
  0x39   : > { %1286 = vmatprep.subr.bf16.mxu1 %v2581_v1  ;;  %1575 = vmatprep.subr.bf16.mxu0 %v2581_v1 }
  0x3c   : > { %1287 = vmatpush1.bf16.msra.mxu1 %v2359_v29  ;;  %1576 = vmatpush1.bf16.msra.mxu0 %v2360_v30  ;;  %v2455_v29 = vld [vmem:[%s2696_s30 + $0x1e4] ss:$16 sps:$4 sm:$0xff]   ;;  %v2457_v30 = vld [vmem:[%s2696_s30 + $0x1ec] ss:$16 sps:$4 sm:$0xff]  }
  0x3d   : > { %1288 = vmatprep.subr.bf16.mxu1 %v2581_v1  ;;  %1577 = vmatprep.subr.bf16.mxu0 %v2581_v1 }
  0x40   : > { %1289 = vmatpush1.bf16.msra.mxu1 %v2361_v31  ;;  %1578 = vmatpush1.bf16.msra.mxu0 %v2362_v32  ;;  %v2459_v31 = vld [vmem:[%s2696_s30 + $0x1e0] ss:$16 sps:$4 sm:$0xff]   ;;  %v2460_v32 = vld [vmem:[%s2696_s30 + $0x1e8] ss:$16 sps:$4 sm:$0xff]  }
  0x41   : > { %1290 = vmatprep.subr.bf16.mxu1 %v2581_v1  ;;  %1579 = vmatprep.subr.bf16.mxu0 %v2581_v1  ;;  %v2413_v1 = vld [vmem:[%s2696_s30 + $0x104] ss:$16 sps:$4 sm:$0xff]  }
  0x44   : > { %1291 = vmatpush1.bf16.msra.mxu1 %v2363_v33  ;;  %1580 = vmatpush1.bf16.msra.mxu0 %v2364_v34  ;;  %v2461_v33 = vld [vmem:[%s2696_s30 + $0x204] ss:$16 sps:$4 sm:$0xff]   ;;  %v2463_v34 = vld [vmem:[%s2696_s30 + $0x20c] ss:$16 sps:$4 sm:$0xff]  }
  0x47   : > { %1293 = vmatmul.mubr.bf16.vlgmr.msra.gmra.mrb[0].mxu1 %v2365_v35  ;;  %1582 = vmatmul.mubr.bf16.vlgmr.msra.gmra.mrb[0].mxu0 %v2368_v36  ;;  %v2465_v35 = vld [vmem:[%s2696_s30 + $0x200] ss:$16 sps:$4 sm:$0xff]   ;;  %v2466_v36 = vld [vmem:[%s2696_s30 + $0x208] ss:$16 sps:$4 sm:$0xff]  }
  0x48   : > { %1300 = vmatprep.mubr.bf16.mxu1 %v2371_v37  ;;  %1589 = vmatprep.mubr.bf16.mxu0 %v2373_v38  ;;  %v2467_v37 = vld [vmem:[%s2696_s30 + $0x224] ss:$16 sps:$4 sm:$0xff]   ;;  %v2469_v38 = vld [vmem:[%s2696_s30 + $0x22c] ss:$16 sps:$4 sm:$0xff]  }
  0x4f   : > { %1301 = vmatmul.mubr.bf16.gmra.mrb[4].mxu1 %v2375_v39  ;;  %1590 = vmatmul.mubr.bf16.gmra.mrb[4].mxu0 %v2376_v40  ;;  %v2471_v39 = vld [vmem:[%s2696_s30 + $0x220] ss:$16 sps:$4 sm:$0xff]   ;;  %v2472_v40 = vld [vmem:[%s2696_s30 + $0x228] ss:$16 sps:$4 sm:$0xff]  }
  0x50   : > { %1308 = vmatprep.mubr.bf16.mxu1 %v2377_v41  ;;  %1597 = vmatprep.mubr.bf16.mxu0 %v2379_v42  ;;  %v2473_v41 = vld [vmem:[%s2696_s30 + $0x244] ss:$16 sps:$4 sm:$0xff]   ;;  %v2475_v42 = vld [vmem:[%s2696_s30 + $0x24c] ss:$16 sps:$4 sm:$0xff]  }
  0x57   : > { %1309 = vmatmul.mubr.bf16.gmra.mrb[8].mxu1 %v2381_v43  ;;  %1598 = vmatmul.mubr.bf16.gmra.mrb[8].mxu0 %v2382_v44  ;;  %v2477_v43 = vld [vmem:[%s2696_s30 + $0x240] ss:$16 sps:$4 sm:$0xff]   ;;  %v2478_v44 = vld [vmem:[%s2696_s30 + $0x248] ss:$16 sps:$4 sm:$0xff]  }
  0x58   : > { %1316 = vmatprep.mubr.bf16.mxu1 %v2383_v45  ;;  %1605 = vmatprep.mubr.bf16.mxu0 %v2385_v46  ;;  %v2479_v45 = vld [vmem:[%s2696_s30 + $0x264] ss:$16 sps:$4 sm:$0xff]   ;;  %v2481_v46 = vld [vmem:[%s2696_s30 + $0x26c] ss:$16 sps:$4 sm:$0xff]  }
  0x5f   : > { %1317 = vmatmul.mubr.bf16.gmra.mrb[12].mxu1 %v2387_v47  ;;  %1606 = vmatmul.mubr.bf16.gmra.mrb[12].mxu0 %v2388_v48  ;;  %v2483_v47 = vld [vmem:[%s2696_s30 + $0x260] ss:$16 sps:$4 sm:$0xff]   ;;  %v2484_v48 = vld [vmem:[%s2696_s30 + $0x268] ss:$16 sps:$4 sm:$0xff]  }
  0x60   : > { %1324 = vmatprep.mubr.bf16.mxu1 %v2389_v49  ;;  %1613 = vmatprep.mubr.bf16.mxu0 %v2391_v50  ;;  %v2485_v49 = vld [vmem:[%s2696_s30 + $0x284] ss:$16 sps:$4 sm:$0xff]   ;;  %v2487_v50 = vld [vmem:[%s2696_s30 + $0x28c] ss:$16 sps:$4 sm:$0xff]  }
  0x67   : > { %1325 = vmatmul.mubr.bf16.gmra.mrb[16].mxu1 %v2393_v51  ;;  %1614 = vmatmul.mubr.bf16.gmra.mrb[16].mxu0 %v2394_v52  ;;  %v2489_v51 = vld [vmem:[%s2696_s30 + $0x280] ss:$16 sps:$4 sm:$0xff]   ;;  %v2490_v52 = vld [vmem:[%s2696_s30 + $0x288] ss:$16 sps:$4 sm:$0xff]  }
  0x68   : > { %1332 = vmatprep.mubr.bf16.mxu1 %v2395_v53  ;;  %1621 = vmatprep.mubr.bf16.mxu0 %v2397_v54  ;;  %v2491_v53 = vld [vmem:[%s2696_s30 + $0x2a4] ss:$16 sps:$4 sm:$0xff]   ;;  %v2493_v54 = vld [vmem:[%s2696_s30 + $0x2ac] ss:$16 sps:$4 sm:$0xff]  }
  0x6f   : > { %1333 = vmatmul.mubr.bf16.gmra.mrb[20].mxu1 %v2399_v55  ;;  %1622 = vmatmul.mubr.bf16.gmra.mrb[20].mxu0 %v2400_v56  ;;  %v2495_v55 = vld [vmem:[%s2696_s30 + $0x2a0] ss:$16 sps:$4 sm:$0xff]   ;;  %v2496_v56 = vld [vmem:[%s2696_s30 + $0x2a8] ss:$16 sps:$4 sm:$0xff]  }
  0x70   : > { %1340 = vmatprep.mubr.bf16.mxu1 %v2401_v57  ;;  %1629 = vmatprep.mubr.bf16.mxu0 %v2403_v58  ;;  %v2497_v57 = vld [vmem:[%s2696_s30 + $0x2c4] ss:$16 sps:$4 sm:$0xff]   ;;  %v2499_v58 = vld [vmem:[%s2696_s30 + $0x2cc] ss:$16 sps:$4 sm:$0xff]  }
  0x77   : > { %1341 = vmatmul.mubr.bf16.gmra.mrb[24].mxu1 %v2405_v59  ;;  %1630 = vmatmul.mubr.bf16.gmra.mrb[24].mxu0 %v2406_v60  ;;  %v2501_v59 = vld [vmem:[%s2696_s30 + $0x2c0] ss:$16 sps:$4 sm:$0xff]   ;;  %v2502_v60 = vld [vmem:[%s2696_s30 + $0x2c8] ss:$16 sps:$4 sm:$0xff]  }
  0x78   : > { %1348 = vmatprep.mubr.bf16.mxu1 %v2407_v61  ;;  %1637 = vmatprep.mubr.bf16.mxu0 %v2409_v62  ;;  %v2503_v61 = vld [vmem:[%s2696_s30 + $0x2e4] ss:$16 sps:$4 sm:$0xff]   ;;  %v2505_v62 = vld [vmem:[%s2696_s30 + $0x2ec] ss:$16 sps:$4 sm:$0xff]  }
  0x7f   : > { %1349 = vmatmul.mubr.bf16.gmra.mrb[28].mxu1 %v2411_v63  ;;  %1638 = vmatmul.mubr.bf16.gmra.mrb[28].mxu0 %v2412_v0  ;;  %v2507_v63 = vld [vmem:[%s2696_s30 + $0x2e0] ss:$16 sps:$4 sm:$0xff]   ;;  %v2508_v0 = vld [vmem:[%s2696_s30 + $0x2e8] ss:$16 sps:$4 sm:$0xff]  }
  0x80   : > { %1356 = vmatprep.mubr.bf16.mxu1 %v2413_v1  ;;  %1645 = vmatprep.mubr.bf16.mxu0 %v2415_v2  ;;  %v2509_v1 = vld [vmem:[%s2696_s30 + $0x304] ss:$16 sps:$4 sm:$0xff]   ;;  %v2511_v2 = vld [vmem:[%s2696_s30 + $0x30c] ss:$16 sps:$4 sm:$0xff]  }
  0x87   : > { %1357 = vmatmul.mubr.bf16.gmra.mrb[32].mxu1 %v2417_v3  ;;  %1646 = vmatmul.mubr.bf16.gmra.mrb[32].mxu0 %v2418_v4  ;;  %v2513_v3 = vld [vmem:[%s2696_s30 + $0x300] ss:$16 sps:$4 sm:$0xff]   ;;  %v2514_v4 = vld [vmem:[%s2696_s30 + $0x308] ss:$16 sps:$4 sm:$0xff]  }
  0x88   : > { %1364 = vmatprep.mubr.bf16.mxu1 %v2419_v5  ;;  %1653 = vmatprep.mubr.bf16.mxu0 %v2421_v6  ;;  %v2515_v5 = vld [vmem:[%s2696_s30 + $0x324] ss:$16 sps:$4 sm:$0xff]   ;;  %v2517_v6 = vld [vmem:[%s2696_s30 + $0x32c] ss:$16 sps:$4 sm:$0xff]  }
  0x8f   : > { %1365 = vmatmul.mubr.bf16.gmra.mrb[36].mxu1 %v2423_v7  ;;  %1654 = vmatmul.mubr.bf16.gmra.mrb[36].mxu0 %v2424_v8  ;;  %v2519_v7 = vld [vmem:[%s2696_s30 + $0x320] ss:$16 sps:$4 sm:$0xff]   ;;  %v2520_v8 = vld [vmem:[%s2696_s30 + $0x328] ss:$16 sps:$4 sm:$0xff]  }
  0x90   : > { %1372 = vmatprep.mubr.bf16.mxu1 %v2425_v9  ;;  %1661 = vmatprep.mubr.bf16.mxu0 %v2427_v10  ;;  %v2521_v9 = vld [vmem:[%s2696_s30 + $0x344] ss:$16 sps:$4 sm:$0xff]   ;;  %v2523_v10 = vld [vmem:[%s2696_s30 + $0x34c] ss:$16 sps:$4 sm:$0xff]  }
  0x97   : > { %1373 = vmatmul.mubr.bf16.gmra.mrb[40].mxu1 %v2429_v11  ;;  %1662 = vmatmul.mubr.bf16.gmra.mrb[40].mxu0 %v2430_v12  ;;  %v2525_v11 = vld [vmem:[%s2696_s30 + $0x340] ss:$16 sps:$4 sm:$0xff]   ;;  %v2526_v12 = vld [vmem:[%s2696_s30 + $0x348] ss:$16 sps:$4 sm:$0xff]  }
  0x98   : > { %1380 = vmatprep.mubr.bf16.mxu1 %v2431_v13  ;;  %1669 = vmatprep.mubr.bf16.mxu0 %v2433_v14  ;;  %v2527_v13 = vld [vmem:[%s2696_s30 + $0x364] ss:$16 sps:$4 sm:$0xff]   ;;  %v2529_v14 = vld [vmem:[%s2696_s30 + $0x36c] ss:$16 sps:$4 sm:$0xff]  }
  0x9f   : > { %1381 = vmatmul.mubr.bf16.gmra.mrb[44].mxu1 %v2435_v15  ;;  %1670 = vmatmul.mubr.bf16.gmra.mrb[44].mxu0 %v2436_v16  ;;  %v2872_v15 = vld [vmem:[%s3037_s2] ss:$0 sm:$0xff] }
  0xa0   : > { %1388 = vmatprep.mubr.bf16.mxu1 %v2437_v17  ;;  %1677 = vmatprep.mubr.bf16.mxu0 %v2439_v18 }
  0xa7   : > { %1389 = vmatmul.mubr.bf16.gmra.mrb[48].mxu1 %v2441_v19  ;;  %1678 = vmatmul.mubr.bf16.gmra.mrb[48].mxu0 %v2442_v20  ;;  %v2531_v20 = vld [vmem:[%s2696_s30 + $0x360] ss:$16 sps:$4 sm:$0xff]  }
  0xa8   : > { %1396 = vmatprep.mubr.bf16.mxu1 %v2443_v21  ;;  %1685 = vmatprep.mubr.bf16.mxu0 %v2445_v22 }
  0xaf   : > { %1397 = vmatmul.mubr.bf16.gmra.mrb[52].mxu1 %v2447_v23  ;;  %1686 = vmatmul.mubr.bf16.gmra.mrb[52].mxu0 %v2448_v24  ;;  %v2532_v23 = vld [vmem:[%s2696_s30 + $0x368] ss:$16 sps:$4 sm:$0xff]   ;;  %v2533_v24 = vld [vmem:[%s2696_s30 + $0x384] ss:$16 sps:$4 sm:$0xff]  }
  0xb0   : > { %1404 = vmatprep.mubr.bf16.mxu1 %v2449_v25  ;;  %1693 = vmatprep.mubr.bf16.mxu0 %v2451_v26 }
  0xb7   : > { %1405 = vmatmul.mubr.bf16.gmra.mrb[56].mxu1 %v2453_v27  ;;  %1694 = vmatmul.mubr.bf16.gmra.mrb[56].mxu0 %v2454_v28 }
  0xb8   : > { %1412 = vmatprep.mubr.bf16.mxu1 %v2455_v29  ;;  %1701 = vmatprep.mubr.bf16.mxu0 %v2457_v30  ;;  %v2535_v29 = vld [vmem:[%s2696_s30 + $0x38c] ss:$16 sps:$4 sm:$0xff]  }
  0xbf   : > { %1413 = vmatmul.mubr.bf16.gmra.mrb[60].mxu1 %v2459_v31  ;;  %1702 = vmatmul.mubr.bf16.gmra.mrb[60].mxu0 %v2460_v32 }
  0xc0   : > { %1420 = vmatprep.mubr.bf16.mxu1 %v2461_v33  ;;  %1709 = vmatprep.mubr.bf16.mxu0 %v2463_v34 }
  0xc7   : > { %1421 = vmatmul.mubr.bf16.gmra.mrb[64].mxu1 %v2465_v35  ;;  %1710 = vmatmul.mubr.bf16.gmra.mrb[64].mxu0 %v2466_v36  ;;  %v2537_v36 = vld [vmem:[%s2696_s30 + $0x380] ss:$16 sps:$4 sm:$0xff]  }
  0xc8   : > { %1428 = vmatprep.mubr.bf16.mxu1 %v2467_v37  ;;  %1717 = vmatprep.mubr.bf16.mxu0 %v2469_v38 }
  0xcf   : > { %1429 = vmatmul.mubr.bf16.gmra.mrb[68].mxu1 %v2471_v39  ;;  %1718 = vmatmul.mubr.bf16.gmra.mrb[68].mxu0 %v2472_v40  ;;  %v2538_v39 = vld [vmem:[%s2696_s30 + $0x388] ss:$16 sps:$4 sm:$0xff]   ;;  %v2539_v40 = vld [vmem:[%s2696_s30 + $0x3a4] ss:$16 sps:$4 sm:$0xff]  }
  0xd0   : > { %1436 = vmatprep.mubr.bf16.mxu1 %v2473_v41  ;;  %1725 = vmatprep.mubr.bf16.mxu0 %v2475_v42 }
  0xd7   : > { %1437 = vmatmul.mubr.bf16.gmra.mrb[72].mxu1 %v2477_v43  ;;  %1726 = vmatmul.mubr.bf16.gmra.mrb[72].mxu0 %v2478_v44 }
  0xd8   : > { %1444 = vmatprep.mubr.bf16.mxu1 %v2479_v45  ;;  %1733 = vmatprep.mubr.bf16.mxu0 %v2481_v46  ;;  %v2541_v45 = vld [vmem:[%s2696_s30 + $0x3ac] ss:$16 sps:$4 sm:$0xff]  }
  0xdf   : > { %1445 = vmatmul.mubr.bf16.gmra.mrb[76].mxu1 %v2483_v47  ;;  %1734 = vmatmul.mubr.bf16.gmra.mrb[76].mxu0 %v2484_v48 }
  0xe0   : > { %1452 = vmatprep.mubr.bf16.mxu1 %v2485_v49  ;;  %1741 = vmatprep.mubr.bf16.mxu0 %v2487_v50 }
  0xe7   : > { %1453 = vmatmul.mubr.bf16.gmra.mrb[80].mxu1 %v2489_v51  ;;  %1742 = vmatmul.mubr.bf16.gmra.mrb[80].mxu0 %v2490_v52  ;;  %v2543_v52 = vld [vmem:[%s2696_s30 + $0x3a0] ss:$16 sps:$4 sm:$0xff]  }
  0xe8   : > { %1460 = vmatprep.mubr.bf16.mxu1 %v2491_v53  ;;  %1749 = vmatprep.mubr.bf16.mxu0 %v2493_v54 }
  0xef   : > { %1461 = vmatmul.mubr.bf16.gmra.mrb[84].mxu1 %v2495_v55  ;;  %1750 = vmatmul.mubr.bf16.gmra.mrb[84].mxu0 %v2496_v56  ;;  %v2544_v55 = vld [vmem:[%s2696_s30 + $0x3a8] ss:$16 sps:$4 sm:$0xff]   ;;  %v2545_v56 = vld [vmem:[%s2696_s30 + $0x3c4] ss:$16 sps:$4 sm:$0xff]  }
  0xf0   : > { %1468 = vmatprep.mubr.bf16.mxu1 %v2497_v57  ;;  %1757 = vmatprep.mubr.bf16.mxu0 %v2499_v58 }
  0xf7   : > { %1469 = vmatmul.mubr.bf16.gmra.mrb[88].mxu1 %v2501_v59  ;;  %1758 = vmatmul.mubr.bf16.gmra.mrb[88].mxu0 %v2502_v60 }
  0xf8   : > { %1476 = vmatprep.mubr.bf16.mxu1 %v2503_v61  ;;  %1765 = vmatprep.mubr.bf16.mxu0 %v2505_v62  ;;  %v2547_v61 = vld [vmem:[%s2696_s30 + $0x3cc] ss:$16 sps:$4 sm:$0xff]  }
  0xff   : > { %1477 = vmatmul.mubr.bf16.gmra.mrb[92].mxu1 %v2507_v63  ;;  %1766 = vmatmul.mubr.bf16.gmra.mrb[92].mxu0 %v2508_v0 }
 0x100   : > { %1484 = vmatprep.mubr.bf16.mxu1 %v2509_v1  ;;  %1773 = vmatprep.mubr.bf16.mxu0 %v2511_v2 }
 0x107   : > { %1485 = vmatmul.mubr.bf16.gmra.mrb[96].mxu1 %v2513_v3  ;;  %1774 = vmatmul.mubr.bf16.gmra.mrb[96].mxu0 %v2514_v4  ;;  %v2549_v4 = vld [vmem:[%s2696_s30 + $0x3c0] ss:$16 sps:$4 sm:$0xff]  }
 0x108   : > { %1492 = vmatprep.mubr.bf16.mxu1 %v2515_v5  ;;  %1781 = vmatprep.mubr.bf16.mxu0 %v2517_v6 }
 0x10f   : > { %1493 = vmatmul.mubr.bf16.gmra.mrb[100].mxu1 %v2519_v7  ;;  %1782 = vmatmul.mubr.bf16.gmra.mrb[100].mxu0 %v2520_v8  ;;  %v2550_v7 = vld [vmem:[%s2696_s30 + $0x3c8] ss:$16 sps:$4 sm:$0xff]   ;;  %v2551_v8 = vld [vmem:[%s2696_s30 + $0x3e4] ss:$16 sps:$4 sm:$0xff]  }
 0x110   : > { %1500 = vmatprep.mubr.bf16.mxu1 %v2521_v9  ;;  %1789 = vmatprep.mubr.bf16.mxu0 %v2523_v10 }
 0x117   : > { %1501 = vmatmul.mubr.bf16.gmra.mrb[104].mxu1 %v2525_v11  ;;  %1790 = vmatmul.mubr.bf16.gmra.mrb[104].mxu0 %v2526_v12 }
 0x118   : > { %1508 = vmatprep.mubr.bf16.mxu1 %v2527_v13  ;;  %1797 = vmatprep.mubr.bf16.mxu0 %v2529_v14  ;;  %v2553_v13 = vld [vmem:[%s2696_s30 + $0x3ec] ss:$16 sps:$4 sm:$0xff]  }
 0x11a   : > { %v1294_v16 = vpop.f32.mrb[0].mxu1  ;;  %v1583_v18 = vpop.f32.mrb[0].mxu0 }
 0x11b   : > { %v1295_v17 = vadd.f32 %v2872_v15, %v1294_v16  ;;  %v1296_v19 = vpop.f32.mrb[1].mxu1  ;;  %v1585_v21 = vpop.f32.mrb[1].mxu0 }
 0x11c   : > { %v1297_v22 = vpop.f32.mrb[2].mxu1  ;;  %v1586_v27 = vpop.f32.mrb[2].mxu0  ;;  %v2555_v21 = vld [vmem:[%s2696_s30 + $0x3e0] ss:$16 sps:$4 sm:$0xff]  }
 0x11d   : > { %v1584_v25 = vadd.f32 %v1583_v18, %v1295_v17  ;;  %v1298_v26 = vadd.f32 %v2872_v15, %v1297_v22  ;;  %v1299_v28 = vpop.f32.mrb[3].mxu1  ;;  %v1588_v30 = vpop.f32.mrb[3].mxu0 }
 0x11f   : > { %1838 = vst [vmem:[%s2880_s21] sm:$0xff] %v1584_v25  ;;  %v1587_v31 = vadd.f32 %v1586_v27, %v1298_v26  ;;  %1509 = vmatmul.mubr.bf16.gmra.mrb[108].mxu1 %v2531_v20  ;;  %1798 = vmatmul.mubr.bf16.gmra.mrb[108].mxu0 %v2532_v23 }
 0x120   : > { %1516 = vmatprep.mubr.bf16.mxu1 %v2533_v24  ;;  %1805 = vmatprep.mubr.bf16.mxu0 %v2535_v29  ;;  %v2556_v24 = vld [vmem:[%s2696_s30 + $0x3e8] ss:$16 sps:$4 sm:$0xff]  }
 0x121   : > { %1839 = vst [vmem:[%s2880_s21 + $0x8] sm:$0xff] %v1587_v31 }
 0x122   : > { %v1302_v32 = vpop.f32.mrb[4].mxu1  ;;  %v1591_v34 = vpop.f32.mrb[4].mxu0 }
 0x123   : > { %v1303_v33 = vadd.f32 %v2872_v15, %v1302_v32  ;;  %v1304_v35 = vpop.f32.mrb[5].mxu1  ;;  %v1593_v37 = vpop.f32.mrb[5].mxu0 }
 0x124   : > { %v1305_v38 = vpop.f32.mrb[6].mxu1  ;;  %v1594_v43 = vpop.f32.mrb[6].mxu0 }
 0x125   : > { %v1592_v41 = vadd.f32 %v1591_v34, %v1303_v33  ;;  %v1306_v42 = vadd.f32 %v2872_v15, %v1305_v38  ;;  %v1307_v44 = vpop.f32.mrb[7].mxu1  ;;  %v1596_v46 = vpop.f32.mrb[7].mxu0 }
 0x127   : > { %1840 = vst [vmem:[%s2880_s21 + $0x10] sm:$0xff] %v1592_v41  ;;  %v1595_v47 = vadd.f32 %v1594_v43, %v1306_v42  ;;  %1517 = vmatmul.mubr.bf16.gmra.mrb[112].mxu1 %v2537_v36  ;;  %1806 = vmatmul.mubr.bf16.gmra.mrb[112].mxu0 %v2538_v39 }
 0x128   : > { %1524 = vmatprep.mubr.bf16.mxu1 %v2539_v40  ;;  %1813 = vmatprep.mubr.bf16.mxu0 %v2541_v45 }
 0x129   : > { %1841 = vst [vmem:[%s2880_s21 + $0x18] sm:$0xff] %v1595_v47 }
 0x12a   : > { %v1310_v48 = vpop.f32.mrb[8].mxu1  ;;  %v1599_v50 = vpop.f32.mrb[8].mxu0 }
 0x12b   : > { %v1311_v49 = vadd.f32 %v2872_v15, %v1310_v48  ;;  %v1312_v51 = vpop.f32.mrb[9].mxu1  ;;  %v1601_v53 = vpop.f32.mrb[9].mxu0 }
 0x12c   : > { %v1313_v54 = vpop.f32.mrb[10].mxu1  ;;  %v1602_v59 = vpop.f32.mrb[10].mxu0 }
 0x12d   : > { %v1600_v57 = vadd.f32 %v1599_v50, %v1311_v49  ;;  %v1314_v58 = vadd.f32 %v2872_v15, %v1313_v54  ;;  %v1315_v60 = vpop.f32.mrb[11].mxu1  ;;  %v1604_v62 = vpop.f32.mrb[11].mxu0 }
 0x12f   : > { %1842 = vst [vmem:[%s2880_s21 + $0x20] sm:$0xff] %v1600_v57  ;;  %v1603_v63 = vadd.f32 %v1602_v59, %v1314_v58  ;;  %1525 = vmatmul.mubr.bf16.gmra.mrb[116].mxu1 %v2543_v52  ;;  %1814 = vmatmul.mubr.bf16.gmra.mrb[116].mxu0 %v2544_v55 }
 0x130   : > { %1532 = vmatprep.mubr.bf16.mxu1 %v2545_v56  ;;  %1821 = vmatprep.mubr.bf16.mxu0 %v2547_v61 }
 0x131   : > { %1843 = vst [vmem:[%s2880_s21 + $0x28] sm:$0xff] %v1603_v63 }
 0x132   : > { %v1318_v0 = vpop.f32.mrb[12].mxu1  ;;  %v1607_v2 = vpop.f32.mrb[12].mxu0 }
 0x133   : > { %v1319_v1 = vadd.f32 %v2872_v15, %v1318_v0  ;;  %v1320_v3 = vpop.f32.mrb[13].mxu1  ;;  %v1609_v5 = vpop.f32.mrb[13].mxu0 }
 0x134   : > { %v1321_v6 = vpop.f32.mrb[14].mxu1  ;;  %v1610_v11 = vpop.f32.mrb[14].mxu0 }
 0x135   : > { %v1608_v9 = vadd.f32 %v1607_v2, %v1319_v1  ;;  %v1322_v10 = vadd.f32 %v2872_v15, %v1321_v6  ;;  %v1323_v12 = vpop.f32.mrb[15].mxu1  ;;  %v1612_v14 = vpop.f32.mrb[15].mxu0 }
 0x137   : > { %1844 = vst [vmem:[%s2880_s21 + $0x30] sm:$0xff] %v1608_v9  ;;  %v1611_v16 = vadd.f32 %v1610_v11, %v1322_v10  ;;  %1533 = vmatmul.mubr.bf16.gmra.mrb[120].mxu1 %v2549_v4  ;;  %1822 = vmatmul.mubr.bf16.gmra.mrb[120].mxu0 %v2550_v7 }
 0x138   : > { %1540 = vmatprep.mubr.bf16.mxu1 %v2551_v8  ;;  %1829 = vmatprep.mubr.bf16.mxu0 %v2553_v13 }
 0x139   : > { %1845 = vst [vmem:[%s2880_s21 + $0x38] sm:$0xff] %v1611_v16 }
 0x13a   : > { %v1326_v17 = vpop.f32.mrb[16].mxu1  ;;  %v1615_v19 = vpop.f32.mrb[16].mxu0 }
 0x13b   : > { %v1327_v18 = vadd.f32 %v2872_v15, %v1326_v17  ;;  %v1328_v20 = vpop.f32.mrb[17].mxu1  ;;  %v1617_v22 = vpop.f32.mrb[17].mxu0 }
 0x13c   : > { %v1329_v23 = vpop.f32.mrb[18].mxu1  ;;  %v1618_v27 = vpop.f32.mrb[18].mxu0 }
 0x13d   : > { %v1616_v25 = vadd.f32 %v1615_v19, %v1327_v18  ;;  %v1330_v26 = vadd.f32 %v2872_v15, %v1329_v23  ;;  %v1331_v28 = vpop.f32.mrb[19].mxu1  ;;  %v1620_v29 = vpop.f32.mrb[19].mxu0 }
 0x13f   : > { %1846 = vst [vmem:[%s2880_s21 + $0x40] sm:$0xff] %v1616_v25  ;;  %v1619_v30 = vadd.f32 %v1618_v27, %v1330_v26  ;;  %1541 = vmatmul.mubr.bf16.gmra.mrb[124].mxu1 %v2555_v21  ;;  %1830 = vmatmul.mubr.bf16.gmra.mrb[124].mxu0 %v2556_v24 }
 0x141   : > { %1847 = vst [vmem:[%s2880_s21 + $0x48] sm:$0xff] %v1619_v30 }
 0x142   : > { %v1334_v31 = vpop.f32.mrb[20].mxu1  ;;  %v1623_v33 = vpop.f32.mrb[20].mxu0 }
 0x143   : > { %v1335_v32 = vadd.f32 %v2872_v15, %v1334_v31  ;;  %v1336_v34 = vpop.f32.mrb[21].mxu1  ;;  %v1625_v35 = vpop.f32.mrb[21].mxu0 }
 0x144   : > { %v1337_v36 = vpop.f32.mrb[22].mxu1  ;;  %v1626_v39 = vpop.f32.mrb[22].mxu0 }
 0x145   : > { %v1624_v37 = vadd.f32 %v1623_v33, %v1335_v32  ;;  %v1338_v38 = vadd.f32 %v2872_v15, %v1337_v36  ;;  %v1339_v40 = vpop.f32.mrb[23].mxu1  ;;  %v1628_v41 = vpop.f32.mrb[23].mxu0 }
 0x147   : > { %1848 = vst [vmem:[%s2880_s21 + $0x50] sm:$0xff] %v1624_v37  ;;  %v1627_v42 = vadd.f32 %v1626_v39, %v1338_v38 }
 0x149   : > { %1849 = vst [vmem:[%s2880_s21 + $0x58] sm:$0xff] %v1627_v42 }
 0x14a   : > { %v1342_v43 = vpop.f32.mrb[24].mxu1  ;;  %v1631_v45 = vpop.f32.mrb[24].mxu0 }
 0x14b   : > { %v1343_v44 = vadd.f32 %v2872_v15, %v1342_v43  ;;  %v1344_v46 = vpop.f32.mrb[25].mxu1  ;;  %v1633_v47 = vpop.f32.mrb[25].mxu0 }
 0x14c   : > { %v1345_v48 = vpop.f32.mrb[26].mxu1  ;;  %v1634_v51 = vpop.f32.mrb[26].mxu0 }
 0x14d   : > { %v1632_v49 = vadd.f32 %v1631_v45, %v1343_v44  ;;  %v1346_v50 = vadd.f32 %v2872_v15, %v1345_v48  ;;  %v1347_v52 = vpop.f32.mrb[27].mxu1  ;;  %v1636_v53 = vpop.f32.mrb[27].mxu0 }
 0x14f   : > { %1850 = vst [vmem:[%s2880_s21 + $0x60] sm:$0xff] %v1632_v49  ;;  %v1635_v54 = vadd.f32 %v1634_v51, %v1346_v50 }
 0x151   : > { %1851 = vst [vmem:[%s2880_s21 + $0x68] sm:$0xff] %v1635_v54 }
 0x152   : > { %v1350_v55 = vpop.f32.mrb[28].mxu1  ;;  %v1639_v57 = vpop.f32.mrb[28].mxu0 }
 0x153   : > { %v1351_v56 = vadd.f32 %v2872_v15, %v1350_v55  ;;  %v1352_v58 = vpop.f32.mrb[29].mxu1  ;;  %v1641_v59 = vpop.f32.mrb[29].mxu0 }
 0x154   : > { %v1353_v60 = vpop.f32.mrb[30].mxu1  ;;  %v1642_v63 = vpop.f32.mrb[30].mxu0 }
 0x155   : > { %v1640_v61 = vadd.f32 %v1639_v57, %v1351_v56  ;;  %v1354_v62 = vadd.f32 %v2872_v15, %v1353_v60  ;;  %v1355_v0 = vpop.f32.mrb[31].mxu1  ;;  %v1644_v1 = vpop.f32.mrb[31].mxu0 }
 0x157   : > { %1852 = vst [vmem:[%s2880_s21 + $0x70] sm:$0xff] %v1640_v61  ;;  %v1643_v2 = vadd.f32 %v1642_v63, %v1354_v62 }
 0x159   : > { %1853 = vst [vmem:[%s2880_s21 + $0x78] sm:$0xff] %v1643_v2 }
 0x15a   : > { %v1358_v3 = vpop.f32.mrb[32].mxu1  ;;  %v1647_v5 = vpop.f32.mrb[32].mxu0 }
 0x15b   : > { %v1359_v4 = vadd.f32 %v2872_v15, %v1358_v3  ;;  %v1360_v6 = vpop.f32.mrb[33].mxu1  ;;  %v1649_v7 = vpop.f32.mrb[33].mxu0 }
 0x15c   : > { %v1361_v8 = vpop.f32.mrb[34].mxu1  ;;  %v1650_v11 = vpop.f32.mrb[34].mxu0 }
 0x15d   : > { %v1648_v9 = vadd.f32 %v1647_v5, %v1359_v4  ;;  %v1362_v10 = vadd.f32 %v2872_v15, %v1361_v8  ;;  %v1363_v12 = vpop.f32.mrb[35].mxu1  ;;  %v1652_v13 = vpop.f32.mrb[35].mxu0 }
 0x15f   : > { %1854 = vst [vmem:[%s2880_s21 + $0x80] sm:$0xff] %v1648_v9  ;;  %v1651_v14 = vadd.f32 %v1650_v11, %v1362_v10 }
 0x161   : > { %1855 = vst [vmem:[%s2880_s21 + $0x88] sm:$0xff] %v1651_v14 }
 0x162   : > { %v1366_v16 = vpop.f32.mrb[36].mxu1  ;;  %v1655_v18 = vpop.f32.mrb[36].mxu0 }
 0x163   : > { %v1367_v17 = vadd.f32 %v2872_v15, %v1366_v16  ;;  %v1368_v19 = vpop.f32.mrb[37].mxu1  ;;  %v1657_v20 = vpop.f32.mrb[37].mxu0 }
 0x164   : > { %v1369_v21 = vpop.f32.mrb[38].mxu1  ;;  %v1658_v24 = vpop.f32.mrb[38].mxu0 }
 0x165   : > { %v1656_v22 = vadd.f32 %v1655_v18, %v1367_v17  ;;  %v1370_v23 = vadd.f32 %v2872_v15, %v1369_v21  ;;  %v1371_v25 = vpop.f32.mrb[39].mxu1  ;;  %v1660_v26 = vpop.f32.mrb[39].mxu0 }
 0x167   : > { %1856 = vst [vmem:[%s2880_s21 + $0x90] sm:$0xff] %v1656_v22  ;;  %v1659_v27 = vadd.f32 %v1658_v24, %v1370_v23 }
 0x169   : > { %1857 = vst [vmem:[%s2880_s21 + $0x98] sm:$0xff] %v1659_v27 }
 0x16a   : > { %v1374_v28 = vpop.f32.mrb[40].mxu1  ;;  %v1663_v30 = vpop.f32.mrb[40].mxu0 }
 0x16b   : > { %v1375_v29 = vadd.f32 %v2872_v15, %v1374_v28  ;;  %v1376_v31 = vpop.f32.mrb[41].mxu1  ;;  %v1665_v32 = vpop.f32.mrb[41].mxu0 }
 0x16c   : > { %v1377_v33 = vpop.f32.mrb[42].mxu1  ;;  %v1666_v36 = vpop.f32.mrb[42].mxu0 }
 0x16d   : > { %v1664_v34 = vadd.f32 %v1663_v30, %v1375_v29  ;;  %v1378_v35 = vadd.f32 %v2872_v15, %v1377_v33  ;;  %v1379_v37 = vpop.f32.mrb[43].mxu1  ;;  %v1668_v38 = vpop.f32.mrb[43].mxu0 }
 0x16f   : > { %1858 = vst [vmem:[%s2880_s21 + $0xa0] sm:$0xff] %v1664_v34  ;;  %v1667_v39 = vadd.f32 %v1666_v36, %v1378_v35 }
 0x171   : > { %1859 = vst [vmem:[%s2880_s21 + $0xa8] sm:$0xff] %v1667_v39 }
 0x172   : > { %v1382_v40 = vpop.f32.mrb[44].mxu1  ;;  %v1671_v42 = vpop.f32.mrb[44].mxu0 }
 0x173   : > { %v1383_v41 = vadd.f32 %v2872_v15, %v1382_v40  ;;  %v1384_v43 = vpop.f32.mrb[45].mxu1  ;;  %v1673_v44 = vpop.f32.mrb[45].mxu0 }
 0x174   : > { %v1385_v45 = vpop.f32.mrb[46].mxu1  ;;  %v1674_v48 = vpop.f32.mrb[46].mxu0 }
 0x175   : > { %v1672_v46 = vadd.f32 %v1671_v42, %v1383_v41  ;;  %v1386_v47 = vadd.f32 %v2872_v15, %v1385_v45  ;;  %v1387_v49 = vpop.f32.mrb[47].mxu1  ;;  %v1676_v50 = vpop.f32.mrb[47].mxu0 }
 0x177   : > { %1860 = vst [vmem:[%s2880_s21 + $0xb0] sm:$0xff] %v1672_v46  ;;  %v1675_v51 = vadd.f32 %v1674_v48, %v1386_v47 }
 0x179   : > { %1861 = vst [vmem:[%s2880_s21 + $0xb8] sm:$0xff] %v1675_v51 }
 0x17a   : > { %v1390_v52 = vpop.f32.mrb[48].mxu1  ;;  %v1679_v54 = vpop.f32.mrb[48].mxu0 }
 0x17b   : > { %v1391_v53 = vadd.f32 %v2872_v15, %v1390_v52  ;;  %v1392_v55 = vpop.f32.mrb[49].mxu1  ;;  %v1681_v56 = vpop.f32.mrb[49].mxu0 }
 0x17c   : > { %v1393_v57 = vpop.f32.mrb[50].mxu1  ;;  %v1682_v60 = vpop.f32.mrb[50].mxu0 }
 0x17d   : > { %v1680_v58 = vadd.f32 %v1679_v54, %v1391_v53  ;;  %v1394_v59 = vadd.f32 %v2872_v15, %v1393_v57  ;;  %v1395_v61 = vpop.f32.mrb[51].mxu1  ;;  %v1684_v62 = vpop.f32.mrb[51].mxu0 }
 0x17f   : > { %1862 = vst [vmem:[%s2880_s21 + $0xc0] sm:$0xff] %v1680_v58  ;;  %v1683_v63 = vadd.f32 %v1682_v60, %v1394_v59 }
 0x181   : > { %1863 = vst [vmem:[%s2880_s21 + $0xc8] sm:$0xff] %v1683_v63 }
 0x182   : > { %v1398_v0 = vpop.f32.mrb[52].mxu1  ;;  %v1687_v2 = vpop.f32.mrb[52].mxu0 }
 0x183   : > { %v1399_v1 = vadd.f32 %v2872_v15, %v1398_v0  ;;  %v1400_v3 = vpop.f32.mrb[53].mxu1  ;;  %v1689_v4 = vpop.f32.mrb[53].mxu0 }
 0x184   : > { %v1401_v5 = vpop.f32.mrb[54].mxu1  ;;  %v1690_v8 = vpop.f32.mrb[54].mxu0 }
 0x185   : > { %v1688_v6 = vadd.f32 %v1687_v2, %v1399_v1  ;;  %v1402_v7 = vadd.f32 %v2872_v15, %v1401_v5  ;;  %v1403_v9 = vpop.f32.mrb[55].mxu1  ;;  %v1692_v10 = vpop.f32.mrb[55].mxu0 }
 0x187   : > { %1864 = vst [vmem:[%s2880_s21 + $0xd0] sm:$0xff] %v1688_v6  ;;  %v1691_v11 = vadd.f32 %v1690_v8, %v1402_v7 }
 0x189   : > { %1865 = vst [vmem:[%s2880_s21 + $0xd8] sm:$0xff] %v1691_v11 }
 0x18a   : > { %v1406_v12 = vpop.f32.mrb[56].mxu1  ;;  %v1695_v14 = vpop.f32.mrb[56].mxu0 }
 0x18b   : > { %v1407_v13 = vadd.f32 %v2872_v15, %v1406_v12  ;;  %v1408_v16 = vpop.f32.mrb[57].mxu1  ;;  %v1697_v17 = vpop.f32.mrb[57].mxu0 }
 0x18c   : > { %v1409_v18 = vpop.f32.mrb[58].mxu1  ;;  %v1698_v21 = vpop.f32.mrb[58].mxu0 }
 0x18d   : > { %v1696_v19 = vadd.f32 %v1695_v14, %v1407_v13  ;;  %v1410_v20 = vadd.f32 %v2872_v15, %v1409_v18  ;;  %v1411_v22 = vpop.f32.mrb[59].mxu1  ;;  %v1700_v23 = vpop.f32.mrb[59].mxu0 }
 0x18f   : > { %1866 = vst [vmem:[%s2880_s21 + $0xe0] sm:$0xff] %v1696_v19  ;;  %v1699_v24 = vadd.f32 %v1698_v21, %v1410_v20 }
 0x191   : > { %1867 = vst [vmem:[%s2880_s21 + $0xe8] sm:$0xff] %v1699_v24 }
 0x192   : > { %v1414_v25 = vpop.f32.mrb[60].mxu1  ;;  %v1703_v27 = vpop.f32.mrb[60].mxu0 }
 0x193   : > { %v1415_v26 = vadd.f32 %v2872_v15, %v1414_v25  ;;  %v1416_v28 = vpop.f32.mrb[61].mxu1  ;;  %v1705_v29 = vpop.f32.mrb[61].mxu0 }
 0x194   : > { %v1417_v30 = vpop.f32.mrb[62].mxu1  ;;  %v1706_v33 = vpop.f32.mrb[62].mxu0 }
 0x195   : > { %v1704_v31 = vadd.f32 %v1703_v27, %v1415_v26  ;;  %v1418_v32 = vadd.f32 %v2872_v15, %v1417_v30  ;;  %v1419_v34 = vpop.f32.mrb[63].mxu1  ;;  %v1708_v35 = vpop.f32.mrb[63].mxu0 }
 0x197   : > { %1868 = vst [vmem:[%s2880_s21 + $0xf0] sm:$0xff] %v1704_v31  ;;  %v1707_v36 = vadd.f32 %v1706_v33, %v1418_v32 }
 0x199   : > { %1869 = vst [vmem:[%s2880_s21 + $0xf8] sm:$0xff] %v1707_v36 }
 0x19a   : > { %v1422_v37 = vpop.f32.mrb[64].mxu1  ;;  %v1711_v39 = vpop.f32.mrb[64].mxu0 }
 0x19b   : > { %v1423_v38 = vadd.f32 %v2872_v15, %v1422_v37  ;;  %v1424_v40 = vpop.f32.mrb[65].mxu1  ;;  %v1713_v41 = vpop.f32.mrb[65].mxu0 }
 0x19c   : > { %v1425_v42 = vpop.f32.mrb[66].mxu1  ;;  %v1714_v45 = vpop.f32.mrb[66].mxu0 }
 0x19d   : > { %v1712_v43 = vadd.f32 %v1711_v39, %v1423_v38  ;;  %v1426_v44 = vadd.f32 %v2872_v15, %v1425_v42  ;;  %v1427_v46 = vpop.f32.mrb[67].mxu1  ;;  %v1716_v47 = vpop.f32.mrb[67].mxu0 }
 0x19f   : > { %1870 = vst [vmem:[%s2880_s21 + $0x100] sm:$0xff] %v1712_v43  ;;  %v1715_v48 = vadd.f32 %v1714_v45, %v1426_v44 }
 0x1a1   : > { %1871 = vst [vmem:[%s2880_s21 + $0x108] sm:$0xff] %v1715_v48 }
 0x1a2   : > { %v1430_v49 = vpop.f32.mrb[68].mxu1  ;;  %v1719_v51 = vpop.f32.mrb[68].mxu0 }
 0x1a3   : > { %v1431_v50 = vadd.f32 %v2872_v15, %v1430_v49  ;;  %v1432_v52 = vpop.f32.mrb[69].mxu1  ;;  %v1721_v53 = vpop.f32.mrb[69].mxu0 }
 0x1a4   : > { %v1433_v54 = vpop.f32.mrb[70].mxu1  ;;  %v1722_v57 = vpop.f32.mrb[70].mxu0 }
 0x1a5   : > { %v1720_v55 = vadd.f32 %v1719_v51, %v1431_v50  ;;  %v1434_v56 = vadd.f32 %v2872_v15, %v1433_v54  ;;  %v1435_v58 = vpop.f32.mrb[71].mxu1  ;;  %v1724_v59 = vpop.f32.mrb[71].mxu0 }
 0x1a7   : > { %1872 = vst [vmem:[%s2880_s21 + $0x110] sm:$0xff] %v1720_v55  ;;  %v1723_v60 = vadd.f32 %v1722_v57, %v1434_v56 }
 0x1a9   : > { %1873 = vst [vmem:[%s2880_s21 + $0x118] sm:$0xff] %v1723_v60 }
 0x1aa   : > { %v1438_v61 = vpop.f32.mrb[72].mxu1  ;;  %v1727_v63 = vpop.f32.mrb[72].mxu0 }
 0x1ab   : > { %v1439_v62 = vadd.f32 %v2872_v15, %v1438_v61  ;;  %v1440_v0 = vpop.f32.mrb[73].mxu1  ;;  %v1729_v1 = vpop.f32.mrb[73].mxu0 }
 0x1ac   : > { %v1441_v2 = vpop.f32.mrb[74].mxu1  ;;  %v1730_v5 = vpop.f32.mrb[74].mxu0 }
 0x1ad   : > { %v1728_v3 = vadd.f32 %v1727_v63, %v1439_v62  ;;  %v1442_v4 = vadd.f32 %v2872_v15, %v1441_v2  ;;  %v1443_v6 = vpop.f32.mrb[75].mxu1  ;;  %v1732_v7 = vpop.f32.mrb[75].mxu0 }
 0x1af   : > { %1874 = vst [vmem:[%s2880_s21 + $0x120] sm:$0xff] %v1728_v3  ;;  %v1731_v8 = vadd.f32 %v1730_v5, %v1442_v4 }
 0x1b1   : > { %1875 = vst [vmem:[%s2880_s21 + $0x128] sm:$0xff] %v1731_v8 }
 0x1b2   : > { %v1446_v9 = vpop.f32.mrb[76].mxu1  ;;  %v1735_v11 = vpop.f32.mrb[76].mxu0 }
 0x1b3   : > { %v1447_v10 = vadd.f32 %v2872_v15, %v1446_v9  ;;  %v1448_v12 = vpop.f32.mrb[77].mxu1  ;;  %v1737_v13 = vpop.f32.mrb[77].mxu0 }
 0x1b4   : > { %v1449_v14 = vpop.f32.mrb[78].mxu1  ;;  %v1738_v18 = vpop.f32.mrb[78].mxu0 }
 0x1b5   : > { %v1736_v16 = vadd.f32 %v1735_v11, %v1447_v10  ;;  %v1450_v17 = vadd.f32 %v2872_v15, %v1449_v14  ;;  %v1451_v19 = vpop.f32.mrb[79].mxu1  ;;  %v1740_v20 = vpop.f32.mrb[79].mxu0 }
 0x1b7   : > { %1876 = vst [vmem:[%s2880_s21 + $0x130] sm:$0xff] %v1736_v16  ;;  %v1739_v21 = vadd.f32 %v1738_v18, %v1450_v17 }
 0x1b9   : > { %1877 = vst [vmem:[%s2880_s21 + $0x138] sm:$0xff] %v1739_v21 }
 0x1ba   : > { %v1454_v22 = vpop.f32.mrb[80].mxu1  ;;  %v1743_v24 = vpop.f32.mrb[80].mxu0 }
 0x1bb   : > { %v1455_v23 = vadd.f32 %v2872_v15, %v1454_v22  ;;  %v1456_v25 = vpop.f32.mrb[81].mxu1  ;;  %v1745_v26 = vpop.f32.mrb[81].mxu0 }
 0x1bc   : > { %v1457_v27 = vpop.f32.mrb[82].mxu1  ;;  %v1746_v30 = vpop.f32.mrb[82].mxu0 }
 0x1bd   : > { %v1744_v28 = vadd.f32 %v1743_v24, %v1455_v23  ;;  %v1458_v29 = vadd.f32 %v2872_v15, %v1457_v27  ;;  %v1459_v31 = vpop.f32.mrb[83].mxu1  ;;  %v1748_v32 = vpop.f32.mrb[83].mxu0 }
 0x1bf   : > { %1878 = vst [vmem:[%s2880_s21 + $0x140] sm:$0xff] %v1744_v28  ;;  %v1747_v33 = vadd.f32 %v1746_v30, %v1458_v29 }
 0x1c1   : > { %1879 = vst [vmem:[%s2880_s21 + $0x148] sm:$0xff] %v1747_v33 }
 0x1c2   : > { %v1462_v34 = vpop.f32.mrb[84].mxu1  ;;  %v1751_v36 = vpop.f32.mrb[84].mxu0 }
 0x1c3   : > { %v1463_v35 = vadd.f32 %v2872_v15, %v1462_v34  ;;  %v1464_v37 = vpop.f32.mrb[85].mxu1  ;;  %v1753_v38 = vpop.f32.mrb[85].mxu0 }
 0x1c4   : > { %v1465_v39 = vpop.f32.mrb[86].mxu1  ;;  %v1754_v42 = vpop.f32.mrb[86].mxu0 }
 0x1c5   : > { %v1752_v40 = vadd.f32 %v1751_v36, %v1463_v35  ;;  %v1466_v41 = vadd.f32 %v2872_v15, %v1465_v39  ;;  %v1467_v43 = vpop.f32.mrb[87].mxu1  ;;  %v1756_v44 = vpop.f32.mrb[87].mxu0 }
 0x1c7   : > { %1880 = vst [vmem:[%s2880_s21 + $0x150] sm:$0xff] %v1752_v40  ;;  %v1755_v45 = vadd.f32 %v1754_v42, %v1466_v41 }
 0x1c9   : > { %1881 = vst [vmem:[%s2880_s21 + $0x158] sm:$0xff] %v1755_v45 }
 0x1ca   : > { %v1470_v46 = vpop.f32.mrb[88].mxu1  ;;  %v1759_v48 = vpop.f32.mrb[88].mxu0 }
 0x1cb   : > { %v1471_v47 = vadd.f32 %v2872_v15, %v1470_v46  ;;  %v1472_v49 = vpop.f32.mrb[89].mxu1  ;;  %v1761_v50 = vpop.f32.mrb[89].mxu0 }
 0x1cc   : > { %v1473_v51 = vpop.f32.mrb[90].mxu1  ;;  %v1762_v54 = vpop.f32.mrb[90].mxu0 }
 0x1cd   : > { %v1760_v52 = vadd.f32 %v1759_v48, %v1471_v47  ;;  %v1474_v53 = vadd.f32 %v2872_v15, %v1473_v51  ;;  %v1475_v55 = vpop.f32.mrb[91].mxu1  ;;  %v1764_v56 = vpop.f32.mrb[91].mxu0 }
 0x1cf   : > { %1882 = vst [vmem:[%s2880_s21 + $0x160] sm:$0xff] %v1760_v52  ;;  %v1763_v57 = vadd.f32 %v1762_v54, %v1474_v53 }
 0x1d1   : > { %1883 = vst [vmem:[%s2880_s21 + $0x168] sm:$0xff] %v1763_v57 }
 0x1d2   : > { %v1478_v58 = vpop.f32.mrb[92].mxu1  ;;  %v1767_v60 = vpop.f32.mrb[92].mxu0 }
 0x1d3   : > { %v1479_v59 = vadd.f32 %v2872_v15, %v1478_v58  ;;  %v1480_v61 = vpop.f32.mrb[93].mxu1  ;;  %v1769_v62 = vpop.f32.mrb[93].mxu0 }
 0x1d4   : > { %v1481_v63 = vpop.f32.mrb[94].mxu1  ;;  %v1770_v2 = vpop.f32.mrb[94].mxu0 }
 0x1d5   : > { %v1768_v0 = vadd.f32 %v1767_v60, %v1479_v59  ;;  %v1482_v1 = vadd.f32 %v2872_v15, %v1481_v63  ;;  %v1483_v3 = vpop.f32.mrb[95].mxu1  ;;  %v1772_v4 = vpop.f32.mrb[95].mxu0 }
 0x1d7   : > { %1884 = vst [vmem:[%s2880_s21 + $0x170] sm:$0xff] %v1768_v0  ;;  %v1771_v5 = vadd.f32 %v1770_v2, %v1482_v1 }
 0x1d9   : > { %1885 = vst [vmem:[%s2880_s21 + $0x178] sm:$0xff] %v1771_v5 }
 0x1da   : > { %v1486_v6 = vpop.f32.mrb[96].mxu1  ;;  %v1775_v8 = vpop.f32.mrb[96].mxu0 }
 0x1db   : > { %v1487_v7 = vadd.f32 %v2872_v15, %v1486_v6  ;;  %v1488_v9 = vpop.f32.mrb[97].mxu1  ;;  %v1777_v10 = vpop.f32.mrb[97].mxu0 }
 0x1dc   : > { %v1489_v11 = vpop.f32.mrb[98].mxu1  ;;  %v1778_v14 = vpop.f32.mrb[98].mxu0 }
 0x1dd   : > { %v1776_v12 = vadd.f32 %v1775_v8, %v1487_v7  ;;  %v1490_v13 = vadd.f32 %v2872_v15, %v1489_v11  ;;  %v1491_v16 = vpop.f32.mrb[99].mxu1  ;;  %v1780_v17 = vpop.f32.mrb[99].mxu0 }
 0x1df   : > { %1886 = vst [vmem:[%s2880_s21 + $0x180] sm:$0xff] %v1776_v12  ;;  %v1779_v18 = vadd.f32 %v1778_v14, %v1490_v13 }
 0x1e1   : > { %1887 = vst [vmem:[%s2880_s21 + $0x188] sm:$0xff] %v1779_v18 }
 0x1e2   : > { %v1494_v19 = vpop.f32.mrb[100].mxu1  ;;  %v1783_v21 = vpop.f32.mrb[100].mxu0 }
 0x1e3   : > { %v1495_v20 = vadd.f32 %v2872_v15, %v1494_v19  ;;  %v1496_v22 = vpop.f32.mrb[101].mxu1  ;;  %v1785_v23 = vpop.f32.mrb[101].mxu0 }
 0x1e4   : > { %v1497_v24 = vpop.f32.mrb[102].mxu1  ;;  %v1786_v27 = vpop.f32.mrb[102].mxu0 }
 0x1e5   : > { %v1784_v25 = vadd.f32 %v1783_v21, %v1495_v20  ;;  %v1498_v26 = vadd.f32 %v2872_v15, %v1497_v24  ;;  %v1499_v28 = vpop.f32.mrb[103].mxu1  ;;  %v1788_v29 = vpop.f32.mrb[103].mxu0 }
 0x1e7   : > { %1888 = vst [vmem:[%s2880_s21 + $0x190] sm:$0xff] %v1784_v25  ;;  %v1787_v30 = vadd.f32 %v1786_v27, %v1498_v26 }
 0x1e9   : > { %1889 = vst [vmem:[%s2880_s21 + $0x198] sm:$0xff] %v1787_v30 }
 0x1ea   : > { %v1502_v31 = vpop.f32.mrb[104].mxu1  ;;  %v1791_v33 = vpop.f32.mrb[104].mxu0 }
 0x1eb   : > { %v1503_v32 = vadd.f32 %v2872_v15, %v1502_v31  ;;  %v1504_v34 = vpop.f32.mrb[105].mxu1  ;;  %v1793_v35 = vpop.f32.mrb[105].mxu0 }
 0x1ec   : > { %v1505_v36 = vpop.f32.mrb[106].mxu1  ;;  %v1794_v39 = vpop.f32.mrb[106].mxu0 }
 0x1ed   : > { %v1792_v37 = vadd.f32 %v1791_v33, %v1503_v32  ;;  %v1506_v38 = vadd.f32 %v2872_v15, %v1505_v36  ;;  %v1507_v40 = vpop.f32.mrb[107].mxu1  ;;  %v1796_v41 = vpop.f32.mrb[107].mxu0 }
 0x1ef   : > { %1890 = vst [vmem:[%s2880_s21 + $0x1a0] sm:$0xff] %v1792_v37  ;;  %v1795_v42 = vadd.f32 %v1794_v39, %v1506_v38 }
 0x1f1   : > { %1891 = vst [vmem:[%s2880_s21 + $0x1a8] sm:$0xff] %v1795_v42 }
 0x1f2   : > { %v1510_v43 = vpop.f32.mrb[108].mxu1  ;;  %v1799_v45 = vpop.f32.mrb[108].mxu0 }
 0x1f3   : > { %v1511_v44 = vadd.f32 %v2872_v15, %v1510_v43  ;;  %v1512_v46 = vpop.f32.mrb[109].mxu1  ;;  %v1801_v47 = vpop.f32.mrb[109].mxu0 }
 0x1f4   : > { %v1513_v48 = vpop.f32.mrb[110].mxu1  ;;  %v1802_v51 = vpop.f32.mrb[110].mxu0 }
 0x1f5   : > { %v1800_v49 = vadd.f32 %v1799_v45, %v1511_v44  ;;  %v1514_v50 = vadd.f32 %v2872_v15, %v1513_v48  ;;  %v1515_v52 = vpop.f32.mrb[111].mxu1  ;;  %v1804_v53 = vpop.f32.mrb[111].mxu0 }
 0x1f7   : > { %1892 = vst [vmem:[%s2880_s21 + $0x1b0] sm:$0xff] %v1800_v49  ;;  %v1803_v54 = vadd.f32 %v1802_v51, %v1514_v50 }
 0x1f9   : > { %1893 = vst [vmem:[%s2880_s21 + $0x1b8] sm:$0xff] %v1803_v54 }
 0x1fa   : > { %v1518_v55 = vpop.f32.mrb[112].mxu1  ;;  %v1807_v57 = vpop.f32.mrb[112].mxu0 }
 0x1fb   : > { %v1519_v56 = vadd.f32 %v2872_v15, %v1518_v55  ;;  %v1520_v58 = vpop.f32.mrb[113].mxu1  ;;  %v1809_v59 = vpop.f32.mrb[113].mxu0 }
 0x1fc   : > { %v1521_v60 = vpop.f32.mrb[114].mxu1  ;;  %v1810_v63 = vpop.f32.mrb[114].mxu0 }
 0x1fd   : > { %v1808_v61 = vadd.f32 %v1807_v57, %v1519_v56  ;;  %v1522_v62 = vadd.f32 %v2872_v15, %v1521_v60  ;;  %v1523_v0 = vpop.f32.mrb[115].mxu1  ;;  %v1812_v1 = vpop.f32.mrb[115].mxu0 }
 0x1ff   : > { %1894 = vst [vmem:[%s2880_s21 + $0x1c0] sm:$0xff] %v1808_v61  ;;  %v1811_v2 = vadd.f32 %v1810_v63, %v1522_v62 }
 0x201   : > { %1895 = vst [vmem:[%s2880_s21 + $0x1c8] sm:$0xff] %v1811_v2 }
 0x202   : > { %v1526_v3 = vpop.f32.mrb[116].mxu1  ;;  %v1815_v5 = vpop.f32.mrb[116].mxu0 }
 0x203   : > { %v1527_v4 = vadd.f32 %v2872_v15, %v1526_v3  ;;  %v1528_v6 = vpop.f32.mrb[117].mxu1  ;;  %v1817_v7 = vpop.f32.mrb[117].mxu0 }
 0x204   : > { %v1529_v8 = vpop.f32.mrb[118].mxu1  ;;  %v1818_v11 = vpop.f32.mrb[118].mxu0 }
 0x205   : > { %v1816_v9 = vadd.f32 %v1815_v5, %v1527_v4  ;;  %v1530_v10 = vadd.f32 %v2872_v15, %v1529_v8  ;;  %v1531_v12 = vpop.f32.mrb[119].mxu1  ;;  %v1820_v13 = vpop.f32.mrb[119].mxu0 }
 0x207   : > { %1896 = vst [vmem:[%s2880_s21 + $0x1d0] sm:$0xff] %v1816_v9  ;;  %v1819_v14 = vadd.f32 %v1818_v11, %v1530_v10 }
 0x209   : > { %1897 = vst [vmem:[%s2880_s21 + $0x1d8] sm:$0xff] %v1819_v14 }
 0x20a   : > { %v1534_v16 = vpop.f32.mrb[120].mxu1  ;;  %v1823_v18 = vpop.f32.mrb[120].mxu0 }
 0x20b   : > { %v1535_v17 = vadd.f32 %v2872_v15, %v1534_v16  ;;  %v1536_v19 = vpop.f32.mrb[121].mxu1  ;;  %v1825_v20 = vpop.f32.mrb[121].mxu0 }
 0x20c   : > { %v1537_v21 = vpop.f32.mrb[122].mxu1  ;;  %v1826_v24 = vpop.f32.mrb[122].mxu0 }
 0x20d   : > { %v1824_v22 = vadd.f32 %v1823_v18, %v1535_v17  ;;  %v1538_v23 = vadd.f32 %v2872_v15, %v1537_v21  ;;  %v1539_v25 = vpop.f32.mrb[123].mxu1  ;;  %v1828_v26 = vpop.f32.mrb[123].mxu0 }
 0x20f   : > { %1898 = vst [vmem:[%s2880_s21 + $0x1e0] sm:$0xff] %v1824_v22  ;;  %v1827_v27 = vadd.f32 %v1826_v24, %v1538_v23 }
 0x211   : > { %1899 = vst [vmem:[%s2880_s21 + $0x1e8] sm:$0xff] %v1827_v27 }
 0x212   : > { %v1542_v28 = vpop.f32.mrb[124].mxu1  ;;  %v1831_v30 = vpop.f32.mrb[124].mxu0 }
 0x213   : > { %v1543_v29 = vadd.f32 %v2872_v15, %v1542_v28  ;;  %v1544_v31 = vpop.f32.mrb[125].mxu1  ;;  %v1833_v32 = vpop.f32.mrb[125].mxu0 }
 0x214   : > { %v1545_v33 = vpop.f32.mrb[126].mxu1  ;;  %v1834_v36 = vpop.f32.mrb[126].mxu0 }
 0x215   : > { %v1832_v34 = vadd.f32 %v1831_v30, %v1543_v29  ;;  %v1546_v35 = vadd.f32 %v2872_v15, %v1545_v33  ;;  %v1547_v37 = vpop.f32.mrb[127].mxu1  ;;  %v1836_v38 = vpop.f32.mrb[127].mxu0 }
 0x217   : > { %1900 = vst [vmem:[%s2880_s21 + $0x1f0] sm:$0xff] %v1832_v34  ;;  %v1835_v39 = vadd.f32 %v1834_v36, %v1546_v35 }
 0x219   : > { %1901 = vst [vmem:[%s2880_s21 + $0x1f8] sm:$0xff] %v1835_v39 }
 0x21a PF: > { %s13_s14 = sadd.s32 1, %s2579_s14   ;;  %s3039_s12 = smov %s2575_s13 }
 0x21b   : > { %p10_p5 = scmp.ge.s32.totalorder %s13_s14, 4   ;;  %s3040_s13 = smov %s3042_s15 }
 0x21d   :  { %12 = sbr.rel (!%p10_p5) target bundleno = 2 (0x2), region = 68 }

// kernel: _lambda_.113
= control target key start
LH: loop header
LB: loop body
LE: loop exit
PB: predicated region body
PF: predicated region fallthrough
CT: control target
= control target key end

     0   :  { %s201_s0 = inlined_call_operand.vmem [shape: f32[128,128], index: 0, kind: input, shape index: {}]   ;;  %s202_s1 = inlined_call_operand.vmem [shape: f32[128,128], index: 1, kind: output, shape index: {}]  }
   0x1   :  { %v8_v0 = vld [vmem:[%s201_s0] sm:$0xff]  ;;  %v9_v1 = vld [vmem:[%s201_s0 + $0x8] sm:$0xff]  ;;  %v10_v2 = vld [vmem:[%s201_s0 + $0x10] sm:$0xff] }
   0x2   :  { %vm24_vm0 = vcmp.ge.f32.partialorder %v8_v0, 0.0  ;;  %v40_v3 = vmul.f32 0.01, %v8_v0  ;;  %vm25_vm1 = vcmp.ge.f32.partialorder %v9_v1, 0.0  ;;  %v41_v4 = vmul.f32 0.01, %v9_v1 }
   0x3   :  { %vm26_vm2 = vcmp.ge.f32.partialorder %v10_v2, 0.0  ;;  %v42_v5 = vmul.f32 0.01, %v10_v2  ;;  %v11_v6 = vld [vmem:[%s201_s0 + $0x18] sm:$0xff]  ;;  %v12_v7 = vld [vmem:[%s201_s0 + $0x20] sm:$0xff]  ;;  %v13_v8 = vld [vmem:[%s201_s0 + $0x28] sm:$0xff] }
   0x4   :  { %v56_v9 = vsel %vm24_vm0, %v8_v0, %v40_v3  ;;  %v57_v10 = vsel %vm25_vm1, %v9_v1, %v41_v4  ;;  %vm27_vm3 = vcmp.ge.f32.partialorder %v11_v6, 0.0  ;;  %v43_v11 = vmul.f32 0.01, %v11_v6  ;;  %v14_v12 = vld [vmem:[%s201_s0 + $0x30] sm:$0xff]  ;;  %v15_v13 = vld [vmem:[%s201_s0 + $0x38] sm:$0xff]  ;;  %v16_v14 = vld [vmem:[%s201_s0 + $0x40] sm:$0xff] }
   0x5   :  { %72 = vst [vmem:[%s202_s1] sm:$0xff] %v56_v9  ;;  %73 = vst [vmem:[%s202_s1 + $0x8] sm:$0xff] %v57_v10  ;;  %v58_v15 = vsel %vm26_vm2, %v10_v2, %v42_v5  ;;  %vm28_vm4 = vcmp.ge.f32.partialorder %v12_v7, 0.0  ;;  %v44_v16 = vmul.f32 0.01, %v12_v7  ;;  %vm29_vm5 = vcmp.ge.f32.partialorder %v13_v8, 0.0  ;;  %v17_v17 = vld [vmem:[%s201_s0 + $0x48] sm:$0xff] }
   0x6   :  { %74 = vst [vmem:[%s202_s1 + $0x10] sm:$0xff] %v58_v15  ;;  %v59_v18 = vsel %vm27_vm3, %v11_v6, %v43_v11  ;;  %v45_v19 = vmul.f32 0.01, %v13_v8  ;;  %vm30_vm6 = vcmp.ge.f32.partialorder %v14_v12, 0.0  ;;  %v46_v20 = vmul.f32 0.01, %v14_v12 }
   0x7   :  { %v18_v21 = vld [vmem:[%s201_s0 + $0x50] sm:$0xff]  ;;  %75 = vst [vmem:[%s202_s1 + $0x18] sm:$0xff] %v59_v18  ;;  %v60_v22 = vsel %vm28_vm4, %v12_v7, %v44_v16  ;;  %vm31_vm7 = vcmp.ge.f32.partialorder %v15_v13, 0.0  ;;  %v47_v23 = vmul.f32 0.01, %v15_v13  ;;  %vm32_vm8 = vcmp.ge.f32.partialorder %v16_v14, 0.0 }
   0x8   :  { %v19_v24 = vld [vmem:[%s201_s0 + $0x58] sm:$0xff]  ;;  %v20_v25 = vld [vmem:[%s201_s0 + $0x60] sm:$0xff]  ;;  %76 = vst [vmem:[%s202_s1 + $0x20] sm:$0xff] %v60_v22  ;;  %v61_v26 = vsel %vm29_vm5, %v13_v8, %v45_v19  ;;  %v62_v27 = vsel %vm30_vm6, %v14_v12, %v46_v20  ;;  %v48_v28 = vmul.f32 0.01, %v16_v14  ;;  %vm33_vm9 = vcmp.ge.f32.partialorder %v17_v17, 0.0 }
   0x9   :  { %v21_v29 = vld [vmem:[%s201_s0 + $0x68] sm:$0xff]  ;;  %77 = vst [vmem:[%s202_s1 + $0x28] sm:$0xff] %v61_v26  ;;  %78 = vst [vmem:[%s202_s1 + $0x30] sm:$0xff] %v62_v27  ;;  %v63_v30 = vsel %vm31_vm7, %v15_v13, %v47_v23  ;;  %v49_v31 = vmul.f32 0.01, %v17_v17  ;;  %vm34_vm10 = vcmp.ge.f32.partialorder %v18_v21, 0.0 }
   0xa   :  { %v50_v32 = vmul.f32 0.01, %v18_v21  ;;  %v22_v33 = vld [vmem:[%s201_s0 + $0x70] sm:$0xff]  ;;  %79 = vst [vmem:[%s202_s1 + $0x38] sm:$0xff] %v63_v30  ;;  %v64_v34 = vsel %vm32_vm8, %v16_v14, %v48_v28  ;;  %vm35_vm11 = vcmp.ge.f32.partialorder %v19_v24, 0.0  ;;  %vm36_vm12 = vcmp.ge.f32.partialorder %v20_v25, 0.0 }
   0xb   :  { %v51_v35 = vmul.f32 0.01, %v19_v24  ;;  %v23_v36 = vld [vmem:[%s201_s0 + $0x78] sm:$0xff]  ;;  %80 = vst [vmem:[%s202_s1 + $0x40] sm:$0xff] %v64_v34  ;;  %v65_v37 = vsel %vm33_vm9, %v17_v17, %v49_v31  ;;  %v52_v39 = vmul.f32 0.01, %v20_v25 }
   0xc   :  { %v66_v38 = vsel %vm34_vm10, %v18_v21, %v50_v32  ;;  %vm37_vm13 = vcmp.ge.f32.partialorder %v21_v29, 0.0  ;;  %81 = vst [vmem:[%s202_s1 + $0x48] sm:$0xff] %v65_v37  ;;  %v53_v41 = vmul.f32 0.01, %v21_v29  ;;  %vm38_vm14 = vcmp.ge.f32.partialorder %v22_v33, 0.0 }
   0xd   :  { %82 = vst [vmem:[%s202_s1 + $0x50] sm:$0xff] %v66_v38  ;;  %v67_v40 = vsel %vm35_vm11, %v19_v24, %v51_v35  ;;  %v54_v42 = vmul.f32 0.01, %v22_v33  ;;  %v68_v43 = vsel %vm36_vm12, %v20_v25, %v52_v39  ;;  %vm39_vm15 = vcmp.ge.f32.partialorder %v23_v36, 0.0 }
   0xe   :  { %83 = vst [vmem:[%s202_s1 + $0x58] sm:$0xff] %v67_v40  ;;  %v55_v44 = vmul.f32 0.01, %v23_v36  ;;  %84 = vst [vmem:[%s202_s1 + $0x60] sm:$0xff] %v68_v43  ;;  %v69_v45 = vsel %vm37_vm13, %v21_v29, %v53_v41 }
   0xf   :  { %v70_v46 = vsel %vm38_vm14, %v22_v33, %v54_v42  ;;  %85 = vst [vmem:[%s202_s1 + $0x68] sm:$0xff] %v69_v45 }
  0x10   :  { %86 = vst [vmem:[%s202_s1 + $0x70] sm:$0xff] %v70_v46  ;;  %v71_v47 = vsel %vm39_vm15, %v23_v36, %v55_v44 }
  0x11   :  { %87 = vst [vmem:[%s202_s1 + $0x78] sm:$0xff] %v71_v47 }

// kernel: _lambda_.115
= control target key start
LH: loop header
LB: loop body
LE: loop exit
PB: predicated region body
PF: predicated region fallthrough
CT: control target
= control target key end

     0   :  { %s288_s0 = inlined_call_operand.vmem [shape: f32[128,128], index: 0, kind: input, shape index: {}]   ;;  %s289_s1 = inlined_call_operand.vmem [shape: f32[128,128], index: 1, kind: input, shape index: {}]   ;;  %s290_s2 = inlined_call_operand.vmem [shape: f32[128,128], index: 2, kind: output, shape index: {}]  }
   0x1   :  { %v11_v0 = vld [vmem:[%s288_s0] sm:$0xff]  ;;  %v12_v2 = vld [vmem:[%s288_s0 + $0x8] sm:$0xff]  ;;  %v13_v5 = vld [vmem:[%s288_s0 + $0x10] sm:$0xff] }
   0x2   :  { %v27_v1 = vld [vmem:[%s289_s1] sm:$0xff]  ;;  %v28_v4 = vld [vmem:[%s289_s1 + $0x8] sm:$0xff]  ;;  %v29_v6 = vld [vmem:[%s289_s1 + $0x10] sm:$0xff] }
   0x3   :  { %v43_v3 = vadd.f32 %v27_v1, %v11_v0  ;;  %v44_v7 = vadd.f32 %v28_v4, %v12_v2  ;;  %v45_v8 = vadd.f32 %v29_v6, %v13_v5  ;;  %v14_v9 = vld [vmem:[%s288_s0 + $0x18] sm:$0xff]  ;;  %v15_v11 = vld [vmem:[%s288_s0 + $0x20] sm:$0xff]  ;;  %v16_v15 = vld [vmem:[%s288_s0 + $0x28] sm:$0xff] }
   0x4   :  { %v30_v10 = vld [vmem:[%s289_s1 + $0x18] sm:$0xff]  ;;  %v31_v14 = vld [vmem:[%s289_s1 + $0x20] sm:$0xff]  ;;  %v32_v16 = vld [vmem:[%s289_s1 + $0x28] sm:$0xff] }
   0x5   :  { %vm59_vm0 = vcmp.ge.f32.partialorder %v43_v3, 0.0  ;;  %v75_v12 = vmul.f32 0.01, %v43_v3  ;;  %v46_v13 = vadd.f32 %v30_v10, %v14_v9  ;;  %vm60_vm1 = vcmp.ge.f32.partialorder %v44_v7, 0.0  ;;  %v17_v22 = vld [vmem:[%s288_s0 + $0x30] sm:$0xff]  ;;  %v18_v24 = vld [vmem:[%s288_s0 + $0x38] sm:$0xff] }
   0x6   :  { %v76_v17 = vmul.f32 0.01, %v44_v7  ;;  %vm61_vm2 = vcmp.ge.f32.partialorder %v45_v8, 0.0  ;;  %v77_v18 = vmul.f32 0.01, %v45_v8  ;;  %v47_v21 = vadd.f32 %v31_v14, %v15_v11  ;;  %v33_v23 = vld [vmem:[%s289_s1 + $0x30] sm:$0xff] }
   0x7   :  { %v91_v19 = vsel %vm59_vm0, %v43_v3, %v75_v12  ;;  %vm62_vm3 = vcmp.ge.f32.partialorder %v46_v13, 0.0  ;;  %v78_v20 = vmul.f32 0.01, %v46_v13  ;;  %v48_v27 = vadd.f32 %v32_v16, %v16_v15  ;;  %v34_v29 = vld [vmem:[%s289_s1 + $0x38] sm:$0xff]  ;;  %v19_v30 = vld [vmem:[%s288_s0 + $0x40] sm:$0xff]  ;;  %v20_v35 = vld [vmem:[%s288_s0 + $0x48] sm:$0xff] }
   0x8   :  { %107 = vst [vmem:[%s290_s2] sm:$0xff] %v91_v19  ;;  %v92_v25 = vsel %vm60_vm1, %v44_v7, %v76_v17  ;;  %v93_v26 = vsel %vm61_vm2, %v45_v8, %v77_v18  ;;  %v49_v28 = vadd.f32 %v33_v23, %v17_v22  ;;  %v35_v31 = vld [vmem:[%s289_s1 + $0x40] sm:$0xff]  ;;  %vm63_vm4 = vcmp.ge.f32.partialorder %v47_v21, 0.0  ;;  %v36_v36 = vld [vmem:[%s289_s1 + $0x48] sm:$0xff]  ;;  %v21_v37 = vld [vmem:[%s288_s0 + $0x50] sm:$0xff] }
   0x9   :  { %108 = vst [vmem:[%s290_s2 + $0x8] sm:$0xff] %v92_v25  ;;  %109 = vst [vmem:[%s290_s2 + $0x10] sm:$0xff] %v93_v26  ;;  %v94_v32 = vsel %vm62_vm3, %v46_v13, %v78_v20  ;;  %v79_v33 = vmul.f32 0.01, %v47_v21  ;;  %v50_v34 = vadd.f32 %v34_v29, %v18_v24  ;;  %vm64_vm5 = vcmp.ge.f32.partialorder %v48_v27, 0.0  ;;  %v37_v43 = vld [vmem:[%s289_s1 + $0x50] sm:$0xff] }
   0xa   :  { %110 = vst [vmem:[%s290_s2 + $0x18] sm:$0xff] %v94_v32  ;;  %v80_v38 = vmul.f32 0.01, %v48_v27  ;;  %vm65_vm6 = vcmp.ge.f32.partialorder %v49_v28, 0.0  ;;  %v81_v39 = vmul.f32 0.01, %v49_v28  ;;  %v51_v42 = vadd.f32 %v35_v31, %v19_v30 }
   0xb   :  { %v95_v40 = vsel %vm63_vm4, %v47_v21, %v79_v33  ;;  %vm66_vm7 = vcmp.ge.f32.partialorder %v50_v34, 0.0  ;;  %v82_v41 = vmul.f32 0.01, %v50_v34  ;;  %v22_v44 = vld [vmem:[%s288_s0 + $0x58] sm:$0xff]  ;;  %v52_v48 = vadd.f32 %v36_v36, %v20_v35  ;;  %v23_v50 = vld [vmem:[%s288_s0 + $0x60] sm:$0xff]  ;;  %v24_v52 = vld [vmem:[%s288_s0 + $0x68] sm:$0xff] }
   0xc   :  { %v38_v45 = vld [vmem:[%s289_s1 + $0x58] sm:$0xff]  ;;  %111 = vst [vmem:[%s290_s2 + $0x20] sm:$0xff] %v95_v40  ;;  %v96_v46 = vsel %vm64_vm5, %v48_v27, %v80_v38  ;;  %v97_v47 = vsel %vm65_vm6, %v49_v28, %v81_v39  ;;  %v53_v49 = vadd.f32 %v37_v43, %v21_v37  ;;  %v39_v51 = vld [vmem:[%s289_s1 + $0x60] sm:$0xff]  ;;  %vm67_vm8 = vcmp.ge.f32.partialorder %v51_v42, 0.0  ;;  %v40_v56 = vld [vmem:[%s289_s1 + $0x68] sm:$0xff] }
   0xd   :  { %112 = vst [vmem:[%s290_s2 + $0x28] sm:$0xff] %v96_v46  ;;  %113 = vst [vmem:[%s290_s2 + $0x30] sm:$0xff] %v97_v47  ;;  %v98_v53 = vsel %vm66_vm7, %v50_v34, %v82_v41  ;;  %v83_v54 = vmul.f32 0.01, %v51_v42  ;;  %v54_v55 = vadd.f32 %v38_v45, %v22_v44  ;;  %v25_v57 = vld [vmem:[%s288_s0 + $0x70] sm:$0xff]  ;;  %vm68_vm9 = vcmp.ge.f32.partialorder %v52_v48, 0.0 }
   0xe   :  { %v41_v58 = vld [vmem:[%s289_s1 + $0x70] sm:$0xff]  ;;  %114 = vst [vmem:[%s290_s2 + $0x38] sm:$0xff] %v98_v53  ;;  %v84_v59 = vmul.f32 0.01, %v52_v48  ;;  %vm69_vm10 = vcmp.ge.f32.partialorder %v53_v49, 0.0  ;;  %v55_v63 = vadd.f32 %v39_v51, %v23_v50  ;;  %v26_v0 = vld [vmem:[%s288_s0 + $0x78] sm:$0xff]  ;;  %v56_v4 = vadd.f32 %v40_v56, %v24_v52 }
   0xf   :  { %v85_v60 = vmul.f32 0.01, %v53_v49  ;;  %v99_v61 = vsel %vm67_vm8, %v51_v42, %v83_v54  ;;  %vm70_vm11 = vcmp.ge.f32.partialorder %v54_v55, 0.0  ;;  %v86_v62 = vmul.f32 0.01, %v54_v55  ;;  %v42_v1 = vld [vmem:[%s289_s1 + $0x78] sm:$0xff] }
  0x10   :  { %115 = vst [vmem:[%s290_s2 + $0x40] sm:$0xff] %v99_v61  ;;  %v100_v2 = vsel %vm68_vm9, %v52_v48, %v84_v59  ;;  %v57_v5 = vadd.f32 %v41_v58, %v25_v57  ;;  %vm71_vm12 = vcmp.ge.f32.partialorder %v55_v63, 0.0  ;;  %v87_v7 = vmul.f32 0.01, %v55_v63 }
  0x11   :  { %v101_v3 = vsel %vm69_vm10, %v53_v49, %v85_v60  ;;  %116 = vst [vmem:[%s290_s2 + $0x48] sm:$0xff] %v100_v2  ;;  %v102_v6 = vsel %vm70_vm11, %v54_v55, %v86_v62  ;;  %v58_v8 = vadd.f32 %v42_v1, %v26_v0  ;;  %vm72_vm13 = vcmp.ge.f32.partialorder %v56_v4, 0.0 }
  0x12   :  { %117 = vst [vmem:[%s290_s2 + $0x50] sm:$0xff] %v101_v3  ;;  %118 = vst [vmem:[%s290_s2 + $0x58] sm:$0xff] %v102_v6  ;;  %v88_v9 = vmul.f32 0.01, %v56_v4  ;;  %vm73_vm14 = vcmp.ge.f32.partialorder %v57_v5, 0.0  ;;  %v103_v11 = vsel %vm71_vm12, %v55_v63, %v87_v7 }
  0x13   :  { %v89_v10 = vmul.f32 0.01, %v57_v5  ;;  %vm74_vm15 = vcmp.ge.f32.partialorder %v58_v8, 0.0  ;;  %v90_v12 = vmul.f32 0.01, %v58_v8  ;;  %119 = vst [vmem:[%s290_s2 + $0x60] sm:$0xff] %v103_v11 }
  0x14   :  { %v104_v13 = vsel %vm72_vm13, %v56_v4, %v88_v9 }
  0x15   :  { %v105_v14 = vsel %vm73_vm14, %v57_v5, %v89_v10  ;;  %120 = vst [vmem:[%s290_s2 + $0x68] sm:$0xff] %v104_v13  ;;  %v106_v15 = vsel %vm74_vm15, %v58_v8, %v90_v12 }
  0x16   :  { %121 = vst [vmem:[%s290_s2 + $0x70] sm:$0xff] %v105_v14  ;;  %122 = vst [vmem:[%s290_s2 + $0x78] sm:$0xff] %v106_v15 }

// kernel: _lambda_.117
= control target key start
LH: loop header
LB: loop body
LE: loop exit
PB: predicated region body
PF: predicated region fallthrough
CT: control target
= control target key end

     0   :  { %s1513_s12 = smov 0   ;;  %s1515_s13 = smov 0   ;;  %s1834_s0 = inlined_call_operand.vmem [shape: bf16[8192,256], index: 0, kind: input, shape index: {}]   ;;  %s1835_s1 = inlined_call_operand.vmem [shape: bf16[256,128], index: 1, kind: input, shape index: {}]   ;;  %s1836_s2 = inlined_call_operand.vmem [shape: f32[1,128], index: 2, kind: input, shape index: {}]   ;;  %s1837_s3 = inlined_call_operand.vmem [shape: f32[8192,128], index: 3, kind: output, shape index: {}]  }
   0x1   :  { %s1517_s14 = smov 0  }
   0x2 LB: > { %s25_s15 = sadd.s32 1, %s1486_s13  ;;  %p1209_p0 = scmp.ge.s32.totalorder %s1490_s14, 1  ;;  %s1490_s14 = sphi %s1517_s14, %s13_s14   ;;  %s1486_s13 = sphi %s1515_s13, %s1839_s13   ;;  %s1482_s12 = sphi %s1513_s12, %s1838_s12  }
   0x3   : > { %p27_p1 = scmp.ge.s32.totalorder %s25_s15, 16  ;;  %p170_p2 = scmp.lt.s32.totalorder %s1490_s14, 17 }
   0x5   : > { %s1841_s15 = smov (%p27_p1, %s25_s15), 0  ;;  %p171_p3 = pnand %p1209_p0, %p170_p2 }
   0x6   : > { %v1356_v0 = vld [vmem:[%s1835_s1] sm:$0xff] (!%p171_p3)   ;;  %v1492_v1 = vmov (!%p171_p3), 0   ;;  %s1210_s18 = sshll.u32 (!%p171_p3), %s1482_s12, 6  ;;  %v1357_v2 = vld [vmem:[%s1835_s1 + $0x8] sm:$0xff] (!%p171_p3)   ;;  %v1358_v3 = vld [vmem:[%s1835_s1 + $0x10] sm:$0xff] (!%p171_p3)  }
   0x7   : > { %174 = sbr.rel (%p171_p3) target bundleno = 408 (0x198), region = 32  ;;  %748 = vmatprep.subr.bf16.mxu0 (!%p171_p3), %v1492_v1  ;;  %1299 = vmatprep.subr.bf16.mxu1 (!%p171_p3), %v1492_v1  ;;  %p206_p4 = scmp.lt.s32.totalorder (!%p171_p3), %s1210_s18, 1023  ;;  %v1359_v4 = vld [vmem:[%s1835_s1 + $0x18] sm:$0xff] (!%p171_p3)   ;;  %v1360_v5 = vld [vmem:[%s1835_s1 + $0x20] sm:$0xff] (!%p171_p3)   ;;  %v1361_v7 = vld [vmem:[%s1835_s1 + $0x28] sm:$0xff] (!%p171_p3)  }
   0x8   : > { %749 = vmatpush1.bf16.msra.mxu0 (!%p171_p3), %v1356_v0  ;;  %1315 = vmatpush1.bf16.msra.mxu1 (!%p171_p3), %v1356_v0  ;;  %v1362_v9 = vld [vmem:[%s1835_s1 + $0x30] sm:$0xff] (!%p171_p3)   ;;  %v1363_v10 = vld [vmem:[%s1835_s1 + $0x38] sm:$0xff] (!%p171_p3)   ;;  %v1364_v11 = vld [vmem:[%s1835_s1 + $0x40] sm:$0xff] (!%p171_p3)  }
   0x9   : > { %750 = vmatprep.subr.bf16.mxu0 (!%p171_p3), %v1492_v1  ;;  %1300 = vmatprep.subr.bf16.mxu1 (!%p171_p3), %v1492_v1  ;;  %v1365_v12 = vld [vmem:[%s1835_s1 + $0x48] sm:$0xff] (!%p171_p3)   ;;  %v1366_v13 = vld [vmem:[%s1835_s1 + $0x50] sm:$0xff] (!%p171_p3)   ;;  %v1367_v14 = vld [vmem:[%s1835_s1 + $0x58] sm:$0xff] (!%p171_p3)  }
   0xa   : > { %v1368_v15 = vld [vmem:[%s1835_s1 + $0x60] sm:$0xff] (!%p171_p3)   ;;  %v1369_v16 = vld [vmem:[%s1835_s1 + $0x68] sm:$0xff] (!%p171_p3)   ;;  %v1370_v17 = vld [vmem:[%s1835_s1 + $0x70] sm:$0xff] (!%p171_p3)  }
   0xb   : > { %v1371_v18 = vld [vmem:[%s1835_s1 + $0x78] sm:$0xff] (!%p171_p3)  }
   0xc   : > { %751 = vmatpush1.bf16.msra.mxu0 (!%p171_p3), %v1357_v2  ;;  %1316 = vmatpush1.bf16.msra.mxu1 (!%p171_p3), %v1357_v2 }
   0xd   : > { %752 = vmatprep.subr.bf16.mxu0 (!%p171_p3), %v1492_v1  ;;  %1301 = vmatprep.subr.bf16.mxu1 (!%p171_p3), %v1492_v1 }
   0xe   : > { %s1843_s18 = smov (!%p206_p4, %s1210_s18), 1023 }
   0xf   : > { %s1298_s25 = sshll.u32 %s1843_s18, 3 }
  0x10   : > { %753 = vmatpush1.bf16.msra.mxu0 %v1358_v3  ;;  %1317 = vmatpush1.bf16.msra.mxu1 %v1358_v3  ;;  %s1562_s30 = scalar_lea.vmem %s1834_s0, %s1298_s25  ;;  %s1695_s9 = scalar_lea.vmem %s1837_s3, %s1298_s25 }
  0x11   : > { %754 = vmatprep.subr.bf16.mxu0 %v1492_v1  ;;  %1302 = vmatprep.subr.bf16.mxu1 %v1492_v1  ;;  %v1374_v6 = vld [vmem:[%s1562_s30 + $0x4] ss:$8 sps:$4 sm:$0xff]   ;;  %v1372_v19 = vld [vmem:[%s1562_s30] ss:$8 sps:$4 sm:$0xff]   ;;  %v1378_v21 = vld [vmem:[%s1562_s30 + $0x14] ss:$8 sps:$4 sm:$0xff]  }
  0x12   : > { %v1377_v8 = vld [vmem:[%s1562_s30 + $0x104] ss:$8 sps:$4 sm:$0xff]   ;;  %780 = vmatprep.mubr.bf16.mxu0 %v1374_v6  ;;  %v1375_v20 = vld [vmem:[%s1562_s30 + $0x100] ss:$8 sps:$4 sm:$0xff]   ;;  %v1380_v22 = vld [vmem:[%s1562_s30 + $0x114] ss:$8 sps:$4 sm:$0xff]  }
  0x13   : > { %908 = vmatprep.mubr.bf16.mxu1 %v1377_v8  ;;  %v1382_v23 = vld [vmem:[%s1562_s30 + $0x10] ss:$8 sps:$4 sm:$0xff]   ;;  %v1384_v25 = vld [vmem:[%s1562_s30 + $0x24] ss:$8 sps:$4 sm:$0xff]   ;;  %v1388_v27 = vld [vmem:[%s1562_s30 + $0x20] ss:$8 sps:$4 sm:$0xff]  }
  0x14   : > { %755 = vmatpush1.bf16.msra.mxu0 %v1359_v4  ;;  %1318 = vmatpush1.bf16.msra.mxu1 %v1359_v4  ;;  %v1383_v24 = vld [vmem:[%s1562_s30 + $0x110] ss:$8 sps:$4 sm:$0xff]   ;;  %v1386_v26 = vld [vmem:[%s1562_s30 + $0x124] ss:$8 sps:$4 sm:$0xff]   ;;  %v1389_v28 = vld [vmem:[%s1562_s30 + $0x120] ss:$8 sps:$4 sm:$0xff]  }
  0x15   : > { %756 = vmatprep.subr.bf16.mxu0 %v1492_v1  ;;  %1303 = vmatprep.subr.bf16.mxu1 %v1492_v1  ;;  %v1390_v29 = vld [vmem:[%s1562_s30 + $0x34] ss:$8 sps:$4 sm:$0xff]   ;;  %v1394_v31 = vld [vmem:[%s1562_s30 + $0x30] ss:$8 sps:$4 sm:$0xff]   ;;  %v1396_v33 = vld [vmem:[%s1562_s30 + $0x44] ss:$8 sps:$4 sm:$0xff]  }
  0x16   : > { %v1392_v30 = vld [vmem:[%s1562_s30 + $0x134] ss:$8 sps:$4 sm:$0xff]   ;;  %v1395_v32 = vld [vmem:[%s1562_s30 + $0x130] ss:$8 sps:$4 sm:$0xff]   ;;  %v1398_v34 = vld [vmem:[%s1562_s30 + $0x144] ss:$8 sps:$4 sm:$0xff]  }
  0x17   : > { %v1400_v35 = vld [vmem:[%s1562_s30 + $0x40] ss:$8 sps:$4 sm:$0xff]   ;;  %v1402_v37 = vld [vmem:[%s1562_s30 + $0x54] ss:$8 sps:$4 sm:$0xff]   ;;  %v1406_v39 = vld [vmem:[%s1562_s30 + $0x50] ss:$8 sps:$4 sm:$0xff]  }
  0x18   : > { %757 = vmatpush1.bf16.msra.mxu0 %v1360_v5  ;;  %1319 = vmatpush1.bf16.msra.mxu1 %v1360_v5  ;;  %v1401_v36 = vld [vmem:[%s1562_s30 + $0x140] ss:$8 sps:$4 sm:$0xff]   ;;  %v1404_v38 = vld [vmem:[%s1562_s30 + $0x154] ss:$8 sps:$4 sm:$0xff]   ;;  %v1407_v40 = vld [vmem:[%s1562_s30 + $0x150] ss:$8 sps:$4 sm:$0xff]  }
  0x19   : > { %758 = vmatprep.subr.bf16.mxu0 %v1492_v1  ;;  %1304 = vmatprep.subr.bf16.mxu1 %v1492_v1  ;;  %v1408_v41 = vld [vmem:[%s1562_s30 + $0x64] ss:$8 sps:$4 sm:$0xff]   ;;  %v1412_v43 = vld [vmem:[%s1562_s30 + $0x60] ss:$8 sps:$4 sm:$0xff]   ;;  %v1414_v45 = vld [vmem:[%s1562_s30 + $0x74] ss:$8 sps:$4 sm:$0xff]  }
  0x1a   : > { %v1410_v42 = vld [vmem:[%s1562_s30 + $0x164] ss:$8 sps:$4 sm:$0xff]   ;;  %v1413_v44 = vld [vmem:[%s1562_s30 + $0x160] ss:$8 sps:$4 sm:$0xff]   ;;  %v1416_v46 = vld [vmem:[%s1562_s30 + $0x174] ss:$8 sps:$4 sm:$0xff]  }
  0x1b   : > { %v1418_v47 = vld [vmem:[%s1562_s30 + $0x70] ss:$8 sps:$4 sm:$0xff]   ;;  %v1420_v49 = vld [vmem:[%s1562_s30 + $0x84] ss:$8 sps:$4 sm:$0xff]   ;;  %v1424_v51 = vld [vmem:[%s1562_s30 + $0x80] ss:$8 sps:$4 sm:$0xff]  }
  0x1c   : > { %759 = vmatpush1.bf16.msra.mxu0 %v1361_v7  ;;  %1320 = vmatpush1.bf16.msra.mxu1 %v1361_v7  ;;  %v1419_v48 = vld [vmem:[%s1562_s30 + $0x170] ss:$8 sps:$4 sm:$0xff]   ;;  %v1422_v50 = vld [vmem:[%s1562_s30 + $0x184] ss:$8 sps:$4 sm:$0xff]   ;;  %v1425_v52 = vld [vmem:[%s1562_s30 + $0x180] ss:$8 sps:$4 sm:$0xff]  }
  0x1d   : > { %760 = vmatprep.subr.bf16.mxu0 %v1492_v1  ;;  %1305 = vmatprep.subr.bf16.mxu1 %v1492_v1  ;;  %v1426_v53 = vld [vmem:[%s1562_s30 + $0x94] ss:$8 sps:$4 sm:$0xff]   ;;  %v1430_v55 = vld [vmem:[%s1562_s30 + $0x90] ss:$8 sps:$4 sm:$0xff]   ;;  %v1432_v57 = vld [vmem:[%s1562_s30 + $0xa4] ss:$8 sps:$4 sm:$0xff]  }
  0x1e   : > { %v1428_v54 = vld [vmem:[%s1562_s30 + $0x194] ss:$8 sps:$4 sm:$0xff]   ;;  %v1431_v56 = vld [vmem:[%s1562_s30 + $0x190] ss:$8 sps:$4 sm:$0xff]   ;;  %v1434_v58 = vld [vmem:[%s1562_s30 + $0x1a4] ss:$8 sps:$4 sm:$0xff]  }
  0x1f   : > { %v1436_v59 = vld [vmem:[%s1562_s30 + $0xa0] ss:$8 sps:$4 sm:$0xff]   ;;  %v1438_v61 = vld [vmem:[%s1562_s30 + $0xb4] ss:$8 sps:$4 sm:$0xff]   ;;  %v1442_v63 = vld [vmem:[%s1562_s30 + $0xb0] ss:$8 sps:$4 sm:$0xff]  }
  0x20   : > { %761 = vmatpush1.bf16.msra.mxu0 %v1362_v9  ;;  %1321 = vmatpush1.bf16.msra.mxu1 %v1362_v9  ;;  %v1437_v60 = vld [vmem:[%s1562_s30 + $0x1a0] ss:$8 sps:$4 sm:$0xff]   ;;  %v1440_v62 = vld [vmem:[%s1562_s30 + $0x1b4] ss:$8 sps:$4 sm:$0xff]   ;;  %v1443_v0 = vld [vmem:[%s1562_s30 + $0x1b0] ss:$8 sps:$4 sm:$0xff]  }
  0x21   : > { %762 = vmatprep.subr.bf16.mxu0 %v1492_v1  ;;  %1306 = vmatprep.subr.bf16.mxu1 %v1492_v1  ;;  %v1446_v2 = vld [vmem:[%s1562_s30 + $0x1c4] ss:$8 sps:$4 sm:$0xff]   ;;  %v1448_v3 = vld [vmem:[%s1562_s30 + $0xc0] ss:$8 sps:$4 sm:$0xff]   ;;  %v1450_v5 = vld [vmem:[%s1562_s30 + $0xd4] ss:$8 sps:$4 sm:$0xff]  }
  0x22   : > { %v1449_v4 = vld [vmem:[%s1562_s30 + $0x1c0] ss:$8 sps:$4 sm:$0xff]   ;;  %v1452_v6 = vld [vmem:[%s1562_s30 + $0x1d4] ss:$8 sps:$4 sm:$0xff]   ;;  %v1454_v7 = vld [vmem:[%s1562_s30 + $0xd0] ss:$8 sps:$4 sm:$0xff]  }
  0x23   : > { %v1455_v8 = vld [vmem:[%s1562_s30 + $0x1d0] ss:$8 sps:$4 sm:$0xff]   ;;  %v1456_v9 = vld [vmem:[%s1562_s30 + $0xe4] ss:$8 sps:$4 sm:$0xff]  }
  0x24   : > { %763 = vmatpush1.bf16.msra.mxu0 %v1363_v10  ;;  %1322 = vmatpush1.bf16.msra.mxu1 %v1363_v10  ;;  %v1458_v10 = vld [vmem:[%s1562_s30 + $0x1e4] ss:$8 sps:$4 sm:$0xff]  }
  0x25   : > { %764 = vmatprep.subr.bf16.mxu0 %v1492_v1  ;;  %1307 = vmatprep.subr.bf16.mxu1 %v1492_v1 }
  0x28   : > { %765 = vmatpush1.bf16.msra.mxu0 %v1364_v11  ;;  %1323 = vmatpush1.bf16.msra.mxu1 %v1364_v11  ;;  %v1460_v11 = vld [vmem:[%s1562_s30 + $0xe0] ss:$8 sps:$4 sm:$0xff]  }
  0x29   : > { %766 = vmatprep.subr.bf16.mxu0 %v1492_v1  ;;  %1308 = vmatprep.subr.bf16.mxu1 %v1492_v1 }
  0x2c   : > { %767 = vmatpush1.bf16.msra.mxu0 %v1365_v12  ;;  %1324 = vmatpush1.bf16.msra.mxu1 %v1365_v12  ;;  %v1461_v12 = vld [vmem:[%s1562_s30 + $0x1e0] ss:$8 sps:$4 sm:$0xff]  }
  0x2d   : > { %768 = vmatprep.subr.bf16.mxu0 %v1492_v1  ;;  %1309 = vmatprep.subr.bf16.mxu1 %v1492_v1 }
  0x30   : > { %769 = vmatpush1.bf16.msra.mxu0 %v1366_v13  ;;  %1325 = vmatpush1.bf16.msra.mxu1 %v1366_v13  ;;  %v1462_v13 = vld [vmem:[%s1562_s30 + $0xf4] ss:$8 sps:$4 sm:$0xff]  }
  0x31   : > { %770 = vmatprep.subr.bf16.mxu0 %v1492_v1  ;;  %1310 = vmatprep.subr.bf16.mxu1 %v1492_v1 }
  0x34   : > { %771 = vmatpush1.bf16.msra.mxu0 %v1367_v14  ;;  %1326 = vmatpush1.bf16.msra.mxu1 %v1367_v14  ;;  %v1464_v14 = vld [vmem:[%s1562_s30 + $0x1f4] ss:$8 sps:$4 sm:$0xff]  }
  0x35   : > { %772 = vmatprep.subr.bf16.mxu0 %v1492_v1  ;;  %1311 = vmatprep.subr.bf16.mxu1 %v1492_v1 }
  0x38   : > { %773 = vmatpush1.bf16.msra.mxu0 %v1368_v15  ;;  %1327 = vmatpush1.bf16.msra.mxu1 %v1368_v15  ;;  %v1466_v15 = vld [vmem:[%s1562_s30 + $0xf0] ss:$8 sps:$4 sm:$0xff]  }
  0x39   : > { %774 = vmatprep.subr.bf16.mxu0 %v1492_v1  ;;  %1312 = vmatprep.subr.bf16.mxu1 %v1492_v1 }
  0x3c   : > { %775 = vmatpush1.bf16.msra.mxu0 %v1369_v16  ;;  %1328 = vmatpush1.bf16.msra.mxu1 %v1369_v16  ;;  %v1467_v16 = vld [vmem:[%s1562_s30 + $0x1f0] ss:$8 sps:$4 sm:$0xff]  }
  0x3d   : > { %776 = vmatprep.subr.bf16.mxu0 %v1492_v1  ;;  %1313 = vmatprep.subr.bf16.mxu1 %v1492_v1 }
  0x40   : > { %777 = vmatpush1.bf16.msra.mxu0 %v1370_v17  ;;  %1329 = vmatpush1.bf16.msra.mxu1 %v1370_v17  ;;  %v1688_v17 = vld [vmem:[%s1836_s2] ss:$0 sm:$0xff] }
  0x41   : > { %778 = vmatprep.subr.bf16.mxu0 %v1492_v1  ;;  %1314 = vmatprep.subr.bf16.mxu1 %v1492_v1  ;;  %v1444_v1 = vld [vmem:[%s1562_s30 + $0xc4] ss:$8 sps:$4 sm:$0xff]  }
  0x44   : > { %779 = vmatpush1.bf16.msra.mxu0 %v1371_v18  ;;  %1330 = vmatpush1.bf16.msra.mxu1 %v1371_v18 }
  0x47   : > { %781 = vmatmul.mubr.bf16.vlgmr.msra.gmra.mrb[0].mxu0 %v1372_v19  ;;  %909 = vmatmul.mubr.bf16.vlgmr.msra.gmra.mrb[0].mxu1 %v1375_v20 }
  0x48   : > { %788 = vmatprep.mubr.bf16.mxu0 %v1378_v21  ;;  %916 = vmatprep.mubr.bf16.mxu1 %v1380_v22 }
  0x4f   : > { %789 = vmatmul.mubr.bf16.gmra.mrb[4].mxu0 %v1382_v23  ;;  %917 = vmatmul.mubr.bf16.gmra.mrb[4].mxu1 %v1383_v24 }
  0x50   : > { %796 = vmatprep.mubr.bf16.mxu0 %v1384_v25  ;;  %924 = vmatprep.mubr.bf16.mxu1 %v1386_v26 }
  0x57   : > { %797 = vmatmul.mubr.bf16.gmra.mrb[8].mxu0 %v1388_v27  ;;  %925 = vmatmul.mubr.bf16.gmra.mrb[8].mxu1 %v1389_v28 }
  0x58   : > { %804 = vmatprep.mubr.bf16.mxu0 %v1390_v29  ;;  %932 = vmatprep.mubr.bf16.mxu1 %v1392_v30 }
  0x5f   : > { %805 = vmatmul.mubr.bf16.gmra.mrb[12].mxu0 %v1394_v31  ;;  %933 = vmatmul.mubr.bf16.gmra.mrb[12].mxu1 %v1395_v32 }
  0x60   : > { %812 = vmatprep.mubr.bf16.mxu0 %v1396_v33  ;;  %940 = vmatprep.mubr.bf16.mxu1 %v1398_v34 }
  0x67   : > { %813 = vmatmul.mubr.bf16.gmra.mrb[16].mxu0 %v1400_v35  ;;  %941 = vmatmul.mubr.bf16.gmra.mrb[16].mxu1 %v1401_v36 }
  0x68   : > { %820 = vmatprep.mubr.bf16.mxu0 %v1402_v37  ;;  %948 = vmatprep.mubr.bf16.mxu1 %v1404_v38 }
  0x6f   : > { %821 = vmatmul.mubr.bf16.gmra.mrb[20].mxu0 %v1406_v39  ;;  %949 = vmatmul.mubr.bf16.gmra.mrb[20].mxu1 %v1407_v40 }
  0x70   : > { %828 = vmatprep.mubr.bf16.mxu0 %v1408_v41  ;;  %956 = vmatprep.mubr.bf16.mxu1 %v1410_v42 }
  0x77   : > { %829 = vmatmul.mubr.bf16.gmra.mrb[24].mxu0 %v1412_v43  ;;  %957 = vmatmul.mubr.bf16.gmra.mrb[24].mxu1 %v1413_v44 }
  0x78   : > { %836 = vmatprep.mubr.bf16.mxu0 %v1414_v45  ;;  %964 = vmatprep.mubr.bf16.mxu1 %v1416_v46 }
  0x7f   : > { %837 = vmatmul.mubr.bf16.gmra.mrb[28].mxu0 %v1418_v47  ;;  %965 = vmatmul.mubr.bf16.gmra.mrb[28].mxu1 %v1419_v48 }
  0x80   : > { %844 = vmatprep.mubr.bf16.mxu0 %v1420_v49  ;;  %972 = vmatprep.mubr.bf16.mxu1 %v1422_v50 }
  0x87   : > { %845 = vmatmul.mubr.bf16.gmra.mrb[32].mxu0 %v1424_v51  ;;  %973 = vmatmul.mubr.bf16.gmra.mrb[32].mxu1 %v1425_v52 }
  0x88   : > { %852 = vmatprep.mubr.bf16.mxu0 %v1426_v53  ;;  %980 = vmatprep.mubr.bf16.mxu1 %v1428_v54 }
  0x8f   : > { %853 = vmatmul.mubr.bf16.gmra.mrb[36].mxu0 %v1430_v55  ;;  %981 = vmatmul.mubr.bf16.gmra.mrb[36].mxu1 %v1431_v56 }
  0x90   : > { %860 = vmatprep.mubr.bf16.mxu0 %v1432_v57  ;;  %988 = vmatprep.mubr.bf16.mxu1 %v1434_v58 }
  0x97   : > { %861 = vmatmul.mubr.bf16.gmra.mrb[40].mxu0 %v1436_v59  ;;  %989 = vmatmul.mubr.bf16.gmra.mrb[40].mxu1 %v1437_v60 }
  0x98   : > { %868 = vmatprep.mubr.bf16.mxu0 %v1438_v61  ;;  %996 = vmatprep.mubr.bf16.mxu1 %v1440_v62 }
  0x9f   : > { %869 = vmatmul.mubr.bf16.gmra.mrb[44].mxu0 %v1442_v63  ;;  %997 = vmatmul.mubr.bf16.gmra.mrb[44].mxu1 %v1443_v0 }
  0xa0   : > { %876 = vmatprep.mubr.bf16.mxu0 %v1444_v1  ;;  %1004 = vmatprep.mubr.bf16.mxu1 %v1446_v2 }
  0xa7   : > { %877 = vmatmul.mubr.bf16.gmra.mrb[48].mxu0 %v1448_v3  ;;  %1005 = vmatmul.mubr.bf16.gmra.mrb[48].mxu1 %v1449_v4 }
  0xa8   : > { %884 = vmatprep.mubr.bf16.mxu0 %v1450_v5  ;;  %1012 = vmatprep.mubr.bf16.mxu1 %v1452_v6 }
  0xaf   : > { %885 = vmatmul.mubr.bf16.gmra.mrb[52].mxu0 %v1454_v7  ;;  %1013 = vmatmul.mubr.bf16.gmra.mrb[52].mxu1 %v1455_v8 }
  0xb0   : > { %892 = vmatprep.mubr.bf16.mxu0 %v1456_v9  ;;  %1020 = vmatprep.mubr.bf16.mxu1 %v1458_v10 }
  0xb7   : > { %893 = vmatmul.mubr.bf16.gmra.mrb[56].mxu0 %v1460_v11  ;;  %1021 = vmatmul.mubr.bf16.gmra.mrb[56].mxu1 %v1461_v12 }
  0xb8   : > { %900 = vmatprep.mubr.bf16.mxu0 %v1462_v13  ;;  %1028 = vmatprep.mubr.bf16.mxu1 %v1464_v14 }
  0xbf   : > { %901 = vmatmul.mubr.bf16.gmra.mrb[60].mxu0 %v1466_v15  ;;  %1029 = vmatmul.mubr.bf16.gmra.mrb[60].mxu1 %v1467_v16 }
 0x11a   : > { %v782_v18 = vpop.f32.mrb[0].mxu0  ;;  %v910_v19 = vpop.f32.mrb[0].mxu1 }
 0x11b   : > { %v783_v20 = vadd.f32 %v1688_v17, %v782_v18  ;;  %v911_v21 = vadd.f32 %v1688_v17, %v910_v19  ;;  %v784_v22 = vpop.f32.mrb[1].mxu0  ;;  %v912_v23 = vpop.f32.mrb[1].mxu1 }
 0x11c   : > { %v785_v24 = vpop.f32.mrb[2].mxu0  ;;  %v913_v25 = vpop.f32.mrb[2].mxu1 }
 0x11d   : > { %1037 = vst [vmem:[%s1695_s9] sm:$0xff] %v783_v20  ;;  %1069 = vst [vmem:[%s1695_s9 + $0x100] sm:$0xff] %v911_v21  ;;  %v786_v26 = vadd.f32 %v1688_v17, %v785_v24  ;;  %v914_v27 = vadd.f32 %v1688_v17, %v913_v25  ;;  %v787_v28 = vpop.f32.mrb[3].mxu0  ;;  %v915_v29 = vpop.f32.mrb[3].mxu1 }
 0x11f   : > { %1038 = vst [vmem:[%s1695_s9 + $0x8] sm:$0xff] %v786_v26  ;;  %1070 = vst [vmem:[%s1695_s9 + $0x108] sm:$0xff] %v914_v27 }
 0x122   : > { %v790_v30 = vpop.f32.mrb[4].mxu0  ;;  %v918_v31 = vpop.f32.mrb[4].mxu1 }
 0x123   : > { %v791_v32 = vadd.f32 %v1688_v17, %v790_v30  ;;  %v919_v33 = vadd.f32 %v1688_v17, %v918_v31  ;;  %v792_v34 = vpop.f32.mrb[5].mxu0  ;;  %v920_v35 = vpop.f32.mrb[5].mxu1 }
 0x124   : > { %v793_v36 = vpop.f32.mrb[6].mxu0  ;;  %v921_v37 = vpop.f32.mrb[6].mxu1 }
 0x125   : > { %1039 = vst [vmem:[%s1695_s9 + $0x10] sm:$0xff] %v791_v32  ;;  %1071 = vst [vmem:[%s1695_s9 + $0x110] sm:$0xff] %v919_v33  ;;  %v794_v38 = vadd.f32 %v1688_v17, %v793_v36  ;;  %v922_v39 = vadd.f32 %v1688_v17, %v921_v37  ;;  %v795_v40 = vpop.f32.mrb[7].mxu0  ;;  %v923_v41 = vpop.f32.mrb[7].mxu1 }
 0x127   : > { %1040 = vst [vmem:[%s1695_s9 + $0x18] sm:$0xff] %v794_v38  ;;  %1072 = vst [vmem:[%s1695_s9 + $0x118] sm:$0xff] %v922_v39 }
 0x12a   : > { %v798_v42 = vpop.f32.mrb[8].mxu0  ;;  %v926_v43 = vpop.f32.mrb[8].mxu1 }
 0x12b   : > { %v799_v44 = vadd.f32 %v1688_v17, %v798_v42  ;;  %v927_v45 = vadd.f32 %v1688_v17, %v926_v43  ;;  %v800_v46 = vpop.f32.mrb[9].mxu0  ;;  %v928_v47 = vpop.f32.mrb[9].mxu1 }
 0x12c   : > { %v801_v48 = vpop.f32.mrb[10].mxu0  ;;  %v929_v49 = vpop.f32.mrb[10].mxu1 }
 0x12d   : > { %1041 = vst [vmem:[%s1695_s9 + $0x20] sm:$0xff] %v799_v44  ;;  %1073 = vst [vmem:[%s1695_s9 + $0x120] sm:$0xff] %v927_v45  ;;  %v802_v50 = vadd.f32 %v1688_v17, %v801_v48  ;;  %v930_v51 = vadd.f32 %v1688_v17, %v929_v49  ;;  %v803_v52 = vpop.f32.mrb[11].mxu0  ;;  %v931_v53 = vpop.f32.mrb[11].mxu1 }
 0x12f   : > { %1042 = vst [vmem:[%s1695_s9 + $0x28] sm:$0xff] %v802_v50  ;;  %1074 = vst [vmem:[%s1695_s9 + $0x128] sm:$0xff] %v930_v51 }
 0x132   : > { %v806_v54 = vpop.f32.mrb[12].mxu0  ;;  %v934_v55 = vpop.f32.mrb[12].mxu1 }
 0x133   : > { %v807_v56 = vadd.f32 %v1688_v17, %v806_v54  ;;  %v935_v57 = vadd.f32 %v1688_v17, %v934_v55  ;;  %v808_v58 = vpop.f32.mrb[13].mxu0  ;;  %v936_v59 = vpop.f32.mrb[13].mxu1 }
 0x134   : > { %v809_v60 = vpop.f32.mrb[14].mxu0  ;;  %v937_v61 = vpop.f32.mrb[14].mxu1 }
 0x135   : > { %1043 = vst [vmem:[%s1695_s9 + $0x30] sm:$0xff] %v807_v56  ;;  %1075 = vst [vmem:[%s1695_s9 + $0x130] sm:$0xff] %v935_v57  ;;  %v810_v62 = vadd.f32 %v1688_v17, %v809_v60  ;;  %v938_v63 = vadd.f32 %v1688_v17, %v937_v61  ;;  %v811_v0 = vpop.f32.mrb[15].mxu0  ;;  %v939_v1 = vpop.f32.mrb[15].mxu1 }
 0x137   : > { %1044 = vst [vmem:[%s1695_s9 + $0x38] sm:$0xff] %v810_v62  ;;  %1076 = vst [vmem:[%s1695_s9 + $0x138] sm:$0xff] %v938_v63 }
 0x13a   : > { %v814_v2 = vpop.f32.mrb[16].mxu0  ;;  %v942_v3 = vpop.f32.mrb[16].mxu1 }
 0x13b   : > { %v815_v4 = vadd.f32 %v1688_v17, %v814_v2  ;;  %v943_v5 = vadd.f32 %v1688_v17, %v942_v3  ;;  %v816_v6 = vpop.f32.mrb[17].mxu0  ;;  %v944_v7 = vpop.f32.mrb[17].mxu1 }
 0x13c   : > { %v817_v8 = vpop.f32.mrb[18].mxu0  ;;  %v945_v9 = vpop.f32.mrb[18].mxu1 }
 0x13d   : > { %1045 = vst [vmem:[%s1695_s9 + $0x40] sm:$0xff] %v815_v4  ;;  %1077 = vst [vmem:[%s1695_s9 + $0x140] sm:$0xff] %v943_v5  ;;  %v818_v10 = vadd.f32 %v1688_v17, %v817_v8  ;;  %v946_v11 = vadd.f32 %v1688_v17, %v945_v9  ;;  %v819_v12 = vpop.f32.mrb[19].mxu0  ;;  %v947_v13 = vpop.f32.mrb[19].mxu1 }
 0x13f   : > { %1046 = vst [vmem:[%s1695_s9 + $0x48] sm:$0xff] %v818_v10  ;;  %1078 = vst [vmem:[%s1695_s9 + $0x148] sm:$0xff] %v946_v11 }
 0x142   : > { %v822_v14 = vpop.f32.mrb[20].mxu0  ;;  %v950_v15 = vpop.f32.mrb[20].mxu1 }
 0x143   : > { %v823_v16 = vadd.f32 %v1688_v17, %v822_v14  ;;  %v951_v18 = vadd.f32 %v1688_v17, %v950_v15  ;;  %v824_v19 = vpop.f32.mrb[21].mxu0  ;;  %v952_v20 = vpop.f32.mrb[21].mxu1 }
 0x144   : > { %v825_v21 = vpop.f32.mrb[22].mxu0  ;;  %v953_v22 = vpop.f32.mrb[22].mxu1 }
 0x145   : > { %1047 = vst [vmem:[%s1695_s9 + $0x50] sm:$0xff] %v823_v16  ;;  %1079 = vst [vmem:[%s1695_s9 + $0x150] sm:$0xff] %v951_v18  ;;  %v826_v23 = vadd.f32 %v1688_v17, %v825_v21  ;;  %v954_v24 = vadd.f32 %v1688_v17, %v953_v22  ;;  %v827_v25 = vpop.f32.mrb[23].mxu0  ;;  %v955_v26 = vpop.f32.mrb[23].mxu1 }
 0x147   : > { %1048 = vst [vmem:[%s1695_s9 + $0x58] sm:$0xff] %v826_v23  ;;  %1080 = vst [vmem:[%s1695_s9 + $0x158] sm:$0xff] %v954_v24 }
 0x14a   : > { %v830_v27 = vpop.f32.mrb[24].mxu0  ;;  %v958_v28 = vpop.f32.mrb[24].mxu1 }
 0x14b   : > { %v831_v29 = vadd.f32 %v1688_v17, %v830_v27  ;;  %v959_v30 = vadd.f32 %v1688_v17, %v958_v28  ;;  %v832_v31 = vpop.f32.mrb[25].mxu0  ;;  %v960_v32 = vpop.f32.mrb[25].mxu1 }
 0x14c   : > { %v833_v33 = vpop.f32.mrb[26].mxu0  ;;  %v961_v34 = vpop.f32.mrb[26].mxu1 }
 0x14d   : > { %1049 = vst [vmem:[%s1695_s9 + $0x60] sm:$0xff] %v831_v29  ;;  %1081 = vst [vmem:[%s1695_s9 + $0x160] sm:$0xff] %v959_v30  ;;  %v834_v35 = vadd.f32 %v1688_v17, %v833_v33  ;;  %v962_v36 = vadd.f32 %v1688_v17, %v961_v34  ;;  %v835_v37 = vpop.f32.mrb[27].mxu0  ;;  %v963_v38 = vpop.f32.mrb[27].mxu1 }
 0x14f   : > { %1050 = vst [vmem:[%s1695_s9 + $0x68] sm:$0xff] %v834_v35  ;;  %1082 = vst [vmem:[%s1695_s9 + $0x168] sm:$0xff] %v962_v36 }
 0x152   : > { %v838_v39 = vpop.f32.mrb[28].mxu0  ;;  %v966_v40 = vpop.f32.mrb[28].mxu1 }
 0x153   : > { %v839_v41 = vadd.f32 %v1688_v17, %v838_v39  ;;  %v967_v42 = vadd.f32 %v1688_v17, %v966_v40  ;;  %v840_v43 = vpop.f32.mrb[29].mxu0  ;;  %v968_v44 = vpop.f32.mrb[29].mxu1 }
 0x154   : > { %v841_v45 = vpop.f32.mrb[30].mxu0  ;;  %v969_v46 = vpop.f32.mrb[30].mxu1 }
 0x155   : > { %1051 = vst [vmem:[%s1695_s9 + $0x70] sm:$0xff] %v839_v41  ;;  %1083 = vst [vmem:[%s1695_s9 + $0x170] sm:$0xff] %v967_v42  ;;  %v842_v47 = vadd.f32 %v1688_v17, %v841_v45  ;;  %v970_v48 = vadd.f32 %v1688_v17, %v969_v46  ;;  %v843_v49 = vpop.f32.mrb[31].mxu0  ;;  %v971_v50 = vpop.f32.mrb[31].mxu1 }
 0x157   : > { %1052 = vst [vmem:[%s1695_s9 + $0x78] sm:$0xff] %v842_v47  ;;  %1084 = vst [vmem:[%s1695_s9 + $0x178] sm:$0xff] %v970_v48 }
 0x15a   : > { %v846_v51 = vpop.f32.mrb[32].mxu0  ;;  %v974_v52 = vpop.f32.mrb[32].mxu1 }
 0x15b   : > { %v847_v53 = vadd.f32 %v1688_v17, %v846_v51  ;;  %v975_v54 = vadd.f32 %v1688_v17, %v974_v52  ;;  %v848_v55 = vpop.f32.mrb[33].mxu0  ;;  %v976_v56 = vpop.f32.mrb[33].mxu1 }
 0x15c   : > { %v849_v57 = vpop.f32.mrb[34].mxu0  ;;  %v977_v58 = vpop.f32.mrb[34].mxu1 }
 0x15d   : > { %1053 = vst [vmem:[%s1695_s9 + $0x80] sm:$0xff] %v847_v53  ;;  %1085 = vst [vmem:[%s1695_s9 + $0x180] sm:$0xff] %v975_v54  ;;  %v850_v59 = vadd.f32 %v1688_v17, %v849_v57  ;;  %v978_v60 = vadd.f32 %v1688_v17, %v977_v58  ;;  %v851_v61 = vpop.f32.mrb[35].mxu0  ;;  %v979_v62 = vpop.f32.mrb[35].mxu1 }
 0x15f   : > { %1054 = vst [vmem:[%s1695_s9 + $0x88] sm:$0xff] %v850_v59  ;;  %1086 = vst [vmem:[%s1695_s9 + $0x188] sm:$0xff] %v978_v60 }
 0x162   : > { %v854_v63 = vpop.f32.mrb[36].mxu0  ;;  %v982_v0 = vpop.f32.mrb[36].mxu1 }
 0x163   : > { %v855_v1 = vadd.f32 %v1688_v17, %v854_v63  ;;  %v983_v2 = vadd.f32 %v1688_v17, %v982_v0  ;;  %v856_v3 = vpop.f32.mrb[37].mxu0  ;;  %v984_v4 = vpop.f32.mrb[37].mxu1 }
 0x164   : > { %v857_v5 = vpop.f32.mrb[38].mxu0  ;;  %v985_v6 = vpop.f32.mrb[38].mxu1 }
 0x165   : > { %1055 = vst [vmem:[%s1695_s9 + $0x90] sm:$0xff] %v855_v1  ;;  %1087 = vst [vmem:[%s1695_s9 + $0x190] sm:$0xff] %v983_v2  ;;  %v858_v7 = vadd.f32 %v1688_v17, %v857_v5  ;;  %v986_v8 = vadd.f32 %v1688_v17, %v985_v6  ;;  %v859_v9 = vpop.f32.mrb[39].mxu0  ;;  %v987_v10 = vpop.f32.mrb[39].mxu1 }
 0x167   : > { %1056 = vst [vmem:[%s1695_s9 + $0x98] sm:$0xff] %v858_v7  ;;  %1088 = vst [vmem:[%s1695_s9 + $0x198] sm:$0xff] %v986_v8 }
 0x16a   : > { %v862_v11 = vpop.f32.mrb[40].mxu0  ;;  %v990_v12 = vpop.f32.mrb[40].mxu1 }
 0x16b   : > { %v863_v13 = vadd.f32 %v1688_v17, %v862_v11  ;;  %v991_v14 = vadd.f32 %v1688_v17, %v990_v12  ;;  %v864_v15 = vpop.f32.mrb[41].mxu0  ;;  %v992_v16 = vpop.f32.mrb[41].mxu1 }
 0x16c   : > { %v865_v18 = vpop.f32.mrb[42].mxu0  ;;  %v993_v19 = vpop.f32.mrb[42].mxu1 }
 0x16d   : > { %1057 = vst [vmem:[%s1695_s9 + $0xa0] sm:$0xff] %v863_v13  ;;  %1089 = vst [vmem:[%s1695_s9 + $0x1a0] sm:$0xff] %v991_v14  ;;  %v866_v20 = vadd.f32 %v1688_v17, %v865_v18  ;;  %v994_v21 = vadd.f32 %v1688_v17, %v993_v19  ;;  %v867_v22 = vpop.f32.mrb[43].mxu0  ;;  %v995_v23 = vpop.f32.mrb[43].mxu1 }
 0x16f   : > { %1058 = vst [vmem:[%s1695_s9 + $0xa8] sm:$0xff] %v866_v20  ;;  %1090 = vst [vmem:[%s1695_s9 + $0x1a8] sm:$0xff] %v994_v21 }
 0x172   : > { %v870_v24 = vpop.f32.mrb[44].mxu0  ;;  %v998_v25 = vpop.f32.mrb[44].mxu1 }
 0x173   : > { %v871_v26 = vadd.f32 %v1688_v17, %v870_v24  ;;  %v999_v27 = vadd.f32 %v1688_v17, %v998_v25  ;;  %v872_v28 = vpop.f32.mrb[45].mxu0  ;;  %v1000_v29 = vpop.f32.mrb[45].mxu1 }
 0x174   : > { %v873_v30 = vpop.f32.mrb[46].mxu0  ;;  %v1001_v31 = vpop.f32.mrb[46].mxu1 }
 0x175   : > { %1059 = vst [vmem:[%s1695_s9 + $0xb0] sm:$0xff] %v871_v26  ;;  %1091 = vst [vmem:[%s1695_s9 + $0x1b0] sm:$0xff] %v999_v27  ;;  %v874_v32 = vadd.f32 %v1688_v17, %v873_v30  ;;  %v1002_v33 = vadd.f32 %v1688_v17, %v1001_v31  ;;  %v875_v34 = vpop.f32.mrb[47].mxu0  ;;  %v1003_v35 = vpop.f32.mrb[47].mxu1 }
 0x177   : > { %1060 = vst [vmem:[%s1695_s9 + $0xb8] sm:$0xff] %v874_v32  ;;  %1092 = vst [vmem:[%s1695_s9 + $0x1b8] sm:$0xff] %v1002_v33 }
 0x17a   : > { %v878_v36 = vpop.f32.mrb[48].mxu0  ;;  %v1006_v37 = vpop.f32.mrb[48].mxu1 }
 0x17b   : > { %v879_v38 = vadd.f32 %v1688_v17, %v878_v36  ;;  %v1007_v39 = vadd.f32 %v1688_v17, %v1006_v37  ;;  %v880_v40 = vpop.f32.mrb[49].mxu0  ;;  %v1008_v41 = vpop.f32.mrb[49].mxu1 }
 0x17c   : > { %v881_v42 = vpop.f32.mrb[50].mxu0  ;;  %v1009_v43 = vpop.f32.mrb[50].mxu1 }
 0x17d   : > { %1061 = vst [vmem:[%s1695_s9 + $0xc0] sm:$0xff] %v879_v38  ;;  %1093 = vst [vmem:[%s1695_s9 + $0x1c0] sm:$0xff] %v1007_v39  ;;  %v882_v44 = vadd.f32 %v1688_v17, %v881_v42  ;;  %v1010_v45 = vadd.f32 %v1688_v17, %v1009_v43  ;;  %v883_v46 = vpop.f32.mrb[51].mxu0  ;;  %v1011_v47 = vpop.f32.mrb[51].mxu1 }
 0x17f   : > { %1062 = vst [vmem:[%s1695_s9 + $0xc8] sm:$0xff] %v882_v44  ;;  %1094 = vst [vmem:[%s1695_s9 + $0x1c8] sm:$0xff] %v1010_v45 }
 0x182   : > { %v886_v48 = vpop.f32.mrb[52].mxu0  ;;  %v1014_v49 = vpop.f32.mrb[52].mxu1 }
 0x183   : > { %v887_v50 = vadd.f32 %v1688_v17, %v886_v48  ;;  %v1015_v51 = vadd.f32 %v1688_v17, %v1014_v49  ;;  %v888_v52 = vpop.f32.mrb[53].mxu0  ;;  %v1016_v53 = vpop.f32.mrb[53].mxu1 }
 0x184   : > { %v889_v54 = vpop.f32.mrb[54].mxu0  ;;  %v1017_v55 = vpop.f32.mrb[54].mxu1 }
 0x185   : > { %1063 = vst [vmem:[%s1695_s9 + $0xd0] sm:$0xff] %v887_v50  ;;  %1095 = vst [vmem:[%s1695_s9 + $0x1d0] sm:$0xff] %v1015_v51  ;;  %v890_v56 = vadd.f32 %v1688_v17, %v889_v54  ;;  %v1018_v57 = vadd.f32 %v1688_v17, %v1017_v55  ;;  %v891_v58 = vpop.f32.mrb[55].mxu0  ;;  %v1019_v59 = vpop.f32.mrb[55].mxu1 }
 0x187   : > { %1064 = vst [vmem:[%s1695_s9 + $0xd8] sm:$0xff] %v890_v56  ;;  %1096 = vst [vmem:[%s1695_s9 + $0x1d8] sm:$0xff] %v1018_v57 }
 0x18a   : > { %v894_v60 = vpop.f32.mrb[56].mxu0  ;;  %v1022_v61 = vpop.f32.mrb[56].mxu1 }
 0x18b   : > { %v895_v62 = vadd.f32 %v1688_v17, %v894_v60  ;;  %v1023_v63 = vadd.f32 %v1688_v17, %v1022_v61  ;;  %v896_v0 = vpop.f32.mrb[57].mxu0  ;;  %v1024_v1 = vpop.f32.mrb[57].mxu1 }
 0x18c   : > { %v897_v2 = vpop.f32.mrb[58].mxu0  ;;  %v1025_v3 = vpop.f32.mrb[58].mxu1 }
 0x18d   : > { %1065 = vst [vmem:[%s1695_s9 + $0xe0] sm:$0xff] %v895_v62  ;;  %1097 = vst [vmem:[%s1695_s9 + $0x1e0] sm:$0xff] %v1023_v63  ;;  %v898_v4 = vadd.f32 %v1688_v17, %v897_v2  ;;  %v1026_v5 = vadd.f32 %v1688_v17, %v1025_v3  ;;  %v899_v6 = vpop.f32.mrb[59].mxu0  ;;  %v1027_v7 = vpop.f32.mrb[59].mxu1 }
 0x18f   : > { %1066 = vst [vmem:[%s1695_s9 + $0xe8] sm:$0xff] %v898_v4  ;;  %1098 = vst [vmem:[%s1695_s9 + $0x1e8] sm:$0xff] %v1026_v5 }
 0x192   : > { %v902_v8 = vpop.f32.mrb[60].mxu0  ;;  %v1030_v9 = vpop.f32.mrb[60].mxu1 }
 0x193   : > { %v903_v10 = vadd.f32 %v1688_v17, %v902_v8  ;;  %v1031_v11 = vadd.f32 %v1688_v17, %v1030_v9  ;;  %v904_v12 = vpop.f32.mrb[61].mxu0  ;;  %v1032_v13 = vpop.f32.mrb[61].mxu1 }
 0x194   : > { %v905_v14 = vpop.f32.mrb[62].mxu0  ;;  %v1033_v15 = vpop.f32.mrb[62].mxu1 }
 0x195   : > { %1067 = vst [vmem:[%s1695_s9 + $0xf0] sm:$0xff] %v903_v10  ;;  %1099 = vst [vmem:[%s1695_s9 + $0x1f0] sm:$0xff] %v1031_v11  ;;  %v906_v16 = vadd.f32 %v1688_v17, %v905_v14  ;;  %v1034_v18 = vadd.f32 %v1688_v17, %v1033_v15  ;;  %v907_v19 = vpop.f32.mrb[63].mxu0  ;;  %v1035_v20 = vpop.f32.mrb[63].mxu1 }
 0x197   : > { %1068 = vst [vmem:[%s1695_s9 + $0xf8] sm:$0xff] %v906_v16  ;;  %1100 = vst [vmem:[%s1695_s9 + $0x1f8] sm:$0xff] %v1034_v18 }
 0x198 PF: > { %s13_s14 = sadd.s32 1, %s1490_s14   ;;  %s1838_s12 = smov %s1486_s13 }
 0x199   : > { %p10_p5 = scmp.ge.s32.totalorder %s13_s14, 18   ;;  %s1839_s13 = smov %s1841_s15 }
 0x19b   :  { %12 = sbr.rel (!%p10_p5) target bundleno = 2 (0x2), region = 68 }

// kernel: _lambda_.118
= control target key start
LH: loop header
LB: loop body
LE: loop exit
PB: predicated region body
PF: predicated region fallthrough
CT: control target
= control target key end

     0   :  { %s753_s0 = inlined_call_operand.vmem [shape: f32[512,128], index: 0, kind: input, shape index: {}]   ;;  %s754_s1 = inlined_call_operand.vmem [shape: f32[512,128], index: 1, kind: output, shape index: {}]  }
   0x1   :  { %v8_v0 = vld [vmem:[%s753_s0] sm:$0xff]  ;;  %v9_v1 = vld [vmem:[%s753_s0 + $0x8] sm:$0xff]  ;;  %v10_v2 = vld [vmem:[%s753_s0 + $0x10] sm:$0xff] }
   0x2   :  { %vm72_vm0 = vcmp.ge.f32.partialorder %v8_v0, 0.0  ;;  %v136_v3 = vmul.f32 0.01, %v8_v0  ;;  %vm73_vm1 = vcmp.ge.f32.partialorder %v9_v1, 0.0  ;;  %v137_v4 = vmul.f32 0.01, %v9_v1 }
   0x3   :  { %vm74_vm2 = vcmp.ge.f32.partialorder %v10_v2, 0.0  ;;  %v138_v5 = vmul.f32 0.01, %v10_v2  ;;  %v11_v6 = vld [vmem:[%s753_s0 + $0x18] sm:$0xff]  ;;  %v12_v7 = vld [vmem:[%s753_s0 + $0x20] sm:$0xff]  ;;  %v13_v8 = vld [vmem:[%s753_s0 + $0x28] sm:$0xff] }
   0x4   :  { %v200_v9 = vsel %vm72_vm0, %v8_v0, %v136_v3  ;;  %v201_v10 = vsel %vm73_vm1, %v9_v1, %v137_v4  ;;  %vm75_vm3 = vcmp.ge.f32.partialorder %v11_v6, 0.0  ;;  %v139_v11 = vmul.f32 0.01, %v11_v6  ;;  %v14_v12 = vld [vmem:[%s753_s0 + $0x30] sm:$0xff]  ;;  %v15_v13 = vld [vmem:[%s753_s0 + $0x38] sm:$0xff]  ;;  %v16_v14 = vld [vmem:[%s753_s0 + $0x40] sm:$0xff] }
   0x5   :  { %264 = vst [vmem:[%s754_s1] sm:$0xff] %v200_v9  ;;  %265 = vst [vmem:[%s754_s1 + $0x8] sm:$0xff] %v201_v10  ;;  %v202_v15 = vsel %vm74_vm2, %v10_v2, %v138_v5  ;;  %vm76_vm4 = vcmp.ge.f32.partialorder %v12_v7, 0.0  ;;  %v140_v16 = vmul.f32 0.01, %v12_v7  ;;  %vm77_vm5 = vcmp.ge.f32.partialorder %v13_v8, 0.0  ;;  %v17_v17 = vld [vmem:[%s753_s0 + $0x48] sm:$0xff] }
   0x6   :  { %266 = vst [vmem:[%s754_s1 + $0x10] sm:$0xff] %v202_v15  ;;  %v203_v18 = vsel %vm75_vm3, %v11_v6, %v139_v11  ;;  %v141_v19 = vmul.f32 0.01, %v13_v8  ;;  %vm78_vm6 = vcmp.ge.f32.partialorder %v14_v12, 0.0  ;;  %v142_v20 = vmul.f32 0.01, %v14_v12 }
   0x7   :  { %v18_v21 = vld [vmem:[%s753_s0 + $0x50] sm:$0xff]  ;;  %267 = vst [vmem:[%s754_s1 + $0x18] sm:$0xff] %v203_v18  ;;  %v204_v22 = vsel %vm76_vm4, %v12_v7, %v140_v16  ;;  %vm79_vm7 = vcmp.ge.f32.partialorder %v15_v13, 0.0  ;;  %v143_v23 = vmul.f32 0.01, %v15_v13  ;;  %vm80_vm8 = vcmp.ge.f32.partialorder %v16_v14, 0.0 }
   0x8   :  { %v19_v24 = vld [vmem:[%s753_s0 + $0x58] sm:$0xff]  ;;  %v20_v25 = vld [vmem:[%s753_s0 + $0x60] sm:$0xff]  ;;  %268 = vst [vmem:[%s754_s1 + $0x20] sm:$0xff] %v204_v22  ;;  %v205_v26 = vsel %vm77_vm5, %v13_v8, %v141_v19  ;;  %v206_v27 = vsel %vm78_vm6, %v14_v12, %v142_v20  ;;  %v144_v28 = vmul.f32 0.01, %v16_v14  ;;  %vm81_vm9 = vcmp.ge.f32.partialorder %v17_v17, 0.0 }
   0x9   :  { %v21_v29 = vld [vmem:[%s753_s0 + $0x68] sm:$0xff]  ;;  %269 = vst [vmem:[%s754_s1 + $0x28] sm:$0xff] %v205_v26  ;;  %270 = vst [vmem:[%s754_s1 + $0x30] sm:$0xff] %v206_v27  ;;  %v207_v30 = vsel %vm79_vm7, %v15_v13, %v143_v23  ;;  %v145_v31 = vmul.f32 0.01, %v17_v17  ;;  %vm82_vm10 = vcmp.ge.f32.partialorder %v18_v21, 0.0 }
   0xa   :  { %v146_v32 = vmul.f32 0.01, %v18_v21  ;;  %v22_v33 = vld [vmem:[%s753_s0 + $0x70] sm:$0xff]  ;;  %271 = vst [vmem:[%s754_s1 + $0x38] sm:$0xff] %v207_v30  ;;  %v208_v34 = vsel %vm80_vm8, %v16_v14, %v144_v28  ;;  %vm83_vm11 = vcmp.ge.f32.partialorder %v19_v24, 0.0  ;;  %vm84_vm12 = vcmp.ge.f32.partialorder %v20_v25, 0.0 }
   0xb   :  { %v147_v35 = vmul.f32 0.01, %v19_v24  ;;  %v23_v36 = vld [vmem:[%s753_s0 + $0x78] sm:$0xff]  ;;  %v24_v37 = vld [vmem:[%s753_s0 + $0x80] sm:$0xff]  ;;  %272 = vst [vmem:[%s754_s1 + $0x40] sm:$0xff] %v208_v34  ;;  %v209_v38 = vsel %vm81_vm9, %v17_v17, %v145_v31  ;;  %vm85_vm13 = vcmp.ge.f32.partialorder %v21_v29, 0.0 }
   0xc   :  { %v210_v39 = vsel %vm82_vm10, %v18_v21, %v146_v32  ;;  %v148_v40 = vmul.f32 0.01, %v20_v25  ;;  %v25_v41 = vld [vmem:[%s753_s0 + $0x88] sm:$0xff]  ;;  %273 = vst [vmem:[%s754_s1 + $0x48] sm:$0xff] %v209_v38  ;;  %v149_v43 = vmul.f32 0.01, %v21_v29 }
   0xd   :  { %274 = vst [vmem:[%s754_s1 + $0x50] sm:$0xff] %v210_v39  ;;  %v211_v42 = vsel %vm83_vm11, %v19_v24, %v147_v35  ;;  %vm86_vm14 = vcmp.ge.f32.partialorder %v22_v33, 0.0  ;;  %v150_v44 = vmul.f32 0.01, %v22_v33  ;;  %v26_v45 = vld [vmem:[%s753_s0 + $0x90] sm:$0xff]  ;;  %vm87_vm15 = vcmp.ge.f32.partialorder %v23_v36, 0.0 }
   0xe   :  { %275 = vst [vmem:[%s754_s1 + $0x58] sm:$0xff] %v211_v42  ;;  %v212_v46 = vsel %vm84_vm12, %v20_v25, %v148_v40  ;;  %v151_v47 = vmul.f32 0.01, %v23_v36  ;;  %vm88_vm0 = vcmp.ge.f32.partialorder %v24_v37, 0.0  ;;  %v27_v48 = vld [vmem:[%s753_s0 + $0x98] sm:$0xff]  ;;  %v28_v49 = vld [vmem:[%s753_s0 + $0xa0] sm:$0xff]  ;;  %v213_v50 = vsel %vm85_vm13, %v21_v29, %v149_v43 }
   0xf   :  { %276 = vst [vmem:[%s754_s1 + $0x60] sm:$0xff] %v212_v46  ;;  %v214_v51 = vsel %vm86_vm14, %v22_v33, %v150_v44  ;;  %v152_v52 = vmul.f32 0.01, %v24_v37  ;;  %vm89_vm1 = vcmp.ge.f32.partialorder %v25_v41, 0.0  ;;  %v29_v53 = vld [vmem:[%s753_s0 + $0xa8] sm:$0xff]  ;;  %277 = vst [vmem:[%s754_s1 + $0x68] sm:$0xff] %v213_v50 }
  0x10   :  { %278 = vst [vmem:[%s754_s1 + $0x70] sm:$0xff] %v214_v51  ;;  %v215_v54 = vsel %vm87_vm15, %v23_v36, %v151_v47  ;;  %v153_v55 = vmul.f32 0.01, %v25_v41  ;;  %vm90_vm2 = vcmp.ge.f32.partialorder %v26_v45, 0.0  ;;  %v154_v56 = vmul.f32 0.01, %v26_v45 }
  0x11   :  { %v30_v57 = vld [vmem:[%s753_s0 + $0xb0] sm:$0xff]  ;;  %279 = vst [vmem:[%s754_s1 + $0x78] sm:$0xff] %v215_v54  ;;  %v216_v58 = vsel %vm88_vm0, %v24_v37, %v152_v52  ;;  %vm91_vm3 = vcmp.ge.f32.partialorder %v27_v48, 0.0  ;;  %v155_v59 = vmul.f32 0.01, %v27_v48  ;;  %vm92_vm4 = vcmp.ge.f32.partialorder %v28_v49, 0.0 }
  0x12   :  { %v31_v60 = vld [vmem:[%s753_s0 + $0xb8] sm:$0xff]  ;;  %v32_v61 = vld [vmem:[%s753_s0 + $0xc0] sm:$0xff]  ;;  %280 = vst [vmem:[%s754_s1 + $0x80] sm:$0xff] %v216_v58  ;;  %v217_v62 = vsel %vm89_vm1, %v25_v41, %v153_v55  ;;  %v218_v63 = vsel %vm90_vm2, %v26_v45, %v154_v56  ;;  %v156_v0 = vmul.f32 0.01, %v28_v49  ;;  %vm93_vm5 = vcmp.ge.f32.partialorder %v29_v53, 0.0 }
  0x13   :  { %v33_v1 = vld [vmem:[%s753_s0 + $0xc8] sm:$0xff]  ;;  %281 = vst [vmem:[%s754_s1 + $0x88] sm:$0xff] %v217_v62  ;;  %282 = vst [vmem:[%s754_s1 + $0x90] sm:$0xff] %v218_v63  ;;  %v219_v2 = vsel %vm91_vm3, %v27_v48, %v155_v59  ;;  %v157_v3 = vmul.f32 0.01, %v29_v53  ;;  %vm94_vm6 = vcmp.ge.f32.partialorder %v30_v57, 0.0 }
  0x14   :  { %v158_v4 = vmul.f32 0.01, %v30_v57  ;;  %v34_v5 = vld [vmem:[%s753_s0 + $0xd0] sm:$0xff]  ;;  %283 = vst [vmem:[%s754_s1 + $0x98] sm:$0xff] %v219_v2  ;;  %v220_v6 = vsel %vm92_vm4, %v28_v49, %v156_v0  ;;  %vm95_vm7 = vcmp.ge.f32.partialorder %v31_v60, 0.0  ;;  %vm96_vm8 = vcmp.ge.f32.partialorder %v32_v61, 0.0 }
  0x15   :  { %v159_v7 = vmul.f32 0.01, %v31_v60  ;;  %v35_v8 = vld [vmem:[%s753_s0 + $0xd8] sm:$0xff]  ;;  %v36_v9 = vld [vmem:[%s753_s0 + $0xe0] sm:$0xff]  ;;  %284 = vst [vmem:[%s754_s1 + $0xa0] sm:$0xff] %v220_v6  ;;  %v221_v10 = vsel %vm93_vm5, %v29_v53, %v157_v3  ;;  %vm97_vm9 = vcmp.ge.f32.partialorder %v33_v1, 0.0 }
  0x16   :  { %v222_v11 = vsel %vm94_vm6, %v30_v57, %v158_v4  ;;  %v160_v12 = vmul.f32 0.01, %v32_v61  ;;  %v37_v13 = vld [vmem:[%s753_s0 + $0xe8] sm:$0xff]  ;;  %285 = vst [vmem:[%s754_s1 + $0xa8] sm:$0xff] %v221_v10  ;;  %v161_v15 = vmul.f32 0.01, %v33_v1 }
  0x17   :  { %286 = vst [vmem:[%s754_s1 + $0xb0] sm:$0xff] %v222_v11  ;;  %v223_v14 = vsel %vm95_vm7, %v31_v60, %v159_v7  ;;  %vm98_vm10 = vcmp.ge.f32.partialorder %v34_v5, 0.0  ;;  %v162_v16 = vmul.f32 0.01, %v34_v5  ;;  %v38_v17 = vld [vmem:[%s753_s0 + $0xf0] sm:$0xff]  ;;  %vm99_vm11 = vcmp.ge.f32.partialorder %v35_v8, 0.0 }
  0x18   :  { %287 = vst [vmem:[%s754_s1 + $0xb8] sm:$0xff] %v223_v14  ;;  %v224_v18 = vsel %vm96_vm8, %v32_v61, %v160_v12  ;;  %v163_v19 = vmul.f32 0.01, %v35_v8  ;;  %vm100_vm12 = vcmp.ge.f32.partialorder %v36_v9, 0.0  ;;  %v39_v20 = vld [vmem:[%s753_s0 + $0xf8] sm:$0xff]  ;;  %v40_v21 = vld [vmem:[%s753_s0 + $0x100] sm:$0xff]  ;;  %v225_v22 = vsel %vm97_vm9, %v33_v1, %v161_v15 }
  0x19   :  { %288 = vst [vmem:[%s754_s1 + $0xc0] sm:$0xff] %v224_v18  ;;  %v226_v23 = vsel %vm98_vm10, %v34_v5, %v162_v16  ;;  %v164_v24 = vmul.f32 0.01, %v36_v9  ;;  %vm101_vm13 = vcmp.ge.f32.partialorder %v37_v13, 0.0  ;;  %v41_v25 = vld [vmem:[%s753_s0 + $0x108] sm:$0xff]  ;;  %289 = vst [vmem:[%s754_s1 + $0xc8] sm:$0xff] %v225_v22 }
  0x1a   :  { %290 = vst [vmem:[%s754_s1 + $0xd0] sm:$0xff] %v226_v23  ;;  %v227_v26 = vsel %vm99_vm11, %v35_v8, %v163_v19  ;;  %v165_v27 = vmul.f32 0.01, %v37_v13  ;;  %vm102_vm14 = vcmp.ge.f32.partialorder %v38_v17, 0.0  ;;  %v166_v28 = vmul.f32 0.01, %v38_v17 }
  0x1b   :  { %v42_v29 = vld [vmem:[%s753_s0 + $0x110] sm:$0xff]  ;;  %291 = vst [vmem:[%s754_s1 + $0xd8] sm:$0xff] %v227_v26  ;;  %v228_v30 = vsel %vm100_vm12, %v36_v9, %v164_v24  ;;  %vm103_vm15 = vcmp.ge.f32.partialorder %v39_v20, 0.0  ;;  %v167_v31 = vmul.f32 0.01, %v39_v20  ;;  %vm104_vm0 = vcmp.ge.f32.partialorder %v40_v21, 0.0 }
  0x1c   :  { %v43_v32 = vld [vmem:[%s753_s0 + $0x118] sm:$0xff]  ;;  %v44_v33 = vld [vmem:[%s753_s0 + $0x120] sm:$0xff]  ;;  %292 = vst [vmem:[%s754_s1 + $0xe0] sm:$0xff] %v228_v30  ;;  %v229_v34 = vsel %vm101_vm13, %v37_v13, %v165_v27  ;;  %v230_v35 = vsel %vm102_vm14, %v38_v17, %v166_v28  ;;  %v168_v36 = vmul.f32 0.01, %v40_v21  ;;  %vm105_vm1 = vcmp.ge.f32.partialorder %v41_v25, 0.0 }
  0x1d   :  { %v45_v37 = vld [vmem:[%s753_s0 + $0x128] sm:$0xff]  ;;  %293 = vst [vmem:[%s754_s1 + $0xe8] sm:$0xff] %v229_v34  ;;  %294 = vst [vmem:[%s754_s1 + $0xf0] sm:$0xff] %v230_v35  ;;  %v231_v38 = vsel %vm103_vm15, %v39_v20, %v167_v31  ;;  %v169_v39 = vmul.f32 0.01, %v41_v25  ;;  %vm106_vm2 = vcmp.ge.f32.partialorder %v42_v29, 0.0 }
  0x1e   :  { %v170_v40 = vmul.f32 0.01, %v42_v29  ;;  %v46_v41 = vld [vmem:[%s753_s0 + $0x130] sm:$0xff]  ;;  %295 = vst [vmem:[%s754_s1 + $0xf8] sm:$0xff] %v231_v38  ;;  %v232_v42 = vsel %vm104_vm0, %v40_v21, %v168_v36  ;;  %vm107_vm3 = vcmp.ge.f32.partialorder %v43_v32, 0.0  ;;  %vm108_vm4 = vcmp.ge.f32.partialorder %v44_v33, 0.0 }
  0x1f   :  { %v171_v43 = vmul.f32 0.01, %v43_v32  ;;  %v47_v44 = vld [vmem:[%s753_s0 + $0x138] sm:$0xff]  ;;  %v48_v45 = vld [vmem:[%s753_s0 + $0x140] sm:$0xff]  ;;  %296 = vst [vmem:[%s754_s1 + $0x100] sm:$0xff] %v232_v42  ;;  %v233_v46 = vsel %vm105_vm1, %v41_v25, %v169_v39  ;;  %vm109_vm5 = vcmp.ge.f32.partialorder %v45_v37, 0.0 }
  0x20   :  { %v234_v47 = vsel %vm106_vm2, %v42_v29, %v170_v40  ;;  %v172_v48 = vmul.f32 0.01, %v44_v33  ;;  %v49_v49 = vld [vmem:[%s753_s0 + $0x148] sm:$0xff]  ;;  %297 = vst [vmem:[%s754_s1 + $0x108] sm:$0xff] %v233_v46  ;;  %v173_v51 = vmul.f32 0.01, %v45_v37 }
  0x21   :  { %298 = vst [vmem:[%s754_s1 + $0x110] sm:$0xff] %v234_v47  ;;  %v235_v50 = vsel %vm107_vm3, %v43_v32, %v171_v43  ;;  %vm110_vm6 = vcmp.ge.f32.partialorder %v46_v41, 0.0  ;;  %v174_v52 = vmul.f32 0.01, %v46_v41  ;;  %v50_v53 = vld [vmem:[%s753_s0 + $0x150] sm:$0xff]  ;;  %vm111_vm7 = vcmp.ge.f32.partialorder %v47_v44, 0.0 }
  0x22   :  { %299 = vst [vmem:[%s754_s1 + $0x118] sm:$0xff] %v235_v50  ;;  %v236_v54 = vsel %vm108_vm4, %v44_v33, %v172_v48  ;;  %v175_v55 = vmul.f32 0.01, %v47_v44  ;;  %vm112_vm8 = vcmp.ge.f32.partialorder %v48_v45, 0.0  ;;  %v51_v56 = vld [vmem:[%s753_s0 + $0x158] sm:$0xff]  ;;  %v52_v57 = vld [vmem:[%s753_s0 + $0x160] sm:$0xff]  ;;  %v237_v58 = vsel %vm109_vm5, %v45_v37, %v173_v51 }
  0x23   :  { %300 = vst [vmem:[%s754_s1 + $0x120] sm:$0xff] %v236_v54  ;;  %v238_v59 = vsel %vm110_vm6, %v46_v41, %v174_v52  ;;  %v176_v60 = vmul.f32 0.01, %v48_v45  ;;  %vm113_vm9 = vcmp.ge.f32.partialorder %v49_v49, 0.0  ;;  %v53_v61 = vld [vmem:[%s753_s0 + $0x168] sm:$0xff]  ;;  %301 = vst [vmem:[%s754_s1 + $0x128] sm:$0xff] %v237_v58 }
  0x24   :  { %302 = vst [vmem:[%s754_s1 + $0x130] sm:$0xff] %v238_v59  ;;  %v239_v62 = vsel %vm111_vm7, %v47_v44, %v175_v55  ;;  %v177_v63 = vmul.f32 0.01, %v49_v49  ;;  %vm114_vm10 = vcmp.ge.f32.partialorder %v50_v53, 0.0  ;;  %v178_v0 = vmul.f32 0.01, %v50_v53 }
  0x25   :  { %v54_v1 = vld [vmem:[%s753_s0 + $0x170] sm:$0xff]  ;;  %303 = vst [vmem:[%s754_s1 + $0x138] sm:$0xff] %v239_v62  ;;  %v240_v2 = vsel %vm112_vm8, %v48_v45, %v176_v60  ;;  %vm115_vm11 = vcmp.ge.f32.partialorder %v51_v56, 0.0  ;;  %v179_v3 = vmul.f32 0.01, %v51_v56  ;;  %vm116_vm12 = vcmp.ge.f32.partialorder %v52_v57, 0.0 }
  0x26   :  { %v55_v4 = vld [vmem:[%s753_s0 + $0x178] sm:$0xff]  ;;  %v56_v5 = vld [vmem:[%s753_s0 + $0x180] sm:$0xff]  ;;  %304 = vst [vmem:[%s754_s1 + $0x140] sm:$0xff] %v240_v2  ;;  %v241_v6 = vsel %vm113_vm9, %v49_v49, %v177_v63  ;;  %v242_v7 = vsel %vm114_vm10, %v50_v53, %v178_v0  ;;  %v180_v8 = vmul.f32 0.01, %v52_v57  ;;  %vm117_vm13 = vcmp.ge.f32.partialorder %v53_v61, 0.0 }
  0x27   :  { %v57_v9 = vld [vmem:[%s753_s0 + $0x188] sm:$0xff]  ;;  %305 = vst [vmem:[%s754_s1 + $0x148] sm:$0xff] %v241_v6  ;;  %306 = vst [vmem:[%s754_s1 + $0x150] sm:$0xff] %v242_v7  ;;  %v243_v10 = vsel %vm115_vm11, %v51_v56, %v179_v3  ;;  %v181_v11 = vmul.f32 0.01, %v53_v61  ;;  %vm118_vm14 = vcmp.ge.f32.partialorder %v54_v1, 0.0 }
  0x28   :  { %v182_v12 = vmul.f32 0.01, %v54_v1  ;;  %v58_v13 = vld [vmem:[%s753_s0 + $0x190] sm:$0xff]  ;;  %307 = vst [vmem:[%s754_s1 + $0x158] sm:$0xff] %v243_v10  ;;  %v244_v14 = vsel %vm116_vm12, %v52_v57, %v180_v8  ;;  %vm119_vm15 = vcmp.ge.f32.partialorder %v55_v4, 0.0  ;;  %vm120_vm0 = vcmp.ge.f32.partialorder %v56_v5, 0.0 }
  0x29   :  { %v183_v15 = vmul.f32 0.01, %v55_v4  ;;  %v59_v16 = vld [vmem:[%s753_s0 + $0x198] sm:$0xff]  ;;  %v60_v17 = vld [vmem:[%s753_s0 + $0x1a0] sm:$0xff]  ;;  %308 = vst [vmem:[%s754_s1 + $0x160] sm:$0xff] %v244_v14  ;;  %v245_v18 = vsel %vm117_vm13, %v53_v61, %v181_v11  ;;  %vm121_vm1 = vcmp.ge.f32.partialorder %v57_v9, 0.0 }
  0x2a   :  { %v246_v19 = vsel %vm118_vm14, %v54_v1, %v182_v12  ;;  %v184_v20 = vmul.f32 0.01, %v56_v5  ;;  %v61_v21 = vld [vmem:[%s753_s0 + $0x1a8] sm:$0xff]  ;;  %309 = vst [vmem:[%s754_s1 + $0x168] sm:$0xff] %v245_v18  ;;  %v185_v23 = vmul.f32 0.01, %v57_v9 }
  0x2b   :  { %310 = vst [vmem:[%s754_s1 + $0x170] sm:$0xff] %v246_v19  ;;  %v247_v22 = vsel %vm119_vm15, %v55_v4, %v183_v15  ;;  %vm122_vm2 = vcmp.ge.f32.partialorder %v58_v13, 0.0  ;;  %v186_v24 = vmul.f32 0.01, %v58_v13  ;;  %v62_v25 = vld [vmem:[%s753_s0 + $0x1b0] sm:$0xff]  ;;  %vm123_vm3 = vcmp.ge.f32.partialorder %v59_v16, 0.0 }
  0x2c   :  { %311 = vst [vmem:[%s754_s1 + $0x178] sm:$0xff] %v247_v22  ;;  %v248_v26 = vsel %vm120_vm0, %v56_v5, %v184_v20  ;;  %v187_v27 = vmul.f32 0.01, %v59_v16  ;;  %vm124_vm4 = vcmp.ge.f32.partialorder %v60_v17, 0.0  ;;  %v63_v28 = vld [vmem:[%s753_s0 + $0x1b8] sm:$0xff]  ;;  %v64_v29 = vld [vmem:[%s753_s0 + $0x1c0] sm:$0xff]  ;;  %v249_v30 = vsel %vm121_vm1, %v57_v9, %v185_v23 }
  0x2d   :  { %312 = vst [vmem:[%s754_s1 + $0x180] sm:$0xff] %v248_v26  ;;  %v250_v31 = vsel %vm122_vm2, %v58_v13, %v186_v24  ;;  %v188_v32 = vmul.f32 0.01, %v60_v17  ;;  %vm125_vm5 = vcmp.ge.f32.partialorder %v61_v21, 0.0  ;;  %v65_v33 = vld [vmem:[%s753_s0 + $0x1c8] sm:$0xff]  ;;  %313 = vst [vmem:[%s754_s1 + $0x188] sm:$0xff] %v249_v30 }
  0x2e   :  { %314 = vst [vmem:[%s754_s1 + $0x190] sm:$0xff] %v250_v31  ;;  %v251_v34 = vsel %vm123_vm3, %v59_v16, %v187_v27  ;;  %v189_v35 = vmul.f32 0.01, %v61_v21  ;;  %vm126_vm6 = vcmp.ge.f32.partialorder %v62_v25, 0.0  ;;  %v190_v36 = vmul.f32 0.01, %v62_v25 }
  0x2f   :  { %v66_v37 = vld [vmem:[%s753_s0 + $0x1d0] sm:$0xff]  ;;  %315 = vst [vmem:[%s754_s1 + $0x198] sm:$0xff] %v251_v34  ;;  %v252_v38 = vsel %vm124_vm4, %v60_v17, %v188_v32  ;;  %vm127_vm7 = vcmp.ge.f32.partialorder %v63_v28, 0.0  ;;  %v191_v39 = vmul.f32 0.01, %v63_v28  ;;  %vm128_vm8 = vcmp.ge.f32.partialorder %v64_v29, 0.0 }
  0x30   :  { %v67_v40 = vld [vmem:[%s753_s0 + $0x1d8] sm:$0xff]  ;;  %v68_v41 = vld [vmem:[%s753_s0 + $0x1e0] sm:$0xff]  ;;  %316 = vst [vmem:[%s754_s1 + $0x1a0] sm:$0xff] %v252_v38  ;;  %v253_v42 = vsel %vm125_vm5, %v61_v21, %v189_v35  ;;  %v254_v43 = vsel %vm126_vm6, %v62_v25, %v190_v36  ;;  %v192_v44 = vmul.f32 0.01, %v64_v29  ;;  %vm129_vm9 = vcmp.ge.f32.partialorder %v65_v33, 0.0 }
  0x31   :  { %v69_v45 = vld [vmem:[%s753_s0 + $0x1e8] sm:$0xff]  ;;  %317 = vst [vmem:[%s754_s1 + $0x1a8] sm:$0xff] %v253_v42  ;;  %318 = vst [vmem:[%s754_s1 + $0x1b0] sm:$0xff] %v254_v43  ;;  %v255_v46 = vsel %vm127_vm7, %v63_v28, %v191_v39  ;;  %v193_v47 = vmul.f32 0.01, %v65_v33  ;;  %vm130_vm10 = vcmp.ge.f32.partialorder %v66_v37, 0.0 }
  0x32   :  { %v194_v48 = vmul.f32 0.01, %v66_v37  ;;  %v70_v49 = vld [vmem:[%s753_s0 + $0x1f0] sm:$0xff]  ;;  %319 = vst [vmem:[%s754_s1 + $0x1b8] sm:$0xff] %v255_v46  ;;  %v256_v50 = vsel %vm128_vm8, %v64_v29, %v192_v44  ;;  %vm131_vm11 = vcmp.ge.f32.partialorder %v67_v40, 0.0  ;;  %vm132_vm12 = vcmp.ge.f32.partialorder %v68_v41, 0.0 }
  0x33   :  { %v195_v51 = vmul.f32 0.01, %v67_v40  ;;  %v71_v52 = vld [vmem:[%s753_s0 + $0x1f8] sm:$0xff]  ;;  %320 = vst [vmem:[%s754_s1 + $0x1c0] sm:$0xff] %v256_v50  ;;  %v257_v53 = vsel %vm129_vm9, %v65_v33, %v193_v47  ;;  %v196_v55 = vmul.f32 0.01, %v68_v41 }
  0x34   :  { %v258_v54 = vsel %vm130_vm10, %v66_v37, %v194_v48  ;;  %vm133_vm13 = vcmp.ge.f32.partialorder %v69_v45, 0.0  ;;  %321 = vst [vmem:[%s754_s1 + $0x1c8] sm:$0xff] %v257_v53  ;;  %v197_v57 = vmul.f32 0.01, %v69_v45  ;;  %vm134_vm14 = vcmp.ge.f32.partialorder %v70_v49, 0.0 }
  0x35   :  { %322 = vst [vmem:[%s754_s1 + $0x1d0] sm:$0xff] %v258_v54  ;;  %v259_v56 = vsel %vm131_vm11, %v67_v40, %v195_v51  ;;  %v198_v58 = vmul.f32 0.01, %v70_v49  ;;  %v260_v59 = vsel %vm132_vm12, %v68_v41, %v196_v55  ;;  %vm135_vm15 = vcmp.ge.f32.partialorder %v71_v52, 0.0 }
  0x36   :  { %323 = vst [vmem:[%s754_s1 + $0x1d8] sm:$0xff] %v259_v56  ;;  %v199_v60 = vmul.f32 0.01, %v71_v52  ;;  %324 = vst [vmem:[%s754_s1 + $0x1e0] sm:$0xff] %v260_v59  ;;  %v261_v61 = vsel %vm133_vm13, %v69_v45, %v197_v57 }
  0x37   :  { %v262_v62 = vsel %vm134_vm14, %v70_v49, %v198_v58  ;;  %325 = vst [vmem:[%s754_s1 + $0x1e8] sm:$0xff] %v261_v61 }
  0x38   :  { %326 = vst [vmem:[%s754_s1 + $0x1f0] sm:$0xff] %v262_v62  ;;  %v263_v63 = vsel %vm135_vm15, %v71_v52, %v199_v60 }
  0x39   :  { %327 = vst [vmem:[%s754_s1 + $0x1f8] sm:$0xff] %v263_v63 }

// kernel: _lambda_.120
= control target key start
LH: loop header
LB: loop body
LE: loop exit
PB: predicated region body
PF: predicated region fallthrough
CT: control target
= control target key end

     0   :  { %s1058_s0 = inlined_call_operand.vmem [shape: f32[512,128], index: 0, kind: input, shape index: {}]   ;;  %s1059_s1 = inlined_call_operand.vmem [shape: f32[512,128], index: 1, kind: input, shape index: {}]   ;;  %s1060_s2 = inlined_call_operand.vmem [shape: f32[512,128], index: 2, kind: output, shape index: {}]  }
   0x1   :  { %v11_v0 = vld [vmem:[%s1058_s0] sm:$0xff]  ;;  %v12_v2 = vld [vmem:[%s1058_s0 + $0x8] sm:$0xff]  ;;  %v13_v5 = vld [vmem:[%s1058_s0 + $0x10] sm:$0xff] }
   0x2   :  { %v75_v1 = vld [vmem:[%s1059_s1] sm:$0xff]  ;;  %v76_v4 = vld [vmem:[%s1059_s1 + $0x8] sm:$0xff]  ;;  %v77_v6 = vld [vmem:[%s1059_s1 + $0x10] sm:$0xff] }
   0x3   :  { %v139_v3 = vadd.f32 %v75_v1, %v11_v0  ;;  %v140_v7 = vadd.f32 %v76_v4, %v12_v2  ;;  %v141_v8 = vadd.f32 %v77_v6, %v13_v5  ;;  %v14_v9 = vld [vmem:[%s1058_s0 + $0x18] sm:$0xff]  ;;  %v15_v11 = vld [vmem:[%s1058_s0 + $0x20] sm:$0xff]  ;;  %v16_v15 = vld [vmem:[%s1058_s0 + $0x28] sm:$0xff] }
   0x4   :  { %v78_v10 = vld [vmem:[%s1059_s1 + $0x18] sm:$0xff]  ;;  %v79_v14 = vld [vmem:[%s1059_s1 + $0x20] sm:$0xff]  ;;  %v80_v16 = vld [vmem:[%s1059_s1 + $0x28] sm:$0xff] }
   0x5   :  { %vm203_vm0 = vcmp.ge.f32.partialorder %v139_v3, 0.0  ;;  %v267_v12 = vmul.f32 0.01, %v139_v3  ;;  %v142_v13 = vadd.f32 %v78_v10, %v14_v9  ;;  %vm204_vm1 = vcmp.ge.f32.partialorder %v140_v7, 0.0  ;;  %v17_v22 = vld [vmem:[%s1058_s0 + $0x30] sm:$0xff]  ;;  %v18_v24 = vld [vmem:[%s1058_s0 + $0x38] sm:$0xff] }
   0x6   :  { %v268_v17 = vmul.f32 0.01, %v140_v7  ;;  %vm205_vm2 = vcmp.ge.f32.partialorder %v141_v8, 0.0  ;;  %v269_v18 = vmul.f32 0.01, %v141_v8  ;;  %v143_v21 = vadd.f32 %v79_v14, %v15_v11  ;;  %v81_v23 = vld [vmem:[%s1059_s1 + $0x30] sm:$0xff] }
   0x7   :  { %v331_v19 = vsel %vm203_vm0, %v139_v3, %v267_v12  ;;  %vm206_vm3 = vcmp.ge.f32.partialorder %v142_v13, 0.0  ;;  %v270_v20 = vmul.f32 0.01, %v142_v13  ;;  %v144_v27 = vadd.f32 %v80_v16, %v16_v15  ;;  %v82_v29 = vld [vmem:[%s1059_s1 + $0x38] sm:$0xff]  ;;  %v19_v30 = vld [vmem:[%s1058_s0 + $0x40] sm:$0xff]  ;;  %v20_v35 = vld [vmem:[%s1058_s0 + $0x48] sm:$0xff] }
   0x8   :  { %395 = vst [vmem:[%s1060_s2] sm:$0xff] %v331_v19  ;;  %v332_v25 = vsel %vm204_vm1, %v140_v7, %v268_v17  ;;  %v333_v26 = vsel %vm205_vm2, %v141_v8, %v269_v18  ;;  %v145_v28 = vadd.f32 %v81_v23, %v17_v22  ;;  %v83_v31 = vld [vmem:[%s1059_s1 + $0x40] sm:$0xff]  ;;  %vm207_vm4 = vcmp.ge.f32.partialorder %v143_v21, 0.0  ;;  %v84_v36 = vld [vmem:[%s1059_s1 + $0x48] sm:$0xff]  ;;  %v21_v37 = vld [vmem:[%s1058_s0 + $0x50] sm:$0xff] }
   0x9   :  { %396 = vst [vmem:[%s1060_s2 + $0x8] sm:$0xff] %v332_v25  ;;  %397 = vst [vmem:[%s1060_s2 + $0x10] sm:$0xff] %v333_v26  ;;  %v334_v32 = vsel %vm206_vm3, %v142_v13, %v270_v20  ;;  %v271_v33 = vmul.f32 0.01, %v143_v21  ;;  %v146_v34 = vadd.f32 %v82_v29, %v18_v24  ;;  %vm208_vm5 = vcmp.ge.f32.partialorder %v144_v27, 0.0  ;;  %v85_v43 = vld [vmem:[%s1059_s1 + $0x50] sm:$0xff] }
   0xa   :  { %398 = vst [vmem:[%s1060_s2 + $0x18] sm:$0xff] %v334_v32  ;;  %v272_v38 = vmul.f32 0.01, %v144_v27  ;;  %vm209_vm6 = vcmp.ge.f32.partialorder %v145_v28, 0.0  ;;  %v273_v39 = vmul.f32 0.01, %v145_v28  ;;  %v147_v42 = vadd.f32 %v83_v31, %v19_v30 }
   0xb   :  { %v335_v40 = vsel %vm207_vm4, %v143_v21, %v271_v33  ;;  %vm210_vm7 = vcmp.ge.f32.partialorder %v146_v34, 0.0  ;;  %v274_v41 = vmul.f32 0.01, %v146_v34  ;;  %v22_v44 = vld [vmem:[%s1058_s0 + $0x58] sm:$0xff]  ;;  %v148_v48 = vadd.f32 %v84_v36, %v20_v35  ;;  %v23_v50 = vld [vmem:[%s1058_s0 + $0x60] sm:$0xff]  ;;  %v24_v52 = vld [vmem:[%s1058_s0 + $0x68] sm:$0xff] }
   0xc   :  { %v86_v45 = vld [vmem:[%s1059_s1 + $0x58] sm:$0xff]  ;;  %399 = vst [vmem:[%s1060_s2 + $0x20] sm:$0xff] %v335_v40  ;;  %v336_v46 = vsel %vm208_vm5, %v144_v27, %v272_v38  ;;  %v337_v47 = vsel %vm209_vm6, %v145_v28, %v273_v39  ;;  %v149_v49 = vadd.f32 %v85_v43, %v21_v37  ;;  %v87_v51 = vld [vmem:[%s1059_s1 + $0x60] sm:$0xff]  ;;  %vm211_vm8 = vcmp.ge.f32.partialorder %v147_v42, 0.0  ;;  %v88_v56 = vld [vmem:[%s1059_s1 + $0x68] sm:$0xff] }
   0xd   :  { %400 = vst [vmem:[%s1060_s2 + $0x28] sm:$0xff] %v336_v46  ;;  %401 = vst [vmem:[%s1060_s2 + $0x30] sm:$0xff] %v337_v47  ;;  %v338_v53 = vsel %vm210_vm7, %v146_v34, %v274_v41  ;;  %v275_v54 = vmul.f32 0.01, %v147_v42  ;;  %v150_v55 = vadd.f32 %v86_v45, %v22_v44  ;;  %v25_v57 = vld [vmem:[%s1058_s0 + $0x70] sm:$0xff]  ;;  %vm212_vm9 = vcmp.ge.f32.partialorder %v148_v48, 0.0 }
   0xe   :  { %v89_v58 = vld [vmem:[%s1059_s1 + $0x70] sm:$0xff]  ;;  %402 = vst [vmem:[%s1060_s2 + $0x38] sm:$0xff] %v338_v53  ;;  %v276_v59 = vmul.f32 0.01, %v148_v48  ;;  %vm213_vm10 = vcmp.ge.f32.partialorder %v149_v49, 0.0  ;;  %v151_v63 = vadd.f32 %v87_v51, %v23_v50  ;;  %v26_v0 = vld [vmem:[%s1058_s0 + $0x78] sm:$0xff]  ;;  %v152_v5 = vadd.f32 %v88_v56, %v24_v52 }
   0xf   :  { %v277_v60 = vmul.f32 0.01, %v149_v49  ;;  %v339_v61 = vsel %vm211_vm8, %v147_v42, %v275_v54  ;;  %vm214_vm11 = vcmp.ge.f32.partialorder %v150_v55, 0.0  ;;  %v278_v62 = vmul.f32 0.01, %v150_v55  ;;  %v90_v1 = vld [vmem:[%s1059_s1 + $0x78] sm:$0xff] }
  0x10   :  { %v27_v2 = vld [vmem:[%s1058_s0 + $0x80] sm:$0xff]  ;;  %403 = vst [vmem:[%s1060_s2 + $0x40] sm:$0xff] %v339_v61  ;;  %v340_v3 = vsel %vm212_vm9, %v148_v48, %v276_v59  ;;  %v153_v6 = vadd.f32 %v89_v58, %v25_v57  ;;  %v28_v8 = vld [vmem:[%s1058_s0 + $0x88] sm:$0xff]  ;;  %vm215_vm12 = vcmp.ge.f32.partialorder %v151_v63, 0.0  ;;  %v279_v11 = vmul.f32 0.01, %v151_v63 }
  0x11   :  { %v341_v4 = vsel %vm213_vm10, %v149_v49, %v277_v60  ;;  %v91_v7 = vld [vmem:[%s1059_s1 + $0x80] sm:$0xff]  ;;  %v92_v9 = vld [vmem:[%s1059_s1 + $0x88] sm:$0xff]  ;;  %404 = vst [vmem:[%s1060_s2 + $0x48] sm:$0xff] %v340_v3  ;;  %v342_v10 = vsel %vm214_vm11, %v150_v55, %v278_v62  ;;  %v154_v12 = vadd.f32 %v90_v1, %v26_v0  ;;  %v29_v13 = vld [vmem:[%s1058_s0 + $0x90] sm:$0xff]  ;;  %vm216_vm13 = vcmp.ge.f32.partialorder %v152_v5, 0.0 }
  0x12   :  { %405 = vst [vmem:[%s1060_s2 + $0x50] sm:$0xff] %v341_v4  ;;  %v93_v14 = vld [vmem:[%s1059_s1 + $0x90] sm:$0xff]  ;;  %v30_v15 = vld [vmem:[%s1058_s0 + $0x98] sm:$0xff]  ;;  %406 = vst [vmem:[%s1060_s2 + $0x58] sm:$0xff] %v342_v10  ;;  %v280_v16 = vmul.f32 0.01, %v152_v5  ;;  %v343_v18 = vsel %vm215_vm12, %v151_v63, %v279_v11  ;;  %v155_v20 = vadd.f32 %v91_v7, %v27_v2  ;;  %v156_v26 = vadd.f32 %v92_v9, %v28_v8 }
  0x13   :  { %vm217_vm14 = vcmp.ge.f32.partialorder %v153_v6, 0.0  ;;  %v281_v17 = vmul.f32 0.01, %v153_v6  ;;  %vm218_vm15 = vcmp.ge.f32.partialorder %v154_v12, 0.0  ;;  %v282_v19 = vmul.f32 0.01, %v154_v12 }
  0x14   :  { %v94_v21 = vld [vmem:[%s1059_s1 + $0x98] sm:$0xff]  ;;  %v31_v22 = vld [vmem:[%s1058_s0 + $0xa0] sm:$0xff]  ;;  %407 = vst [vmem:[%s1060_s2 + $0x60] sm:$0xff] %v343_v18  ;;  %v344_v24 = vsel %vm216_vm13, %v152_v5, %v280_v16  ;;  %v157_v27 = vadd.f32 %v93_v14, %v29_v13  ;;  %v32_v28 = vld [vmem:[%s1058_s0 + $0xa8] sm:$0xff]  ;;  %vm219_vm0 = vcmp.ge.f32.partialorder %v155_v20, 0.0  ;;  %vm220_vm1 = vcmp.ge.f32.partialorder %v156_v26, 0.0 }
  0x15   :  { %v95_v23 = vld [vmem:[%s1059_s1 + $0xa0] sm:$0xff]  ;;  %v345_v25 = vsel %vm217_vm14, %v153_v6, %v281_v17  ;;  %v96_v29 = vld [vmem:[%s1059_s1 + $0xa8] sm:$0xff]  ;;  %v33_v30 = vld [vmem:[%s1058_s0 + $0xb0] sm:$0xff]  ;;  %408 = vst [vmem:[%s1060_s2 + $0x68] sm:$0xff] %v344_v24  ;;  %v346_v31 = vsel %vm218_vm15, %v154_v12, %v282_v19  ;;  %v283_v32 = vmul.f32 0.01, %v155_v20  ;;  %v158_v33 = vadd.f32 %v94_v21, %v30_v15 }
  0x16   :  { %409 = vst [vmem:[%s1060_s2 + $0x70] sm:$0xff] %v345_v25  ;;  %v97_v34 = vld [vmem:[%s1059_s1 + $0xb0] sm:$0xff]  ;;  %v34_v35 = vld [vmem:[%s1058_s0 + $0xb8] sm:$0xff]  ;;  %410 = vst [vmem:[%s1060_s2 + $0x78] sm:$0xff] %v346_v31  ;;  %v284_v37 = vmul.f32 0.01, %v156_v26  ;;  %v159_v41 = vadd.f32 %v95_v23, %v31_v22  ;;  %v160_v46 = vadd.f32 %v96_v29, %v32_v28 }
  0x17   :  { %v98_v36 = vld [vmem:[%s1059_s1 + $0xb8] sm:$0xff]  ;;  %vm221_vm2 = vcmp.ge.f32.partialorder %v157_v27, 0.0  ;;  %v285_v38 = vmul.f32 0.01, %v157_v27  ;;  %v347_v39 = vsel %vm219_vm0, %v155_v20, %v283_v32  ;;  %vm222_vm3 = vcmp.ge.f32.partialorder %v158_v33, 0.0  ;;  %v35_v42 = vld [vmem:[%s1058_s0 + $0xc0] sm:$0xff] }
  0x18   :  { %v286_v40 = vmul.f32 0.01, %v158_v33  ;;  %v99_v43 = vld [vmem:[%s1059_s1 + $0xc0] sm:$0xff]  ;;  %411 = vst [vmem:[%s1060_s2 + $0x80] sm:$0xff] %v347_v39  ;;  %v348_v44 = vsel %vm220_vm1, %v156_v26, %v284_v37  ;;  %v161_v47 = vadd.f32 %v97_v34, %v33_v30  ;;  %v36_v48 = vld [vmem:[%s1058_s0 + $0xc8] sm:$0xff]  ;;  %v37_v50 = vld [vmem:[%s1058_s0 + $0xd0] sm:$0xff]  ;;  %v162_v53 = vadd.f32 %v98_v36, %v34_v35 }
  0x19   :  { %v349_v45 = vsel %vm221_vm2, %v157_v27, %v285_v38  ;;  %v100_v49 = vld [vmem:[%s1059_s1 + $0xc8] sm:$0xff]  ;;  %412 = vst [vmem:[%s1060_s2 + $0x88] sm:$0xff] %v348_v44  ;;  %vm223_vm4 = vcmp.ge.f32.partialorder %v159_v41, 0.0  ;;  %v287_v52 = vmul.f32 0.01, %v159_v41  ;;  %v101_v54 = vld [vmem:[%s1059_s1 + $0xd0] sm:$0xff]  ;;  %v163_v61 = vadd.f32 %v99_v43, %v35_v42 }
  0x1a   :  { %413 = vst [vmem:[%s1060_s2 + $0x90] sm:$0xff] %v349_v45  ;;  %v350_v51 = vsel %vm222_vm3, %v158_v33, %v286_v40  ;;  %v38_v55 = vld [vmem:[%s1058_s0 + $0xd8] sm:$0xff]  ;;  %vm224_vm5 = vcmp.ge.f32.partialorder %v160_v46, 0.0  ;;  %v288_v57 = vmul.f32 0.01, %v160_v46  ;;  %vm225_vm6 = vcmp.ge.f32.partialorder %v161_v47, 0.0 }
  0x1b   :  { %v102_v56 = vld [vmem:[%s1059_s1 + $0xd8] sm:$0xff]  ;;  %414 = vst [vmem:[%s1060_s2 + $0x98] sm:$0xff] %v350_v51  ;;  %v289_v58 = vmul.f32 0.01, %v161_v47  ;;  %v351_v59 = vsel %vm223_vm4, %v159_v41, %v287_v52  ;;  %vm226_vm7 = vcmp.ge.f32.partialorder %v162_v53, 0.0  ;;  %v39_v62 = vld [vmem:[%s1058_s0 + $0xe0] sm:$0xff]  ;;  %v164_v2 = vadd.f32 %v100_v49, %v36_v48 }
  0x1c   :  { %v290_v60 = vmul.f32 0.01, %v162_v53  ;;  %v103_v63 = vld [vmem:[%s1059_s1 + $0xe0] sm:$0xff]  ;;  %415 = vst [vmem:[%s1060_s2 + $0xa0] sm:$0xff] %v351_v59  ;;  %v352_v0 = vsel %vm224_vm5, %v160_v46, %v288_v57  ;;  %v165_v3 = vadd.f32 %v101_v54, %v37_v50  ;;  %v40_v4 = vld [vmem:[%s1058_s0 + $0xe8] sm:$0xff]  ;;  %v41_v6 = vld [vmem:[%s1058_s0 + $0xf0] sm:$0xff]  ;;  %v166_v9 = vadd.f32 %v102_v56, %v38_v55 }
  0x1d   :  { %v353_v1 = vsel %vm225_vm6, %v161_v47, %v289_v58  ;;  %v104_v5 = vld [vmem:[%s1059_s1 + $0xe8] sm:$0xff]  ;;  %416 = vst [vmem:[%s1060_s2 + $0xa8] sm:$0xff] %v352_v0  ;;  %vm227_vm8 = vcmp.ge.f32.partialorder %v163_v61, 0.0  ;;  %v291_v8 = vmul.f32 0.01, %v163_v61  ;;  %v105_v10 = vld [vmem:[%s1059_s1 + $0xf0] sm:$0xff]  ;;  %v167_v17 = vadd.f32 %v103_v63, %v39_v62 }
  0x1e   :  { %417 = vst [vmem:[%s1060_s2 + $0xb0] sm:$0xff] %v353_v1  ;;  %v354_v7 = vsel %vm226_vm7, %v162_v53, %v290_v60  ;;  %v42_v11 = vld [vmem:[%s1058_s0 + $0xf8] sm:$0xff]  ;;  %vm228_vm9 = vcmp.ge.f32.partialorder %v164_v2, 0.0  ;;  %v292_v13 = vmul.f32 0.01, %v164_v2  ;;  %vm229_vm10 = vcmp.ge.f32.partialorder %v165_v3, 0.0 }
  0x1f   :  { %v106_v12 = vld [vmem:[%s1059_s1 + $0xf8] sm:$0xff]  ;;  %418 = vst [vmem:[%s1060_s2 + $0xb8] sm:$0xff] %v354_v7  ;;  %v293_v14 = vmul.f32 0.01, %v165_v3  ;;  %v355_v15 = vsel %vm227_vm8, %v163_v61, %v291_v8  ;;  %vm230_vm11 = vcmp.ge.f32.partialorder %v166_v9, 0.0  ;;  %v43_v18 = vld [vmem:[%s1058_s0 + $0x100] sm:$0xff]  ;;  %v168_v22 = vadd.f32 %v104_v5, %v40_v4 }
  0x20   :  { %v294_v16 = vmul.f32 0.01, %v166_v9  ;;  %v107_v19 = vld [vmem:[%s1059_s1 + $0x100] sm:$0xff]  ;;  %419 = vst [vmem:[%s1060_s2 + $0xc0] sm:$0xff] %v355_v15  ;;  %v356_v20 = vsel %vm228_vm9, %v164_v2, %v292_v13  ;;  %v169_v23 = vadd.f32 %v105_v10, %v41_v6  ;;  %v44_v24 = vld [vmem:[%s1058_s0 + $0x108] sm:$0xff]  ;;  %v45_v26 = vld [vmem:[%s1058_s0 + $0x110] sm:$0xff]  ;;  %v170_v29 = vadd.f32 %v106_v12, %v42_v11 }
  0x21   :  { %v357_v21 = vsel %vm229_vm10, %v165_v3, %v293_v14  ;;  %v108_v25 = vld [vmem:[%s1059_s1 + $0x108] sm:$0xff]  ;;  %420 = vst [vmem:[%s1060_s2 + $0xc8] sm:$0xff] %v356_v20  ;;  %vm231_vm12 = vcmp.ge.f32.partialorder %v167_v17, 0.0  ;;  %v295_v28 = vmul.f32 0.01, %v167_v17  ;;  %v109_v30 = vld [vmem:[%s1059_s1 + $0x110] sm:$0xff]  ;;  %v171_v37 = vadd.f32 %v107_v19, %v43_v18 }
  0x22   :  { %421 = vst [vmem:[%s1060_s2 + $0xd0] sm:$0xff] %v357_v21  ;;  %v358_v27 = vsel %vm230_vm11, %v166_v9, %v294_v16  ;;  %v46_v31 = vld [vmem:[%s1058_s0 + $0x118] sm:$0xff]  ;;  %vm232_vm13 = vcmp.ge.f32.partialorder %v168_v22, 0.0  ;;  %v296_v33 = vmul.f32 0.01, %v168_v22  ;;  %vm233_vm14 = vcmp.ge.f32.partialorder %v169_v23, 0.0 }
  0x23   :  { %v110_v32 = vld [vmem:[%s1059_s1 + $0x118] sm:$0xff]  ;;  %422 = vst [vmem:[%s1060_s2 + $0xd8] sm:$0xff] %v358_v27  ;;  %v297_v34 = vmul.f32 0.01, %v169_v23  ;;  %v359_v35 = vsel %vm231_vm12, %v167_v17, %v295_v28  ;;  %vm234_vm15 = vcmp.ge.f32.partialorder %v170_v29, 0.0  ;;  %v47_v38 = vld [vmem:[%s1058_s0 + $0x120] sm:$0xff]  ;;  %v172_v42 = vadd.f32 %v108_v25, %v44_v24 }
  0x24   :  { %v298_v36 = vmul.f32 0.01, %v170_v29  ;;  %v111_v39 = vld [vmem:[%s1059_s1 + $0x120] sm:$0xff]  ;;  %423 = vst [vmem:[%s1060_s2 + $0xe0] sm:$0xff] %v359_v35  ;;  %v360_v40 = vsel %vm232_vm13, %v168_v22, %v296_v33  ;;  %v173_v43 = vadd.f32 %v109_v30, %v45_v26  ;;  %v48_v44 = vld [vmem:[%s1058_s0 + $0x128] sm:$0xff]  ;;  %v49_v46 = vld [vmem:[%s1058_s0 + $0x130] sm:$0xff]  ;;  %v174_v49 = vadd.f32 %v110_v32, %v46_v31 }
  0x25   :  { %v361_v41 = vsel %vm233_vm14, %v169_v23, %v297_v34  ;;  %v112_v45 = vld [vmem:[%s1059_s1 + $0x128] sm:$0xff]  ;;  %424 = vst [vmem:[%s1060_s2 + $0xe8] sm:$0xff] %v360_v40  ;;  %vm235_vm0 = vcmp.ge.f32.partialorder %v171_v37, 0.0  ;;  %v299_v48 = vmul.f32 0.01, %v171_v37  ;;  %v113_v50 = vld [vmem:[%s1059_s1 + $0x130] sm:$0xff]  ;;  %v175_v57 = vadd.f32 %v111_v39, %v47_v38 }
  0x26   :  { %425 = vst [vmem:[%s1060_s2 + $0xf0] sm:$0xff] %v361_v41  ;;  %v362_v47 = vsel %vm234_vm15, %v170_v29, %v298_v36  ;;  %v50_v51 = vld [vmem:[%s1058_s0 + $0x138] sm:$0xff]  ;;  %vm236_vm1 = vcmp.ge.f32.partialorder %v172_v42, 0.0  ;;  %v300_v53 = vmul.f32 0.01, %v172_v42  ;;  %vm237_vm2 = vcmp.ge.f32.partialorder %v173_v43, 0.0 }
  0x27   :  { %v114_v52 = vld [vmem:[%s1059_s1 + $0x138] sm:$0xff]  ;;  %426 = vst [vmem:[%s1060_s2 + $0xf8] sm:$0xff] %v362_v47  ;;  %v301_v54 = vmul.f32 0.01, %v173_v43  ;;  %v363_v55 = vsel %vm235_vm0, %v171_v37, %v299_v48  ;;  %vm238_vm3 = vcmp.ge.f32.partialorder %v174_v49, 0.0  ;;  %v51_v58 = vld [vmem:[%s1058_s0 + $0x140] sm:$0xff]  ;;  %v176_v62 = vadd.f32 %v112_v45, %v48_v44 }
  0x28   :  { %v302_v56 = vmul.f32 0.01, %v174_v49  ;;  %v115_v59 = vld [vmem:[%s1059_s1 + $0x140] sm:$0xff]  ;;  %427 = vst [vmem:[%s1060_s2 + $0x100] sm:$0xff] %v363_v55  ;;  %v364_v60 = vsel %vm236_vm1, %v172_v42, %v300_v53  ;;  %v177_v63 = vadd.f32 %v113_v50, %v49_v46  ;;  %v52_v0 = vld [vmem:[%s1058_s0 + $0x148] sm:$0xff]  ;;  %v53_v2 = vld [vmem:[%s1058_s0 + $0x150] sm:$0xff]  ;;  %v178_v5 = vadd.f32 %v114_v52, %v50_v51 }
  0x29   :  { %v365_v61 = vsel %vm237_vm2, %v173_v43, %v301_v54  ;;  %v116_v1 = vld [vmem:[%s1059_s1 + $0x148] sm:$0xff]  ;;  %428 = vst [vmem:[%s1060_s2 + $0x108] sm:$0xff] %v364_v60  ;;  %vm239_vm4 = vcmp.ge.f32.partialorder %v175_v57, 0.0  ;;  %v303_v4 = vmul.f32 0.01, %v175_v57  ;;  %v117_v6 = vld [vmem:[%s1059_s1 + $0x150] sm:$0xff]  ;;  %v179_v13 = vadd.f32 %v115_v59, %v51_v58 }
  0x2a   :  { %429 = vst [vmem:[%s1060_s2 + $0x110] sm:$0xff] %v365_v61  ;;  %v366_v3 = vsel %vm238_vm3, %v174_v49, %v302_v56  ;;  %v54_v7 = vld [vmem:[%s1058_s0 + $0x158] sm:$0xff]  ;;  %vm240_vm5 = vcmp.ge.f32.partialorder %v176_v62, 0.0  ;;  %v304_v9 = vmul.f32 0.01, %v176_v62  ;;  %vm241_vm6 = vcmp.ge.f32.partialorder %v177_v63, 0.0 }
  0x2b   :  { %v118_v8 = vld [vmem:[%s1059_s1 + $0x158] sm:$0xff]  ;;  %430 = vst [vmem:[%s1060_s2 + $0x118] sm:$0xff] %v366_v3  ;;  %v305_v10 = vmul.f32 0.01, %v177_v63  ;;  %v367_v11 = vsel %vm239_vm4, %v175_v57, %v303_v4  ;;  %vm242_vm7 = vcmp.ge.f32.partialorder %v178_v5, 0.0  ;;  %v55_v14 = vld [vmem:[%s1058_s0 + $0x160] sm:$0xff]  ;;  %v180_v18 = vadd.f32 %v116_v1, %v52_v0 }
  0x2c   :  { %v306_v12 = vmul.f32 0.01, %v178_v5  ;;  %v119_v15 = vld [vmem:[%s1059_s1 + $0x160] sm:$0xff]  ;;  %431 = vst [vmem:[%s1060_s2 + $0x120] sm:$0xff] %v367_v11  ;;  %v368_v16 = vsel %vm240_vm5, %v176_v62, %v304_v9  ;;  %v181_v19 = vadd.f32 %v117_v6, %v53_v2  ;;  %v56_v20 = vld [vmem:[%s1058_s0 + $0x168] sm:$0xff]  ;;  %v57_v22 = vld [vmem:[%s1058_s0 + $0x170] sm:$0xff]  ;;  %v182_v25 = vadd.f32 %v118_v8, %v54_v7 }
  0x2d   :  { %v369_v17 = vsel %vm241_vm6, %v177_v63, %v305_v10  ;;  %v120_v21 = vld [vmem:[%s1059_s1 + $0x168] sm:$0xff]  ;;  %432 = vst [vmem:[%s1060_s2 + $0x128] sm:$0xff] %v368_v16  ;;  %vm243_vm8 = vcmp.ge.f32.partialorder %v179_v13, 0.0  ;;  %v307_v24 = vmul.f32 0.01, %v179_v13  ;;  %v121_v26 = vld [vmem:[%s1059_s1 + $0x170] sm:$0xff]  ;;  %v183_v33 = vadd.f32 %v119_v15, %v55_v14 }
  0x2e   :  { %433 = vst [vmem:[%s1060_s2 + $0x130] sm:$0xff] %v369_v17  ;;  %v370_v23 = vsel %vm242_vm7, %v178_v5, %v306_v12  ;;  %v58_v27 = vld [vmem:[%s1058_s0 + $0x178] sm:$0xff]  ;;  %vm244_vm9 = vcmp.ge.f32.partialorder %v180_v18, 0.0  ;;  %v308_v29 = vmul.f32 0.01, %v180_v18  ;;  %vm245_vm10 = vcmp.ge.f32.partialorder %v181_v19, 0.0 }
  0x2f   :  { %v122_v28 = vld [vmem:[%s1059_s1 + $0x178] sm:$0xff]  ;;  %434 = vst [vmem:[%s1060_s2 + $0x138] sm:$0xff] %v370_v23  ;;  %v309_v30 = vmul.f32 0.01, %v181_v19  ;;  %v371_v31 = vsel %vm243_vm8, %v179_v13, %v307_v24  ;;  %vm246_vm11 = vcmp.ge.f32.partialorder %v182_v25, 0.0  ;;  %v59_v34 = vld [vmem:[%s1058_s0 + $0x180] sm:$0xff]  ;;  %v184_v38 = vadd.f32 %v120_v21, %v56_v20 }
  0x30   :  { %v310_v32 = vmul.f32 0.01, %v182_v25  ;;  %v123_v35 = vld [vmem:[%s1059_s1 + $0x180] sm:$0xff]  ;;  %435 = vst [vmem:[%s1060_s2 + $0x140] sm:$0xff] %v371_v31  ;;  %v372_v36 = vsel %vm244_vm9, %v180_v18, %v308_v29  ;;  %v185_v39 = vadd.f32 %v121_v26, %v57_v22  ;;  %v60_v40 = vld [vmem:[%s1058_s0 + $0x188] sm:$0xff]  ;;  %v61_v42 = vld [vmem:[%s1058_s0 + $0x190] sm:$0xff]  ;;  %v186_v45 = vadd.f32 %v122_v28, %v58_v27 }
  0x31   :  { %v373_v37 = vsel %vm245_vm10, %v181_v19, %v309_v30  ;;  %v124_v41 = vld [vmem:[%s1059_s1 + $0x188] sm:$0xff]  ;;  %436 = vst [vmem:[%s1060_s2 + $0x148] sm:$0xff] %v372_v36  ;;  %vm247_vm12 = vcmp.ge.f32.partialorder %v183_v33, 0.0  ;;  %v311_v44 = vmul.f32 0.01, %v183_v33  ;;  %v125_v46 = vld [vmem:[%s1059_s1 + $0x190] sm:$0xff]  ;;  %v187_v53 = vadd.f32 %v123_v35, %v59_v34 }
  0x32   :  { %437 = vst [vmem:[%s1060_s2 + $0x150] sm:$0xff] %v373_v37  ;;  %v374_v43 = vsel %vm246_vm11, %v182_v25, %v310_v32  ;;  %v62_v47 = vld [vmem:[%s1058_s0 + $0x198] sm:$0xff]  ;;  %vm248_vm13 = vcmp.ge.f32.partialorder %v184_v38, 0.0  ;;  %v312_v49 = vmul.f32 0.01, %v184_v38  ;;  %vm249_vm14 = vcmp.ge.f32.partialorder %v185_v39, 0.0 }
  0x33   :  { %v126_v48 = vld [vmem:[%s1059_s1 + $0x198] sm:$0xff]  ;;  %438 = vst [vmem:[%s1060_s2 + $0x158] sm:$0xff] %v374_v43  ;;  %v313_v50 = vmul.f32 0.01, %v185_v39  ;;  %v375_v51 = vsel %vm247_vm12, %v183_v33, %v311_v44  ;;  %vm250_vm15 = vcmp.ge.f32.partialorder %v186_v45, 0.0  ;;  %v63_v54 = vld [vmem:[%s1058_s0 + $0x1a0] sm:$0xff]  ;;  %v188_v58 = vadd.f32 %v124_v41, %v60_v40 }
  0x34   :  { %v314_v52 = vmul.f32 0.01, %v186_v45  ;;  %v127_v55 = vld [vmem:[%s1059_s1 + $0x1a0] sm:$0xff]  ;;  %439 = vst [vmem:[%s1060_s2 + $0x160] sm:$0xff] %v375_v51  ;;  %v376_v56 = vsel %vm248_vm13, %v184_v38, %v312_v49  ;;  %v189_v59 = vadd.f32 %v125_v46, %v61_v42  ;;  %v64_v60 = vld [vmem:[%s1058_s0 + $0x1a8] sm:$0xff]  ;;  %v65_v62 = vld [vmem:[%s1058_s0 + $0x1b0] sm:$0xff]  ;;  %v190_v1 = vadd.f32 %v126_v48, %v62_v47 }
  0x35   :  { %v377_v57 = vsel %vm249_vm14, %v185_v39, %v313_v50  ;;  %v128_v61 = vld [vmem:[%s1059_s1 + $0x1a8] sm:$0xff]  ;;  %440 = vst [vmem:[%s1060_s2 + $0x168] sm:$0xff] %v376_v56  ;;  %vm251_vm0 = vcmp.ge.f32.partialorder %v187_v53, 0.0  ;;  %v315_v0 = vmul.f32 0.01, %v187_v53  ;;  %v129_v2 = vld [vmem:[%s1059_s1 + $0x1b0] sm:$0xff]  ;;  %v191_v9 = vadd.f32 %v127_v55, %v63_v54 }
  0x36   :  { %441 = vst [vmem:[%s1060_s2 + $0x170] sm:$0xff] %v377_v57  ;;  %v378_v63 = vsel %vm250_vm15, %v186_v45, %v314_v52  ;;  %v66_v3 = vld [vmem:[%s1058_s0 + $0x1b8] sm:$0xff]  ;;  %vm252_vm1 = vcmp.ge.f32.partialorder %v188_v58, 0.0  ;;  %v316_v5 = vmul.f32 0.01, %v188_v58  ;;  %vm253_vm2 = vcmp.ge.f32.partialorder %v189_v59, 0.0 }
  0x37   :  { %v130_v4 = vld [vmem:[%s1059_s1 + $0x1b8] sm:$0xff]  ;;  %442 = vst [vmem:[%s1060_s2 + $0x178] sm:$0xff] %v378_v63  ;;  %v317_v6 = vmul.f32 0.01, %v189_v59  ;;  %v379_v7 = vsel %vm251_vm0, %v187_v53, %v315_v0  ;;  %vm254_vm3 = vcmp.ge.f32.partialorder %v190_v1, 0.0  ;;  %v67_v10 = vld [vmem:[%s1058_s0 + $0x1c0] sm:$0xff]  ;;  %v192_v14 = vadd.f32 %v128_v61, %v64_v60 }
  0x38   :  { %v318_v8 = vmul.f32 0.01, %v190_v1  ;;  %v131_v11 = vld [vmem:[%s1059_s1 + $0x1c0] sm:$0xff]  ;;  %443 = vst [vmem:[%s1060_s2 + $0x180] sm:$0xff] %v379_v7  ;;  %v380_v12 = vsel %vm252_vm1, %v188_v58, %v316_v5  ;;  %v193_v15 = vadd.f32 %v129_v2, %v65_v62  ;;  %v68_v16 = vld [vmem:[%s1058_s0 + $0x1c8] sm:$0xff]  ;;  %v69_v18 = vld [vmem:[%s1058_s0 + $0x1d0] sm:$0xff]  ;;  %v194_v21 = vadd.f32 %v130_v4, %v66_v3 }
  0x39   :  { %v381_v13 = vsel %vm253_vm2, %v189_v59, %v317_v6  ;;  %v132_v17 = vld [vmem:[%s1059_s1 + $0x1c8] sm:$0xff]  ;;  %444 = vst [vmem:[%s1060_s2 + $0x188] sm:$0xff] %v380_v12  ;;  %vm255_vm4 = vcmp.ge.f32.partialorder %v191_v9, 0.0  ;;  %v319_v20 = vmul.f32 0.01, %v191_v9  ;;  %v133_v22 = vld [vmem:[%s1059_s1 + $0x1d0] sm:$0xff]  ;;  %v195_v29 = vadd.f32 %v131_v11, %v67_v10 }
  0x3a   :  { %445 = vst [vmem:[%s1060_s2 + $0x190] sm:$0xff] %v381_v13  ;;  %v382_v19 = vsel %vm254_vm3, %v190_v1, %v318_v8  ;;  %v70_v23 = vld [vmem:[%s1058_s0 + $0x1d8] sm:$0xff]  ;;  %vm256_vm5 = vcmp.ge.f32.partialorder %v192_v14, 0.0  ;;  %v320_v25 = vmul.f32 0.01, %v192_v14  ;;  %vm257_vm6 = vcmp.ge.f32.partialorder %v193_v15, 0.0 }
  0x3b   :  { %v134_v24 = vld [vmem:[%s1059_s1 + $0x1d8] sm:$0xff]  ;;  %446 = vst [vmem:[%s1060_s2 + $0x198] sm:$0xff] %v382_v19  ;;  %v321_v26 = vmul.f32 0.01, %v193_v15  ;;  %v383_v27 = vsel %vm255_vm4, %v191_v9, %v319_v20  ;;  %vm258_vm7 = vcmp.ge.f32.partialorder %v194_v21, 0.0  ;;  %v71_v30 = vld [vmem:[%s1058_s0 + $0x1e0] sm:$0xff]  ;;  %v196_v34 = vadd.f32 %v132_v17, %v68_v16 }
  0x3c   :  { %v322_v28 = vmul.f32 0.01, %v194_v21  ;;  %v135_v31 = vld [vmem:[%s1059_s1 + $0x1e0] sm:$0xff]  ;;  %447 = vst [vmem:[%s1060_s2 + $0x1a0] sm:$0xff] %v383_v27  ;;  %v384_v32 = vsel %vm256_vm5, %v192_v14, %v320_v25  ;;  %v197_v35 = vadd.f32 %v133_v22, %v69_v18  ;;  %v72_v36 = vld [vmem:[%s1058_s0 + $0x1e8] sm:$0xff]  ;;  %v73_v38 = vld [vmem:[%s1058_s0 + $0x1f0] sm:$0xff]  ;;  %v198_v41 = vadd.f32 %v134_v24, %v70_v23 }
  0x3d   :  { %v385_v33 = vsel %vm257_vm6, %v193_v15, %v321_v26  ;;  %v136_v37 = vld [vmem:[%s1059_s1 + $0x1e8] sm:$0xff]  ;;  %448 = vst [vmem:[%s1060_s2 + $0x1a8] sm:$0xff] %v384_v32  ;;  %vm259_vm8 = vcmp.ge.f32.partialorder %v195_v29, 0.0  ;;  %v323_v40 = vmul.f32 0.01, %v195_v29  ;;  %v137_v42 = vld [vmem:[%s1059_s1 + $0x1f0] sm:$0xff]  ;;  %v199_v49 = vadd.f32 %v135_v31, %v71_v30 }
  0x3e   :  { %449 = vst [vmem:[%s1060_s2 + $0x1b0] sm:$0xff] %v385_v33  ;;  %v386_v39 = vsel %vm258_vm7, %v194_v21, %v322_v28  ;;  %v74_v43 = vld [vmem:[%s1058_s0 + $0x1f8] sm:$0xff]  ;;  %vm260_vm9 = vcmp.ge.f32.partialorder %v196_v34, 0.0  ;;  %v324_v45 = vmul.f32 0.01, %v196_v34  ;;  %vm261_vm10 = vcmp.ge.f32.partialorder %v197_v35, 0.0 }
  0x3f   :  { %v138_v44 = vld [vmem:[%s1059_s1 + $0x1f8] sm:$0xff]  ;;  %450 = vst [vmem:[%s1060_s2 + $0x1b8] sm:$0xff] %v386_v39  ;;  %v325_v46 = vmul.f32 0.01, %v197_v35  ;;  %v387_v47 = vsel %vm259_vm8, %v195_v29, %v323_v40  ;;  %vm262_vm11 = vcmp.ge.f32.partialorder %v198_v41, 0.0  ;;  %v200_v52 = vadd.f32 %v136_v37, %v72_v36 }
  0x40   :  { %v326_v48 = vmul.f32 0.01, %v198_v41  ;;  %451 = vst [vmem:[%s1060_s2 + $0x1c0] sm:$0xff] %v387_v47  ;;  %v388_v50 = vsel %vm260_vm9, %v196_v34, %v324_v45  ;;  %v201_v53 = vadd.f32 %v137_v42, %v73_v38  ;;  %vm263_vm12 = vcmp.ge.f32.partialorder %v199_v49, 0.0 }
  0x41   :  { %v389_v51 = vsel %vm261_vm10, %v197_v35, %v325_v46  ;;  %452 = vst [vmem:[%s1060_s2 + $0x1c8] sm:$0xff] %v388_v50  ;;  %v327_v55 = vmul.f32 0.01, %v199_v49  ;;  %v202_v56 = vadd.f32 %v138_v44, %v74_v43  ;;  %vm264_vm13 = vcmp.ge.f32.partialorder %v200_v52, 0.0 }
  0x42   :  { %453 = vst [vmem:[%s1060_s2 + $0x1d0] sm:$0xff] %v389_v51  ;;  %v390_v54 = vsel %vm262_vm11, %v198_v41, %v326_v48  ;;  %v328_v57 = vmul.f32 0.01, %v200_v52  ;;  %vm265_vm14 = vcmp.ge.f32.partialorder %v201_v53, 0.0  ;;  %v329_v58 = vmul.f32 0.01, %v201_v53 }
  0x43   :  { %454 = vst [vmem:[%s1060_s2 + $0x1d8] sm:$0xff] %v390_v54  ;;  %v391_v59 = vsel %vm263_vm12, %v199_v49, %v327_v55  ;;  %vm266_vm15 = vcmp.ge.f32.partialorder %v202_v56, 0.0  ;;  %v330_v60 = vmul.f32 0.01, %v202_v56 }
  0x44   :  { %455 = vst [vmem:[%s1060_s2 + $0x1e0] sm:$0xff] %v391_v59  ;;  %v392_v61 = vsel %vm264_vm13, %v200_v52, %v328_v57  ;;  %v393_v62 = vsel %vm265_vm14, %v201_v53, %v329_v58 }
  0x45   :  { %456 = vst [vmem:[%s1060_s2 + $0x1e8] sm:$0xff] %v392_v61  ;;  %457 = vst [vmem:[%s1060_s2 + $0x1f0] sm:$0xff] %v393_v62  ;;  %v394_v63 = vsel %vm266_vm15, %v202_v56, %v330_v60 }
  0x46   :  { %458 = vst [vmem:[%s1060_s2 + $0x1f8] sm:$0xff] %v394_v63 }

// kernel: _lambda_.121
= control target key start
LH: loop header
LB: loop body
LE: loop exit
PB: predicated region body
PF: predicated region fallthrough
CT: control target
= control target key end

     0   :  { %s1306_s12 = smov 0   ;;  %s1308_s13 = smov 0   ;;  %s1536_s0 = inlined_call_operand.vmem [shape: bf16[8192,128], index: 0, kind: input, shape index: {}]   ;;  %s1537_s1 = inlined_call_operand.vmem [shape: bf16[128,128], index: 1, kind: input, shape index: {}]   ;;  %s1538_s2 = inlined_call_operand.vmem [shape: f32[1,128], index: 2, kind: input, shape index: {}]   ;;  %s1539_s3 = inlined_call_operand.vmem [shape: f32[8192,128], index: 3, kind: output, shape index: {}]  }
   0x1   :  { %s1310_s14 = smov 0  }
   0x2 LB: > { %s25_s15 = sadd.s32 1, %s1280_s13  ;;  %p1014_p0 = scmp.ge.s32.totalorder %s1284_s14, 1  ;;  %s1284_s14 = sphi %s1310_s14, %s13_s14   ;;  %s1280_s13 = sphi %s1308_s13, %s1541_s13   ;;  %s1276_s12 = sphi %s1306_s12, %s1540_s12  }
   0x3   : > { %p27_p1 = scmp.ge.s32.totalorder %s25_s15, 16  ;;  %p169_p2 = scmp.lt.s32.totalorder %s1284_s14, 17 }
   0x5   : > { %s1543_s15 = smov (%p27_p1, %s25_s15), 0  ;;  %p170_p3 = pnand %p1014_p0, %p169_p2 }
   0x6   : > { %v1222_v0 = vld [vmem:[%s1537_s1] sm:$0xff] (!%p170_p3)   ;;  %s1015_s18 = sshll.u32 (!%p170_p3), %s1276_s12, 6  ;;  %v1223_v1 = vld [vmem:[%s1537_s1 + $0x8] sm:$0xff] (!%p170_p3)   ;;  %v1224_v2 = vld [vmem:[%s1537_s1 + $0x10] sm:$0xff] (!%p170_p3)  }
   0x7   : > { %173 = sbr.rel (%p170_p3) target bundleno = 313 (0x139), region = 32  ;;  %p204_p4 = scmp.lt.s32.totalorder (!%p170_p3), %s1015_s18, 1023  ;;  %1102 = vmatprep.subr.bf16.mxu0 (!%p170_p3), %v1222_v0  ;;  %1182 = vmatprep.subr.bf16.mxu1 (!%p170_p3), %v1222_v0  ;;  %v1225_v3 = vld [vmem:[%s1537_s1 + $0x18] sm:$0xff] (!%p170_p3)   ;;  %v1226_v6 = vld [vmem:[%s1537_s1 + $0x20] sm:$0xff] (!%p170_p3)   ;;  %v1227_v7 = vld [vmem:[%s1537_s1 + $0x28] sm:$0xff] (!%p170_p3)  }
   0x8   : > { %1103 = vmatpush3.bf16.msra.mxu0 (!%p170_p3), %v1222_v0  ;;  %1190 = vmatpush3.bf16.msra.mxu1 (!%p170_p3), %v1222_v0  ;;  %v1228_v8 = vld [vmem:[%s1537_s1 + $0x30] sm:$0xff] (!%p170_p3)   ;;  %v1229_v9 = vld [vmem:[%s1537_s1 + $0x38] sm:$0xff] (!%p170_p3)   ;;  %v1392_v40 = vld [vmem:[%s1538_s2] ss:$0 sm:$0xff] (!%p170_p3) }
   0x9   : > { %1104 = vmatprep.subr.bf16.mxu0 (!%p170_p3), %v1223_v1  ;;  %1183 = vmatprep.subr.bf16.mxu1 (!%p170_p3), %v1223_v1 }
   0xc   : > { %1105 = vmatpush3.bf16.msra.mxu0 (!%p170_p3), %v1223_v1  ;;  %1191 = vmatpush3.bf16.msra.mxu1 (!%p170_p3), %v1223_v1 }
   0xd   : > { %1106 = vmatprep.subr.bf16.mxu0 (!%p170_p3), %v1224_v2  ;;  %1184 = vmatprep.subr.bf16.mxu1 (!%p170_p3), %v1224_v2 }
   0xe   : > { %s1545_s18 = smov (!%p204_p4, %s1015_s18), 1023 }
   0xf   : > { %s1016_s23 = sshll.u32 %s1545_s18, 2  ;;  %s1018_s10 = sshll.u32 %s1545_s18, 3 }
  0x10   : > { %s1339_s26 = scalar_lea.vmem %s1536_s0, %s1016_s23  ;;  %1107 = vmatpush3.bf16.msra.mxu0 %v1224_v2  ;;  %1192 = vmatpush3.bf16.msra.mxu1 %v1224_v2  ;;  %s1397_s19 = scalar_lea.vmem %s1539_s3, %s1018_s10 }
  0x11   : > { %v1230_v4 = vld [vmem:[%s1339_s26] sm:$0xff]   ;;  %1108 = vmatprep.subr.bf16.mxu0 %v1225_v3  ;;  %1185 = vmatprep.subr.bf16.mxu1 %v1225_v3  ;;  %v1232_v10 = vld [vmem:[%s1339_s26 + $0x8] sm:$0xff]   ;;  %v1234_v12 = vld [vmem:[%s1339_s26 + $0x10] sm:$0xff]  }
  0x12   : > { %v1231_v5 = vld [vmem:[%s1339_s26 + $0x80] sm:$0xff]   ;;  %1118 = vmatprep.mubr.bf16.mxu0 %v1230_v4  ;;  %v1233_v11 = vld [vmem:[%s1339_s26 + $0x88] sm:$0xff]   ;;  %v1235_v13 = vld [vmem:[%s1339_s26 + $0x90] sm:$0xff]  }
  0x13   : > { %1150 = vmatprep.mubr.bf16.mxu1 %v1231_v5  ;;  %v1236_v14 = vld [vmem:[%s1339_s26 + $0x18] sm:$0xff]   ;;  %v1238_v16 = vld [vmem:[%s1339_s26 + $0x20] sm:$0xff]   ;;  %v1240_v18 = vld [vmem:[%s1339_s26 + $0x28] sm:$0xff]  }
  0x14   : > { %1109 = vmatpush3.bf16.msra.mxu0 %v1225_v3  ;;  %1193 = vmatpush3.bf16.msra.mxu1 %v1225_v3  ;;  %v1237_v15 = vld [vmem:[%s1339_s26 + $0x98] sm:$0xff]   ;;  %v1239_v17 = vld [vmem:[%s1339_s26 + $0xa0] sm:$0xff]   ;;  %v1241_v19 = vld [vmem:[%s1339_s26 + $0xa8] sm:$0xff]  }
  0x15   : > { %1110 = vmatprep.subr.bf16.mxu0 %v1226_v6  ;;  %1186 = vmatprep.subr.bf16.mxu1 %v1226_v6  ;;  %v1242_v20 = vld [vmem:[%s1339_s26 + $0x30] sm:$0xff]   ;;  %v1244_v22 = vld [vmem:[%s1339_s26 + $0x38] sm:$0xff]   ;;  %v1246_v24 = vld [vmem:[%s1339_s26 + $0x40] sm:$0xff]  }
  0x16   : > { %v1243_v21 = vld [vmem:[%s1339_s26 + $0xb0] sm:$0xff]   ;;  %v1245_v23 = vld [vmem:[%s1339_s26 + $0xb8] sm:$0xff]   ;;  %v1247_v25 = vld [vmem:[%s1339_s26 + $0xc0] sm:$0xff]  }
  0x17   : > { %v1248_v26 = vld [vmem:[%s1339_s26 + $0x48] sm:$0xff]   ;;  %v1250_v28 = vld [vmem:[%s1339_s26 + $0x50] sm:$0xff]   ;;  %v1252_v30 = vld [vmem:[%s1339_s26 + $0x58] sm:$0xff]  }
  0x18   : > { %1111 = vmatpush3.bf16.msra.mxu0 %v1226_v6  ;;  %1194 = vmatpush3.bf16.msra.mxu1 %v1226_v6  ;;  %v1249_v27 = vld [vmem:[%s1339_s26 + $0xc8] sm:$0xff]   ;;  %v1251_v29 = vld [vmem:[%s1339_s26 + $0xd0] sm:$0xff]   ;;  %v1253_v31 = vld [vmem:[%s1339_s26 + $0xd8] sm:$0xff]  }
  0x19   : > { %1112 = vmatprep.subr.bf16.mxu0 %v1227_v7  ;;  %1187 = vmatprep.subr.bf16.mxu1 %v1227_v7  ;;  %v1254_v32 = vld [vmem:[%s1339_s26 + $0x60] sm:$0xff]   ;;  %v1256_v34 = vld [vmem:[%s1339_s26 + $0x68] sm:$0xff]   ;;  %v1258_v36 = vld [vmem:[%s1339_s26 + $0x70] sm:$0xff]  }
  0x1a   : > { %v1255_v33 = vld [vmem:[%s1339_s26 + $0xe0] sm:$0xff]   ;;  %v1257_v35 = vld [vmem:[%s1339_s26 + $0xe8] sm:$0xff]   ;;  %v1259_v37 = vld [vmem:[%s1339_s26 + $0xf0] sm:$0xff]  }
  0x1b   : > { %v1260_v38 = vld [vmem:[%s1339_s26 + $0x78] sm:$0xff]  }
  0x1c   : > { %1113 = vmatpush3.bf16.msra.mxu0 %v1227_v7  ;;  %1195 = vmatpush3.bf16.msra.mxu1 %v1227_v7  ;;  %v1261_v39 = vld [vmem:[%s1339_s26 + $0xf8] sm:$0xff]  }
  0x1d   : > { %1114 = vmatprep.subr.bf16.mxu0 %v1228_v8  ;;  %1188 = vmatprep.subr.bf16.mxu1 %v1228_v8 }
  0x20   : > { %1115 = vmatpush3.bf16.msra.mxu0 %v1228_v8  ;;  %1196 = vmatpush3.bf16.msra.mxu1 %v1228_v8 }
  0x21   : > { %1116 = vmatprep.subr.bf16.mxu0 %v1229_v9  ;;  %1189 = vmatprep.subr.bf16.mxu1 %v1229_v9 }
  0x24   : > { %1117 = vmatpush3.bf16.msra.mxu0 %v1229_v9  ;;  %1197 = vmatpush3.bf16.msra.mxu1 %v1229_v9 }
  0x27   : > { %1119 = vmatmul.mubr.bf16.vlgmr.msra.gmra.mrb[0].mxu0 %v1232_v10  ;;  %1151 = vmatmul.mubr.bf16.vlgmr.msra.gmra.mrb[0].mxu1 %v1233_v11 }
  0x28   : > { %1122 = vmatprep.mubr.bf16.mxu0 %v1234_v12  ;;  %1154 = vmatprep.mubr.bf16.mxu1 %v1235_v13 }
  0x2f   : > { %1123 = vmatmul.mubr.bf16.gmra.mrb[4].mxu0 %v1236_v14  ;;  %1155 = vmatmul.mubr.bf16.gmra.mrb[4].mxu1 %v1237_v15 }
  0x30   : > { %1126 = vmatprep.mubr.bf16.mxu0 %v1238_v16  ;;  %1158 = vmatprep.mubr.bf16.mxu1 %v1239_v17 }
  0x37   : > { %1127 = vmatmul.mubr.bf16.gmra.mrb[8].mxu0 %v1240_v18  ;;  %1159 = vmatmul.mubr.bf16.gmra.mrb[8].mxu1 %v1241_v19 }
  0x38   : > { %1130 = vmatprep.mubr.bf16.mxu0 %v1242_v20  ;;  %1162 = vmatprep.mubr.bf16.mxu1 %v1243_v21 }
  0x3f   : > { %1131 = vmatmul.mubr.bf16.gmra.mrb[12].mxu0 %v1244_v22  ;;  %1163 = vmatmul.mubr.bf16.gmra.mrb[12].mxu1 %v1245_v23 }
  0x40   : > { %1134 = vmatprep.mubr.bf16.mxu0 %v1246_v24  ;;  %1166 = vmatprep.mubr.bf16.mxu1 %v1247_v25 }
  0x47   : > { %1135 = vmatmul.mubr.bf16.gmra.mrb[16].mxu0 %v1248_v26  ;;  %1167 = vmatmul.mubr.bf16.gmra.mrb[16].mxu1 %v1249_v27 }
  0x48   : > { %1138 = vmatprep.mubr.bf16.mxu0 %v1250_v28  ;;  %1170 = vmatprep.mubr.bf16.mxu1 %v1251_v29 }
  0x4f   : > { %1139 = vmatmul.mubr.bf16.gmra.mrb[20].mxu0 %v1252_v30  ;;  %1171 = vmatmul.mubr.bf16.gmra.mrb[20].mxu1 %v1253_v31 }
  0x50   : > { %1142 = vmatprep.mubr.bf16.mxu0 %v1254_v32  ;;  %1174 = vmatprep.mubr.bf16.mxu1 %v1255_v33 }
  0x57   : > { %1143 = vmatmul.mubr.bf16.gmra.mrb[24].mxu0 %v1256_v34  ;;  %1175 = vmatmul.mubr.bf16.gmra.mrb[24].mxu1 %v1257_v35 }
  0x58   : > { %1146 = vmatprep.mubr.bf16.mxu0 %v1258_v36  ;;  %1178 = vmatprep.mubr.bf16.mxu1 %v1259_v37 }
  0x5f   : > { %1147 = vmatmul.mubr.bf16.gmra.mrb[28].mxu0 %v1260_v38  ;;  %1179 = vmatmul.mubr.bf16.gmra.mrb[28].mxu1 %v1261_v39 }
  0xfa   : > { %v1120_v41 = vpop.f32.mrb[0].mxu0  ;;  %v1152_v42 = vpop.f32.mrb[0].mxu1 }
  0xfb   : > { %v596_v43 = vadd.f32 %v1120_v41, %v1392_v40  ;;  %v724_v44 = vadd.f32 %v1152_v42, %v1392_v40  ;;  %v587_v45 = vpop.f32.mrb[1].mxu0  ;;  %v715_v46 = vpop.f32.mrb[1].mxu1 }
  0xfc   : > { %v588_v47 = vadd.f32 %v1392_v40, %v587_v45  ;;  %v716_v48 = vadd.f32 %v1392_v40, %v715_v46  ;;  %v1121_v49 = vpop.f32.mrb[2].mxu0  ;;  %v1153_v50 = vpop.f32.mrb[2].mxu1 }
  0xfd   : > { %844 = vst [vmem:[%s1397_s19 + $0x10] sm:$0xff] %v596_v43  ;;  %876 = vst [vmem:[%s1397_s19 + $0x110] sm:$0xff] %v724_v44  ;;  %v599_v51 = vadd.f32 %v1121_v49, %v1392_v40  ;;  %v727_v52 = vadd.f32 %v1153_v50, %v1392_v40  ;;  %v590_v53 = vpop.f32.mrb[3].mxu0  ;;  %v718_v54 = vpop.f32.mrb[3].mxu1 }
  0xfe   : > { %842 = vst [vmem:[%s1397_s19] sm:$0xff] %v588_v47  ;;  %874 = vst [vmem:[%s1397_s19 + $0x100] sm:$0xff] %v716_v48  ;;  %v591_v55 = vadd.f32 %v1392_v40, %v590_v53  ;;  %v719_v56 = vadd.f32 %v1392_v40, %v718_v54 }
  0xff   : > { %845 = vst [vmem:[%s1397_s19 + $0x18] sm:$0xff] %v599_v51  ;;  %877 = vst [vmem:[%s1397_s19 + $0x118] sm:$0xff] %v727_v52 }
 0x100   : > { %843 = vst [vmem:[%s1397_s19 + $0x8] sm:$0xff] %v591_v55  ;;  %875 = vst [vmem:[%s1397_s19 + $0x108] sm:$0xff] %v719_v56 }
 0x102   : > { %v1124_v57 = vpop.f32.mrb[4].mxu0  ;;  %v1156_v58 = vpop.f32.mrb[4].mxu1 }
 0x103   : > { %v612_v59 = vadd.f32 %v1124_v57, %v1392_v40  ;;  %v740_v60 = vadd.f32 %v1156_v58, %v1392_v40  ;;  %v603_v61 = vpop.f32.mrb[5].mxu0  ;;  %v731_v62 = vpop.f32.mrb[5].mxu1 }
 0x104   : > { %v604_v63 = vadd.f32 %v1392_v40, %v603_v61  ;;  %v732_v0 = vadd.f32 %v1392_v40, %v731_v62  ;;  %v1125_v1 = vpop.f32.mrb[6].mxu0  ;;  %v1157_v2 = vpop.f32.mrb[6].mxu1 }
 0x105   : > { %848 = vst [vmem:[%s1397_s19 + $0x30] sm:$0xff] %v612_v59  ;;  %880 = vst [vmem:[%s1397_s19 + $0x130] sm:$0xff] %v740_v60  ;;  %v615_v3 = vadd.f32 %v1125_v1, %v1392_v40  ;;  %v743_v4 = vadd.f32 %v1157_v2, %v1392_v40  ;;  %v606_v5 = vpop.f32.mrb[7].mxu0  ;;  %v734_v6 = vpop.f32.mrb[7].mxu1 }
 0x106   : > { %846 = vst [vmem:[%s1397_s19 + $0x20] sm:$0xff] %v604_v63  ;;  %878 = vst [vmem:[%s1397_s19 + $0x120] sm:$0xff] %v732_v0  ;;  %v607_v7 = vadd.f32 %v1392_v40, %v606_v5  ;;  %v735_v8 = vadd.f32 %v1392_v40, %v734_v6 }
 0x107   : > { %849 = vst [vmem:[%s1397_s19 + $0x38] sm:$0xff] %v615_v3  ;;  %881 = vst [vmem:[%s1397_s19 + $0x138] sm:$0xff] %v743_v4 }
 0x108   : > { %847 = vst [vmem:[%s1397_s19 + $0x28] sm:$0xff] %v607_v7  ;;  %879 = vst [vmem:[%s1397_s19 + $0x128] sm:$0xff] %v735_v8 }
 0x10a   : > { %v1128_v9 = vpop.f32.mrb[8].mxu0  ;;  %v1160_v10 = vpop.f32.mrb[8].mxu1 }
 0x10b   : > { %v628_v11 = vadd.f32 %v1128_v9, %v1392_v40  ;;  %v756_v12 = vadd.f32 %v1160_v10, %v1392_v40  ;;  %v619_v13 = vpop.f32.mrb[9].mxu0  ;;  %v747_v14 = vpop.f32.mrb[9].mxu1 }
 0x10c   : > { %v620_v15 = vadd.f32 %v1392_v40, %v619_v13  ;;  %v748_v16 = vadd.f32 %v1392_v40, %v747_v14  ;;  %v1129_v17 = vpop.f32.mrb[10].mxu0  ;;  %v1161_v18 = vpop.f32.mrb[10].mxu1 }
 0x10d   : > { %852 = vst [vmem:[%s1397_s19 + $0x50] sm:$0xff] %v628_v11  ;;  %884 = vst [vmem:[%s1397_s19 + $0x150] sm:$0xff] %v756_v12  ;;  %v631_v19 = vadd.f32 %v1129_v17, %v1392_v40  ;;  %v759_v20 = vadd.f32 %v1161_v18, %v1392_v40  ;;  %v622_v21 = vpop.f32.mrb[11].mxu0  ;;  %v750_v22 = vpop.f32.mrb[11].mxu1 }
 0x10e   : > { %850 = vst [vmem:[%s1397_s19 + $0x40] sm:$0xff] %v620_v15  ;;  %882 = vst [vmem:[%s1397_s19 + $0x140] sm:$0xff] %v748_v16  ;;  %v623_v23 = vadd.f32 %v1392_v40, %v622_v21  ;;  %v751_v24 = vadd.f32 %v1392_v40, %v750_v22 }
 0x10f   : > { %853 = vst [vmem:[%s1397_s19 + $0x58] sm:$0xff] %v631_v19  ;;  %885 = vst [vmem:[%s1397_s19 + $0x158] sm:$0xff] %v759_v20 }
 0x110   : > { %851 = vst [vmem:[%s1397_s19 + $0x48] sm:$0xff] %v623_v23  ;;  %883 = vst [vmem:[%s1397_s19 + $0x148] sm:$0xff] %v751_v24 }
 0x112   : > { %v1132_v25 = vpop.f32.mrb[12].mxu0  ;;  %v1164_v26 = vpop.f32.mrb[12].mxu1 }
 0x113   : > { %v644_v27 = vadd.f32 %v1132_v25, %v1392_v40  ;;  %v772_v28 = vadd.f32 %v1164_v26, %v1392_v40  ;;  %v635_v29 = vpop.f32.mrb[13].mxu0  ;;  %v763_v30 = vpop.f32.mrb[13].mxu1 }
 0x114   : > { %v636_v31 = vadd.f32 %v1392_v40, %v635_v29  ;;  %v764_v32 = vadd.f32 %v1392_v40, %v763_v30  ;;  %v1133_v33 = vpop.f32.mrb[14].mxu0  ;;  %v1165_v34 = vpop.f32.mrb[14].mxu1 }
 0x115   : > { %856 = vst [vmem:[%s1397_s19 + $0x70] sm:$0xff] %v644_v27  ;;  %888 = vst [vmem:[%s1397_s19 + $0x170] sm:$0xff] %v772_v28  ;;  %v647_v35 = vadd.f32 %v1133_v33, %v1392_v40  ;;  %v775_v36 = vadd.f32 %v1165_v34, %v1392_v40  ;;  %v638_v37 = vpop.f32.mrb[15].mxu0  ;;  %v766_v38 = vpop.f32.mrb[15].mxu1 }
 0x116   : > { %854 = vst [vmem:[%s1397_s19 + $0x60] sm:$0xff] %v636_v31  ;;  %886 = vst [vmem:[%s1397_s19 + $0x160] sm:$0xff] %v764_v32  ;;  %v639_v39 = vadd.f32 %v1392_v40, %v638_v37  ;;  %v767_v41 = vadd.f32 %v1392_v40, %v766_v38 }
 0x117   : > { %857 = vst [vmem:[%s1397_s19 + $0x78] sm:$0xff] %v647_v35  ;;  %889 = vst [vmem:[%s1397_s19 + $0x178] sm:$0xff] %v775_v36 }
 0x118   : > { %855 = vst [vmem:[%s1397_s19 + $0x68] sm:$0xff] %v639_v39  ;;  %887 = vst [vmem:[%s1397_s19 + $0x168] sm:$0xff] %v767_v41 }
 0x11a   : > { %v1136_v42 = vpop.f32.mrb[16].mxu0  ;;  %v1168_v43 = vpop.f32.mrb[16].mxu1 }
 0x11b   : > { %v660_v44 = vadd.f32 %v1136_v42, %v1392_v40  ;;  %v788_v45 = vadd.f32 %v1168_v43, %v1392_v40  ;;  %v651_v46 = vpop.f32.mrb[17].mxu0  ;;  %v779_v47 = vpop.f32.mrb[17].mxu1 }
 0x11c   : > { %v652_v48 = vadd.f32 %v1392_v40, %v651_v46  ;;  %v780_v49 = vadd.f32 %v1392_v40, %v779_v47  ;;  %v1137_v50 = vpop.f32.mrb[18].mxu0  ;;  %v1169_v51 = vpop.f32.mrb[18].mxu1 }
 0x11d   : > { %860 = vst [vmem:[%s1397_s19 + $0x90] sm:$0xff] %v660_v44  ;;  %892 = vst [vmem:[%s1397_s19 + $0x190] sm:$0xff] %v788_v45  ;;  %v663_v52 = vadd.f32 %v1137_v50, %v1392_v40  ;;  %v791_v53 = vadd.f32 %v1169_v51, %v1392_v40  ;;  %v654_v54 = vpop.f32.mrb[19].mxu0  ;;  %v782_v55 = vpop.f32.mrb[19].mxu1 }
 0x11e   : > { %858 = vst [vmem:[%s1397_s19 + $0x80] sm:$0xff] %v652_v48  ;;  %890 = vst [vmem:[%s1397_s19 + $0x180] sm:$0xff] %v780_v49  ;;  %v655_v56 = vadd.f32 %v1392_v40, %v654_v54  ;;  %v783_v57 = vadd.f32 %v1392_v40, %v782_v55 }
 0x11f   : > { %861 = vst [vmem:[%s1397_s19 + $0x98] sm:$0xff] %v663_v52  ;;  %893 = vst [vmem:[%s1397_s19 + $0x198] sm:$0xff] %v791_v53 }
 0x120   : > { %859 = vst [vmem:[%s1397_s19 + $0x88] sm:$0xff] %v655_v56  ;;  %891 = vst [vmem:[%s1397_s19 + $0x188] sm:$0xff] %v783_v57 }
 0x122   : > { %v1140_v58 = vpop.f32.mrb[20].mxu0  ;;  %v1172_v59 = vpop.f32.mrb[20].mxu1 }
 0x123   : > { %v676_v60 = vadd.f32 %v1140_v58, %v1392_v40  ;;  %v804_v61 = vadd.f32 %v1172_v59, %v1392_v40  ;;  %v667_v62 = vpop.f32.mrb[21].mxu0  ;;  %v795_v63 = vpop.f32.mrb[21].mxu1 }
 0x124   : > { %v668_v0 = vadd.f32 %v1392_v40, %v667_v62  ;;  %v796_v1 = vadd.f32 %v1392_v40, %v795_v63  ;;  %v1141_v2 = vpop.f32.mrb[22].mxu0  ;;  %v1173_v3 = vpop.f32.mrb[22].mxu1 }
 0x125   : > { %864 = vst [vmem:[%s1397_s19 + $0xb0] sm:$0xff] %v676_v60  ;;  %896 = vst [vmem:[%s1397_s19 + $0x1b0] sm:$0xff] %v804_v61  ;;  %v679_v4 = vadd.f32 %v1141_v2, %v1392_v40  ;;  %v807_v5 = vadd.f32 %v1173_v3, %v1392_v40  ;;  %v670_v6 = vpop.f32.mrb[23].mxu0  ;;  %v798_v7 = vpop.f32.mrb[23].mxu1 }
 0x126   : > { %862 = vst [vmem:[%s1397_s19 + $0xa0] sm:$0xff] %v668_v0  ;;  %894 = vst [vmem:[%s1397_s19 + $0x1a0] sm:$0xff] %v796_v1  ;;  %v671_v8 = vadd.f32 %v1392_v40, %v670_v6  ;;  %v799_v9 = vadd.f32 %v1392_v40, %v798_v7 }
 0x127   : > { %865 = vst [vmem:[%s1397_s19 + $0xb8] sm:$0xff] %v679_v4  ;;  %897 = vst [vmem:[%s1397_s19 + $0x1b8] sm:$0xff] %v807_v5 }
 0x128   : > { %863 = vst [vmem:[%s1397_s19 + $0xa8] sm:$0xff] %v671_v8  ;;  %895 = vst [vmem:[%s1397_s19 + $0x1a8] sm:$0xff] %v799_v9 }
 0x12a   : > { %v1144_v10 = vpop.f32.mrb[24].mxu0  ;;  %v1176_v11 = vpop.f32.mrb[24].mxu1 }
 0x12b   : > { %v692_v12 = vadd.f32 %v1144_v10, %v1392_v40  ;;  %v820_v13 = vadd.f32 %v1176_v11, %v1392_v40  ;;  %v683_v14 = vpop.f32.mrb[25].mxu0  ;;  %v811_v15 = vpop.f32.mrb[25].mxu1 }
 0x12c   : > { %v684_v16 = vadd.f32 %v1392_v40, %v683_v14  ;;  %v812_v17 = vadd.f32 %v1392_v40, %v811_v15  ;;  %v1145_v18 = vpop.f32.mrb[26].mxu0  ;;  %v1177_v19 = vpop.f32.mrb[26].mxu1 }
 0x12d   : > { %868 = vst [vmem:[%s1397_s19 + $0xd0] sm:$0xff] %v692_v12  ;;  %900 = vst [vmem:[%s1397_s19 + $0x1d0] sm:$0xff] %v820_v13  ;;  %v695_v20 = vadd.f32 %v1145_v18, %v1392_v40  ;;  %v823_v21 = vadd.f32 %v1177_v19, %v1392_v40  ;;  %v686_v22 = vpop.f32.mrb[27].mxu0  ;;  %v814_v23 = vpop.f32.mrb[27].mxu1 }
 0x12e   : > { %866 = vst [vmem:[%s1397_s19 + $0xc0] sm:$0xff] %v684_v16  ;;  %898 = vst [vmem:[%s1397_s19 + $0x1c0] sm:$0xff] %v812_v17  ;;  %v687_v24 = vadd.f32 %v1392_v40, %v686_v22  ;;  %v815_v25 = vadd.f32 %v1392_v40, %v814_v23 }
 0x12f   : > { %869 = vst [vmem:[%s1397_s19 + $0xd8] sm:$0xff] %v695_v20  ;;  %901 = vst [vmem:[%s1397_s19 + $0x1d8] sm:$0xff] %v823_v21 }
 0x130   : > { %867 = vst [vmem:[%s1397_s19 + $0xc8] sm:$0xff] %v687_v24  ;;  %899 = vst [vmem:[%s1397_s19 + $0x1c8] sm:$0xff] %v815_v25 }
 0x132   : > { %v1148_v26 = vpop.f32.mrb[28].mxu0  ;;  %v1180_v27 = vpop.f32.mrb[28].mxu1 }
 0x133   : > { %v708_v28 = vadd.f32 %v1148_v26, %v1392_v40  ;;  %v836_v29 = vadd.f32 %v1180_v27, %v1392_v40  ;;  %v699_v30 = vpop.f32.mrb[29].mxu0  ;;  %v827_v31 = vpop.f32.mrb[29].mxu1 }
 0x134   : > { %v700_v32 = vadd.f32 %v1392_v40, %v699_v30  ;;  %v828_v33 = vadd.f32 %v1392_v40, %v827_v31  ;;  %v1149_v34 = vpop.f32.mrb[30].mxu0  ;;  %v1181_v35 = vpop.f32.mrb[30].mxu1 }
 0x135   : > { %872 = vst [vmem:[%s1397_s19 + $0xf0] sm:$0xff] %v708_v28  ;;  %904 = vst [vmem:[%s1397_s19 + $0x1f0] sm:$0xff] %v836_v29  ;;  %v711_v36 = vadd.f32 %v1149_v34, %v1392_v40  ;;  %v839_v37 = vadd.f32 %v1181_v35, %v1392_v40  ;;  %v702_v38 = vpop.f32.mrb[31].mxu0  ;;  %v830_v39 = vpop.f32.mrb[31].mxu1 }
 0x136   : > { %870 = vst [vmem:[%s1397_s19 + $0xe0] sm:$0xff] %v700_v32  ;;  %902 = vst [vmem:[%s1397_s19 + $0x1e0] sm:$0xff] %v828_v33  ;;  %v703_v41 = vadd.f32 %v1392_v40, %v702_v38  ;;  %v831_v42 = vadd.f32 %v1392_v40, %v830_v39 }
 0x137   : > { %873 = vst [vmem:[%s1397_s19 + $0xf8] sm:$0xff] %v711_v36  ;;  %905 = vst [vmem:[%s1397_s19 + $0x1f8] sm:$0xff] %v839_v37 }
 0x138   : > { %871 = vst [vmem:[%s1397_s19 + $0xe8] sm:$0xff] %v703_v41  ;;  %903 = vst [vmem:[%s1397_s19 + $0x1e8] sm:$0xff] %v831_v42 }
 0x139 PF: > { %s13_s14 = sadd.s32 1, %s1284_s14   ;;  %s1540_s12 = smov %s1280_s13 }
 0x13a   : > { %p10_p5 = scmp.ge.s32.totalorder %s13_s14, 18   ;;  %s1541_s13 = smov %s1543_s15 }
 0x13c   :  { %12 = sbr.rel (!%p10_p5) target bundleno = 2 (0x2), region = 68 }

</bundles_post_ra>
